<compile_context>
chip_gen: v5e
topology: v5e:2x2
jax: 0.10.0
libtpu: 0.0.40
codegen_flags: <defaults>
</compile_context>

<pallas_src>
import functools
import math

import jax
import jax.numpy as jnp
from jax import lax
from jax.experimental import pallas as pl
from jax.experimental.pallas import tpu as pltpu

D_MODEL = 256          # hard-coded in the PyTorch module
VID_LEN = 64           # hard-coded in the PyTorch module
TIME_DIM = 4 * D_MODEL
BBOX_WC, BBOX_WW = 2.0, 1.0
LN_EPS = 1e-5


def _layer_norm(x, g, b):
  mu = jnp.mean(x, axis=-1, keepdims=True)
  var = jnp.mean(jnp.square(x - mu), axis=-1, keepdims=True)
  return (x - mu) * lax.rsqrt(var + LN_EPS) * g + b


# ----------------------------------------------------------------------------
# Kernel 1: span_feature_align (masked softmax over frames) + span_embed MLP
# ----------------------------------------------------------------------------
def _span_features_kernel(vis_ref, spans_ref, wsc_ref, bsc_ref,
                          w1_ref, b1_ref, w2_ref, b2_ref, out_ref):
  vis = vis_ref[...]                    # (N, T, D)  batch-first video memory
  spans = spans_ref[...]                # (N, R, 2)  (x1, x2) in [0, 1]
  N, T, D = vis.shape
  R = spans.shape[1]

  # feature_scorer logits for every frame: (N, T)
  w_sc = wsc_ref[...].reshape(1, 1, D)
  scores = jnp.sum(vis * w_sc, axis=-1) + bsc_ref[...]

  # proposal frame windows; float->int truncates toward zero like torch .type(int)
  prop = jnp.clip((spans * float(VID_LEN)).astype(jnp.int32), 0, VID_LEN - 1)
  s_i = prop[:, :, 0:1]                 # (N, R, 1)
  e_i = prop[:, :, 1:2]
  t_idx = lax.broadcasted_iota(jnp.int32, (N, R, T), 2)
  in_range = (t_idx >= s_i) & (t_idx < e_i)
  # torch falls back to the single frame `s` when s == e (valid x1 <= x2 spans
  # can never produce e < s).
  mask = in_range | ((t_idx == s_i) & (e_i == s_i))

  logits = jnp.where(mask, scores[:, None, :], -1e30)
  m = jnp.max(logits, axis=-1, keepdims=True)
  p = jnp.exp(logits - m)
  p = p / jnp.sum(p, axis=-1, keepdims=True)          # masked softmax over frames
  span_feat = jnp.einsum('nrt,ntd->nrd', p, vis,
                         preferred_element_type=jnp.float32)   # (N, R, D)

  # span_embed = MLP(2, D, D, 2): Linear(2,D) -> relu -> Linear(D,D).
  # The K=2 first layer is done as two rank-1 broadcasts (no degenerate matmul).
  sp = spans.reshape(N * R, 2)
  h = sp[:, 0:1] * w1_ref[0:1, :] + sp[:, 1:2] * w1_ref[1:2, :] + b1_ref[...]
  h = jnp.maximum(h, 0.0)
  emb = jnp.dot(h, w2_ref[...], preferred_element_type=jnp.float32) + b2_ref[...]

  out_ref[...] = span_feat.reshape(N * R, D) + emb


# ----------------------------------------------------------------------------
# Kernel 2: attention-V path + norms + linear1(x2) + time scale/shift +
#           reg MLP + apply_deltas
# ----------------------------------------------------------------------------
def _refine_kernel(sf_ref, q_ref, spans_ref, time_ref,
                   wv_ref, bv_ref, wo_ref, bo_ref,
                   g2_ref, be2_ref, wl1_ref, bl1_ref, g1_ref, be1_ref,
                   wbt_ref, bbt_ref,
                   wr1_ref, br1_ref, wr2_ref, br2_ref, wr3_ref, br3_ref,
                   pred_ref, obj_ref):
  sf = sf_ref[...]                      # (N*R, D) span features, seq order b*R+a
  q = q_ref[...]                        # (N*R, D) permuted residual queries
  spans = spans_ref[...]                # (N, R, 2)
  N, R, _ = spans.shape
  D = sf.shape[-1]

  # Cross-attention over a length-1 key sequence: softmax(.) == 1, so the
  # attention output is out_proj(v_proj(value)); Q/K projections drop out.
  v = jnp.dot(sf, wv_ref[...], preferred_element_type=jnp.float32) + bv_ref[...]
  pro2 = jnp.dot(v, wo_ref[...], preferred_element_type=jnp.float32) + bo_ref[...]

  x = _layer_norm(q + pro2, g2_ref[...], be2_ref[...])          # norm2

  # linear1 applied twice (as in the reference module), relu in between.
  h = jnp.maximum(
      jnp.dot(x, wl1_ref[...], preferred_element_type=jnp.float32) + bl1_ref[...],
      0.0)
  h = jnp.dot(h, wl1_ref[...], preferred_element_type=jnp.float32) + bl1_ref[...]
  obj = _layer_norm(x + h, g1_ref[...], be1_ref[...])           # norm1
  obj_ref[...] = obj

  # block_time_mlp: SiLU -> Linear(4D, 2D), per-batch scale/shift broadcast.
  te = time_ref[...]                                            # (N, 4D)
  silu = te * jax.nn.sigmoid(te)
  ss = jnp.dot(silu, wbt_ref[...], preferred_element_type=jnp.float32) + bbt_ref[...]
  scale = ss[:, :D]
  shift = ss[:, D:]
  fc = obj.reshape(N, R, D) * (scale[:, None, :] + 1.0) + shift[:, None, :]
  fc = fc.reshape(N * R, D)

  # reg_module = MLP(D, D, 2, 3): Linear -> relu -> Linear -> relu -> Linear(D,2)
  r = jnp.maximum(
      jnp.dot(fc, wr1_ref[...], preferred_element_type=jnp.float32) + br1_ref[...],
      0.0)
  r = jnp.maximum(
      jnp.dot(r, wr2_ref[...], preferred_element_type=jnp.float32) + br2_ref[...],
      0.0)
  deltas = jnp.dot(r, wr3_ref[...], preferred_element_type=jnp.float32) + br3_ref[...]

  # apply_deltas (bbox_weights = (2.0, 1.0)) + span_cxw_to_xx
  sp = spans.reshape(N * R, 2)
  w = sp[:, 1:2] - sp[:, 0:1]
  c = sp[:, 0:1] + 0.5 * w
  dc = deltas[:, 0:1] / BBOX_WC
  dw = jnp.minimum(deltas[:, 1:2] / BBOX_WW, 5.0)
  pc = c + dc
  pw = jax.nn.sigmoid(dw + w)
  pred = jnp.concatenate([pc - 0.5 * pw, pc + 0.5 * pw], axis=-1)
  pred_ref[...] = pred.reshape(N, R, 2)


# ----------------------------------------------------------------------------
# pallas_call wrappers
# ----------------------------------------------------------------------------
def _full_spec(shape):
  nd = len(shape)
  return pl.BlockSpec(shape, lambda i, _n=nd: (0,) * _n)


def _span_features_call(vis, spans, scorer_w, scorer_b, lp):
  N, T, D = vis.shape
  R = spans.shape[1]
  args = (vis, spans, scorer_w, scorer_b,
          lp['se_w1'], lp['se_b1'], lp['se_w2'], lp['se_b2'])
  flops = 2 * N * T * D + 2 * N * R * T * D + 2 * N * R * D * D
  bytes_accessed = 4 * (sum(int(a.size) for a in args) + N * R * D)
  return pl.pallas_call(
      _span_features_kernel,
      out_shape=jax.ShapeDtypeStruct((N * R, D), jnp.float32),
      grid=(1,),
      in_specs=[_full_spec(a.shape) for a in args],
      out_specs=_full_spec((N * R, D)),
      compiler_params=pltpu.CompilerParams(dimension_semantics=("arbitrary",)),
      cost_estimate=pl.CostEstimate(flops=flops, transcendentals=N * R * T,
                                    bytes_accessed=bytes_accessed),
  )(*args)


def _refine_call(span_feats, q_perm, spans, time_emb, lp):
  NR, D = span_feats.shape
  N, R, _ = spans.shape
  args = (span_feats, q_perm, spans, time_emb,
          lp['wv'], lp['bv'], lp['wo'], lp['bo'],
          lp['g2'], lp['be2'], lp['wl1'], lp['bl1'], lp['g1'], lp['be1'],
          lp['wbt'], lp['bbt'],
          lp['wr1'], lp['br1'], lp['wr2'], lp['br2'], lp['wr3'], lp['br3'])
  flops = 2 * NR * D * D * 6 + 2 * N * TIME_DIM * (2 * D) + 2 * NR * D * 2
  bytes_accessed = 4 * (sum(int(a.size) for a in args) + NR * D + N * R * 2)
  out_shapes = (jax.ShapeDtypeStruct((N, R, 2), jnp.float32),
                jax.ShapeDtypeStruct((NR, D), jnp.float32))
  return pl.pallas_call(
      _refine_kernel,
      out_shape=out_shapes,
      grid=(1,),
      in_specs=[_full_spec(a.shape) for a in args],
      out_specs=(_full_spec((N, R, 2)), _full_spec((NR, D))),
      compiler_params=pltpu.CompilerParams(dimension_semantics=("arbitrary",)),
      cost_estimate=pl.CostEstimate(flops=flops,
                                    transcendentals=N * TIME_DIM + 4 * NR,
                                    bytes_accessed=bytes_accessed),
  )(*args)


def _time_mlp(t, p):
  """SinusoidalPositionEmbeddings -> Linear -> GELU -> Linear (runs once)."""
  half = D_MODEL // 2
  freqs = jnp.exp(jnp.arange(half, dtype=jnp.float32) *
                  (-math.log(10000.0) / (half - 1)))
  emb = t[:, None] * freqs[None, :]
  emb = jnp.concatenate([jnp.sin(emb), jnp.cos(emb)], axis=-1)     # (B, D)
  # TODO(synk): time_mlp kept in XLA -- exact (erf) GELU lowering inside Mosaic
  # is not guaranteed; this is a one-shot (B, 256) computation.
  h = jax.nn.gelu(emb @ p['time_w1'] + p['time_b1'], approximate=False)
  return h @ p['time_w2'] + p['time_b2']                           # (B, 4D)


def span_refining_decoder_forward(mask, pos_embed, memory, x_spans, t, params):
  """Forward of SpanRefiningDecoder (eval mode, init_features=None).

  memory: (L, B, D) with L >= 64; x_spans: (B, R, 2) in (x1, x2); t: (B,).
  mask / pos_embed are accepted for signature parity but are unused by the
  reference module's forward.  Returns stacked intermediate predictions
  (num_layers, B, R, 2)."""
  del mask, pos_embed
  B = memory.shape[1]
  R = x_spans.shape[1]
  D = D_MODEL

  time_emb = _time_mlp(t.astype(jnp.float32), params)                    # (B, 4D)
  vis = jnp.transpose(memory[:VID_LEN].astype(jnp.float32), (1, 0, 2))   # (B,64,D)

  spans = x_spans.astype(jnp.float32)
  q_prev = None
  preds = []
  for lp in params['layers']:
    span_feats = _span_features_call(vis, spans, params['scorer_w'],
                                     params['scorer_b'], lp)             # (B*R, D)
    q_src = span_feats if q_prev is None else q_prev
    # Replicate the module's .view(R, N, D).permute(1, 0, 2) query reordering
    # (cross-batch permutation) on the tiny (B*R, D) tensor in XLA.
    q_perm = jnp.transpose(q_src.reshape(R, B, D), (1, 0, 2)).reshape(B * R, D)
    pred, obj = _refine_call(span_feats, q_perm, spans, time_emb, lp)
    preds.append(pred)
    q_prev = obj
    spans = lax.stop_gradient(pred)
  return jnp.stack(preds)          # (num_layers, B, R, 2)


# ----------------------------------------------------------------------------
# Parameter init.  Weights are stored pre-transposed as (in, out) so the kernels
# never transpose; biases are (1, out).
# ----------------------------------------------------------------------------
def init_params(key, num_layers=2):
  D = D_MODEL
  keys = jax.random.split(key, 4 + num_layers)
  r = lambda k, shape, s=0.05: jax.random.normal(k, shape, jnp.float32) * s

  def layer_params(k):
    ks = jax.random.split(k, 17)
    return {
        # span_embed MLP(2, D, D, 2)
        'se_w1': r(ks[0], (2, D), 0.5), 'se_b1': r(ks[1], (1, D), 0.02),
        'se_w2': r(ks[2], (D, D)),      'se_b2': r(ks[3], (1, D), 0.02),
        # cross-attn: only the V slice of in_proj and out_proj matter (seq len 1)
        'wv': r(ks[4], (D, D)), 'bv': r(ks[5], (1, D), 0.02),
        'wo': r(ks[6], (D, D)), 'bo': r(ks[7], (1, D), 0.02),
        'g2': jnp.ones((1, D), jnp.float32), 'be2': jnp.zeros((1, D), jnp.float32),
        'wl1': r(ks[8], (D, D)), 'bl1': r(ks[9], (1, D), 0.02),
        'g1': jnp.ones((1, D), jnp.float32), 'be1': jnp.zeros((1, D), jnp.float32),
        'wbt': r(ks[10], (4 * D, 2 * D), 0.02), 'bbt': r(ks[11], (1, 2 * D), 0.02),
        'wr1': r(ks[12], (D, D)), 'br1': r(ks[13], (1, D), 0.02),
        'wr2': r(ks[14], (D, D)), 'br2': r(ks[15], (1, D), 0.02),
        'wr3': r(ks[16], (D, 2), 0.05), 'br3': jnp.zeros((1, 2), jnp.float32),
    }

  return {
      'scorer_w': r(keys[0], (1, D), 0.1),          # shared feature_scorer
      'scorer_b': jnp.zeros((1, 1), jnp.float32),
      'time_w1': r(keys[1], (D, 4 * D), 0.05),
      'time_b1': jnp.zeros((1, 4 * D), jnp.float32),
      'time_w2': r(keys[2], (4 * D, 4 * D), 0.02),
      'time_b2': jnp.zeros((1, 4 * D), jnp.float32),
      'layers': [layer_params(k) for k in jax.random.split(keys[3], num_layers)],
  }


# ----------------------------------------------------------------------------
# Pure-JAX reference mirroring the PyTorch code (eager, python loops for the
# data-dependent span slicing) for validation.
# ----------------------------------------------------------------------------
def _ref_forward(mask, pos_embed, memory, x_spans, t, params):
  del mask, pos_embed
  D = D_MODEL
  B = memory.shape[1]
  R = x_spans.shape[1]

  def ln(x, g, b):
    mu = jnp.mean(x, axis=-1, keepdims=True)
    var = jnp.mean((x - mu) ** 2, axis=-1, keepdims=True)
    return (x - mu) / jnp.sqrt(var + LN_EPS) * g + b

  time_emb = _time_mlp(t.astype(jnp.float32), params)
  vis = jnp.transpose(memory[:VID_LEN].astype(jnp.float32), (1, 0, 2))

  spans = x_spans.astype(jnp.float32)
  q_prev = None
  preds = []
  for lp in params['layers']:
    prop = jnp.clip((spans * float(VID_LEN)).astype(jnp.int32), 0, VID_LEN - 1)
    feats = []
    for b in range(B):
      row = []
      for rr in range(R):
        s = int(prop[b, rr, 0]); e = int(prop[b, rr, 1])
        sf = vis[b, s:s + 1] if s == e else vis[b, s:e]
        sc = sf @ params['scorer_w'].T + params['scorer_b']
        pr = jax.nn.softmax(sc, axis=0)
        row.append(jnp.sum(pr * sf, axis=0))
      feats.append(jnp.stack(row))
    span_feats = jnp.stack(feats)                                  # (B, R, D)
    se = jnp.maximum(spans.reshape(-1, 2) @ lp['se_w1'] + lp['se_b1'], 0.0)
    se = se @ lp['se_w2'] + lp['se_b2']
    span_feats = span_feats + se.reshape(B, R, D)

    q_src = span_feats if q_prev is None else q_prev
    q_seq = jnp.transpose(q_src.reshape(R, B, D), (1, 0, 2)).reshape(B * R, D)
    v_seq = span_feats.reshape(B * R, D)
    pro2 = (v_seq @ lp['wv'] + lp['bv']) @ lp['wo'] + lp['bo']
    x = ln(q_seq + pro2, lp['g2'], lp['be2'])
    h = jnp.maximum(x @ lp['wl1'] + lp['bl1'], 0.0)
    h = h @ lp['wl1'] + lp['bl1']
    obj = ln(x + h, lp['g1'], lp['be1'])

    silu = time_emb * jax.nn.sigmoid(time_emb)
    ss = silu @ lp['wbt'] + lp['bbt']
    scale = jnp.repeat(ss[:, :D], R, axis=0)
    shift = jnp.repeat(ss[:, D:], R, axis=0)
    fc = obj * (scale + 1.0) + shift
    r1 = jnp.maximum(fc @ lp['wr1'] + lp['br1'], 0.0)
    r2 = jnp.maximum(r1 @ lp['wr2'] + lp['br2'], 0.0)
    deltas = r2 @ lp['wr3'] + lp['br3']

    sp = spans.reshape(-1, 2)
    w = sp[:, 1:2] - sp[:, 0:1]
    c = sp[:, 0:1] + 0.5 * w
    dc = deltas[:, 0:1] / BBOX_WC
    dw = jnp.minimum(deltas[:, 1:2] / BBOX_WW, 5.0)
    pc = c + dc
    pw = jax.nn.sigmoid(dw + w)
    pred = jnp.concatenate([pc - 0.5 * pw, pc + 0.5 * pw], axis=-1).reshape(B, R, 2)

    preds.append(pred)
    q_prev = obj
    spans = pred
  return jnp.stack(preds)


if __name__ == "__main__":
  B, R, L = 2, 4, VID_LEN
  key = jax.random.PRNGKey(0)
  k_mem, k_c, k_w, k_p = jax.random.split(key, 4)

  memory = jax.random.normal(k_mem, (L, B, D_MODEL), jnp.float32)    # (L, B, D)
  centers = jax.random.uniform(k_c, (B, R), minval=0.2, maxval=0.8)
  widths = jax.random.uniform(k_w, (B, R), minval=0.05, maxval=0.3)
  x_spans = jnp.stack([centers - 0.5 * widths, centers + 0.5 * widths], axis=-1)
  t = jnp.array([7.0, 350.0], jnp.float32)
  mask = jnp.zeros((B, L), dtype=bool)                  # unused by the forward
  pos_embed = jnp.zeros((L, B, D_MODEL), jnp.float32)   # unused by the forward
  # TODO(synk): init_features path (repeat of external proposal features) not
  # implemented; the default init_features=None path is what this covers.

  params = init_params(k_p, num_layers=2)

  fwd = jax.jit(span_refining_decoder_forward)
  out = fwd(mask, pos_embed, memory, x_spans, t, params)
  out = jax.block_until_ready(out)

  ref = _ref_forward(mask, pos_embed, memory, x_spans, t, params)

  assert out.shape == (2, B, R, 2), out.shape
  assert bool(jnp.all(jnp.isfinite(out)))
  err = float(jnp.max(jnp.abs(out - ref)))
  assert err < 2e-3, err
  print("KERNEL_OK")
</pallas_src>

<mosaic_0001>
module attributes {stable_mosaic.version = 11 : i64} {
  func.func @_span_features_kernel(%arg0: i32, %arg1: memref<2x64x256xf32, #tpu.memory_space<vmem>>, %arg2: memref<2x4x2xf32, #tpu.memory_space<vmem>>, %arg3: memref<1x256xf32, #tpu.memory_space<vmem>>, %arg4: memref<1x1xf32, #tpu.memory_space<vmem>>, %arg5: memref<2x256xf32, #tpu.memory_space<vmem>>, %arg6: memref<1x256xf32, #tpu.memory_space<vmem>>, %arg7: memref<256x256xf32, #tpu.memory_space<vmem>>, %arg8: memref<1x256xf32, #tpu.memory_space<vmem>>, %arg9: memref<8x256xf32, #tpu.memory_space<vmem>>) attributes {dimension_semantics = [#tpu.dimension_semantics<arbitrary>], iteration_bounds = array<i64: 1>, scalar_prefetch = 0 : i64, scratch_operands = 0 : i64, tpu.core_type = #tpu.core_type<tc>, window_params = [{pipeline_mode = #tpu.pipeline_mode<synchronous>, transform_indices = @transform_0, window_bounds = array<i64: 2, 64, 256>}, {pipeline_mode = #tpu.pipeline_mode<synchronous>, transform_indices = @transform_1, window_bounds = array<i64: 2, 4, 2>}, {pipeline_mode = #tpu.pipeline_mode<synchronous>, transform_indices = @transform_2, window_bounds = array<i64: 1, 256>}, {pipeline_mode = #tpu.pipeline_mode<synchronous>, transform_indices = @transform_3, window_bounds = array<i64: 1, 1>}, {pipeline_mode = #tpu.pipeline_mode<synchronous>, transform_indices = @transform_4, window_bounds = array<i64: 2, 256>}, {pipeline_mode = #tpu.pipeline_mode<synchronous>, transform_indices = @transform_5, window_bounds = array<i64: 1, 256>}, {pipeline_mode = #tpu.pipeline_mode<synchronous>, transform_indices = @transform_6, window_bounds = array<i64: 256, 256>}, {pipeline_mode = #tpu.pipeline_mode<synchronous>, transform_indices = @transform_7, window_bounds = array<i64: 1, 256>}, {pipeline_mode = #tpu.pipeline_mode<synchronous>, transform_indices = @transform_8, window_bounds = array<i64: 8, 256>}]} {
    %c0 = arith.constant 0 : index
    %c0_0 = arith.constant 0 : index
    %c0_1 = arith.constant 0 : index
    %0 = vector.load %arg1[%c0, %c0_0, %c0_1] : memref<2x64x256xf32, #tpu.memory_space<vmem>>, vector<2x64x256xf32>
    %c0_2 = arith.constant 0 : index
    %c0_3 = arith.constant 0 : index
    %c0_4 = arith.constant 0 : index
    %1 = vector.load %arg2[%c0_2, %c0_3, %c0_4] : memref<2x4x2xf32, #tpu.memory_space<vmem>>, vector<2x4x2xf32>
    %c0_5 = arith.constant 0 : index
    %c0_6 = arith.constant 0 : index
    %2 = vector.load %arg3[%c0_5, %c0_6] : memref<1x256xf32, #tpu.memory_space<vmem>>, vector<1x256xf32>
    %3 = vector.shape_cast %2 : vector<1x256xf32> to vector<1x1x256xf32>
    %4 = vector.broadcast %3 : vector<1x1x256xf32> to vector<2x64x256xf32>
    %5 = arith.mulf %0, %4 : vector<2x64x256xf32>
    %cst = arith.constant dense<0.000000e+00> : vector<2x64xf32>
    %6 = vector.multi_reduction <add>, %5, %cst [2] : vector<2x64x256xf32> to vector<2x64xf32>
    %c0_7 = arith.constant 0 : index
    %c0_8 = arith.constant 0 : index
    %7 = vector.load %arg4[%c0_7, %c0_8] : memref<1x1xf32, #tpu.memory_space<vmem>>, vector<1x1xf32>
    %8 = vector.broadcast %7 : vector<1x1xf32> to vector<2x64xf32>
    %9 = arith.addf %6, %8 : vector<2x64xf32>
    %cst_9 = arith.constant 6.400000e+01 : f32
    %10 = vector.broadcast %cst_9 : f32 to vector<2x4x2xf32>
    %11 = arith.mulf %1, %10 : vector<2x4x2xf32>
    %12 = arith.fptosi %11 : vector<2x4x2xf32> to vector<2x4x2xi32>
    %c0_i32 = arith.constant 0 : i32
    %c63_i32 = arith.constant 63 : i32
    %13 = vector.broadcast %c0_i32 : i32 to vector<2x4x2xi32>
    %14 = arith.maxsi %13, %12 : vector<2x4x2xi32>
    %15 = vector.broadcast %c63_i32 : i32 to vector<2x4x2xi32>
    %16 = arith.minsi %15, %14 : vector<2x4x2xi32>
    %17 = vector.extract_strided_slice %16 {offsets = [0, 0, 0], sizes = [2, 4, 1], strides = [1, 1, 1]} : vector<2x4x2xi32> to vector<2x4x1xi32>
    %18 = vector.extract_strided_slice %16 {offsets = [0, 0, 1], sizes = [2, 4, 1], strides = [1, 1, 1]} : vector<2x4x2xi32> to vector<2x4x1xi32>
    %19 = tpu.iota {dimensions = array<i32: 2>} : vector<2x4x64xi32>
    %20 = vector.broadcast %17 : vector<2x4x1xi32> to vector<2x4x64xi32>
    %21 = arith.cmpi sge, %19, %20 : vector<2x4x64xi32>
    %22 = vector.broadcast %18 : vector<2x4x1xi32> to vector<2x4x64xi32>
    %23 = arith.cmpi slt, %19, %22 : vector<2x4x64xi32>
    %24 = arith.andi %21, %23 : vector<2x4x64xi1>
    %25 = vector.broadcast %17 : vector<2x4x1xi32> to vector<2x4x64xi32>
    %26 = arith.cmpi eq, %19, %25 : vector<2x4x64xi32>
    %27 = arith.cmpi eq, %18, %17 : vector<2x4x1xi32>
    %28 = vector.broadcast %27 : vector<2x4x1xi1> to vector<2x4x64xi1>
    %29 = arith.andi %26, %28 : vector<2x4x64xi1>
    %30 = arith.ori %24, %29 : vector<2x4x64xi1>
    %31 = vector.shape_cast %9 : vector<2x64xf32> to vector<2x1x64xf32>
    %cst_10 = arith.constant -1.000000e+30 : f32
    %32 = vector.shape_cast %31 : vector<2x1x64xf32> to vector<2x1x64xf32>
    %33 = vector.broadcast %32 : vector<2x1x64xf32> to vector<2x4x64xf32>
    %34 = vector.broadcast %cst_10 : f32 to vector<2x4x64xf32>
    %35 = arith.select %30, %33, %34 : vector<2x4x64xi1>, vector<2x4x64xf32>
    %cst_11 = arith.constant dense<0xFF800000> : vector<2x4xf32>
    %36 = vector.multi_reduction <maximumf>, %35, %cst_11 [2] : vector<2x4x64xf32> to vector<2x4xf32>
    %37 = vector.shape_cast %36 : vector<2x4xf32> to vector<2x4x1xf32>
    %38 = vector.broadcast %37 : vector<2x4x1xf32> to vector<2x4x64xf32>
    %39 = arith.subf %35, %38 : vector<2x4x64xf32>
    %40 = math.exp %39 : vector<2x4x64xf32>
    %cst_12 = arith.constant dense<0.000000e+00> : vector<2x4xf32>
    %41 = vector.multi_reduction <add>, %40, %cst_12 [2] : vector<2x4x64xf32> to vector<2x4xf32>
    %42 = vector.shape_cast %41 : vector<2x4xf32> to vector<2x4x1xf32>
    %43 = vector.broadcast %42 : vector<2x4x1xf32> to vector<2x4x64xf32>
    %44 = arith.divf %40, %43 : vector<2x4x64xf32>
    "tpu.trace_start"() <{level = 10 : i32, message = "nrt,ntd->nrd"}> : () -> ()
    %cst_13 = arith.constant dense<0.000000e+00> : vector<2x4x256xf32>
    %45 = tpu.matmul %44, %0, %cst_13 {dimension_numbers = #tpu.dot_dimension_numbers<[2], [1], [1], [2], [0, 0, 0, 1, 1, 2], [0], [0]>} : vector<2x4x64xf32>, vector<2x64x256xf32>, vector<2x4x256xf32> -> vector<2x4x256xf32>
    "tpu.trace_stop"() : () -> ()
    %46 = vector.shape_cast %1 : vector<2x4x2xf32> to vector<8x2xf32>
    %47 = vector.extract_strided_slice %46 {offsets = [0, 0], sizes = [8, 1], strides = [1, 1]} : vector<8x2xf32> to vector<8x1xf32>
    %c0_14 = arith.constant 0 : index
    %c0_15 = arith.constant 0 : index
    %48 = vector.load %arg5[%c0_14, %c0_15] : memref<2x256xf32, #tpu.memory_space<vmem>>, vector<1x256xf32>
    %49 = vector.broadcast %47 : vector<8x1xf32> to vector<8x256xf32>
    %50 = vector.broadcast %48 : vector<1x256xf32> to vector<8x256xf32>
    %51 = arith.mulf %49, %50 : vector<8x256xf32>
    %52 = vector.extract_strided_slice %46 {offsets = [0, 1], sizes = [8, 1], strides = [1, 1]} : vector<8x2xf32> to vector<8x1xf32>
    %c1 = arith.constant 1 : index
    %c0_16 = arith.constant 0 : index
    %53 = vector.load %arg5[%c1, %c0_16] : memref<2x256xf32, #tpu.memory_space<vmem>>, vector<1x256xf32>
    %54 = vector.broadcast %52 : vector<8x1xf32> to vector<8x256xf32>
    %55 = vector.broadcast %53 : vector<1x256xf32> to vector<8x256xf32>
    %56 = arith.mulf %54, %55 : vector<8x256xf32>
    %57 = arith.addf %51, %56 : vector<8x256xf32>
    %c0_17 = arith.constant 0 : index
    %c0_18 = arith.constant 0 : index
    %58 = vector.load %arg6[%c0_17, %c0_18] : memref<1x256xf32, #tpu.memory_space<vmem>>, vector<1x256xf32>
    %59 = vector.broadcast %58 : vector<1x256xf32> to vector<8x256xf32>
    %60 = arith.addf %57, %59 : vector<8x256xf32>
    %cst_19 = arith.constant 0.000000e+00 : f32
    %61 = vector.broadcast %cst_19 : f32 to vector<8x256xf32>
    %62 = arith.maximumf %60, %61 : vector<8x256xf32>
    %c0_20 = arith.constant 0 : index
    %c0_21 = arith.constant 0 : index
    %63 = vector.load %arg7[%c0_20, %c0_21] : memref<256x256xf32, #tpu.memory_space<vmem>>, vector<256x256xf32>
    %cst_22 = arith.constant dense<0.000000e+00> : vector<8x256xf32>
    %64 = tpu.matmul %62, %63, %cst_22 {dimension_numbers = #tpu.dot_dimension_numbers<[1], [0], [0], [1], [0, 0, 1, 1], [], []>} : vector<8x256xf32>, vector<256x256xf32>, vector<8x256xf32> -> vector<8x256xf32>
    %c0_23 = arith.constant 0 : index
    %c0_24 = arith.constant 0 : index
    %65 = vector.load %arg8[%c0_23, %c0_24] : memref<1x256xf32, #tpu.memory_space<vmem>>, vector<1x256xf32>
    %66 = vector.broadcast %65 : vector<1x256xf32> to vector<8x256xf32>
    %67 = arith.addf %64, %66 : vector<8x256xf32>
    %68 = vector.shape_cast %45 : vector<2x4x256xf32> to vector<8x256xf32>
    %69 = arith.addf %68, %67 : vector<8x256xf32>
    %c0_25 = arith.constant 0 : index
    %c0_26 = arith.constant 0 : index
    %70 = vector.load %arg9[%c0_25, %c0_26] : memref<8x256xf32, #tpu.memory_space<vmem>>, vector<8x256xf32>
    tpu.vector_store %arg9[%c0_25, %c0_26], %69 {strides = array<i32>} : memref<8x256xf32, #tpu.memory_space<vmem>>, vector<8x256xf32>,
    return
  }
  func.func @transform_0(%arg0: i32) -> (i32, i32, i32) {
    %c0_i32 = arith.constant 0 : i32
    %c0_i32_0 = arith.constant 0 : i32
    %c0_i32_1 = arith.constant 0 : i32
    %c0_i32_2 = arith.constant 0 : i32
    return %c0_i32, %c0_i32_0, %c0_i32_1 : i32, i32, i32
  }
  func.func @transform_1(%arg0: i32) -> (i32, i32, i32) {
    %c0_i32 = arith.constant 0 : i32
    %c0_i32_0 = arith.constant 0 : i32
    %c0_i32_1 = arith.constant 0 : i32
    %c0_i32_2 = arith.constant 0 : i32
    return %c0_i32, %c0_i32_0, %c0_i32_1 : i32, i32, i32
  }
  func.func @transform_2(%arg0: i32) -> (i32, i32) {
    %c0_i32 = arith.constant 0 : i32
    %c0_i32_0 = arith.constant 0 : i32
    %c0_i32_1 = arith.constant 0 : i32
    return %c0_i32, %c0_i32_0 : i32, i32
  }
  func.func @transform_3(%arg0: i32) -> (i32, i32) {
    %c0_i32 = arith.constant 0 : i32
    %c0_i32_0 = arith.constant 0 : i32
    %c0_i32_1 = arith.constant 0 : i32
    return %c0_i32, %c0_i32_0 : i32, i32
  }
  func.func @transform_4(%arg0: i32) -> (i32, i32) {
    %c0_i32 = arith.constant 0 : i32
    %c0_i32_0 = arith.constant 0 : i32
    %c0_i32_1 = arith.constant 0 : i32
    return %c0_i32, %c0_i32_0 : i32, i32
  }
  func.func @transform_5(%arg0: i32) -> (i32, i32) {
    %c0_i32 = arith.constant 0 : i32
    %c0_i32_0 = arith.constant 0 : i32
    %c0_i32_1 = arith.constant 0 : i32
    return %c0_i32, %c0_i32_0 : i32, i32
  }
  func.func @transform_6(%arg0: i32) -> (i32, i32) {
    %c0_i32 = arith.constant 0 : i32
    %c0_i32_0 = arith.constant 0 : i32
    %c0_i32_1 = arith.constant 0 : i32
    return %c0_i32, %c0_i32_0 : i32, i32
  }
  func.func @transform_7(%arg0: i32) -> (i32, i32) {
    %c0_i32 = arith.constant 0 : i32
    %c0_i32_0 = arith.constant 0 : i32
    %c0_i32_1 = arith.constant 0 : i32
    return %c0_i32, %c0_i32_0 : i32, i32
  }
  func.func @transform_8(%arg0: i32) -> (i32, i32) {
    %c0_i32 = arith.constant 0 : i32
    %c0_i32_0 = arith.constant 0 : i32
    %c0_i32_1 = arith.constant 0 : i32
    return %c0_i32, %c0_i32_0 : i32, i32
  }
}

module attributes {stable_mosaic.version = 11 : i64} {
  func.func @_refine_kernel(%arg0: i32, %arg1: memref<8x256xf32, #tpu.memory_space<vmem>>, %arg2: memref<8x256xf32, #tpu.memory_space<vmem>>, %arg3: memref<2x4x2xf32, #tpu.memory_space<vmem>>, %arg4: memref<2x1024xf32, #tpu.memory_space<vmem>>, %arg5: memref<256x256xf32, #tpu.memory_space<vmem>>, %arg6: memref<1x256xf32, #tpu.memory_space<vmem>>, %arg7: memref<256x256xf32, #tpu.memory_space<vmem>>, %arg8: memref<1x256xf32, #tpu.memory_space<vmem>>, %arg9: memref<1x256xf32, #tpu.memory_space<vmem>>, %arg10: memref<1x256xf32, #tpu.memory_space<vmem>>, %arg11: memref<256x256xf32, #tpu.memory_space<vmem>>, %arg12: memref<1x256xf32, #tpu.memory_space<vmem>>, %arg13: memref<1x256xf32, #tpu.memory_space<vmem>>, %arg14: memref<1x256xf32, #tpu.memory_space<vmem>>, %arg15: memref<1024x512xf32, #tpu.memory_space<vmem>>, %arg16: memref<1x512xf32, #tpu.memory_space<vmem>>, %arg17: memref<256x256xf32, #tpu.memory_space<vmem>>, %arg18: memref<1x256xf32, #tpu.memory_space<vmem>>, %arg19: memref<256x256xf32, #tpu.memory_space<vmem>>, %arg20: memref<1x256xf32, #tpu.memory_space<vmem>>, %arg21: memref<256x2xf32, #tpu.memory_space<vmem>>, %arg22: memref<1x2xf32, #tpu.memory_space<vmem>>, %arg23: memref<2x4x2xf32, #tpu.memory_space<vmem>>, %arg24: memref<8x256xf32, #tpu.memory_space<vmem>>) attributes {dimension_semantics = [#tpu.dimension_semantics<arbitrary>], iteration_bounds = array<i64: 1>, scalar_prefetch = 0 : i64, scratch_operands = 0 : i64, tpu.core_type = #tpu.core_type<tc>, window_params = [{pipeline_mode = #tpu.pipeline_mode<synchronous>, transform_indices = @transform_0, window_bounds = array<i64: 8, 256>}, {pipeline_mode = #tpu.pipeline_mode<synchronous>, transform_indices = @transform_1, window_bounds = array<i64: 8, 256>}, {pipeline_mode = #tpu.pipeline_mode<synchronous>, transform_indices = @transform_2, window_bounds = array<i64: 2, 4, 2>}, {pipeline_mode = #tpu.pipeline_mode<synchronous>, transform_indices = @transform_3, window_bounds = array<i64: 2, 1024>}, {pipeline_mode = #tpu.pipeline_mode<synchronous>, transform_indices = @transform_4, window_bounds = array<i64: 256, 256>}, {pipeline_mode = #tpu.pipeline_mode<synchronous>, transform_indices = @transform_5, window_bounds = array<i64: 1, 256>}, {pipeline_mode = #tpu.pipeline_mode<synchronous>, transform_indices = @transform_6, window_bounds = array<i64: 256, 256>}, {pipeline_mode = #tpu.pipeline_mode<synchronous>, transform_indices = @transform_7, window_bounds = array<i64: 1, 256>}, {pipeline_mode = #tpu.pipeline_mode<synchronous>, transform_indices = @transform_8, window_bounds = array<i64: 1, 256>}, {pipeline_mode = #tpu.pipeline_mode<synchronous>, transform_indices = @transform_9, window_bounds = array<i64: 1, 256>}, {pipeline_mode = #tpu.pipeline_mode<synchronous>, transform_indices = @transform_10, window_bounds = array<i64: 256, 256>}, {pipeline_mode = #tpu.pipeline_mode<synchronous>, transform_indices = @transform_11, window_bounds = array<i64: 1, 256>}, {pipeline_mode = #tpu.pipeline_mode<synchronous>, transform_indices = @transform_12, window_bounds = array<i64: 1, 256>}, {pipeline_mode = #tpu.pipeline_mode<synchronous>, transform_indices = @transform_13, window_bounds = array<i64: 1, 256>}, {pipeline_mode = #tpu.pipeline_mode<synchronous>, transform_indices = @transform_14, window_bounds = array<i64: 1024, 512>}, {pipeline_mode = #tpu.pipeline_mode<synchronous>, transform_indices = @transform_15, window_bounds = array<i64: 1, 512>}, {pipeline_mode = #tpu.pipeline_mode<synchronous>, transform_indices = @transform_16, window_bounds = array<i64: 256, 256>}, {pipeline_mode = #tpu.pipeline_mode<synchronous>, transform_indices = @transform_17, window_bounds = array<i64: 1, 256>}, {pipeline_mode = #tpu.pipeline_mode<synchronous>, transform_indices = @transform_18, window_bounds = array<i64: 256, 256>}, {pipeline_mode = #tpu.pipeline_mode<synchronous>, transform_indices = @transform_19, window_bounds = array<i64: 1, 256>}, {pipeline_mode = #tpu.pipeline_mode<synchronous>, transform_indices = @transform_20, window_bounds = array<i64: 256, 2>}, {pipeline_mode = #tpu.pipeline_mode<synchronous>, transform_indices = @transform_21, window_bounds = array<i64: 1, 2>}, {pipeline_mode = #tpu.pipeline_mode<synchronous>, transform_indices = @transform_22, window_bounds = array<i64: 2, 4, 2>}, {pipeline_mode = #tpu.pipeline_mode<synchronous>, transform_indices = @transform_23, window_bounds = array<i64: 8, 256>}]} {
    %c0 = arith.constant 0 : index
    %c0_0 = arith.constant 0 : index
    %0 = vector.load %arg1[%c0, %c0_0] : memref<8x256xf32, #tpu.memory_space<vmem>>, vector<8x256xf32>
    %c0_1 = arith.constant 0 : index
    %c0_2 = arith.constant 0 : index
    %1 = vector.load %arg2[%c0_1, %c0_2] : memref<8x256xf32, #tpu.memory_space<vmem>>, vector<8x256xf32>
    %c0_3 = arith.constant 0 : index
    %c0_4 = arith.constant 0 : index
    %c0_5 = arith.constant 0 : index
    %2 = vector.load %arg3[%c0_3, %c0_4, %c0_5] : memref<2x4x2xf32, #tpu.memory_space<vmem>>, vector<2x4x2xf32>
    %c0_6 = arith.constant 0 : index
    %c0_7 = arith.constant 0 : index
    %3 = vector.load %arg5[%c0_6, %c0_7] : memref<256x256xf32, #tpu.memory_space<vmem>>, vector<256x256xf32>
    %cst = arith.constant dense<0.000000e+00> : vector<8x256xf32>
    %4 = tpu.matmul %0, %3, %cst {dimension_numbers = #tpu.dot_dimension_numbers<[1], [0], [0], [1], [0, 0, 1, 1], [], []>} : vector<8x256xf32>, vector<256x256xf32>, vector<8x256xf32> -> vector<8x256xf32>
    %c0_8 = arith.constant 0 : index
    %c0_9 = arith.constant 0 : index
    %5 = vector.load %arg6[%c0_8, %c0_9] : memref<1x256xf32, #tpu.memory_space<vmem>>, vector<1x256xf32>
    %6 = vector.broadcast %5 : vector<1x256xf32> to vector<8x256xf32>
    %7 = arith.addf %4, %6 : vector<8x256xf32>
    %c0_10 = arith.constant 0 : index
    %c0_11 = arith.constant 0 : index
    %8 = vector.load %arg7[%c0_10, %c0_11] : memref<256x256xf32, #tpu.memory_space<vmem>>, vector<256x256xf32>
    %cst_12 = arith.constant dense<0.000000e+00> : vector<8x256xf32>
    %9 = tpu.matmul %7, %8, %cst_12 {dimension_numbers = #tpu.dot_dimension_numbers<[1], [0], [0], [1], [0, 0, 1, 1], [], []>} : vector<8x256xf32>, vector<256x256xf32>, vector<8x256xf32> -> vector<8x256xf32>
    %c0_13 = arith.constant 0 : index
    %c0_14 = arith.constant 0 : index
    %10 = vector.load %arg8[%c0_13, %c0_14] : memref<1x256xf32, #tpu.memory_space<vmem>>, vector<1x256xf32>
    %11 = vector.broadcast %10 : vector<1x256xf32> to vector<8x256xf32>
    %12 = arith.addf %9, %11 : vector<8x256xf32>
    %13 = arith.addf %1, %12 : vector<8x256xf32>
    %c0_15 = arith.constant 0 : index
    %c0_16 = arith.constant 0 : index
    %14 = vector.load %arg9[%c0_15, %c0_16] : memref<1x256xf32, #tpu.memory_space<vmem>>, vector<1x256xf32>
    %c0_17 = arith.constant 0 : index
    %c0_18 = arith.constant 0 : index
    %15 = vector.load %arg10[%c0_17, %c0_18] : memref<1x256xf32, #tpu.memory_space<vmem>>, vector<1x256xf32>
    %cst_19 = arith.constant dense<0.000000e+00> : vector<8xf32>
    %16 = vector.multi_reduction <add>, %13, %cst_19 [1] : vector<8x256xf32> to vector<8xf32>
    %17 = vector.shape_cast %16 : vector<8xf32> to vector<8x1xf32>
    %cst_20 = arith.constant 2.560000e+02 : f32
    %18 = vector.broadcast %cst_20 : f32 to vector<8x1xf32>
    %19 = arith.divf %17, %18 : vector<8x1xf32>
    %20 = vector.broadcast %19 : vector<8x1xf32> to vector<8x256xf32>
    %21 = arith.subf %13, %20 : vector<8x256xf32>
    %22 = arith.mulf %21, %21 : vector<8x256xf32>
    %cst_21 = arith.constant dense<0.000000e+00> : vector<8xf32>
    %23 = vector.multi_reduction <add>, %22, %cst_21 [1] : vector<8x256xf32> to vector<8xf32>
    %24 = vector.shape_cast %23 : vector<8xf32> to vector<8x1xf32>
    %cst_22 = arith.constant 2.560000e+02 : f32
    %25 = vector.broadcast %cst_22 : f32 to vector<8x1xf32>
    %26 = arith.divf %24, %25 : vector<8x1xf32>
    %27 = vector.broadcast %19 : vector<8x1xf32> to vector<8x256xf32>
    %28 = arith.subf %13, %27 : vector<8x256xf32>
    %cst_23 = arith.constant 9.99999974E-6 : f32
    %29 = vector.broadcast %cst_23 : f32 to vector<8x1xf32>
    %30 = arith.addf %26, %29 : vector<8x1xf32>
    %31 = math.rsqrt %30 : vector<8x1xf32>
    %32 = vector.broadcast %31 : vector<8x1xf32> to vector<8x256xf32>
    %33 = arith.mulf %28, %32 : vector<8x256xf32>
    %34 = vector.broadcast %14 : vector<1x256xf32> to vector<8x256xf32>
    %35 = arith.mulf %33, %34 : vector<8x256xf32>
    %36 = vector.broadcast %15 : vector<1x256xf32> to vector<8x256xf32>
    %37 = arith.addf %35, %36 : vector<8x256xf32>
    %c0_24 = arith.constant 0 : index
    %c0_25 = arith.constant 0 : index
    %38 = vector.load %arg11[%c0_24, %c0_25] : memref<256x256xf32, #tpu.memory_space<vmem>>, vector<256x256xf32>
    %cst_26 = arith.constant dense<0.000000e+00> : vector<8x256xf32>
    %39 = tpu.matmul %37, %38, %cst_26 {dimension_numbers = #tpu.dot_dimension_numbers<[1], [0], [0], [1], [0, 0, 1, 1], [], []>} : vector<8x256xf32>, vector<256x256xf32>, vector<8x256xf32> -> vector<8x256xf32>
    %c0_27 = arith.constant 0 : index
    %c0_28 = arith.constant 0 : index
    %40 = vector.load %arg12[%c0_27, %c0_28] : memref<1x256xf32, #tpu.memory_space<vmem>>, vector<1x256xf32>
    %41 = vector.broadcast %40 : vector<1x256xf32> to vector<8x256xf32>
    %42 = arith.addf %39, %41 : vector<8x256xf32>
    %cst_29 = arith.constant 0.000000e+00 : f32
    %43 = vector.broadcast %cst_29 : f32 to vector<8x256xf32>
    %44 = arith.maximumf %42, %43 : vector<8x256xf32>
    %c0_30 = arith.constant 0 : index
    %c0_31 = arith.constant 0 : index
    %45 = vector.load %arg11[%c0_30, %c0_31] : memref<256x256xf32, #tpu.memory_space<vmem>>, vector<256x256xf32>
    %cst_32 = arith.constant dense<0.000000e+00> : vector<8x256xf32>
    %46 = tpu.matmul %44, %45, %cst_32 {dimension_numbers = #tpu.dot_dimension_numbers<[1], [0], [0], [1], [0, 0, 1, 1], [], []>} : vector<8x256xf32>, vector<256x256xf32>, vector<8x256xf32> -> vector<8x256xf32>
    %c0_33 = arith.constant 0 : index
    %c0_34 = arith.constant 0 : index
    %47 = vector.load %arg12[%c0_33, %c0_34] : memref<1x256xf32, #tpu.memory_space<vmem>>, vector<1x256xf32>
    %48 = vector.broadcast %47 : vector<1x256xf32> to vector<8x256xf32>
    %49 = arith.addf %46, %48 : vector<8x256xf32>
    %50 = arith.addf %37, %49 : vector<8x256xf32>
    %c0_35 = arith.constant 0 : index
    %c0_36 = arith.constant 0 : index
    %51 = vector.load %arg13[%c0_35, %c0_36] : memref<1x256xf32, #tpu.memory_space<vmem>>, vector<1x256xf32>
    %c0_37 = arith.constant 0 : index
    %c0_38 = arith.constant 0 : index
    %52 = vector.load %arg14[%c0_37, %c0_38] : memref<1x256xf32, #tpu.memory_space<vmem>>, vector<1x256xf32>
    %cst_39 = arith.constant dense<0.000000e+00> : vector<8xf32>
    %53 = vector.multi_reduction <add>, %50, %cst_39 [1] : vector<8x256xf32> to vector<8xf32>
    %54 = vector.shape_cast %53 : vector<8xf32> to vector<8x1xf32>
    %cst_40 = arith.constant 2.560000e+02 : f32
    %55 = vector.broadcast %cst_40 : f32 to vector<8x1xf32>
    %56 = arith.divf %54, %55 : vector<8x1xf32>
    %57 = vector.broadcast %56 : vector<8x1xf32> to vector<8x256xf32>
    %58 = arith.subf %50, %57 : vector<8x256xf32>
    %59 = arith.mulf %58, %58 : vector<8x256xf32>
    %cst_41 = arith.constant dense<0.000000e+00> : vector<8xf32>
    %60 = vector.multi_reduction <add>, %59, %cst_41 [1] : vector<8x256xf32> to vector<8xf32>
    %61 = vector.shape_cast %60 : vector<8xf32> to vector<8x1xf32>
    %cst_42 = arith.constant 2.560000e+02 : f32
    %62 = vector.broadcast %cst_42 : f32 to vector<8x1xf32>
    %63 = arith.divf %61, %62 : vector<8x1xf32>
    %64 = vector.broadcast %56 : vector<8x1xf32> to vector<8x256xf32>
    %65 = arith.subf %50, %64 : vector<8x256xf32>
    %cst_43 = arith.constant 9.99999974E-6 : f32
    %66 = vector.broadcast %cst_43 : f32 to vector<8x1xf32>
    %67 = arith.addf %63, %66 : vector<8x1xf32>
    %68 = math.rsqrt %67 : vector<8x1xf32>
    %69 = vector.broadcast %68 : vector<8x1xf32> to vector<8x256xf32>
    %70 = arith.mulf %65, %69 : vector<8x256xf32>
    %71 = vector.broadcast %51 : vector<1x256xf32> to vector<8x256xf32>
    %72 = arith.mulf %70, %71 : vector<8x256xf32>
    %73 = vector.broadcast %52 : vector<1x256xf32> to vector<8x256xf32>
    %74 = arith.addf %72, %73 : vector<8x256xf32>
    %c0_44 = arith.constant 0 : index
    %c0_45 = arith.constant 0 : index
    %75 = vector.load %arg24[%c0_44, %c0_45] : memref<8x256xf32, #tpu.memory_space<vmem>>, vector<8x256xf32>
    tpu.vector_store %arg24[%c0_44, %c0_45], %74 {strides = array<i32>} : memref<8x256xf32, #tpu.memory_space<vmem>>, vector<8x256xf32>,
    %c0_46 = arith.constant 0 : index
    %c0_47 = arith.constant 0 : index
    %76 = vector.load %arg4[%c0_46, %c0_47] : memref<2x1024xf32, #tpu.memory_space<vmem>>, vector<2x1024xf32>
    %77 = arith.negf %76 : vector<2x1024xf32>
    %78 = math.exp %77 : vector<2x1024xf32>
    %cst_48 = arith.constant 1.000000e+00 : f32
    %79 = vector.broadcast %cst_48 : f32 to vector<2x1024xf32>
    %80 = arith.addf %79, %78 : vector<2x1024xf32>
    %81 = arith.divf %79, %80 : vector<2x1024xf32>
    %82 = arith.mulf %76, %81 : vector<2x1024xf32>
    %c0_49 = arith.constant 0 : index
    %c0_50 = arith.constant 0 : index
    %83 = vector.load %arg15[%c0_49, %c0_50] : memref<1024x512xf32, #tpu.memory_space<vmem>>, vector<1024x512xf32>
    %cst_51 = arith.constant dense<0.000000e+00> : vector<2x512xf32>
    %84 = tpu.matmul %82, %83, %cst_51 {dimension_numbers = #tpu.dot_dimension_numbers<[1], [0], [0], [1], [0, 0, 1, 1], [], []>} : vector<2x1024xf32>, vector<1024x512xf32>, vector<2x512xf32> -> vector<2x512xf32>
    %c0_52 = arith.constant 0 : index
    %c0_53 = arith.constant 0 : index
    %85 = vector.load %arg16[%c0_52, %c0_53] : memref<1x512xf32, #tpu.memory_space<vmem>>, vector<1x512xf32>
    %86 = vector.broadcast %85 : vector<1x512xf32> to vector<2x512xf32>
    %87 = arith.addf %84, %86 : vector<2x512xf32>
    %88 = vector.extract_strided_slice %87 {offsets = [0, 0], sizes = [2, 256], strides = [1, 1]} : vector<2x512xf32> to vector<2x256xf32>
    %89 = vector.extract_strided_slice %87 {offsets = [0, 256], sizes = [2, 256], strides = [1, 1]} : vector<2x512xf32> to vector<2x256xf32>
    %90 = vector.shape_cast %74 : vector<8x256xf32> to vector<2x4x256xf32>
    %91 = vector.shape_cast %88 : vector<2x256xf32> to vector<2x1x256xf32>
    %cst_54 = arith.constant 1.000000e+00 : f32
    %92 = vector.broadcast %cst_54 : f32 to vector<2x1x256xf32>
    %93 = arith.addf %91, %92 : vector<2x1x256xf32>
    %94 = vector.broadcast %93 : vector<2x1x256xf32> to vector<2x4x256xf32>
    %95 = arith.mulf %90, %94 : vector<2x4x256xf32>
    %96 = vector.shape_cast %89 : vector<2x256xf32> to vector<2x1x256xf32>
    %97 = vector.broadcast %96 : vector<2x1x256xf32> to vector<2x4x256xf32>
    %98 = arith.addf %95, %97 : vector<2x4x256xf32>
    %99 = vector.shape_cast %98 : vector<2x4x256xf32> to vector<8x256xf32>
    %c0_55 = arith.constant 0 : index
    %c0_56 = arith.constant 0 : index
    %100 = vector.load %arg17[%c0_55, %c0_56] : memref<256x256xf32, #tpu.memory_space<vmem>>, vector<256x256xf32>
    %cst_57 = arith.constant dense<0.000000e+00> : vector<8x256xf32>
    %101 = tpu.matmul %99, %100, %cst_57 {dimension_numbers = #tpu.dot_dimension_numbers<[1], [0], [0], [1], [0, 0, 1, 1], [], []>} : vector<8x256xf32>, vector<256x256xf32>, vector<8x256xf32> -> vector<8x256xf32>
    %c0_58 = arith.constant 0 : index
    %c0_59 = arith.constant 0 : index
    %102 = vector.load %arg18[%c0_58, %c0_59] : memref<1x256xf32, #tpu.memory_space<vmem>>, vector<1x256xf32>
    %103 = vector.broadcast %102 : vector<1x256xf32> to vector<8x256xf32>
    %104 = arith.addf %101, %103 : vector<8x256xf32>
    %cst_60 = arith.constant 0.000000e+00 : f32
    %105 = vector.broadcast %cst_60 : f32 to vector<8x256xf32>
    %106 = arith.maximumf %104, %105 : vector<8x256xf32>
    %c0_61 = arith.constant 0 : index
    %c0_62 = arith.constant 0 : index
    %107 = vector.load %arg19[%c0_61, %c0_62] : memref<256x256xf32, #tpu.memory_space<vmem>>, vector<256x256xf32>
    %cst_63 = arith.constant dense<0.000000e+00> : vector<8x256xf32>
    %108 = tpu.matmul %106, %107, %cst_63 {dimension_numbers = #tpu.dot_dimension_numbers<[1], [0], [0], [1], [0, 0, 1, 1], [], []>} : vector<8x256xf32>, vector<256x256xf32>, vector<8x256xf32> -> vector<8x256xf32>
    %c0_64 = arith.constant 0 : index
    %c0_65 = arith.constant 0 : index
    %109 = vector.load %arg20[%c0_64, %c0_65] : memref<1x256xf32, #tpu.memory_space<vmem>>, vector<1x256xf32>
    %110 = vector.broadcast %109 : vector<1x256xf32> to vector<8x256xf32>
    %111 = arith.addf %108, %110 : vector<8x256xf32>
    %cst_66 = arith.constant 0.000000e+00 : f32
    %112 = vector.broadcast %cst_66 : f32 to vector<8x256xf32>
    %113 = arith.maximumf %111, %112 : vector<8x256xf32>
    %c0_67 = arith.constant 0 : index
    %c0_68 = arith.constant 0 : index
    %114 = vector.load %arg21[%c0_67, %c0_68] : memref<256x2xf32, #tpu.memory_space<vmem>>, vector<256x2xf32>
    %cst_69 = arith.constant dense<0.000000e+00> : vector<8x2xf32>
    %115 = tpu.matmul %113, %114, %cst_69 {dimension_numbers = #tpu.dot_dimension_numbers<[1], [0], [0], [1], [0, 0, 1, 1], [], []>} : vector<8x256xf32>, vector<256x2xf32>, vector<8x2xf32> -> vector<8x2xf32>
    %c0_70 = arith.constant 0 : index
    %c0_71 = arith.constant 0 : index
    %116 = vector.load %arg22[%c0_70, %c0_71] : memref<1x2xf32, #tpu.memory_space<vmem>>, vector<1x2xf32>
    %117 = vector.broadcast %116 : vector<1x2xf32> to vector<8x2xf32>
    %118 = arith.addf %115, %117 : vector<8x2xf32>
    %119 = vector.shape_cast %2 : vector<2x4x2xf32> to vector<8x2xf32>
    %120 = vector.extract_strided_slice %119 {offsets = [0, 1], sizes = [8, 1], strides = [1, 1]} : vector<8x2xf32> to vector<8x1xf32>
    %121 = vector.extract_strided_slice %119 {offsets = [0, 0], sizes = [8, 1], strides = [1, 1]} : vector<8x2xf32> to vector<8x1xf32>
    %122 = arith.subf %120, %121 : vector<8x1xf32>
    %123 = vector.extract_strided_slice %119 {offsets = [0, 0], sizes = [8, 1], strides = [1, 1]} : vector<8x2xf32> to vector<8x1xf32>
    %cst_72 = arith.constant 5.000000e-01 : f32
    %124 = vector.broadcast %cst_72 : f32 to vector<8x1xf32>
    %125 = arith.mulf %124, %122 : vector<8x1xf32>
    %126 = arith.addf %123, %125 : vector<8x1xf32>
    %127 = vector.extract_strided_slice %118 {offsets = [0, 0], sizes = [8, 1], strides = [1, 1]} : vector<8x2xf32> to vector<8x1xf32>
    %cst_73 = arith.constant 2.000000e+00 : f32
    %128 = vector.broadcast %cst_73 : f32 to vector<8x1xf32>
    %129 = arith.divf %127, %128 : vector<8x1xf32>
    %130 = vector.extract_strided_slice %118 {offsets = [0, 1], sizes = [8, 1], strides = [1, 1]} : vector<8x2xf32> to vector<8x1xf32>
    %cst_74 = arith.constant 1.000000e+00 : f32
    %131 = vector.broadcast %cst_74 : f32 to vector<8x1xf32>
    %132 = arith.divf %130, %131 : vector<8x1xf32>
    %cst_75 = arith.constant 5.000000e+00 : f32
    %133 = vector.broadcast %cst_75 : f32 to vector<8x1xf32>
    %134 = arith.minimumf %132, %133 : vector<8x1xf32>
    %135 = arith.addf %126, %129 : vector<8x1xf32>
    %136 = arith.addf %134, %122 : vector<8x1xf32>
    %137 = arith.negf %136 : vector<8x1xf32>
    %138 = math.exp %137 : vector<8x1xf32>
    %cst_76 = arith.constant 1.000000e+00 : f32
    %139 = vector.broadcast %cst_76 : f32 to vector<8x1xf32>
    %140 = arith.addf %139, %138 : vector<8x1xf32>
    %141 = arith.divf %139, %140 : vector<8x1xf32>
    %cst_77 = arith.constant 5.000000e-01 : f32
    %142 = vector.broadcast %cst_77 : f32 to vector<8x1xf32>
    %143 = arith.mulf %142, %141 : vector<8x1xf32>
    %144 = arith.subf %135, %143 : vector<8x1xf32>
    %cst_78 = arith.constant 5.000000e-01 : f32
    %145 = vector.broadcast %cst_78 : f32 to vector<8x1xf32>
    %146 = arith.mulf %145, %141 : vector<8x1xf32>
    %147 = arith.addf %135, %146 : vector<8x1xf32>
    %148 = tpu.concatenate %144, %147 in 1 : vector<8x1xf32>, vector<8x1xf32> -> vector<8x2xf32>
    %149 = vector.shape_cast %148 : vector<8x2xf32> to vector<2x4x2xf32>
    %c0_79 = arith.constant 0 : index
    %c0_80 = arith.constant 0 : index
    %c0_81 = arith.constant 0 : index
    %150 = vector.load %arg23[%c0_79, %c0_80, %c0_81] : memref<2x4x2xf32, #tpu.memory_space<vmem>>, vector<2x4x2xf32>
    tpu.vector_store %arg23[%c0_79, %c0_80, %c0_81], %149 {strides = array<i32>} : memref<2x4x2xf32, #tpu.memory_space<vmem>>, vector<2x4x2xf32>,
    return
  }
  func.func @transform_0(%arg0: i32) -> (i32, i32) {
    %c0_i32 = arith.constant 0 : i32
    %c0_i32_0 = arith.constant 0 : i32
    %c0_i32_1 = arith.constant 0 : i32
    return %c0_i32, %c0_i32_0 : i32, i32
  }
  func.func @transform_1(%arg0: i32) -> (i32, i32) {
    %c0_i32 = arith.constant 0 : i32
    %c0_i32_0 = arith.constant 0 : i32
    %c0_i32_1 = arith.constant 0 : i32
    return %c0_i32, %c0_i32_0 : i32, i32
  }
  func.func @transform_2(%arg0: i32) -> (i32, i32, i32) {
    %c0_i32 = arith.constant 0 : i32
    %c0_i32_0 = arith.constant 0 : i32
    %c0_i32_1 = arith.constant 0 : i32
    %c0_i32_2 = arith.constant 0 : i32
    return %c0_i32, %c0_i32_0, %c0_i32_1 : i32, i32, i32
  }
  func.func @transform_3(%arg0: i32) -> (i32, i32) {
    %c0_i32 = arith.constant 0 : i32
    %c0_i32_0 = arith.constant 0 : i32
    %c0_i32_1 = arith.constant 0 : i32
    return %c0_i32, %c0_i32_0 : i32, i32
  }
  func.func @transform_4(%arg0: i32) -> (i32, i32) {
    %c0_i32 = arith.constant 0 : i32
    %c0_i32_0 = arith.constant 0 : i32
    %c0_i32_1 = arith.constant 0 : i32
    return %c0_i32, %c0_i32_0 : i32, i32
  }
  func.func @transform_5(%arg0: i32) -> (i32, i32) {
    %c0_i32 = arith.constant 0 : i32
    %c0_i32_0 = arith.constant 0 : i32
    %c0_i32_1 = arith.constant 0 : i32
    return %c0_i32, %c0_i32_0 : i32, i32
  }
  func.func @transform_6(%arg0: i32) -> (i32, i32) {
    %c0_i32 = arith.constant 0 : i32
    %c0_i32_0 = arith.constant 0 : i32
    %c0_i32_1 = arith.constant 0 : i32
    return %c0_i32, %c0_i32_0 : i32, i32
  }
  func.func @transform_7(%arg0: i32) -> (i32, i32) {
    %c0_i32 = arith.constant 0 : i32
    %c0_i32_0 = arith.constant 0 : i32
    %c0_i32_1 = arith.constant 0 : i32
    return %c0_i32, %c0_i32_0 : i32, i32
  }
  func.func @transform_8(%arg0: i32) -> (i32, i32) {
    %c0_i32 = arith.constant 0 : i32
    %c0_i32_0 = arith.constant 0 : i32
    %c0_i32_1 = arith.constant 0 : i32
    return %c0_i32, %c0_i32_0 : i32, i32
  }
  func.func @transform_9(%arg0: i32) -> (i32, i32) {
    %c0_i32 = arith.constant 0 : i32
    %c0_i32_0 = arith.constant 0 : i32
    %c0_i32_1 = arith.constant 0 : i32
    return %c0_i32, %c0_i32_0 : i32, i32
  }
  func.func @transform_10(%arg0: i32) -> (i32, i32) {
    %c0_i32 = arith.constant 0 : i32
    %c0_i32_0 = arith.constant 0 : i32
    %c0_i32_1 = arith.constant 0 : i32
    return %c0_i32, %c0_i32_0 : i32, i32
  }
  func.func @transform_11(%arg0: i32) -> (i32, i32) {
    %c0_i32 = arith.constant 0 : i32
    %c0_i32_0 = arith.constant 0 : i32
    %c0_i32_1 = arith.constant 0 : i32
    return %c0_i32, %c0_i32_0 : i32, i32
  }
  func.func @transform_12(%arg0: i32) -> (i32, i32) {
    %c0_i32 = arith.constant 0 : i32
    %c0_i32_0 = arith.constant 0 : i32
    %c0_i32_1 = arith.constant 0 : i32
    return %c0_i32, %c0_i32_0 : i32, i32
  }
  func.func @transform_13(%arg0: i32) -> (i32, i32) {
    %c0_i32 = arith.constant 0 : i32
    %c0_i32_0 = arith.constant 0 : i32
    %c0_i32_1 = arith.constant 0 : i32
    return %c0_i32, %c0_i32_0 : i32, i32
  }
  func.func @transform_14(%arg0: i32) -> (i32, i32) {
    %c0_i32 = arith.constant 0 : i32
    %c0_i32_0 = arith.constant 0 : i32
    %c0_i32_1 = arith.constant 0 : i32
    return %c0_i32, %c0_i32_0 : i32, i32
  }
  func.func @transform_15(%arg0: i32) -> (i32, i32) {
    %c0_i32 = arith.constant 0 : i32
    %c0_i32_0 = arith.constant 0 : i32
    %c0_i32_1 = arith.constant 0 : i32
    return %c0_i32, %c0_i32_0 : i32, i32
  }
  func.func @transform_16(%arg0: i32) -> (i32, i32) {
    %c0_i32 = arith.constant 0 : i32
    %c0_i32_0 = arith.constant 0 : i32
    %c0_i32_1 = arith.constant 0 : i32
    return %c0_i32, %c0_i32_0 : i32, i32
  }
  func.func @transform_17(%arg0: i32) -> (i32, i32) {
    %c0_i32 = arith.constant 0 : i32
    %c0_i32_0 = arith.constant 0 : i32
    %c0_i32_1 = arith.constant 0 : i32
    return %c0_i32, %c0_i32_0 : i32, i32
  }
  func.func @transform_18(%arg0: i32) -> (i32, i32) {
    %c0_i32 = arith.constant 0 : i32
    %c0_i32_0 = arith.constant 0 : i32
    %c0_i32_1 = arith.constant 0 : i32
    return %c0_i32, %c0_i32_0 : i32, i32
  }
  func.func @transform_19(%arg0: i32) -> (i32, i32) {
    %c0_i32 = arith.constant 0 : i32
    %c0_i32_0 = arith.constant 0 : i32
    %c0_i32_1 = arith.constant 0 : i32
    return %c0_i32, %c0_i32_0 : i32, i32
  }
  func.func @transform_20(%arg0: i32) -> (i32, i32) {
    %c0_i32 = arith.constant 0 : i32
    %c0_i32_0 = arith.constant 0 : i32
    %c0_i32_1 = arith.constant 0 : i32
    return %c0_i32, %c0_i32_0 : i32, i32
  }
  func.func @transform_21(%arg0: i32) -> (i32, i32) {
    %c0_i32 = arith.constant 0 : i32
    %c0_i32_0 = arith.constant 0 : i32
    %c0_i32_1 = arith.constant 0 : i32
    return %c0_i32, %c0_i32_0 : i32, i32
  }
  func.func @transform_22(%arg0: i32) -> (i32, i32, i32) {
    %c0_i32 = arith.constant 0 : i32
    %c0_i32_0 = arith.constant 0 : i32
    %c0_i32_1 = arith.constant 0 : i32
    %c0_i32_2 = arith.constant 0 : i32
    return %c0_i32, %c0_i32_0, %c0_i32_1 : i32, i32, i32
  }
  func.func @transform_23(%arg0: i32) -> (i32, i32) {
    %c0_i32 = arith.constant 0 : i32
    %c0_i32_0 = arith.constant 0 : i32
    %c0_i32_1 = arith.constant 0 : i32
    return %c0_i32, %c0_i32_0 : i32, i32
  }
}

module attributes {stable_mosaic.version = 11 : i64} {
  func.func @_span_features_kernel(%arg0: i32, %arg1: memref<2x64x256xf32, #tpu.memory_space<vmem>>, %arg2: memref<2x4x2xf32, #tpu.memory_space<vmem>>, %arg3: memref<1x256xf32, #tpu.memory_space<vmem>>, %arg4: memref<1x1xf32, #tpu.memory_space<vmem>>, %arg5: memref<2x256xf32, #tpu.memory_space<vmem>>, %arg6: memref<1x256xf32, #tpu.memory_space<vmem>>, %arg7: memref<256x256xf32, #tpu.memory_space<vmem>>, %arg8: memref<1x256xf32, #tpu.memory_space<vmem>>, %arg9: memref<8x256xf32, #tpu.memory_space<vmem>>) attributes {dimension_semantics = [#tpu.dimension_semantics<arbitrary>], iteration_bounds = array<i64: 1>, scalar_prefetch = 0 : i64, scratch_operands = 0 : i64, tpu.core_type = #tpu.core_type<tc>, window_params = [{pipeline_mode = #tpu.pipeline_mode<synchronous>, transform_indices = @transform_0, window_bounds = array<i64: 2, 64, 256>}, {pipeline_mode = #tpu.pipeline_mode<synchronous>, transform_indices = @transform_1, window_bounds = array<i64: 2, 4, 2>}, {pipeline_mode = #tpu.pipeline_mode<synchronous>, transform_indices = @transform_2, window_bounds = array<i64: 1, 256>}, {pipeline_mode = #tpu.pipeline_mode<synchronous>, transform_indices = @transform_3, window_bounds = array<i64: 1, 1>}, {pipeline_mode = #tpu.pipeline_mode<synchronous>, transform_indices = @transform_4, window_bounds = array<i64: 2, 256>}, {pipeline_mode = #tpu.pipeline_mode<synchronous>, transform_indices = @transform_5, window_bounds = array<i64: 1, 256>}, {pipeline_mode = #tpu.pipeline_mode<synchronous>, transform_indices = @transform_6, window_bounds = array<i64: 256, 256>}, {pipeline_mode = #tpu.pipeline_mode<synchronous>, transform_indices = @transform_7, window_bounds = array<i64: 1, 256>}, {pipeline_mode = #tpu.pipeline_mode<synchronous>, transform_indices = @transform_8, window_bounds = array<i64: 8, 256>}]} {
    %c0 = arith.constant 0 : index
    %c0_0 = arith.constant 0 : index
    %c0_1 = arith.constant 0 : index
    %0 = vector.load %arg1[%c0, %c0_0, %c0_1] : memref<2x64x256xf32, #tpu.memory_space<vmem>>, vector<2x64x256xf32>
    %c0_2 = arith.constant 0 : index
    %c0_3 = arith.constant 0 : index
    %c0_4 = arith.constant 0 : index
    %1 = vector.load %arg2[%c0_2, %c0_3, %c0_4] : memref<2x4x2xf32, #tpu.memory_space<vmem>>, vector<2x4x2xf32>
    %c0_5 = arith.constant 0 : index
    %c0_6 = arith.constant 0 : index
    %2 = vector.load %arg3[%c0_5, %c0_6] : memref<1x256xf32, #tpu.memory_space<vmem>>, vector<1x256xf32>
    %3 = vector.shape_cast %2 : vector<1x256xf32> to vector<1x1x256xf32>
    %4 = vector.broadcast %3 : vector<1x1x256xf32> to vector<2x64x256xf32>
    %5 = arith.mulf %0, %4 : vector<2x64x256xf32>
    %cst = arith.constant dense<0.000000e+00> : vector<2x64xf32>
    %6 = vector.multi_reduction <add>, %5, %cst [2] : vector<2x64x256xf32> to vector<2x64xf32>
    %c0_7 = arith.constant 0 : index
    %c0_8 = arith.constant 0 : index
    %7 = vector.load %arg4[%c0_7, %c0_8] : memref<1x1xf32, #tpu.memory_space<vmem>>, vector<1x1xf32>
    %8 = vector.broadcast %7 : vector<1x1xf32> to vector<2x64xf32>
    %9 = arith.addf %6, %8 : vector<2x64xf32>
    %cst_9 = arith.constant 6.400000e+01 : f32
    %10 = vector.broadcast %cst_9 : f32 to vector<2x4x2xf32>
    %11 = arith.mulf %1, %10 : vector<2x4x2xf32>
    %12 = arith.fptosi %11 : vector<2x4x2xf32> to vector<2x4x2xi32>
    %c0_i32 = arith.constant 0 : i32
    %c63_i32 = arith.constant 63 : i32
    %13 = vector.broadcast %c0_i32 : i32 to vector<2x4x2xi32>
    %14 = arith.maxsi %13, %12 : vector<2x4x2xi32>
    %15 = vector.broadcast %c63_i32 : i32 to vector<2x4x2xi32>
    %16 = arith.minsi %15, %14 : vector<2x4x2xi32>
    %17 = vector.extract_strided_slice %16 {offsets = [0, 0, 0], sizes = [2, 4, 1], strides = [1, 1, 1]} : vector<2x4x2xi32> to vector<2x4x1xi32>
    %18 = vector.extract_strided_slice %16 {offsets = [0, 0, 1], sizes = [2, 4, 1], strides = [1, 1, 1]} : vector<2x4x2xi32> to vector<2x4x1xi32>
    %19 = tpu.iota {dimensions = array<i32: 2>} : vector<2x4x64xi32>
    %20 = vector.broadcast %17 : vector<2x4x1xi32> to vector<2x4x64xi32>
    %21 = arith.cmpi sge, %19, %20 : vector<2x4x64xi32>
    %22 = vector.broadcast %18 : vector<2x4x1xi32> to vector<2x4x64xi32>
    %23 = arith.cmpi slt, %19, %22 : vector<2x4x64xi32>
    %24 = arith.andi %21, %23 : vector<2x4x64xi1>
    %25 = vector.broadcast %17 : vector<2x4x1xi32> to vector<2x4x64xi32>
    %26 = arith.cmpi eq, %19, %25 : vector<2x4x64xi32>
    %27 = arith.cmpi eq, %18, %17 : vector<2x4x1xi32>
    %28 = vector.broadcast %27 : vector<2x4x1xi1> to vector<2x4x64xi1>
    %29 = arith.andi %26, %28 : vector<2x4x64xi1>
    %30 = arith.ori %24, %29 : vector<2x4x64xi1>
    %31 = vector.shape_cast %9 : vector<2x64xf32> to vector<2x1x64xf32>
    %cst_10 = arith.constant -1.000000e+30 : f32
    %32 = vector.shape_cast %31 : vector<2x1x64xf32> to vector<2x1x64xf32>
    %33 = vector.broadcast %32 : vector<2x1x64xf32> to vector<2x4x64xf32>
    %34 = vector.broadcast %cst_10 : f32 to vector<2x4x64xf32>
    %35 = arith.select %30, %33, %34 : vector<2x4x64xi1>, vector<2x4x64xf32>
    %cst_11 = arith.constant dense<0xFF800000> : vector<2x4xf32>
    %36 = vector.multi_reduction <maximumf>, %35, %cst_11 [2] : vector<2x4x64xf32> to vector<2x4xf32>
    %37 = vector.shape_cast %36 : vector<2x4xf32> to vector<2x4x1xf32>
    %38 = vector.broadcast %37 : vector<2x4x1xf32> to vector<2x4x64xf32>
    %39 = arith.subf %35, %38 : vector<2x4x64xf32>
    %40 = math.exp %39 : vector<2x4x64xf32>
    %cst_12 = arith.constant dense<0.000000e+00> : vector<2x4xf32>
    %41 = vector.multi_reduction <add>, %40, %cst_12 [2] : vector<2x4x64xf32> to vector<2x4xf32>
    %42 = vector.shape_cast %41 : vector<2x4xf32> to vector<2x4x1xf32>
    %43 = vector.broadcast %42 : vector<2x4x1xf32> to vector<2x4x64xf32>
    %44 = arith.divf %40, %43 : vector<2x4x64xf32>
    "tpu.trace_start"() <{level = 10 : i32, message = "nrt,ntd->nrd"}> : () -> ()
    %cst_13 = arith.constant dense<0.000000e+00> : vector<2x4x256xf32>
    %45 = tpu.matmul %44, %0, %cst_13 {dimension_numbers = #tpu.dot_dimension_numbers<[2], [1], [1], [2], [0, 0, 0, 1, 1, 2], [0], [0]>} : vector<2x4x64xf32>, vector<2x64x256xf32>, vector<2x4x256xf32> -> vector<2x4x256xf32>
    "tpu.trace_stop"() : () -> ()
    %46 = vector.shape_cast %1 : vector<2x4x2xf32> to vector<8x2xf32>
    %47 = vector.extract_strided_slice %46 {offsets = [0, 0], sizes = [8, 1], strides = [1, 1]} : vector<8x2xf32> to vector<8x1xf32>
    %c0_14 = arith.constant 0 : index
    %c0_15 = arith.constant 0 : index
    %48 = vector.load %arg5[%c0_14, %c0_15] : memref<2x256xf32, #tpu.memory_space<vmem>>, vector<1x256xf32>
    %49 = vector.broadcast %47 : vector<8x1xf32> to vector<8x256xf32>
    %50 = vector.broadcast %48 : vector<1x256xf32> to vector<8x256xf32>
    %51 = arith.mulf %49, %50 : vector<8x256xf32>
    %52 = vector.extract_strided_slice %46 {offsets = [0, 1], sizes = [8, 1], strides = [1, 1]} : vector<8x2xf32> to vector<8x1xf32>
    %c1 = arith.constant 1 : index
    %c0_16 = arith.constant 0 : index
    %53 = vector.load %arg5[%c1, %c0_16] : memref<2x256xf32, #tpu.memory_space<vmem>>, vector<1x256xf32>
    %54 = vector.broadcast %52 : vector<8x1xf32> to vector<8x256xf32>
    %55 = vector.broadcast %53 : vector<1x256xf32> to vector<8x256xf32>
    %56 = arith.mulf %54, %55 : vector<8x256xf32>
    %57 = arith.addf %51, %56 : vector<8x256xf32>
    %c0_17 = arith.constant 0 : index
    %c0_18 = arith.constant 0 : index
    %58 = vector.load %arg6[%c0_17, %c0_18] : memref<1x256xf32, #tpu.memory_space<vmem>>, vector<1x256xf32>
    %59 = vector.broadcast %58 : vector<1x256xf32> to vector<8x256xf32>
    %60 = arith.addf %57, %59 : vector<8x256xf32>
    %cst_19 = arith.constant 0.000000e+00 : f32
    %61 = vector.broadcast %cst_19 : f32 to vector<8x256xf32>
    %62 = arith.maximumf %60, %61 : vector<8x256xf32>
    %c0_20 = arith.constant 0 : index
    %c0_21 = arith.constant 0 : index
    %63 = vector.load %arg7[%c0_20, %c0_21] : memref<256x256xf32, #tpu.memory_space<vmem>>, vector<256x256xf32>
    %cst_22 = arith.constant dense<0.000000e+00> : vector<8x256xf32>
    %64 = tpu.matmul %62, %63, %cst_22 {dimension_numbers = #tpu.dot_dimension_numbers<[1], [0], [0], [1], [0, 0, 1, 1], [], []>} : vector<8x256xf32>, vector<256x256xf32>, vector<8x256xf32> -> vector<8x256xf32>
    %c0_23 = arith.constant 0 : index
    %c0_24 = arith.constant 0 : index
    %65 = vector.load %arg8[%c0_23, %c0_24] : memref<1x256xf32, #tpu.memory_space<vmem>>, vector<1x256xf32>
    %66 = vector.broadcast %65 : vector<1x256xf32> to vector<8x256xf32>
    %67 = arith.addf %64, %66 : vector<8x256xf32>
    %68 = vector.shape_cast %45 : vector<2x4x256xf32> to vector<8x256xf32>
    %69 = arith.addf %68, %67 : vector<8x256xf32>
    %c0_25 = arith.constant 0 : index
    %c0_26 = arith.constant 0 : index
    %70 = vector.load %arg9[%c0_25, %c0_26] : memref<8x256xf32, #tpu.memory_space<vmem>>, vector<8x256xf32>
    tpu.vector_store %arg9[%c0_25, %c0_26], %69 {strides = array<i32>} : memref<8x256xf32, #tpu.memory_space<vmem>>, vector<8x256xf32>,
    return
  }
  func.func @transform_0(%arg0: i32) -> (i32, i32, i32) {
    %c0_i32 = arith.constant 0 : i32
    %c0_i32_0 = arith.constant 0 : i32
    %c0_i32_1 = arith.constant 0 : i32
    %c0_i32_2 = arith.constant 0 : i32
    return %c0_i32, %c0_i32_0, %c0_i32_1 : i32, i32, i32
  }
  func.func @transform_1(%arg0: i32) -> (i32, i32, i32) {
    %c0_i32 = arith.constant 0 : i32
    %c0_i32_0 = arith.constant 0 : i32
    %c0_i32_1 = arith.constant 0 : i32
    %c0_i32_2 = arith.constant 0 : i32
    return %c0_i32, %c0_i32_0, %c0_i32_1 : i32, i32, i32
  }
  func.func @transform_2(%arg0: i32) -> (i32, i32) {
    %c0_i32 = arith.constant 0 : i32
    %c0_i32_0 = arith.constant 0 : i32
    %c0_i32_1 = arith.constant 0 : i32
    return %c0_i32, %c0_i32_0 : i32, i32
  }
  func.func @transform_3(%arg0: i32) -> (i32, i32) {
    %c0_i32 = arith.constant 0 : i32
    %c0_i32_0 = arith.constant 0 : i32
    %c0_i32_1 = arith.constant 0 : i32
    return %c0_i32, %c0_i32_0 : i32, i32
  }
  func.func @transform_4(%arg0: i32) -> (i32, i32) {
    %c0_i32 = arith.constant 0 : i32
    %c0_i32_0 = arith.constant 0 : i32
    %c0_i32_1 = arith.constant 0 : i32
    return %c0_i32, %c0_i32_0 : i32, i32
  }
  func.func @transform_5(%arg0: i32) -> (i32, i32) {
    %c0_i32 = arith.constant 0 : i32
    %c0_i32_0 = arith.constant 0 : i32
    %c0_i32_1 = arith.constant 0 : i32
    return %c0_i32, %c0_i32_0 : i32, i32
  }
  func.func @transform_6(%arg0: i32) -> (i32, i32) {
    %c0_i32 = arith.constant 0 : i32
    %c0_i32_0 = arith.constant 0 : i32
    %c0_i32_1 = arith.constant 0 : i32
    return %c0_i32, %c0_i32_0 : i32, i32
  }
  func.func @transform_7(%arg0: i32) -> (i32, i32) {
    %c0_i32 = arith.constant 0 : i32
    %c0_i32_0 = arith.constant 0 : i32
    %c0_i32_1 = arith.constant 0 : i32
    return %c0_i32, %c0_i32_0 : i32, i32
  }
  func.func @transform_8(%arg0: i32) -> (i32, i32) {
    %c0_i32 = arith.constant 0 : i32
    %c0_i32_0 = arith.constant 0 : i32
    %c0_i32_1 = arith.constant 0 : i32
    return %c0_i32, %c0_i32_0 : i32, i32
  }
}

module attributes {stable_mosaic.version = 11 : i64} {
  func.func @_refine_kernel(%arg0: i32, %arg1: memref<8x256xf32, #tpu.memory_space<vmem>>, %arg2: memref<8x256xf32, #tpu.memory_space<vmem>>, %arg3: memref<2x4x2xf32, #tpu.memory_space<vmem>>, %arg4: memref<2x1024xf32, #tpu.memory_space<vmem>>, %arg5: memref<256x256xf32, #tpu.memory_space<vmem>>, %arg6: memref<1x256xf32, #tpu.memory_space<vmem>>, %arg7: memref<256x256xf32, #tpu.memory_space<vmem>>, %arg8: memref<1x256xf32, #tpu.memory_space<vmem>>, %arg9: memref<1x256xf32, #tpu.memory_space<vmem>>, %arg10: memref<1x256xf32, #tpu.memory_space<vmem>>, %arg11: memref<256x256xf32, #tpu.memory_space<vmem>>, %arg12: memref<1x256xf32, #tpu.memory_space<vmem>>, %arg13: memref<1x256xf32, #tpu.memory_space<vmem>>, %arg14: memref<1x256xf32, #tpu.memory_space<vmem>>, %arg15: memref<1024x512xf32, #tpu.memory_space<vmem>>, %arg16: memref<1x512xf32, #tpu.memory_space<vmem>>, %arg17: memref<256x256xf32, #tpu.memory_space<vmem>>, %arg18: memref<1x256xf32, #tpu.memory_space<vmem>>, %arg19: memref<256x256xf32, #tpu.memory_space<vmem>>, %arg20: memref<1x256xf32, #tpu.memory_space<vmem>>, %arg21: memref<256x2xf32, #tpu.memory_space<vmem>>, %arg22: memref<1x2xf32, #tpu.memory_space<vmem>>, %arg23: memref<2x4x2xf32, #tpu.memory_space<vmem>>, %arg24: memref<8x256xf32, #tpu.memory_space<vmem>>) attributes {dimension_semantics = [#tpu.dimension_semantics<arbitrary>], iteration_bounds = array<i64: 1>, scalar_prefetch = 0 : i64, scratch_operands = 0 : i64, tpu.core_type = #tpu.core_type<tc>, window_params = [{pipeline_mode = #tpu.pipeline_mode<synchronous>, transform_indices = @transform_0, window_bounds = array<i64: 8, 256>}, {pipeline_mode = #tpu.pipeline_mode<synchronous>, transform_indices = @transform_1, window_bounds = array<i64: 8, 256>}, {pipeline_mode = #tpu.pipeline_mode<synchronous>, transform_indices = @transform_2, window_bounds = array<i64: 2, 4, 2>}, {pipeline_mode = #tpu.pipeline_mode<synchronous>, transform_indices = @transform_3, window_bounds = array<i64: 2, 1024>}, {pipeline_mode = #tpu.pipeline_mode<synchronous>, transform_indices = @transform_4, window_bounds = array<i64: 256, 256>}, {pipeline_mode = #tpu.pipeline_mode<synchronous>, transform_indices = @transform_5, window_bounds = array<i64: 1, 256>}, {pipeline_mode = #tpu.pipeline_mode<synchronous>, transform_indices = @transform_6, window_bounds = array<i64: 256, 256>}, {pipeline_mode = #tpu.pipeline_mode<synchronous>, transform_indices = @transform_7, window_bounds = array<i64: 1, 256>}, {pipeline_mode = #tpu.pipeline_mode<synchronous>, transform_indices = @transform_8, window_bounds = array<i64: 1, 256>}, {pipeline_mode = #tpu.pipeline_mode<synchronous>, transform_indices = @transform_9, window_bounds = array<i64: 1, 256>}, {pipeline_mode = #tpu.pipeline_mode<synchronous>, transform_indices = @transform_10, window_bounds = array<i64: 256, 256>}, {pipeline_mode = #tpu.pipeline_mode<synchronous>, transform_indices = @transform_11, window_bounds = array<i64: 1, 256>}, {pipeline_mode = #tpu.pipeline_mode<synchronous>, transform_indices = @transform_12, window_bounds = array<i64: 1, 256>}, {pipeline_mode = #tpu.pipeline_mode<synchronous>, transform_indices = @transform_13, window_bounds = array<i64: 1, 256>}, {pipeline_mode = #tpu.pipeline_mode<synchronous>, transform_indices = @transform_14, window_bounds = array<i64: 1024, 512>}, {pipeline_mode = #tpu.pipeline_mode<synchronous>, transform_indices = @transform_15, window_bounds = array<i64: 1, 512>}, {pipeline_mode = #tpu.pipeline_mode<synchronous>, transform_indices = @transform_16, window_bounds = array<i64: 256, 256>}, {pipeline_mode = #tpu.pipeline_mode<synchronous>, transform_indices = @transform_17, window_bounds = array<i64: 1, 256>}, {pipeline_mode = #tpu.pipeline_mode<synchronous>, transform_indices = @transform_18, window_bounds = array<i64: 256, 256>}, {pipeline_mode = #tpu.pipeline_mode<synchronous>, transform_indices = @transform_19, window_bounds = array<i64: 1, 256>}, {pipeline_mode = #tpu.pipeline_mode<synchronous>, transform_indices = @transform_20, window_bounds = array<i64: 256, 2>}, {pipeline_mode = #tpu.pipeline_mode<synchronous>, transform_indices = @transform_21, window_bounds = array<i64: 1, 2>}, {pipeline_mode = #tpu.pipeline_mode<synchronous>, transform_indices = @transform_22, window_bounds = array<i64: 2, 4, 2>}, {pipeline_mode = #tpu.pipeline_mode<synchronous>, transform_indices = @transform_23, window_bounds = array<i64: 8, 256>}]} {
    %c0 = arith.constant 0 : index
    %c0_0 = arith.constant 0 : index
    %0 = vector.load %arg1[%c0, %c0_0] : memref<8x256xf32, #tpu.memory_space<vmem>>, vector<8x256xf32>
    %c0_1 = arith.constant 0 : index
    %c0_2 = arith.constant 0 : index
    %1 = vector.load %arg2[%c0_1, %c0_2] : memref<8x256xf32, #tpu.memory_space<vmem>>, vector<8x256xf32>
    %c0_3 = arith.constant 0 : index
    %c0_4 = arith.constant 0 : index
    %c0_5 = arith.constant 0 : index
    %2 = vector.load %arg3[%c0_3, %c0_4, %c0_5] : memref<2x4x2xf32, #tpu.memory_space<vmem>>, vector<2x4x2xf32>
    %c0_6 = arith.constant 0 : index
    %c0_7 = arith.constant 0 : index
    %3 = vector.load %arg5[%c0_6, %c0_7] : memref<256x256xf32, #tpu.memory_space<vmem>>, vector<256x256xf32>
    %cst = arith.constant dense<0.000000e+00> : vector<8x256xf32>
    %4 = tpu.matmul %0, %3, %cst {dimension_numbers = #tpu.dot_dimension_numbers<[1], [0], [0], [1], [0, 0, 1, 1], [], []>} : vector<8x256xf32>, vector<256x256xf32>, vector<8x256xf32> -> vector<8x256xf32>
    %c0_8 = arith.constant 0 : index
    %c0_9 = arith.constant 0 : index
    %5 = vector.load %arg6[%c0_8, %c0_9] : memref<1x256xf32, #tpu.memory_space<vmem>>, vector<1x256xf32>
    %6 = vector.broadcast %5 : vector<1x256xf32> to vector<8x256xf32>
    %7 = arith.addf %4, %6 : vector<8x256xf32>
    %c0_10 = arith.constant 0 : index
    %c0_11 = arith.constant 0 : index
    %8 = vector.load %arg7[%c0_10, %c0_11] : memref<256x256xf32, #tpu.memory_space<vmem>>, vector<256x256xf32>
    %cst_12 = arith.constant dense<0.000000e+00> : vector<8x256xf32>
    %9 = tpu.matmul %7, %8, %cst_12 {dimension_numbers = #tpu.dot_dimension_numbers<[1], [0], [0], [1], [0, 0, 1, 1], [], []>} : vector<8x256xf32>, vector<256x256xf32>, vector<8x256xf32> -> vector<8x256xf32>
    %c0_13 = arith.constant 0 : index
    %c0_14 = arith.constant 0 : index
    %10 = vector.load %arg8[%c0_13, %c0_14] : memref<1x256xf32, #tpu.memory_space<vmem>>, vector<1x256xf32>
    %11 = vector.broadcast %10 : vector<1x256xf32> to vector<8x256xf32>
    %12 = arith.addf %9, %11 : vector<8x256xf32>
    %13 = arith.addf %1, %12 : vector<8x256xf32>
    %c0_15 = arith.constant 0 : index
    %c0_16 = arith.constant 0 : index
    %14 = vector.load %arg9[%c0_15, %c0_16] : memref<1x256xf32, #tpu.memory_space<vmem>>, vector<1x256xf32>
    %c0_17 = arith.constant 0 : index
    %c0_18 = arith.constant 0 : index
    %15 = vector.load %arg10[%c0_17, %c0_18] : memref<1x256xf32, #tpu.memory_space<vmem>>, vector<1x256xf32>
    %cst_19 = arith.constant dense<0.000000e+00> : vector<8xf32>
    %16 = vector.multi_reduction <add>, %13, %cst_19 [1] : vector<8x256xf32> to vector<8xf32>
    %17 = vector.shape_cast %16 : vector<8xf32> to vector<8x1xf32>
    %cst_20 = arith.constant 2.560000e+02 : f32
    %18 = vector.broadcast %cst_20 : f32 to vector<8x1xf32>
    %19 = arith.divf %17, %18 : vector<8x1xf32>
    %20 = vector.broadcast %19 : vector<8x1xf32> to vector<8x256xf32>
    %21 = arith.subf %13, %20 : vector<8x256xf32>
    %22 = arith.mulf %21, %21 : vector<8x256xf32>
    %cst_21 = arith.constant dense<0.000000e+00> : vector<8xf32>
    %23 = vector.multi_reduction <add>, %22, %cst_21 [1] : vector<8x256xf32> to vector<8xf32>
    %24 = vector.shape_cast %23 : vector<8xf32> to vector<8x1xf32>
    %cst_22 = arith.constant 2.560000e+02 : f32
    %25 = vector.broadcast %cst_22 : f32 to vector<8x1xf32>
    %26 = arith.divf %24, %25 : vector<8x1xf32>
    %27 = vector.broadcast %19 : vector<8x1xf32> to vector<8x256xf32>
    %28 = arith.subf %13, %27 : vector<8x256xf32>
    %cst_23 = arith.constant 9.99999974E-6 : f32
    %29 = vector.broadcast %cst_23 : f32 to vector<8x1xf32>
    %30 = arith.addf %26, %29 : vector<8x1xf32>
    %31 = math.rsqrt %30 : vector<8x1xf32>
    %32 = vector.broadcast %31 : vector<8x1xf32> to vector<8x256xf32>
    %33 = arith.mulf %28, %32 : vector<8x256xf32>
    %34 = vector.broadcast %14 : vector<1x256xf32> to vector<8x256xf32>
    %35 = arith.mulf %33, %34 : vector<8x256xf32>
    %36 = vector.broadcast %15 : vector<1x256xf32> to vector<8x256xf32>
    %37 = arith.addf %35, %36 : vector<8x256xf32>
    %c0_24 = arith.constant 0 : index
    %c0_25 = arith.constant 0 : index
    %38 = vector.load %arg11[%c0_24, %c0_25] : memref<256x256xf32, #tpu.memory_space<vmem>>, vector<256x256xf32>
    %cst_26 = arith.constant dense<0.000000e+00> : vector<8x256xf32>
    %39 = tpu.matmul %37, %38, %cst_26 {dimension_numbers = #tpu.dot_dimension_numbers<[1], [0], [0], [1], [0, 0, 1, 1], [], []>} : vector<8x256xf32>, vector<256x256xf32>, vector<8x256xf32> -> vector<8x256xf32>
    %c0_27 = arith.constant 0 : index
    %c0_28 = arith.constant 0 : index
    %40 = vector.load %arg12[%c0_27, %c0_28] : memref<1x256xf32, #tpu.memory_space<vmem>>, vector<1x256xf32>
    %41 = vector.broadcast %40 : vector<1x256xf32> to vector<8x256xf32>
    %42 = arith.addf %39, %41 : vector<8x256xf32>
    %cst_29 = arith.constant 0.000000e+00 : f32
    %43 = vector.broadcast %cst_29 : f32 to vector<8x256xf32>
    %44 = arith.maximumf %42, %43 : vector<8x256xf32>
    %c0_30 = arith.constant 0 : index
    %c0_31 = arith.constant 0 : index
    %45 = vector.load %arg11[%c0_30, %c0_31] : memref<256x256xf32, #tpu.memory_space<vmem>>, vector<256x256xf32>
    %cst_32 = arith.constant dense<0.000000e+00> : vector<8x256xf32>
    %46 = tpu.matmul %44, %45, %cst_32 {dimension_numbers = #tpu.dot_dimension_numbers<[1], [0], [0], [1], [0, 0, 1, 1], [], []>} : vector<8x256xf32>, vector<256x256xf32>, vector<8x256xf32> -> vector<8x256xf32>
    %c0_33 = arith.constant 0 : index
    %c0_34 = arith.constant 0 : index
    %47 = vector.load %arg12[%c0_33, %c0_34] : memref<1x256xf32, #tpu.memory_space<vmem>>, vector<1x256xf32>
    %48 = vector.broadcast %47 : vector<1x256xf32> to vector<8x256xf32>
    %49 = arith.addf %46, %48 : vector<8x256xf32>
    %50 = arith.addf %37, %49 : vector<8x256xf32>
    %c0_35 = arith.constant 0 : index
    %c0_36 = arith.constant 0 : index
    %51 = vector.load %arg13[%c0_35, %c0_36] : memref<1x256xf32, #tpu.memory_space<vmem>>, vector<1x256xf32>
    %c0_37 = arith.constant 0 : index
    %c0_38 = arith.constant 0 : index
    %52 = vector.load %arg14[%c0_37, %c0_38] : memref<1x256xf32, #tpu.memory_space<vmem>>, vector<1x256xf32>
    %cst_39 = arith.constant dense<0.000000e+00> : vector<8xf32>
    %53 = vector.multi_reduction <add>, %50, %cst_39 [1] : vector<8x256xf32> to vector<8xf32>
    %54 = vector.shape_cast %53 : vector<8xf32> to vector<8x1xf32>
    %cst_40 = arith.constant 2.560000e+02 : f32
    %55 = vector.broadcast %cst_40 : f32 to vector<8x1xf32>
    %56 = arith.divf %54, %55 : vector<8x1xf32>
    %57 = vector.broadcast %56 : vector<8x1xf32> to vector<8x256xf32>
    %58 = arith.subf %50, %57 : vector<8x256xf32>
    %59 = arith.mulf %58, %58 : vector<8x256xf32>
    %cst_41 = arith.constant dense<0.000000e+00> : vector<8xf32>
    %60 = vector.multi_reduction <add>, %59, %cst_41 [1] : vector<8x256xf32> to vector<8xf32>
    %61 = vector.shape_cast %60 : vector<8xf32> to vector<8x1xf32>
    %cst_42 = arith.constant 2.560000e+02 : f32
    %62 = vector.broadcast %cst_42 : f32 to vector<8x1xf32>
    %63 = arith.divf %61, %62 : vector<8x1xf32>
    %64 = vector.broadcast %56 : vector<8x1xf32> to vector<8x256xf32>
    %65 = arith.subf %50, %64 : vector<8x256xf32>
    %cst_43 = arith.constant 9.99999974E-6 : f32
    %66 = vector.broadcast %cst_43 : f32 to vector<8x1xf32>
    %67 = arith.addf %63, %66 : vector<8x1xf32>
    %68 = math.rsqrt %67 : vector<8x1xf32>
    %69 = vector.broadcast %68 : vector<8x1xf32> to vector<8x256xf32>
    %70 = arith.mulf %65, %69 : vector<8x256xf32>
    %71 = vector.broadcast %51 : vector<1x256xf32> to vector<8x256xf32>
    %72 = arith.mulf %70, %71 : vector<8x256xf32>
    %73 = vector.broadcast %52 : vector<1x256xf32> to vector<8x256xf32>
    %74 = arith.addf %72, %73 : vector<8x256xf32>
    %c0_44 = arith.constant 0 : index
    %c0_45 = arith.constant 0 : index
    %75 = vector.load %arg24[%c0_44, %c0_45] : memref<8x256xf32, #tpu.memory_space<vmem>>, vector<8x256xf32>
    tpu.vector_store %arg24[%c0_44, %c0_45], %74 {strides = array<i32>} : memref<8x256xf32, #tpu.memory_space<vmem>>, vector<8x256xf32>,
    %c0_46 = arith.constant 0 : index
    %c0_47 = arith.constant 0 : index
    %76 = vector.load %arg4[%c0_46, %c0_47] : memref<2x1024xf32, #tpu.memory_space<vmem>>, vector<2x1024xf32>
    %77 = arith.negf %76 : vector<2x1024xf32>
    %78 = math.exp %77 : vector<2x1024xf32>
    %cst_48 = arith.constant 1.000000e+00 : f32
    %79 = vector.broadcast %cst_48 : f32 to vector<2x1024xf32>
    %80 = arith.addf %79, %78 : vector<2x1024xf32>
    %81 = arith.divf %79, %80 : vector<2x1024xf32>
    %82 = arith.mulf %76, %81 : vector<2x1024xf32>
    %c0_49 = arith.constant 0 : index
    %c0_50 = arith.constant 0 : index
    %83 = vector.load %arg15[%c0_49, %c0_50] : memref<1024x512xf32, #tpu.memory_space<vmem>>, vector<1024x512xf32>
    %cst_51 = arith.constant dense<0.000000e+00> : vector<2x512xf32>
    %84 = tpu.matmul %82, %83, %cst_51 {dimension_numbers = #tpu.dot_dimension_numbers<[1], [0], [0], [1], [0, 0, 1, 1], [], []>} : vector<2x1024xf32>, vector<1024x512xf32>, vector<2x512xf32> -> vector<2x512xf32>
    %c0_52 = arith.constant 0 : index
    %c0_53 = arith.constant 0 : index
    %85 = vector.load %arg16[%c0_52, %c0_53] : memref<1x512xf32, #tpu.memory_space<vmem>>, vector<1x512xf32>
    %86 = vector.broadcast %85 : vector<1x512xf32> to vector<2x512xf32>
    %87 = arith.addf %84, %86 : vector<2x512xf32>
    %88 = vector.extract_strided_slice %87 {offsets = [0, 0], sizes = [2, 256], strides = [1, 1]} : vector<2x512xf32> to vector<2x256xf32>
    %89 = vector.extract_strided_slice %87 {offsets = [0, 256], sizes = [2, 256], strides = [1, 1]} : vector<2x512xf32> to vector<2x256xf32>
    %90 = vector.shape_cast %74 : vector<8x256xf32> to vector<2x4x256xf32>
    %91 = vector.shape_cast %88 : vector<2x256xf32> to vector<2x1x256xf32>
    %cst_54 = arith.constant 1.000000e+00 : f32
    %92 = vector.broadcast %cst_54 : f32 to vector<2x1x256xf32>
    %93 = arith.addf %91, %92 : vector<2x1x256xf32>
    %94 = vector.broadcast %93 : vector<2x1x256xf32> to vector<2x4x256xf32>
    %95 = arith.mulf %90, %94 : vector<2x4x256xf32>
    %96 = vector.shape_cast %89 : vector<2x256xf32> to vector<2x1x256xf32>
    %97 = vector.broadcast %96 : vector<2x1x256xf32> to vector<2x4x256xf32>
    %98 = arith.addf %95, %97 : vector<2x4x256xf32>
    %99 = vector.shape_cast %98 : vector<2x4x256xf32> to vector<8x256xf32>
    %c0_55 = arith.constant 0 : index
    %c0_56 = arith.constant 0 : index
    %100 = vector.load %arg17[%c0_55, %c0_56] : memref<256x256xf32, #tpu.memory_space<vmem>>, vector<256x256xf32>
    %cst_57 = arith.constant dense<0.000000e+00> : vector<8x256xf32>
    %101 = tpu.matmul %99, %100, %cst_57 {dimension_numbers = #tpu.dot_dimension_numbers<[1], [0], [0], [1], [0, 0, 1, 1], [], []>} : vector<8x256xf32>, vector<256x256xf32>, vector<8x256xf32> -> vector<8x256xf32>
    %c0_58 = arith.constant 0 : index
    %c0_59 = arith.constant 0 : index
    %102 = vector.load %arg18[%c0_58, %c0_59] : memref<1x256xf32, #tpu.memory_space<vmem>>, vector<1x256xf32>
    %103 = vector.broadcast %102 : vector<1x256xf32> to vector<8x256xf32>
    %104 = arith.addf %101, %103 : vector<8x256xf32>
    %cst_60 = arith.constant 0.000000e+00 : f32
    %105 = vector.broadcast %cst_60 : f32 to vector<8x256xf32>
    %106 = arith.maximumf %104, %105 : vector<8x256xf32>
    %c0_61 = arith.constant 0 : index
    %c0_62 = arith.constant 0 : index
    %107 = vector.load %arg19[%c0_61, %c0_62] : memref<256x256xf32, #tpu.memory_space<vmem>>, vector<256x256xf32>
    %cst_63 = arith.constant dense<0.000000e+00> : vector<8x256xf32>
    %108 = tpu.matmul %106, %107, %cst_63 {dimension_numbers = #tpu.dot_dimension_numbers<[1], [0], [0], [1], [0, 0, 1, 1], [], []>} : vector<8x256xf32>, vector<256x256xf32>, vector<8x256xf32> -> vector<8x256xf32>
    %c0_64 = arith.constant 0 : index
    %c0_65 = arith.constant 0 : index
    %109 = vector.load %arg20[%c0_64, %c0_65] : memref<1x256xf32, #tpu.memory_space<vmem>>, vector<1x256xf32>
    %110 = vector.broadcast %109 : vector<1x256xf32> to vector<8x256xf32>
    %111 = arith.addf %108, %110 : vector<8x256xf32>
    %cst_66 = arith.constant 0.000000e+00 : f32
    %112 = vector.broadcast %cst_66 : f32 to vector<8x256xf32>
    %113 = arith.maximumf %111, %112 : vector<8x256xf32>
    %c0_67 = arith.constant 0 : index
    %c0_68 = arith.constant 0 : index
    %114 = vector.load %arg21[%c0_67, %c0_68] : memref<256x2xf32, #tpu.memory_space<vmem>>, vector<256x2xf32>
    %cst_69 = arith.constant dense<0.000000e+00> : vector<8x2xf32>
    %115 = tpu.matmul %113, %114, %cst_69 {dimension_numbers = #tpu.dot_dimension_numbers<[1], [0], [0], [1], [0, 0, 1, 1], [], []>} : vector<8x256xf32>, vector<256x2xf32>, vector<8x2xf32> -> vector<8x2xf32>
    %c0_70 = arith.constant 0 : index
    %c0_71 = arith.constant 0 : index
    %116 = vector.load %arg22[%c0_70, %c0_71] : memref<1x2xf32, #tpu.memory_space<vmem>>, vector<1x2xf32>
    %117 = vector.broadcast %116 : vector<1x2xf32> to vector<8x2xf32>
    %118 = arith.addf %115, %117 : vector<8x2xf32>
    %119 = vector.shape_cast %2 : vector<2x4x2xf32> to vector<8x2xf32>
    %120 = vector.extract_strided_slice %119 {offsets = [0, 1], sizes = [8, 1], strides = [1, 1]} : vector<8x2xf32> to vector<8x1xf32>
    %121 = vector.extract_strided_slice %119 {offsets = [0, 0], sizes = [8, 1], strides = [1, 1]} : vector<8x2xf32> to vector<8x1xf32>
    %122 = arith.subf %120, %121 : vector<8x1xf32>
    %123 = vector.extract_strided_slice %119 {offsets = [0, 0], sizes = [8, 1], strides = [1, 1]} : vector<8x2xf32> to vector<8x1xf32>
    %cst_72 = arith.constant 5.000000e-01 : f32
    %124 = vector.broadcast %cst_72 : f32 to vector<8x1xf32>
    %125 = arith.mulf %124, %122 : vector<8x1xf32>
    %126 = arith.addf %123, %125 : vector<8x1xf32>
    %127 = vector.extract_strided_slice %118 {offsets = [0, 0], sizes = [8, 1], strides = [1, 1]} : vector<8x2xf32> to vector<8x1xf32>
    %cst_73 = arith.constant 2.000000e+00 : f32
    %128 = vector.broadcast %cst_73 : f32 to vector<8x1xf32>
    %129 = arith.divf %127, %128 : vector<8x1xf32>
    %130 = vector.extract_strided_slice %118 {offsets = [0, 1], sizes = [8, 1], strides = [1, 1]} : vector<8x2xf32> to vector<8x1xf32>
    %cst_74 = arith.constant 1.000000e+00 : f32
    %131 = vector.broadcast %cst_74 : f32 to vector<8x1xf32>
    %132 = arith.divf %130, %131 : vector<8x1xf32>
    %cst_75 = arith.constant 5.000000e+00 : f32
    %133 = vector.broadcast %cst_75 : f32 to vector<8x1xf32>
    %134 = arith.minimumf %132, %133 : vector<8x1xf32>
    %135 = arith.addf %126, %129 : vector<8x1xf32>
    %136 = arith.addf %134, %122 : vector<8x1xf32>
    %137 = arith.negf %136 : vector<8x1xf32>
    %138 = math.exp %137 : vector<8x1xf32>
    %cst_76 = arith.constant 1.000000e+00 : f32
    %139 = vector.broadcast %cst_76 : f32 to vector<8x1xf32>
    %140 = arith.addf %139, %138 : vector<8x1xf32>
    %141 = arith.divf %139, %140 : vector<8x1xf32>
    %cst_77 = arith.constant 5.000000e-01 : f32
    %142 = vector.broadcast %cst_77 : f32 to vector<8x1xf32>
    %143 = arith.mulf %142, %141 : vector<8x1xf32>
    %144 = arith.subf %135, %143 : vector<8x1xf32>
    %cst_78 = arith.constant 5.000000e-01 : f32
    %145 = vector.broadcast %cst_78 : f32 to vector<8x1xf32>
    %146 = arith.mulf %145, %141 : vector<8x1xf32>
    %147 = arith.addf %135, %146 : vector<8x1xf32>
    %148 = tpu.concatenate %144, %147 in 1 : vector<8x1xf32>, vector<8x1xf32> -> vector<8x2xf32>
    %149 = vector.shape_cast %148 : vector<8x2xf32> to vector<2x4x2xf32>
    %c0_79 = arith.constant 0 : index
    %c0_80 = arith.constant 0 : index
    %c0_81 = arith.constant 0 : index
    %150 = vector.load %arg23[%c0_79, %c0_80, %c0_81] : memref<2x4x2xf32, #tpu.memory_space<vmem>>, vector<2x4x2xf32>
    tpu.vector_store %arg23[%c0_79, %c0_80, %c0_81], %149 {strides = array<i32>} : memref<2x4x2xf32, #tpu.memory_space<vmem>>, vector<2x4x2xf32>,
    return
  }
  func.func @transform_0(%arg0: i32) -> (i32, i32) {
    %c0_i32 = arith.constant 0 : i32
    %c0_i32_0 = arith.constant 0 : i32
    %c0_i32_1 = arith.constant 0 : i32
    return %c0_i32, %c0_i32_0 : i32, i32
  }
  func.func @transform_1(%arg0: i32) -> (i32, i32) {
    %c0_i32 = arith.constant 0 : i32
    %c0_i32_0 = arith.constant 0 : i32
    %c0_i32_1 = arith.constant 0 : i32
    return %c0_i32, %c0_i32_0 : i32, i32
  }
  func.func @transform_2(%arg0: i32) -> (i32, i32, i32) {
    %c0_i32 = arith.constant 0 : i32
    %c0_i32_0 = arith.constant 0 : i32
    %c0_i32_1 = arith.constant 0 : i32
    %c0_i32_2 = arith.constant 0 : i32
    return %c0_i32, %c0_i32_0, %c0_i32_1 : i32, i32, i32
  }
  func.func @transform_3(%arg0: i32) -> (i32, i32) {
    %c0_i32 = arith.constant 0 : i32
    %c0_i32_0 = arith.constant 0 : i32
    %c0_i32_1 = arith.constant 0 : i32
    return %c0_i32, %c0_i32_0 : i32, i32
  }
  func.func @transform_4(%arg0: i32) -> (i32, i32) {
    %c0_i32 = arith.constant 0 : i32
    %c0_i32_0 = arith.constant 0 : i32
    %c0_i32_1 = arith.constant 0 : i32
    return %c0_i32, %c0_i32_0 : i32, i32
  }
  func.func @transform_5(%arg0: i32) -> (i32, i32) {
    %c0_i32 = arith.constant 0 : i32
    %c0_i32_0 = arith.constant 0 : i32
    %c0_i32_1 = arith.constant 0 : i32
    return %c0_i32, %c0_i32_0 : i32, i32
  }
  func.func @transform_6(%arg0: i32) -> (i32, i32) {
    %c0_i32 = arith.constant 0 : i32
    %c0_i32_0 = arith.constant 0 : i32
    %c0_i32_1 = arith.constant 0 : i32
    return %c0_i32, %c0_i32_0 : i32, i32
  }
  func.func @transform_7(%arg0: i32) -> (i32, i32) {
    %c0_i32 = arith.constant 0 : i32
    %c0_i32_0 = arith.constant 0 : i32
    %c0_i32_1 = arith.constant 0 : i32
    return %c0_i32, %c0_i32_0 : i32, i32
  }
  func.func @transform_8(%arg0: i32) -> (i32, i32) {
    %c0_i32 = arith.constant 0 : i32
    %c0_i32_0 = arith.constant 0 : i32
    %c0_i32_1 = arith.constant 0 : i32
    return %c0_i32, %c0_i32_0 : i32, i32
  }
  func.func @transform_9(%arg0: i32) -> (i32, i32) {
    %c0_i32 = arith.constant 0 : i32
    %c0_i32_0 = arith.constant 0 : i32
    %c0_i32_1 = arith.constant 0 : i32
    return %c0_i32, %c0_i32_0 : i32, i32
  }
  func.func @transform_10(%arg0: i32) -> (i32, i32) {
    %c0_i32 = arith.constant 0 : i32
    %c0_i32_0 = arith.constant 0 : i32
    %c0_i32_1 = arith.constant 0 : i32
    return %c0_i32, %c0_i32_0 : i32, i32
  }
  func.func @transform_11(%arg0: i32) -> (i32, i32) {
    %c0_i32 = arith.constant 0 : i32
    %c0_i32_0 = arith.constant 0 : i32
    %c0_i32_1 = arith.constant 0 : i32
    return %c0_i32, %c0_i32_0 : i32, i32
  }
  func.func @transform_12(%arg0: i32) -> (i32, i32) {
    %c0_i32 = arith.constant 0 : i32
    %c0_i32_0 = arith.constant 0 : i32
    %c0_i32_1 = arith.constant 0 : i32
    return %c0_i32, %c0_i32_0 : i32, i32
  }
  func.func @transform_13(%arg0: i32) -> (i32, i32) {
    %c0_i32 = arith.constant 0 : i32
    %c0_i32_0 = arith.constant 0 : i32
    %c0_i32_1 = arith.constant 0 : i32
    return %c0_i32, %c0_i32_0 : i32, i32
  }
  func.func @transform_14(%arg0: i32) -> (i32, i32) {
    %c0_i32 = arith.constant 0 : i32
    %c0_i32_0 = arith.constant 0 : i32
    %c0_i32_1 = arith.constant 0 : i32
    return %c0_i32, %c0_i32_0 : i32, i32
  }
  func.func @transform_15(%arg0: i32) -> (i32, i32) {
    %c0_i32 = arith.constant 0 : i32
    %c0_i32_0 = arith.constant 0 : i32
    %c0_i32_1 = arith.constant 0 : i32
    return %c0_i32, %c0_i32_0 : i32, i32
  }
  func.func @transform_16(%arg0: i32) -> (i32, i32) {
    %c0_i32 = arith.constant 0 : i32
    %c0_i32_0 = arith.constant 0 : i32
    %c0_i32_1 = arith.constant 0 : i32
    return %c0_i32, %c0_i32_0 : i32, i32
  }
  func.func @transform_17(%arg0: i32) -> (i32, i32) {
    %c0_i32 = arith.constant 0 : i32
    %c0_i32_0 = arith.constant 0 : i32
    %c0_i32_1 = arith.constant 0 : i32
    return %c0_i32, %c0_i32_0 : i32, i32
  }
  func.func @transform_18(%arg0: i32) -> (i32, i32) {
    %c0_i32 = arith.constant 0 : i32
    %c0_i32_0 = arith.constant 0 : i32
    %c0_i32_1 = arith.constant 0 : i32
    return %c0_i32, %c0_i32_0 : i32, i32
  }
  func.func @transform_19(%arg0: i32) -> (i32, i32) {
    %c0_i32 = arith.constant 0 : i32
    %c0_i32_0 = arith.constant 0 : i32
    %c0_i32_1 = arith.constant 0 : i32
    return %c0_i32, %c0_i32_0 : i32, i32
  }
  func.func @transform_20(%arg0: i32) -> (i32, i32) {
    %c0_i32 = arith.constant 0 : i32
    %c0_i32_0 = arith.constant 0 : i32
    %c0_i32_1 = arith.constant 0 : i32
    return %c0_i32, %c0_i32_0 : i32, i32
  }
  func.func @transform_21(%arg0: i32) -> (i32, i32) {
    %c0_i32 = arith.constant 0 : i32
    %c0_i32_0 = arith.constant 0 : i32
    %c0_i32_1 = arith.constant 0 : i32
    return %c0_i32, %c0_i32_0 : i32, i32
  }
  func.func @transform_22(%arg0: i32) -> (i32, i32, i32) {
    %c0_i32 = arith.constant 0 : i32
    %c0_i32_0 = arith.constant 0 : i32
    %c0_i32_1 = arith.constant 0 : i32
    %c0_i32_2 = arith.constant 0 : i32
    return %c0_i32, %c0_i32_0, %c0_i32_1 : i32, i32, i32
  }
  func.func @transform_23(%arg0: i32) -> (i32, i32) {
    %c0_i32 = arith.constant 0 : i32
    %c0_i32_0 = arith.constant 0 : i32
    %c0_i32_1 = arith.constant 0 : i32
    return %c0_i32, %c0_i32_0 : i32, i32
  }
}

</mosaic_0001>

<bundles_post_ra>
// kernel: span_refining_decoder_forward.4
= control target key start
LH: loop header
LB: loop body
LE: loop exit
PB: predicated region body
PF: predicated region fallthrough
CT: control target
= control target key end

     0   :  { %v740_v3 = vmov 0   ;;  %s741_s26 = smov 1   ;;  %vm247_vm8 = vcmask 130112   ;;  %vm251_vm9 = vcmask 195712   ;;  %vm255_vm10 = vcmask 261312   ;;  %s1321_s0 = inlined_call_operand.vmem [shape: f32[2,64,256], index: 0, kind: input, shape index: {}]   ;;  %s1322_s2 = inlined_call_operand.vmem [shape: f32[1,256], index: 2, kind: input, shape index: {}]   ;;  %s1323_s1 = inlined_call_operand.vmem [shape: f32[2,4,2], index: 1, kind: input, shape index: {}]   ;;  %s1324_s3 = inlined_call_operand.<no memory space> [shape: f32[1,1], index: 3, kind: input, shape index: {}]   ;;  %s1325_s4 = inlined_call_operand.vmem [shape: f32[2,256], index: 4, kind: input, shape index: {}]   ;;  %s1326_s5 = inlined_call_operand.vmem [shape: f32[1,256], index: 5, kind: input, shape index: {}]   ;;  %s1327_s6 = inlined_call_operand.vmem [shape: f32[256,256], index: 6, kind: input, shape index: {}]   ;;  %s1328_s7 = inlined_call_operand.vmem [shape: f32[1,256], index: 7, kind: input, shape index: {}]   ;;  %s1329_s8 = inlined_call_operand.vmem [shape: f32[8,256], index: 8, kind: output, shape index: {}]  }
   0x1   :  { %v792_v0 = vld [vmem:[%s1321_s0 + $0xa0] sm:$0xff]  ;;  %v797_v1 = vld [vmem:[%s1321_s0 + $0xa8] sm:$0xff]  ;;  %723 = vset.pattern.permute.xlu2 %v740_v3  ;;  %v13_v4 = vstv %s1324_s3  ;;  %724 = vset.pattern.permute.xlu0 %v740_v3  ;;  %v843_v16 = vld [vmem:[%s1321_s0 + $0x90] sm:$0xff]  ;;  %vm259_vm11 = vcmask 326912   ;;  %vm263_vm12 = vcmask 392512   ;;  %vm267_vm15 = vcmask 458112  }
   0x2   :  { %v65_v2 = vld [vmem:[%s1322_s2] sm:$0x3]  ;;  %v819_v8 = vld [vmem:[%s1321_s0 + $0x88] sm:$0xff]  ;;  %v824_v9 = vld [vmem:[%s1323_s1 + $0x4] sm:$0xf] }
   0x3   :  { %v807_v5 = vperm.slane %v65_v2, 0  ;;  %v809_v6 = vperm.slane %v65_v2, 1  ;;  %v814_v7 = vld [vmem:[%s1321_s0 + $0x80] sm:$0xff]  ;;  %v175_v10 = vmul.f32 64.0, %v824_v9  ;;  %14 = vst [vmem:[#allocation2] sm:$0x1] %v13_v4 }
   0x4   :  { %v830_v11 = vld [vmem:[%s1323_s1] sm:$0xf]  ;;  %v848_v19 = vld [vmem:[%s1321_s0 + $0x98] sm:$0xff]  ;;  %v56_v35 = vld [vmem:[%s1321_s0 + $0xc8] sm:$0xff] }
   0x5   :  { %v91_v12 = vmul.f32 %v807_v5, %v792_v0  ;;  %v92_v13 = vmul.f32 %v809_v6, %v797_v1  ;;  %v87_v14 = vmul.f32 %v807_v5, %v814_v7  ;;  %v88_v15 = vmul.f32 %v809_v6, %v819_v8  ;;  %v55_v34 = vld [vmem:[%s1321_s0 + $0xc0] sm:$0xff]  ;;  %v57_v41 = vld [vmem:[%s1321_s0 + $0xd0] sm:$0xff]  ;;  %v58_v42 = vld [vmem:[%s1321_s0 + $0xd8] sm:$0xff] }
   0x6   :  { %vm714_vm0 = vcmp.lt.s32.totalorder %v175_v10, 0  ;;  %v715_v17 = vceil.f32 %v175_v10  ;;  %v716_v18 = vfloor.f32 %v175_v10  ;;  %v174_v22 = vmul.f32 64.0, %v830_v11  ;;  %v59_v47 = vld [vmem:[%s1321_s0 + $0xe0] sm:$0xff]  ;;  %v60_v48 = vld [vmem:[%s1321_s0 + $0xe8] sm:$0xff]  ;;  %v61_v51 = vld [vmem:[%s1321_s0 + $0xf0] sm:$0xff] }
   0x7   :  { %v133_v20 = vadd.f32 %v92_v13, %v91_v12  ;;  %v127_v21 = vadd.f32 %v88_v15, %v87_v14  ;;  %v89_v24 = vmul.f32 %v807_v5, %v843_v16  ;;  %v90_v26 = vmul.f32 %v809_v6, %v848_v19  ;;  %v62_v52 = vld [vmem:[%s1321_s0 + $0xf8] sm:$0xff]  ;;  %402 = vmatpush.msra.mxu2 %v61_v51  ;;  %v894_v54 = vld [vmem:[%s1321_s0] sm:$0xff]  ;;  %v899_v55 = vld [vmem:[%s1321_s0 + $0x8] sm:$0xff] }
   0x8   :  { %v717_v23 = vsel %vm714_vm0, %v715_v17, %v716_v18  ;;  %vm709_vm1 = vcmp.lt.s32.totalorder %v174_v22, 0  ;;  %v710_v27 = vceil.f32 %v174_v22  ;;  %v711_v28 = vfloor.f32 %v174_v22  ;;  %422 = vmatpush.msra.mxu3 %v62_v52  ;;  %v53_v58 = vld [vmem:[%s1321_s0 + $0xb0] sm:$0xff]  ;;  %v54_v59 = vld [vmem:[%s1321_s0 + $0xb8] sm:$0xff]  ;;  %v35_v2 = vld [vmem:[%s1321_s0 + $0x20] sm:$0xff] }
   0x9   :  { %134 = vadd.xlane.f32.xlu2 %v133_v20  ;;  %128 = vadd.xlane.f32.xlu1 %v127_v21  ;;  %v718_v25 = vcvt.f32.s32 %v717_v23  ;;  %v130_v31 = vadd.f32 %v90_v26, %v89_v24  ;;  %v95_v37 = vmul.f32 %v807_v5, %v55_v34  ;;  %v96_v38 = vmul.f32 %v809_v6, %v56_v35  ;;  %v33_v61 = vld [vmem:[%s1321_s0 + $0x10] sm:$0xff]  ;;  %v34_v62 = vld [vmem:[%s1321_s0 + $0x18] sm:$0xff]  ;;  %v36_v4 = vld [vmem:[%s1321_s0 + $0x28] sm:$0xff] }
   0xa   :  { %v712_v30 = vsel %vm709_vm1, %v710_v27, %v711_v28  ;;  %v97_v43 = vmul.f32 %v807_v5, %v57_v41  ;;  %v98_v44 = vmul.f32 %v809_v6, %v58_v42  ;;  %v731_v45 = vld [vmem:[#allocation2] ss:$0 sm:$0xff]  ;;  %v99_v49 = vmul.f32 %v807_v5, %v59_v47  ;;  %403 = vmatpush.msra.mxu2 %v59_v47  ;;  %v39_v21 = vld [vmem:[%s1321_s0 + $0x40] sm:$0xff] }
   0xb   :  { %vm180_vm2 = vcmp.gt.s32.totalorder %v718_v25, 0  ;;  %v713_v32 = vcvt.f32.s32 %v712_v30  ;;  %v139_v40 = vadd.f32 %v96_v38, %v95_v37  ;;  %v100_v50 = vmul.f32 %v809_v6, %v60_v48  ;;  %423 = vmatpush.msra.mxu3 %v60_v48  ;;  %v40_v22 = vld [vmem:[%s1321_s0 + $0x48] sm:$0xff] }
   0xc   :  { %v181_v29 = vsel %vm180_vm2, %v718_v25, 0  ;;  %v142_v46 = vadd.f32 %v98_v44, %v97_v43  ;;  %404 = vmatpush.msra.mxu2 %v57_v41  ;;  %v71_v56 = vmul.f32 %v807_v5, %v894_v54  ;;  %v72_v57 = vmul.f32 %v809_v6, %v899_v55  ;;  %v44_v30 = vld [vmem:[%s1321_s0 + $0x68] sm:$0xff] }
   0xd   :  { %vm184_vm3 = vcmp.lt.s32.totalorder %v181_v29, 63  ;;  %vm178_vm4 = vcmp.gt.s32.totalorder %v713_v32, 0  ;;  %v145_v53 = vadd.f32 %v100_v50, %v99_v49  ;;  %424 = vmatpush.msra.mxu3 %v58_v42  ;;  %v73_v63 = vmul.f32 %v807_v5, %v33_v61 }
   0xe   :  { %v855_v33 = vsel %vm184_vm3, %v181_v29, 63  ;;  %v179_v36 = vsel %vm178_vm4, %v713_v32, 0  ;;  %405 = vmatpush.msra.mxu2 %v55_v34  ;;  %v103_v60 = vadd.f32 %v72_v57, %v71_v56  ;;  %v742_v10 = vmov 1   ;;  %v43_v29 = vld [vmem:[%s1321_s0 + $0x60] sm:$0xff]  ;;  %v42_v32 = vld [vmem:[%s1321_s0 + $0x58] sm:$0xff]  ;;  %v37_v34 = vld [vmem:[%s1321_s0 + $0x30] sm:$0xff] }
   0xf   :  { %210 = vrot.lane.b32.xlu0 %v855_v33, %s741_s26  ;;  %vm182_vm5 = vcmp.lt.s32.totalorder %v179_v36, 63  ;;  %425 = vmatpush.msra.mxu3 %v56_v35  ;;  %v93_v12 = vmul.f32 %v807_v5, %v53_v58  ;;  %v94_v13 = vmul.f32 %v809_v6, %v54_v59  ;;  %v75_v14 = vmul.f32 %v807_v5, %v35_v2  ;;  %v38_v35 = vld [vmem:[%s1321_s0 + $0x38] sm:$0xff] }
  0x10   :  { %v866_v39 = vsel %vm182_vm5, %v179_v36, 63  ;;  %406 = vmatpush.msra.mxu2 %v53_v58  ;;  %725 = vset.pattern.permute.xlu1 %v742_v10  ;;  %v76_v15 = vmul.f32 %v809_v6, %v36_v4  ;;  %v101_v18 = vmul.f32 %v807_v5, %v61_v51  ;;  %v79_v23 = vmul.f32 %v807_v5, %v39_v21 }
  0x11   :  { %131 = vadd.xlane.f32.xlu1 %v130_v31  ;;  %426 = vmatpush.msra.mxu3 %v54_v59  ;;  %v80_v24 = vmul.f32 %v809_v6, %v40_v22  ;;  %v41_v31 = vld [vmem:[%s1321_s0 + $0x50] sm:$0xff]  ;;  %v82_v37 = vmul.f32 %v809_v6, %v42_v32  ;;  %v77_v41 = vmul.f32 %v807_v5, %v37_v34  ;;  %vm271_vm0 = vcmask 523712  }
  0x12   :  { %407 = vmatpush.msra.mxu2 %v792_v0  ;;  %v74_v0 = vmul.f32 %v809_v6, %v34_v62  ;;  %v109_v17 = vadd.f32 %v76_v15, %v75_v14  ;;  %v81_v36 = vmul.f32 %v807_v5, %v41_v31  ;;  %v78_v42 = vmul.f32 %v809_v6, %v38_v35 }
  0x13   :  { %427 = vmatpush.msra.mxu3 %v797_v1  ;;  %v115_v25 = vadd.f32 %v80_v24, %v79_v23  ;;  %v83_v47 = vmul.f32 %v807_v5, %v43_v29  ;;  %v84_v48 = vmul.f32 %v809_v6, %v44_v30  ;;  %vm298_vm5 = vcmask 519168  }
  0x14   :  { %408 = vmatpush.msra.mxu2 %v843_v16  ;;  %v106_v1 = vadd.f32 %v74_v0, %v73_v63  ;;  %v136_v16 = vadd.f32 %v94_v13, %v93_v12  ;;  %v118_v38 = vadd.f32 %v82_v37, %v81_v36  ;;  %v112_v43 = vadd.f32 %v78_v42, %v77_v41 }
  0x15   :  { %428 = vmatpush.msra.mxu3 %v848_v19  ;;  %v102_v19 = vmul.f32 %v809_v6, %v62_v52  ;;  %v121_v49 = vadd.f32 %v84_v48, %v83_v47 }
  0x16   :  { %409 = vmatpush.msra.mxu2 %v814_v7  ;;  %v45_v7 = vld [vmem:[%s1321_s0 + $0x70] sm:$0xff] }
  0x17   :  { %208 = vrot.lane.b32.xlu0 %v866_v39, %s741_s26  ;;  %429 = vmatpush.msra.mxu3 %v819_v8  ;;  %v46_v8 = vld [vmem:[%s1321_s0 + $0x78] sm:$0xff]  ;;  %v148_v20 = vadd.f32 %v102_v19, %v101_v18  ;;  %v85_v26 = vmul.f32 %v807_v5, %v45_v7  ;;  %v186_v5 = vlaneseq }
  0x18   :  { %359 = vmatpush.msra.mxu0 %v45_v7  ;;  %379 = vmatpush.msra.mxu1 %v46_v8  ;;  %v86_v27 = vmul.f32 %v809_v6, %v46_v8 }
  0x19   :  { %140 = vadd.xlane.f32.xlu1 %v139_v40  ;;  %v992_v6 = vand.u32 127, %v186_v5 }
  0x1a   :  { %v124_v28 = vadd.f32 %v86_v27, %v85_v26  ;;  %360 = vmatpush.msra.mxu0 %v43_v29  ;;  %380 = vmatpush.msra.mxu1 %v44_v30 }
  0x1b   :  { %v245_v59 = vadd.s32 4294967288, %v992_v6  ;;  %v249_v7 = vadd.s32 4294967280, %v992_v6  ;;  %v253_v13 = vadd.s32 4294967272, %v992_v6  ;;  %v257_v19 = vadd.s32 4294967264, %v992_v6 }
  0x1c   :  { %361 = vmatpush.msra.mxu0 %v41_v31  ;;  %381 = vmatpush.msra.mxu1 %v42_v32  ;;  %v261_v23 = vadd.s32 4294967256, %v992_v6  ;;  %v269_v27 = vadd.s32 4294967240, %v992_v6  ;;  %v265_v31 = vadd.s32 4294967248, %v992_v6 }
  0x1e   :  { %362 = vmatpush.msra.mxu0 %v39_v21  ;;  %382 = vmatpush.msra.mxu1 %v40_v22 }
  0x20   :  { %363 = vmatpush.msra.mxu0 %v37_v34  ;;  %383 = vmatpush.msra.mxu1 %v38_v35 }
  0x21   :  { %155 = vperm.xlu2 %723, %v731_v45   ;;  %143 = vadd.xlane.f32.xlu1 %v142_v46 }
  0x22   :  { %364 = vmatpush.msra.mxu0 %v35_v2  ;;  %384 = vmatpush.msra.mxu1 %v36_v4 }
  0x24   :  { %365 = vmatpush.msra.mxu0 %v33_v61  ;;  %385 = vmatpush.msra.mxu1 %v34_v62 }
  0x26   :  { %366 = vmatpush.msra.mxu0 %v894_v54  ;;  %386 = vmatpush.msra.mxu1 %v899_v55 }
  0x29   :  { %146 = vadd.xlane.f32.xlu1 %v145_v53  ;;  %726 = vset.pattern.permute.xlu2 %v742_v10 }
  0x31   :  { %104 = vadd.xlane.f32.xlu1 %v103_v60 }
  0x39   :  { %107 = vadd.xlane.f32.xlu1 %v106_v1 }
  0x41   :  { %137 = vadd.xlane.f32.xlu0 %v136_v16  ;;  %110 = vadd.xlane.f32.xlu1 %v109_v17 }
  0x4a   :  { %149 = vadd.xlane.f32.xlu2 %v148_v20 }
  0x52   :  { %116 = vadd.xlane.f32.xlu2 %v115_v25 }
  0x55   :  { %192 = vperm.xlu0 %724, %v855_v33  }
  0x5a   :  { %125 = vadd.xlane.f32.xlu2 %v124_v28  ;;  %200 = vperm.xlu1 %725, %v855_v33  }
  0x5d   :  { %728 = vset.pattern.permute.xlu0 %v742_v10 }
  0x62   :  { %727 = vset.pattern.permute.xlu1 %v740_v3 }
  0x7c   :  { %v129_v40 = vpop.xlane.xlu1 %128  ;;  %v135_v54 = vpop.xlane.xlu2 %134 }
  0x7f   :  { %119 = vadd.xlane.f32.xlu0 %v118_v38 }
  0x81   :  { %v211_v44 = vpop.permute.xlu0 %210 }
  0x82   :  { %vm213_vm6 = vcmp.eq.s32.totalorder %v855_v33, %v211_v44 }
  0x83   :  { %v215_v45 = vsel %vm213_vm6, 1, %v740_v3 }
  0x84   :  { %220 = vperm.xlu2 %726, %v215_v45   ;;  %v132_v46 = vpop.xlane.xlu1 %131  ;;  %113 = vadd.xlane.f32.xlu1 %v112_v43  ;;  %v994_v56 = vpop.permute.xlu2 %155 }
  0x85   :  { %v167_v0 = vadd.f32 %v994_v56, %v132_v46  ;;  %v168_v4 = vadd.f32 %v994_v56, %v135_v54 }
  0x87   :  { %v274_v12 = vperm.slane %v167_v0, %v245_v59  ;;  %v276_v16 = vperm.slane %v168_v4, %v249_v7 }
  0x89   :  { %v209_v50 = vpop.permute.xlu0 %208 }
  0x8a   :  { %vm212_vm7 = vcmp.eq.s32.totalorder %v866_v39, %v209_v50 }
  0x8b   :  { %v214_v51 = vsel %vm212_vm7, 1, %v740_v3 }
  0x8c   :  { %v141_v52 = vpop.xlane.xlu1 %140  ;;  %122 = vadd.xlane.f32.xlu1 %v121_v49  ;;  %217 = vperm.xlu2 %726, %v214_v51  }
  0x8d   :  { %v170_v20 = vadd.f32 %v994_v56, %v141_v52 }
  0x8f   :  { %v280_v26 = vperm.slane %v170_v20, %v257_v19  ;;  %v743_v20 = vmov 839922192  }
  0x93   :  { %197 = vperm.xlu0 %728, %v866_v39  }
  0x94   :  { %v144_v33 = vpop.xlane.xlu1 %143  ;;  %729 = vset.pattern.permute.xlu2 %v740_v3 }
  0x95   :  { %v171_v24 = vadd.f32 %v994_v56, %v144_v33 }
  0x97   :  { %v282_v35 = vperm.slane %v171_v24, %v261_v23 }
  0x9c   :  { %v147_v53 = vpop.xlane.xlu1 %146 }
  0x9d   :  { %v172_v32 = vadd.f32 %v994_v56, %v147_v53 }
  0x9f   :  { %v284_v38 = vperm.slane %v172_v32, %v265_v31 }
  0xa4   :  { %v105_v55 = vpop.xlane.xlu1 %104 }
  0xa5   :  { %189 = vperm.xlu1 %727, %v866_v39   ;;  %v158_v57 = vadd.f32 %v994_v56, %v105_v55  ;;  %v166_v39 = vadd.f32 %v994_v56, %v129_v40 }
  0xa7   :  { %v244_v61 = vperm.slane %v158_v57, %v992_v6  ;;  %v273_v8 = vperm.slane %v166_v39, %v992_v6 }
  0xa9   :  { %v275_v17 = vsel %vm247_vm8, %v274_v12, %v273_v8 }
  0xaa   :  { %v277_v21 = vsel %vm251_vm9, %v276_v16, %v275_v17 }
  0xac   :  { %v108_v58 = vpop.xlane.xlu1 %107 }
  0xad   :  { %v159_v60 = vadd.f32 %v994_v56, %v108_v58 }
  0xaf   :  { %v246_v3 = vperm.slane %v159_v60, %v245_v59 }
  0xb1   :  { %v1000_v62 = vsel %vm247_vm8, %v246_v3, %v244_v61 }
  0xb4   :  { %v138_v1 = vpop.xlane.xlu0 %137  ;;  %v111_v15 = vpop.xlane.xlu1 %110 }
  0xb5   :  { %v169_v14 = vadd.f32 %v994_v56, %v138_v1  ;;  %v160_v45 = vadd.f32 %v994_v56, %v111_v15 }
  0xb7   :  { %v278_v18 = vperm.slane %v169_v14, %v253_v13  ;;  %v250_v46 = vperm.slane %v160_v45, %v249_v7 }
  0xb9   :  { %v279_v25 = vsel %vm255_vm10, %v278_v18, %v277_v21  ;;  %v252_v52 = vsel %vm251_vm9, %v250_v46, %v1000_v62  ;;  %v1057_v18 = vld [vmem:[%s1325_s4] ss:$2 sm:$0x3]  ;;  %v441_v21 = vunpack.c.l.s4 %v743_v20  ;;  %v561_v20 = vld [vmem:[%s1327_s6 + $0x198] sm:$0xff] }
  0xba   :  { %v281_v34 = vsel %vm259_vm11, %v280_v26, %v279_v25 }
  0xbb   :  { %v283_v37 = vsel %vm263_vm12, %v282_v35, %v281_v34 }
  0xbc   :  { %v285_v41 = vsel %vm267_vm15, %v284_v38, %v283_v37 }
  0xbd   :  { %v150_v63 = vpop.xlane.xlu2 %149 }
  0xbe   :  { %v173_v28 = vadd.f32 %v994_v56, %v150_v63 }
  0xc0   :  { %v286_v36 = vperm.slane %v173_v28, %v269_v27  ;;  %v1071_v28 = vld [vmem:[%s1326_s5] sm:$0x3] }
  0xc1   :  { %v499_v38 = vperm.slane %v1071_v28, 1  ;;  %v498_v46 = vperm.slane %v1071_v28, 0 }
  0xc2   :  { %v287_v42 = vsel %vm271_vm0, %v286_v36, %v285_v41 }
  0xc5   :  { %v117_v2 = vpop.xlane.xlu2 %116 }
  0xc6   :  { %v162_v47 = vadd.f32 %v994_v56, %v117_v2 }
  0xc7   :  { %v193_v29 = vpop.permute.xlu0 %192 }
  0xc8   :  { %vm195_vm13 = vcmp.ge.s32.totalorder %v992_v6, %v193_v29  ;;  %vm207_vm1 = vcmp.eq.s32.totalorder %v992_v6, %v193_v29  ;;  %v258_v33 = vperm.slane %v162_v47, %v257_v19  ;;  %v1090_v47 = vrot.slane %v499_v38, 4  ;;  %v523_v38 = vld [vmem:[%s1327_s6 + $0x68] sm:$0xff] }
  0xcc   :  { %v201_v30 = vpop.permute.xlu1 %200 }
  0xcd   :  { %v126_v22 = vpop.xlane.xlu2 %125  ;;  %vm203_vm14 = vcmp.lt.s32.totalorder %v992_v6, %v201_v30  ;;  %v454_v30 = vperm.slane %v1057_v18, 0 }
  0xce   :  { %vm205_vm2 = vmand %vm195_vm13, %vm203_vm14  ;;  %v165_v5 = vadd.f32 %v994_v56, %v126_v22  ;;  %v1062_v22 = vld [vmem:[%s1325_s4 + $0x1] ss:$2 sm:$0x3] }
  0xcf   :  { %v485_v25 = vperm.slane %v1062_v22, 1  ;;  %v484_v36 = vperm.slane %v1062_v22, 0 }
  0xd0   :  { %v270_v61 = vperm.slane %v165_v5, %v269_v27  ;;  %v1066_v27 = vunpack.c.0.s8 %v441_v21  ;;  %v572_v5 = vld [vmem:[%s1327_s6 + $0x1f0] sm:$0xff]  ;;  %v526_v21 = vld [vmem:[%s1327_s6 + $0x80] sm:$0xff] }
  0xd1   :  { %v1077_v37 = vrot.slane %v485_v25, 4  ;;  %609 = vmatpush.msrb.mxu1 %v572_v5  ;;  %v524_v25 = vld [vmem:[%s1327_s6 + $0x70] sm:$0xff]  ;;  %v546_v5 = vld [vmem:[%s1327_s6 + $0x120] sm:$0xff] }
  0xde   :  { %v221_v40 = vpop.permute.xlu2 %220 }
  0xdf   :  { %vm223_vm3 = vcmp.eq.s32.totalorder %v221_v40, 1 }
  0xe0   :  { %vm225_vm4 = vmand %vm207_vm1, %vm223_vm3  ;;  %vm347_vm3 = vcmask 523264  }
  0xe1   :  { %vm227_vm6 = vmor %vm205_vm2, %vm225_vm4 }
  0xe2   :  { %v297_v43 = vsel %vm227_vm6, %v287_v42, -1e+30 }
  0xe3   :  { %v302_v44 = vsel %vm298_vm5, %v297_v43, -inf }
  0xe4   :  { %303 = vmax.xlane.f32.xlu1 %v302_v44 }
  0xe6   :  { %v218_v0 = vpop.permute.xlu2 %217 }
  0xf2   :  { %v120_v50 = vpop.xlane.xlu0 %119 }
  0xf3   :  { %v163_v54 = vadd.f32 %v994_v56, %v120_v50 }
  0xf5   :  { %v262_v59 = vperm.slane %v163_v54, %v261_v23  ;;  %v455_v23 = vperm.slane %v1057_v18, 1 }
  0xf7   :  { %v114_v48 = vpop.xlane.xlu1 %113 }
  0xf8   :  { %v161_v49 = vadd.f32 %v994_v56, %v114_v48 }
  0xfa   :  { %v254_v51 = vperm.slane %v161_v49, %v253_v13 }
  0xfc   :  { %v256_v53 = vsel %vm255_vm10, %v254_v51, %v252_v52  ;;  %vm222_vm10 = vcmp.eq.s32.totalorder %v218_v0, 1  ;;  %v569_v0 = vld [vmem:[%s1327_s6 + $0x1d8] sm:$0xff] }
  0xfd   :  { %v260_v55 = vsel %vm259_vm11, %v258_v33, %v256_v53 }
  0xfe   :  { %v264_v3 = vsel %vm263_vm12, %v262_v59, %v260_v55  ;;  %v540_v55 = vld [vmem:[%s1327_s6 + $0xf0] sm:$0xff]  ;;  %v538_v59 = vld [vmem:[%s1327_s6 + $0xe0] sm:$0xff] }
  0xff   :  { %v123_v57 = vpop.xlane.xlu1 %122  ;;  %589 = vmatpush.msrb.mxu0 %v540_v55  ;;  %v514_v55 = vld [vmem:[%s1327_s6 + $0x20] sm:$0xff] }
 0x100   :  { %v164_v58 = vadd.f32 %v994_v56, %v123_v57  ;;  %v541_v57 = vld [vmem:[%s1327_s6 + $0xf8] sm:$0xff] }
 0x101   :  { %629 = vmatpush.msrb.mxu2 %v541_v57  ;;  %590 = vmatpush.msrb.mxu0 %v538_v59  ;;  %v515_v57 = vld [vmem:[%s1327_s6 + $0x28] sm:$0xff]  ;;  %v512_v59 = vld [vmem:[%s1327_s6 + $0x10] sm:$0xff] }
 0x102   :  { %v266_v60 = vperm.slane %v164_v58, %v265_v31  ;;  %v1074_v31 = vrot.slane %v455_v23, 4  ;;  %v573_v58 = vld [vmem:[%s1327_s6 + $0x1f8] sm:$0xff]  ;;  %v558_v23 = vld [vmem:[%s1327_s6 + $0x180] sm:$0xff] }
 0x103   :  { %649 = vmatpush.msrb.mxu3 %v573_v58  ;;  %v547_v58 = vld [vmem:[%s1327_s6 + $0x128] sm:$0xff] }
 0x104   :  { %v268_v63 = vsel %vm267_vm15, %v266_v60, %v264_v3  ;;  %v570_v60 = vld [vmem:[%s1327_s6 + $0x1e0] sm:$0xff]  ;;  %v571_v3 = vld [vmem:[%s1327_s6 + $0x1e8] sm:$0xff] }
 0x105   :  { %v272_v62 = vsel %vm271_vm0, %v270_v61, %v268_v63  ;;  %v198_v39 = vpop.permute.xlu0 %197  ;;  %vm457_vm0 = vcmask 1043456   ;;  %v539_v61 = vld [vmem:[%s1327_s6 + $0xe8] sm:$0xff]  ;;  %v536_v63 = vld [vmem:[%s1327_s6 + $0xd0] sm:$0xff]  ;;  %610 = vmatpush.msrb.mxu1 %v570_v60  ;;  %650 = vmatpush.msrb.mxu3 %v571_v3  ;;  %v545_v3 = vld [vmem:[%s1327_s6 + $0x118] sm:$0xff] }
 0x106   :  { %vm202_vm7 = vcmp.lt.s32.totalorder %v992_v6, %v198_v39  ;;  %v458_v42 = vsel %vm457_vm0, %v454_v30, %v1074_v31  ;;  %v487_v45 = vsel %vm457_vm0, %v484_v36, %v1077_v37  ;;  %v501_v52 = vsel %vm457_vm0, %v498_v46, %v1090_v47  ;;  %v537_v39 = vld [vmem:[%s1327_s6 + $0xd8] sm:$0xff]  ;;  %630 = vmatpush.msrb.mxu2 %v539_v61  ;;  %v544_v60 = vld [vmem:[%s1327_s6 + $0x110] sm:$0xff] }
 0x107   :  { %591 = vmatpush.msrb.mxu0 %v536_v63  ;;  %651 = vmatpush.msrb.mxu3 %v569_v0  ;;  %v513_v61 = vld [vmem:[%s1327_s6 + $0x18] sm:$0xff] }
 0x108   :  { %631 = vmatpush.msrb.mxu2 %v537_v39  ;;  %v542_v39 = vld [vmem:[%s1327_s6 + $0x100] sm:$0xff] }
 0x117   :  { %v190_v1 = vpop.permute.xlu1 %189 }
 0x118   :  { %vm194_vm8 = vcmp.ge.s32.totalorder %v992_v6, %v190_v1  ;;  %vm206_vm9 = vcmp.eq.s32.totalorder %v992_v6, %v190_v1  ;;  %v534_v1 = vld [vmem:[%s1327_s6 + $0xc0] sm:$0xff] }
 0x119   :  { %vm204_vm11 = vmand %vm194_vm8, %vm202_vm7  ;;  %592 = vmatpush.msrb.mxu0 %v534_v1  ;;  %v511_v1 = vld [vmem:[%s1327_s6 + $0x8] sm:$0xff] }
 0x11a   :  { %vm224_vm13 = vmand %vm206_vm9, %vm222_vm10 }
 0x11b   :  { %vm226_vm14 = vmor %vm204_vm11, %vm224_vm13 }
 0x11c   :  { %v296_v56 = vsel %vm226_vm14, %v272_v62, -1e+30  ;;  %v568_v62 = vld [vmem:[%s1327_s6 + $0x1d0] sm:$0xff] }
 0x11d   :  { %v299_v2 = vsel %vm298_vm5, %v296_v56, -inf  ;;  %611 = vmatpush.msrb.mxu1 %v568_v62  ;;  %v510_v62 = vld [vmem:[%s1327_s6] sm:$0xff] }
 0x11e   :  { %300 = vmax.xlane.f32.xlu2 %v299_v2  ;;  %v535_v2 = vld [vmem:[%s1327_s6 + $0xc8] sm:$0xff] }
 0x11f   :  { %632 = vmatpush.msrb.mxu2 %v535_v2 }
 0x136   :  { %437 = vperm.xlu2 %729, %v830_v11  }
 0x13e   :  { %730 = vset.pattern.permute.xlu2 %v742_v10 }
 0x13f   :  { %476 = vperm.xlu2 %730, %v824_v9  }
 0x157   :  { %v304_v4 = vpop.xlane.xlu1 %303 }
 0x158   :  { %v306_v7 = vsub.f32 %v297_v43, %v304_v4  ;;  %v567_v4 = vld [vmem:[%s1327_s6 + $0x1c8] sm:$0xff] }
 0x159   :  { %652 = vmatpush.msrb.mxu3 %v567_v4 }
 0x15a   :  { %v309_v8 = vmul.f32 1.442695, %v306_v7  ;;  %v532_v7 = vld [vmem:[%s1327_s6 + $0xb0] sm:$0xff] }
 0x15b   :  { %593 = vmatpush.msrb.mxu0 %v532_v7 }
 0x15c   :  { %732 = vpow2.f32 %v309_v8  ;;  %v564_v8 = vld [vmem:[%s1327_s6 + $0x1b0] sm:$0xff] }
 0x162   :  { %v733_v12 = vpop.eup %732 }
 0x163   :  { %v314_v6 = vsel %vm298_vm5, %v733_v12, 0.0 }
 0x164   :  { %315 = vadd.xlane.f32.xlu0 %v314_v6  ;;  %v565_v6 = vld [vmem:[%s1327_s6 + $0x1b8] sm:$0xff] }
 0x165   :  { %653 = vmatpush.msrb.mxu3 %v565_v6 }
 0x178   :  { %468 = vperm.xlu0 %728, %v830_v11  }
 0x191   :  { %v301_v13 = vpop.xlane.xlu2 %300 }
 0x192   :  { %v305_v14 = vsub.f32 %v296_v56, %v301_v13  ;;  %v566_v56 = vld [vmem:[%s1327_s6 + $0x1c0] sm:$0xff] }
 0x193   :  { %612 = vmatpush.msrb.mxu1 %v566_v56  ;;  %v530_v13 = vld [vmem:[%s1327_s6 + $0xa0] sm:$0xff]  ;;  %v543_v56 = vld [vmem:[%s1327_s6 + $0x108] sm:$0xff] }
 0x194   :  { %v307_v15 = vmul.f32 1.442695, %v305_v14  ;;  %v562_v14 = vld [vmem:[%s1327_s6 + $0x1a0] sm:$0xff]  ;;  %594 = vmatpush.msrb.mxu0 %v530_v13 }
 0x195   :  { %613 = vmatpush.msrb.mxu1 %v564_v8 }
 0x196   :  { %734 = vpow2.f32 %v307_v15  ;;  %v531_v15 = vld [vmem:[%s1327_s6 + $0xa8] sm:$0xff] }
 0x197   :  { %614 = vmatpush.msrb.mxu1 %v562_v14 }
 0x199   :  { %v438_v32 = vpop.permute.xlu2 %437 }
 0x19a   :  { %v443_v40 = vperm.slane %v438_v32, %v1066_v27  ;;  %v557_v32 = vld [vmem:[%s1327_s6 + $0x178] sm:$0xff] }
 0x19c   :  { %v1049_v16 = vpop.eup %734  ;;  %v463_v49 = vmul.f32 %v458_v42, %v443_v40  ;;  %v555_v40 = vld [vmem:[%s1327_s6 + $0x168] sm:$0xff]  ;;  %v552_v42 = vld [vmem:[%s1327_s6 + $0x150] sm:$0xff] }
 0x19d   :  { %v311_v10 = vsel %vm298_vm5, %v1049_v16, 0.0 }
 0x19e   :  { %312 = vadd.xlane.f32.xlu1 %v311_v10  ;;  %v563_v10 = vld [vmem:[%s1327_s6 + $0x1a8] sm:$0xff] }
 0x19f   :  { %654 = vmatpush.msrb.mxu3 %v563_v10  ;;  %v488_v10 = vsel %vm457_vm0, %v1077_v37, %v484_v36 }
 0x1a1   :  { %655 = vmatpush.msrb.mxu3 %v561_v20 }
 0x1b7   :  { %446 = vperm.xlu1 %727, %v824_v9  }
 0x1d7   :  { %v316_v17 = vpop.xlane.xlu0 %315 }
 0x1d8   :  { %736 = vrcp.f32 %v316_v17  ;;  %v343_v9 = vand.u32 2147483648, %v316_v17  ;;  %v341_v29 = vand.u32 2147483647, %v316_v17  ;;  %vm337_vm15 = vweird.f32 %v316_v17 }
 0x1da   :  { %v344_v35 = vor.u32 1.1754944e-38, %v343_v9  ;;  %vm342_vm2 = vcmp.eq.f32.partialorder %v341_v29, 8.507059e+37  ;;  %v559_v9 = vld [vmem:[%s1327_s6 + $0x188] sm:$0xff]  ;;  %v525_v29 = vld [vmem:[%s1327_s6 + $0x78] sm:$0xff] }
 0x1db   :  { %656 = vmatpush.msrb.mxu3 %v559_v9 }
 0x1dd   :  { %657 = vmatpush.msrb.mxu3 %v557_v32 }
 0x1de   :  { %v737_v11 = vpop.eup %736 }
 0x1df   :  { %v333_v19 = vmul.f32 %v737_v11, %v316_v17  ;;  %vm338_vm12 = vweird.f32 %v737_v11  ;;  %v528_v17 = vld [vmem:[%s1327_s6 + $0x90] sm:$0xff]  ;;  %658 = vmatpush.msrb.mxu3 %v555_v40 }
 0x1e0   :  { %vm339_vm1 = vmor %vm337_vm15, %vm338_vm12  ;;  %595 = vmatpush.msrb.mxu0 %v528_v17  ;;  %v477_v17 = vpop.permute.xlu2 %476 }
 0x1e1   :  { %v334_v24 = vsub.f32 1.0, %v333_v19  ;;  %v529_v19 = vld [vmem:[%s1327_s6 + $0x98] sm:$0xff]  ;;  %v482_v20 = vperm.slane %v477_v17, %v1066_v27 }
 0x1e2   :  { %596 = vmatpush.msrb.mxu0 %v526_v21 }
 0x1e3   :  { %v335_v26 = vmul.f32 %v737_v11, %v334_v24  ;;  %v527_v24 = vld [vmem:[%s1327_s6 + $0x88] sm:$0xff] }
 0x1e4   :  { %597 = vmatpush.msrb.mxu0 %v524_v25 }
 0x1e5   :  { %v336_v34 = vadd.f32 %v737_v11, %v335_v26  ;;  %v556_v26 = vld [vmem:[%s1327_s6 + $0x170] sm:$0xff] }
 0x1e7   :  { %v340_v41 = vsel %vm339_vm1, %v737_v11, %v336_v34  ;;  %v560_v11 = vld [vmem:[%s1327_s6 + $0x190] sm:$0xff]  ;;  %v522_v34 = vld [vmem:[%s1327_s6 + $0x60] sm:$0xff] }
 0x1e8   :  { %v345_v43 = vsel %vm342_vm2, %v344_v35, %v340_v41  ;;  %615 = vmatpush.msrb.mxu1 %v560_v11  ;;  %v554_v35 = vld [vmem:[%s1327_s6 + $0x160] sm:$0xff]  ;;  %598 = vmatpush.msrb.mxu0 %v522_v34  ;;  %v520_v41 = vld [vmem:[%s1327_s6 + $0x50] sm:$0xff]  ;;  %v459_v11 = vsel %vm457_vm0, %v1074_v31, %v454_v30 }
 0x1e9   :  { %v346_v44 = vmul.f32 %v733_v12, %v345_v43  ;;  %v533_v12 = vld [vmem:[%s1327_s6 + $0xb8] sm:$0xff]  ;;  %v460_v21 = vrot.slane %v459_v11, 4 }
 0x1ea   :  { %v469_v48 = vpop.permute.xlu0 %468  ;;  %633 = vmatpush.msrb.mxu2 %v533_v12  ;;  %616 = vmatpush.msrb.mxu1 %v558_v23  ;;  %v521_v43 = vld [vmem:[%s1327_s6 + $0x58] sm:$0xff] }
 0x1eb   :  { %v474_v50 = vperm.slane %v469_v48, %v1066_v27  ;;  %706 = vmatmul.msk.f32.vlgmr.msra.gmra.mxu2 %vm347_vm3, %v346_v44  ;;  %707 = vmatmul.msk.f32.vlgmr.msra.gmra.mxu3 %vm347_vm3, %v346_v44  ;;  %v518_v48 = vld [vmem:[%s1327_s6 + $0x40] sm:$0xff] }
 0x1ec   :  { %634 = vmatpush.msrb.mxu2 %v531_v15  ;;  %617 = vmatpush.msrb.mxu1 %v556_v26 }
 0x1ed   :  { %v492_v51 = vmul.f32 %v487_v45, %v474_v50  ;;  %599 = vmatpush.msrb.mxu0 %v520_v41  ;;  %v553_v45 = vld [vmem:[%s1327_s6 + $0x158] sm:$0xff]  ;;  %v519_v50 = vld [vmem:[%s1327_s6 + $0x48] sm:$0xff] }
 0x1ee   :  { %635 = vmatpush.msrb.mxu2 %v529_v19  ;;  %618 = vmatpush.msrb.mxu1 %v554_v35  ;;  %v489_v19 = vrot.slane %v488_v10, 4 }
 0x1ef   :  { %v494_v33 = vadd.f32 %v492_v51, %v463_v49  ;;  %659 = vmatpush.msrb.mxu3 %v553_v45  ;;  %v550_v49 = vld [vmem:[%s1327_s6 + $0x140] sm:$0xff]  ;;  %600 = vmatpush.msrb.mxu0 %v518_v48  ;;  %v551_v51 = vld [vmem:[%s1327_s6 + $0x148] sm:$0xff] }
 0x1f0   :  { %636 = vmatpush.msrb.mxu2 %v527_v24  ;;  %619 = vmatpush.msrb.mxu1 %v552_v42  ;;  %v493_v36 = vmul.f32 %v489_v19, %v482_v20 }
 0x1f1   :  { %v506_v53 = vadd.f32 %v501_v52, %v494_v33  ;;  %660 = vmatpush.msrb.mxu3 %v551_v51  ;;  %v516_v52 = vld [vmem:[%s1327_s6 + $0x30] sm:$0xff] }
 0x1f2   :  { %637 = vmatpush.msrb.mxu2 %v525_v29  ;;  %620 = vmatpush.msrb.mxu1 %v550_v49  ;;  %v548_v33 = vld [vmem:[%s1327_s6 + $0x130] sm:$0xff] }
 0x1f3   :  { %v508_v54 = vmax.f32 %v506_v53, 0.0  ;;  %v517_v53 = vld [vmem:[%s1327_s6 + $0x38] sm:$0xff]  ;;  %601 = vmatpush.msrb.mxu0 %v516_v52 }
 0x1f4   :  { %638 = vmatpush.msrb.mxu2 %v523_v38  ;;  %621 = vmatpush.msrb.mxu1 %v548_v33 }
 0x1f5   :  { %582 = vst [vmem:[#allocation1] ss:$2 sm:$0xff] %v508_v54  ;;  %v549_v54 = vld [vmem:[%s1327_s6 + $0x138] sm:$0xff]  ;;  %602 = vmatpush.msrb.mxu0 %v514_v55 }
 0x1f6   :  { %639 = vmatpush.msrb.mxu2 %v521_v43  ;;  %661 = vmatpush.msrb.mxu3 %v549_v54 }
 0x1f7   :  { %622 = vmatpush.msrb.mxu1 %v546_v5  ;;  %603 = vmatpush.msrb.mxu0 %v512_v59 }
 0x1f8   :  { %640 = vmatpush.msrb.mxu2 %v519_v50  ;;  %662 = vmatpush.msrb.mxu3 %v547_v58 }
 0x1f9   :  { %623 = vmatpush.msrb.mxu1 %v544_v60  ;;  %604 = vmatpush.msrb.mxu0 %v510_v62 }
 0x1fa   :  { %641 = vmatpush.msrb.mxu2 %v517_v53  ;;  %663 = vmatpush.msrb.mxu3 %v545_v3 }
 0x1fb   :  { %624 = vmatpush.msrb.mxu1 %v542_v39 }
 0x1fc   :  { %642 = vmatpush.msrb.mxu2 %v515_v57  ;;  %664 = vmatpush.msrb.mxu3 %v543_v56 }
 0x1fe   :  { %643 = vmatpush.msrb.mxu2 %v513_v61 }
 0x200   :  { %644 = vmatpush.msrb.mxu2 %v511_v1 }
 0x211   :  { %v313_v44 = vpop.xlane.xlu1 %312 }
 0x212   :  { %738 = vrcp.f32 %v313_v44  ;;  %v328_v4 = vand.u32 2147483648, %v313_v44  ;;  %v326_v8 = vand.u32 2147483647, %v313_v44  ;;  %vm322_vm5 = vweird.f32 %v313_v44 }
 0x214   :  { %v329_v6 = vor.u32 1.1754944e-38, %v328_v4  ;;  %vm327_vm7 = vcmp.eq.f32.partialorder %v326_v8, 8.507059e+37 }
 0x218   :  { %v739_v63 = vpop.eup %738 }
 0x219   :  { %v318_v0 = vmul.f32 %v739_v63, %v313_v44  ;;  %vm323_vm4 = vweird.f32 %v739_v63 }
 0x21a   :  { %vm324_vm6 = vmor %vm322_vm5, %vm323_vm4 }
 0x21b   :  { %v319_v2 = vsub.f32 1.0, %v318_v0 }
 0x21d   :  { %v320_v7 = vmul.f32 %v739_v63, %v319_v2 }
 0x21f   :  { %v321_v12 = vadd.f32 %v739_v63, %v320_v7 }
 0x221   :  { %v325_v13 = vsel %vm324_vm6, %v739_v63, %v321_v12 }
 0x222   :  { %v330_v14 = vsel %vm327_vm7, %v329_v6, %v325_v13 }
 0x223   :  { %v331_v15 = vmul.f32 %v1049_v16, %v330_v14  ;;  %v502_v16 = vsel %vm457_vm0, %v1090_v47, %v498_v46  ;;  %v574_v46 = vld [vmem:[%s1328_s7] sm:$0x3] }
 0x224   :  { %v503_v23 = vrot.slane %v502_v16, 4  ;;  %v576_v47 = vperm.slane %v574_v46, 0  ;;  %v577_v32 = vperm.slane %v574_v46, 1 }
 0x225   :  { %704 = vmatmul.msk.f32.vlgmr.msra.gmra.mxu0 %vm347_vm3, %v331_v15  ;;  %705 = vmatmul.msk.f32.vlgmr.msra.gmra.mxu1 %vm347_vm3, %v331_v15 }
 0x229   :  { %v447_v22 = vpop.permute.xlu1 %446 }
 0x22a   :  { %v452_v37 = vperm.slane %v447_v22, %v1066_v27 }
 0x22c   :  { %v464_v24 = vmul.f32 %v460_v21, %v452_v37 }
 0x22e   :  { %v495_v9 = vadd.f32 %v493_v36, %v464_v24 }
 0x230   :  { %v507_v18 = vadd.f32 %v503_v23, %v495_v9 }
 0x232   :  { %v509_v25 = vmax.f32 %v507_v18, 0.0 }
 0x234   :  { %584 = vst [vmem:[#allocation1 + $0x1] ss:$2 sm:$0xff] %v509_v25 }
 0x23b   :  { %v585_v30 = vld.sshfl [vmem:[#allocation1] sm:$0xff pattern:$0x75316420]  ;;  %v586_v31 = vld.sshfl [vmem:[#allocation1 + $0x8] sm:$0xff pattern:$0x75316420] }
 0x23c   :  { %605 = vmatmul.f32.vlgmr.msrb.gmra.mxu0 %v585_v30  ;;  %625 = vmatmul.f32.vlgmr.msrb.gmra.mxu1 %v586_v31 }
 0x23d   :  { %645 = vmatmul.f32.vlgmr.msrb.gmra.mxu2 %v585_v30  ;;  %665 = vmatmul.f32.vlgmr.msrb.gmra.mxu3 %v586_v31 }
 0x26e   :  { %v411_v26 = vpop.f32.mrf.mxu2  ;;  %v431_v29 = vpop.f32.mrf.mxu3 }
 0x26f   :  { %v674_v45 = vrot.slane %v431_v29, 4 }
 0x271   :  { %v676_v54 = vsel %vm457_vm0, %v411_v26, %v674_v45 }
 0x2a2   :  { %v368_v28 = vpop.f32.mrf.mxu0  ;;  %v388_v27 = vpop.f32.mrf.mxu1 }
 0x2a3   :  { %v673_v42 = vrot.slane %v388_v27, 4 }
 0x2a5   :  { %v675_v50 = vsel %vm457_vm0, %v368_v28, %v673_v42 }
 0x2b9   :  { %v606_v34 = vpop.f32.mrf.mxu0  ;;  %v626_v44 = vpop.f32.mrf.mxu1 }
 0x2ba   :  { %v607_v38 = vadd.f32 %v606_v34, %v576_v47 }
 0x2bc   :  { %v627_v48 = vadd.f32 %v626_v44, %v607_v38 }
 0x2c0   :  { %v646_v35 = vpop.f32.mrf.mxu2  ;;  %v666_v41 = vpop.f32.mrf.mxu3 }
 0x2c1   :  { %v647_v40 = vadd.f32 %v646_v35, %v577_v32 }
 0x2c3   :  { %v667_v43 = vadd.f32 %v666_v41, %v647_v40 }
 0x2c5   :  { %v681_v49 = vrot.slane %v667_v43, 4 }
 0x2c7   :  { %v682_v51 = vsel %vm457_vm0, %v627_v48, %v681_v49  ;;  %v683_v52 = vsel %vm457_vm0, %v681_v49, %v627_v48 }
 0x2c8   :  { %v684_v33 = vrot.slane %v683_v52, 4  ;;  %v687_v53 = vadd.f32 %v682_v51, %v675_v50 }
 0x2ca   :  { %v688_v55 = vadd.f32 %v684_v33, %v676_v54  ;;  %691 = vst [vmem:[#allocation1] ss:$2 sm:$0xff] %v687_v53 }
 0x2cc   :  { %693 = vst [vmem:[#allocation1 + $0x1] ss:$2 sm:$0xff] %v688_v55 }
 0x2d3   :  { %v694_v5 = vld.sshfl [vmem:[#allocation1] sm:$0xff pattern:$0x75316420]  ;;  %v695_v57 = vld.sshfl [vmem:[#allocation1 + $0x8] sm:$0xff pattern:$0x75316420] }
 0x2d4   :  { %698 = vst [vmem:[%s1329_s8] sm:$0xff] %v694_v5 }
 0x2d5   :  { %699 = vst [vmem:[%s1329_s8 + $0x8] sm:$0xff] %v695_v57 }

// kernel: span_refining_decoder_forward.6
= control target key start
LH: loop header
LB: loop body
LE: loop exit
PB: predicated region body
PF: predicated region fallthrough
CT: control target
= control target key end

     0   :  { %s1407_s0 = inlined_call_operand.vmem [shape: f32[2,64,256], index: 0, kind: input, shape index: {}]   ;;  %s1408_s1 = inlined_call_operand.vmem [shape: f32[2,4,2], index: 1, kind: input, shape index: {}]   ;;  %s1409_s2 = inlined_call_operand.vmem [shape: f32[1,256], index: 2, kind: input, shape index: {}]   ;;  %s1410_s3 = inlined_call_operand.<no memory space> [shape: f32[1,1], index: 3, kind: input, shape index: {}]   ;;  %s1411_s4 = inlined_call_operand.vmem [shape: f32[2,256], index: 4, kind: input, shape index: {}]   ;;  %s1412_s5 = inlined_call_operand.hbm [shape: f32[1,256], index: 5, kind: input, shape index: {}]   ;;  %s1413_s6 = inlined_call_operand.vmem [shape: f32[256,256], index: 6, kind: input, shape index: {}]   ;;  %s1414_s7 = inlined_call_operand.hbm [shape: f32[1,256], index: 7, kind: input, shape index: {}]   ;;  %s1415_s8 = inlined_call_operand.vmem [shape: f32[8,256], index: 8, kind: output, shape index: {}]  }
   0x1   :  { %v13_v0 = vstv %s1410_s3 }
   0x2   :  { %14 = vst [vmem:[#allocation2] sm:$0x1] %v13_v0 }
   0x3   :  { %15 = vsyncpa [#allocation4], 0  ;;  %s32_s9 = sshll.u32 %s1412_s5, 4  ;;  %s33_s9 = int_to_ptr.hbm [resolvable:$true] %s32_s9 }
   0x4   :  { %16 = vsyncpa [#allocation6], 0  ;;  %s824_s10 = smov [#allocation3]   ;;  %s45_s14 = sshll.u32 %s1414_s7, 4  ;;  %s46_s14 = int_to_ptr.hbm [resolvable:$true] %s45_s14 }
   0x5   :  { %s34_s11 = sshll.u32 %s824_s10, 4  ;;  %s825_s15 = smov [#allocation5]   ;;  %s35_s11 = int_to_ptr.vmem [resolvable:$true] %s34_s11 }
   0x6   :  { %37 = dma.hbm_to_vmem [thread:$0]  %s33_s9, 32, %s35_s11, [#allocation4]  }
   0x7   :  { %s47_s16 = sshll.u32 %s825_s15, 4  ;;  %s48_s16 = int_to_ptr.vmem [resolvable:$true] %s47_s16 }
   0x8   :  { %50 = dma.hbm_to_vmem [thread:$0]  %s46_s14, 32, %s48_s16, [#allocation6]  }
   0x9   :  { %820 = dma.done.wait [#allocation4], 32  }
   0xa   :  { %821 = vsyncadd [#allocation4], 4294967264 }
   0xb   :  { %822 = dma.done.wait [#allocation6], 32  }
   0xc   :  { %823 = vsyncadd [#allocation6], 4294967264  ;;  %v826_v1 = vmov 0   ;;  %v889_v2 = vld [vmem:[%s1407_s0 + $0xa0] sm:$0xff]  ;;  %v894_v3 = vld [vmem:[%s1407_s0 + $0xa8] sm:$0xff]  ;;  %s827_s12 = smov 1  }
   0xd   :  { %755 = vset.pattern.permute.xlu2 %v826_v1  ;;  %756 = vset.pattern.permute.xlu0 %v826_v1  ;;  %v93_v4 = vld [vmem:[%s1409_s2] sm:$0x3]  ;;  %v911_v8 = vld [vmem:[%s1407_s0 + $0x88] sm:$0xff]  ;;  %v916_v9 = vld [vmem:[%s1408_s1 + $0x4] sm:$0xf]  ;;  %vm275_vm8 = vcmask 130112  }
   0xe   :  { %v899_v5 = vperm.slane %v93_v4, 0  ;;  %v901_v6 = vperm.slane %v93_v4, 1  ;;  %v906_v7 = vld [vmem:[%s1407_s0 + $0x80] sm:$0xff]  ;;  %v203_v10 = vmul.f32 64.0, %v916_v9  ;;  %v935_v16 = vld [vmem:[%s1407_s0 + $0x90] sm:$0xff]  ;;  %v940_v19 = vld [vmem:[%s1407_s0 + $0x98] sm:$0xff] }
   0xf   :  { %v922_v11 = vld [vmem:[%s1408_s1] sm:$0xf]  ;;  %v84_v35 = vld [vmem:[%s1407_s0 + $0xc8] sm:$0xff]  ;;  %v85_v41 = vld [vmem:[%s1407_s0 + $0xd0] sm:$0xff]  ;;  %vm279_vm9 = vcmask 195712   ;;  %vm283_vm10 = vcmask 261312  }
  0x10   :  { %v119_v12 = vmul.f32 %v899_v5, %v889_v2  ;;  %v120_v13 = vmul.f32 %v901_v6, %v894_v3  ;;  %v115_v14 = vmul.f32 %v899_v5, %v906_v7  ;;  %v116_v15 = vmul.f32 %v901_v6, %v911_v8  ;;  %v83_v34 = vld [vmem:[%s1407_s0 + $0xc0] sm:$0xff]  ;;  %v86_v42 = vld [vmem:[%s1407_s0 + $0xd8] sm:$0xff]  ;;  %v763_v45 = vld [vmem:[#allocation2] ss:$0 sm:$0xff] }
  0x11   :  { %vm744_vm0 = vcmp.lt.s32.totalorder %v203_v10, 0  ;;  %v745_v17 = vceil.f32 %v203_v10  ;;  %v746_v18 = vfloor.f32 %v203_v10  ;;  %v202_v22 = vmul.f32 64.0, %v922_v11  ;;  %v87_v47 = vld [vmem:[%s1407_s0 + $0xe0] sm:$0xff]  ;;  %v88_v48 = vld [vmem:[%s1407_s0 + $0xe8] sm:$0xff]  ;;  %v89_v51 = vld [vmem:[%s1407_s0 + $0xf0] sm:$0xff] }
  0x12   :  { %v161_v20 = vadd.f32 %v120_v13, %v119_v12  ;;  %v155_v21 = vadd.f32 %v116_v15, %v115_v14  ;;  %v117_v24 = vmul.f32 %v899_v5, %v935_v16  ;;  %v118_v26 = vmul.f32 %v901_v6, %v940_v19  ;;  %v90_v52 = vld [vmem:[%s1407_s0 + $0xf8] sm:$0xff]  ;;  %430 = vmatpush.msra.mxu2 %v89_v51  ;;  %v986_v54 = vld [vmem:[%s1407_s0] sm:$0xff]  ;;  %v991_v55 = vld [vmem:[%s1407_s0 + $0x8] sm:$0xff] }
  0x13   :  { %v747_v23 = vsel %vm744_vm0, %v745_v17, %v746_v18  ;;  %vm739_vm1 = vcmp.lt.s32.totalorder %v202_v22, 0  ;;  %v740_v27 = vceil.f32 %v202_v22  ;;  %v741_v28 = vfloor.f32 %v202_v22  ;;  %450 = vmatpush.msra.mxu3 %v90_v52  ;;  %v81_v58 = vld [vmem:[%s1407_s0 + $0xb0] sm:$0xff]  ;;  %v82_v59 = vld [vmem:[%s1407_s0 + $0xb8] sm:$0xff]  ;;  %v64_v4 = vld [vmem:[%s1407_s0 + $0x28] sm:$0xff] }
  0x14   :  { %162 = vadd.xlane.f32.xlu2 %v161_v20  ;;  %156 = vadd.xlane.f32.xlu1 %v155_v21  ;;  %v748_v25 = vcvt.f32.s32 %v747_v23  ;;  %v158_v31 = vadd.f32 %v118_v26, %v117_v24  ;;  %v123_v37 = vmul.f32 %v899_v5, %v83_v34  ;;  %v124_v38 = vmul.f32 %v901_v6, %v84_v35  ;;  %v61_v61 = vld [vmem:[%s1407_s0 + $0x10] sm:$0xff]  ;;  %v62_v62 = vld [vmem:[%s1407_s0 + $0x18] sm:$0xff]  ;;  %v67_v21 = vld [vmem:[%s1407_s0 + $0x40] sm:$0xff] }
  0x15   :  { %v742_v30 = vsel %vm739_vm1, %v740_v27, %v741_v28  ;;  %v125_v43 = vmul.f32 %v899_v5, %v85_v41  ;;  %v126_v44 = vmul.f32 %v901_v6, %v86_v42  ;;  %v127_v49 = vmul.f32 %v899_v5, %v87_v47  ;;  %431 = vmatpush.msra.mxu2 %v87_v47  ;;  %v68_v22 = vld [vmem:[%s1407_s0 + $0x48] sm:$0xff] }
  0x16   :  { %vm208_vm2 = vcmp.gt.s32.totalorder %v748_v25, 0  ;;  %v743_v32 = vcvt.f32.s32 %v742_v30  ;;  %v167_v40 = vadd.f32 %v124_v38, %v123_v37  ;;  %v128_v50 = vmul.f32 %v901_v6, %v88_v48  ;;  %451 = vmatpush.msra.mxu3 %v88_v48  ;;  %v72_v30 = vld [vmem:[%s1407_s0 + $0x68] sm:$0xff] }
  0x17   :  { %v209_v29 = vsel %vm208_vm2, %v748_v25, 0  ;;  %v170_v46 = vadd.f32 %v126_v44, %v125_v43  ;;  %432 = vmatpush.msra.mxu2 %v85_v41  ;;  %v99_v56 = vmul.f32 %v899_v5, %v986_v54  ;;  %v100_v57 = vmul.f32 %v901_v6, %v991_v55 }
  0x18   :  { %vm212_vm3 = vcmp.lt.s32.totalorder %v209_v29, 63  ;;  %vm206_vm4 = vcmp.gt.s32.totalorder %v743_v32, 0  ;;  %v173_v53 = vadd.f32 %v128_v50, %v127_v49  ;;  %452 = vmatpush.msra.mxu3 %v86_v42  ;;  %v101_v63 = vmul.f32 %v899_v5, %v61_v61 }
  0x19   :  { %v947_v33 = vsel %vm212_vm3, %v209_v29, 63  ;;  %v207_v36 = vsel %vm206_vm4, %v743_v32, 0  ;;  %433 = vmatpush.msra.mxu2 %v83_v34  ;;  %v131_v60 = vadd.f32 %v100_v57, %v99_v56  ;;  %v102_v0 = vmul.f32 %v901_v6, %v62_v62  ;;  %v71_v29 = vld [vmem:[%s1407_s0 + $0x60] sm:$0xff]  ;;  %v70_v32 = vld [vmem:[%s1407_s0 + $0x58] sm:$0xff]  ;;  %v65_v34 = vld [vmem:[%s1407_s0 + $0x30] sm:$0xff] }
  0x1a   :  { %238 = vrot.lane.b32.xlu0 %v947_v33, %s827_s12  ;;  %vm210_vm5 = vcmp.lt.s32.totalorder %v207_v36, 63  ;;  %453 = vmatpush.msra.mxu3 %v84_v35  ;;  %v828_v10 = vmov 1   ;;  %v121_v12 = vmul.f32 %v899_v5, %v81_v58  ;;  %v122_v13 = vmul.f32 %v901_v6, %v82_v59  ;;  %v66_v35 = vld [vmem:[%s1407_s0 + $0x38] sm:$0xff] }
  0x1b   :  { %v958_v39 = vsel %vm210_vm5, %v207_v36, 63  ;;  %434 = vmatpush.msra.mxu2 %v81_v58  ;;  %757 = vset.pattern.permute.xlu1 %v828_v10  ;;  %v104_v15 = vmul.f32 %v901_v6, %v64_v4  ;;  %v129_v18 = vmul.f32 %v899_v5, %v89_v51  ;;  %v107_v23 = vmul.f32 %v899_v5, %v67_v21 }
  0x1c   :  { %159 = vadd.xlane.f32.xlu1 %v158_v31  ;;  %454 = vmatpush.msra.mxu3 %v82_v59  ;;  %v108_v24 = vmul.f32 %v901_v6, %v68_v22  ;;  %v69_v31 = vld [vmem:[%s1407_s0 + $0x50] sm:$0xff]  ;;  %v110_v37 = vmul.f32 %v901_v6, %v70_v32  ;;  %v105_v41 = vmul.f32 %v899_v5, %v65_v34  ;;  %vm287_vm11 = vcmask 326912  }
  0x1d   :  { %435 = vmatpush.msra.mxu2 %v889_v2  ;;  %v134_v2 = vadd.f32 %v102_v0, %v101_v63  ;;  %v109_v36 = vmul.f32 %v899_v5, %v69_v31  ;;  %v106_v42 = vmul.f32 %v901_v6, %v66_v35  ;;  %v111_v47 = vmul.f32 %v899_v5, %v71_v29 }
  0x1e   :  { %455 = vmatpush.msra.mxu3 %v894_v3  ;;  %v63_v3 = vld [vmem:[%s1407_s0 + $0x20] sm:$0xff]  ;;  %v143_v25 = vadd.f32 %v108_v24, %v107_v23  ;;  %v112_v48 = vmul.f32 %v901_v6, %v72_v30  ;;  %vm291_vm12 = vcmask 392512   ;;  %vm295_vm15 = vcmask 458112  }
  0x1f   :  { %436 = vmatpush.msra.mxu2 %v935_v16  ;;  %v103_v14 = vmul.f32 %v899_v5, %v63_v3  ;;  %v164_v16 = vadd.f32 %v122_v13, %v121_v12  ;;  %v146_v38 = vadd.f32 %v110_v37, %v109_v36  ;;  %v140_v43 = vadd.f32 %v106_v42, %v105_v41 }
  0x20   :  { %456 = vmatpush.msra.mxu3 %v940_v19  ;;  %v130_v19 = vmul.f32 %v901_v6, %v90_v52  ;;  %v149_v49 = vadd.f32 %v112_v48, %v111_v47  ;;  %vm299_vm0 = vcmask 523712   ;;  %vm326_vm5 = vcmask 519168  }
  0x21   :  { %437 = vmatpush.msra.mxu2 %v906_v7  ;;  %v73_v7 = vld [vmem:[%s1407_s0 + $0x70] sm:$0xff]  ;;  %v137_v17 = vadd.f32 %v104_v15, %v103_v14 }
  0x22   :  { %236 = vrot.lane.b32.xlu0 %v958_v39, %s827_s12  ;;  %457 = vmatpush.msra.mxu3 %v911_v8  ;;  %v74_v8 = vld [vmem:[%s1407_s0 + $0x78] sm:$0xff]  ;;  %v176_v20 = vadd.f32 %v130_v19, %v129_v18  ;;  %v113_v26 = vmul.f32 %v899_v5, %v73_v7  ;;  %v214_v5 = vlaneseq }
  0x23   :  { %387 = vmatpush.msra.mxu0 %v73_v7  ;;  %407 = vmatpush.msra.mxu1 %v74_v8  ;;  %v114_v27 = vmul.f32 %v901_v6, %v74_v8 }
  0x24   :  { %168 = vadd.xlane.f32.xlu1 %v167_v40  ;;  %v1084_v6 = vand.u32 127, %v214_v5 }
  0x25   :  { %v152_v28 = vadd.f32 %v114_v27, %v113_v26  ;;  %388 = vmatpush.msra.mxu0 %v71_v29  ;;  %408 = vmatpush.msra.mxu1 %v72_v30 }
  0x26   :  { %v273_v59 = vadd.s32 4294967288, %v1084_v6  ;;  %v277_v7 = vadd.s32 4294967280, %v1084_v6  ;;  %v281_v13 = vadd.s32 4294967272, %v1084_v6  ;;  %v285_v19 = vadd.s32 4294967264, %v1084_v6 }
  0x27   :  { %389 = vmatpush.msra.mxu0 %v69_v31  ;;  %409 = vmatpush.msra.mxu1 %v70_v32  ;;  %v289_v23 = vadd.s32 4294967256, %v1084_v6  ;;  %v297_v27 = vadd.s32 4294967240, %v1084_v6  ;;  %v293_v31 = vadd.s32 4294967248, %v1084_v6 }
  0x29   :  { %390 = vmatpush.msra.mxu0 %v67_v21  ;;  %410 = vmatpush.msra.mxu1 %v68_v22 }
  0x2b   :  { %391 = vmatpush.msra.mxu0 %v65_v34  ;;  %411 = vmatpush.msra.mxu1 %v66_v35 }
  0x2c   :  { %183 = vperm.xlu2 %755, %v763_v45   ;;  %171 = vadd.xlane.f32.xlu1 %v170_v46 }
  0x2d   :  { %392 = vmatpush.msra.mxu0 %v63_v3  ;;  %412 = vmatpush.msra.mxu1 %v64_v4 }
  0x2f   :  { %393 = vmatpush.msra.mxu0 %v61_v61  ;;  %413 = vmatpush.msra.mxu1 %v62_v62 }
  0x31   :  { %394 = vmatpush.msra.mxu0 %v986_v54  ;;  %414 = vmatpush.msra.mxu1 %v991_v55 }
  0x34   :  { %174 = vadd.xlane.f32.xlu1 %v173_v53  ;;  %758 = vset.pattern.permute.xlu2 %v828_v10 }
  0x3c   :  { %132 = vadd.xlane.f32.xlu1 %v131_v60 }
  0x44   :  { %135 = vadd.xlane.f32.xlu1 %v134_v2 }
  0x4c   :  { %165 = vadd.xlane.f32.xlu0 %v164_v16  ;;  %138 = vadd.xlane.f32.xlu1 %v137_v17 }
  0x55   :  { %177 = vadd.xlane.f32.xlu2 %v176_v20 }
  0x5d   :  { %144 = vadd.xlane.f32.xlu2 %v143_v25 }
  0x60   :  { %220 = vperm.xlu0 %756, %v947_v33  }
  0x65   :  { %153 = vadd.xlane.f32.xlu2 %v152_v28  ;;  %228 = vperm.xlu1 %757, %v947_v33  }
  0x68   :  { %760 = vset.pattern.permute.xlu0 %v828_v10 }
  0x6d   :  { %759 = vset.pattern.permute.xlu1 %v826_v1 }
  0x87   :  { %v157_v40 = vpop.xlane.xlu1 %156  ;;  %v163_v54 = vpop.xlane.xlu2 %162 }
  0x8a   :  { %147 = vadd.xlane.f32.xlu0 %v146_v38 }
  0x8c   :  { %v239_v44 = vpop.permute.xlu0 %238 }
  0x8d   :  { %vm241_vm6 = vcmp.eq.s32.totalorder %v947_v33, %v239_v44 }
  0x8e   :  { %v243_v45 = vsel %vm241_vm6, 1, %v826_v1 }
  0x8f   :  { %248 = vperm.xlu2 %758, %v243_v45   ;;  %v160_v46 = vpop.xlane.xlu1 %159  ;;  %141 = vadd.xlane.f32.xlu1 %v140_v43  ;;  %v1086_v56 = vpop.permute.xlu2 %183 }
  0x90   :  { %v195_v0 = vadd.f32 %v1086_v56, %v160_v46  ;;  %v196_v4 = vadd.f32 %v1086_v56, %v163_v54 }
  0x92   :  { %v302_v12 = vperm.slane %v195_v0, %v273_v59  ;;  %v304_v16 = vperm.slane %v196_v4, %v277_v7 }
  0x94   :  { %v237_v50 = vpop.permute.xlu0 %236 }
  0x95   :  { %vm240_vm7 = vcmp.eq.s32.totalorder %v958_v39, %v237_v50 }
  0x96   :  { %v242_v51 = vsel %vm240_vm7, 1, %v826_v1 }
  0x97   :  { %v169_v52 = vpop.xlane.xlu1 %168  ;;  %150 = vadd.xlane.f32.xlu1 %v149_v49  ;;  %245 = vperm.xlu2 %758, %v242_v51  }
  0x98   :  { %v198_v20 = vadd.f32 %v1086_v56, %v169_v52 }
  0x9a   :  { %v308_v26 = vperm.slane %v198_v20, %v285_v19  ;;  %v829_v20 = vmov 839922192  }
  0x9e   :  { %225 = vperm.xlu0 %760, %v958_v39  }
  0x9f   :  { %v172_v33 = vpop.xlane.xlu1 %171  ;;  %761 = vset.pattern.permute.xlu2 %v826_v1 }
  0xa0   :  { %v199_v24 = vadd.f32 %v1086_v56, %v172_v33 }
  0xa2   :  { %v310_v35 = vperm.slane %v199_v24, %v289_v23 }
  0xa7   :  { %v175_v53 = vpop.xlane.xlu1 %174 }
  0xa8   :  { %v200_v32 = vadd.f32 %v1086_v56, %v175_v53 }
  0xaa   :  { %v312_v38 = vperm.slane %v200_v32, %v293_v31 }
  0xaf   :  { %v133_v55 = vpop.xlane.xlu1 %132 }
  0xb0   :  { %217 = vperm.xlu1 %759, %v958_v39   ;;  %v186_v57 = vadd.f32 %v1086_v56, %v133_v55  ;;  %v194_v39 = vadd.f32 %v1086_v56, %v157_v40 }
  0xb2   :  { %v272_v61 = vperm.slane %v186_v57, %v1084_v6  ;;  %v301_v8 = vperm.slane %v194_v39, %v1084_v6 }
  0xb4   :  { %v303_v17 = vsel %vm275_vm8, %v302_v12, %v301_v8 }
  0xb5   :  { %v305_v21 = vsel %vm279_vm9, %v304_v16, %v303_v17 }
  0xb7   :  { %v136_v58 = vpop.xlane.xlu1 %135 }
  0xb8   :  { %v187_v60 = vadd.f32 %v1086_v56, %v136_v58 }
  0xba   :  { %v274_v1 = vperm.slane %v187_v60, %v273_v59 }
  0xbc   :  { %v1092_v62 = vsel %vm275_vm8, %v274_v1, %v272_v61 }
  0xbf   :  { %v166_v2 = vpop.xlane.xlu0 %165  ;;  %v139_v15 = vpop.xlane.xlu1 %138 }
  0xc0   :  { %v197_v14 = vadd.f32 %v1086_v56, %v166_v2  ;;  %v188_v45 = vadd.f32 %v1086_v56, %v139_v15 }
  0xc2   :  { %v306_v18 = vperm.slane %v197_v14, %v281_v13  ;;  %v278_v46 = vperm.slane %v188_v45, %v277_v7 }
  0xc4   :  { %v307_v25 = vsel %vm283_vm10, %v306_v18, %v305_v21  ;;  %v280_v52 = vsel %vm279_vm9, %v278_v46, %v1092_v62  ;;  %v1149_v18 = vld [vmem:[%s1411_s4] ss:$2 sm:$0x3]  ;;  %v469_v21 = vunpack.c.l.s4 %v829_v20  ;;  %v589_v20 = vld [vmem:[%s1413_s6 + $0x198] sm:$0xff] }
  0xc5   :  { %v309_v34 = vsel %vm287_vm11, %v308_v26, %v307_v25 }
  0xc6   :  { %v311_v37 = vsel %vm291_vm12, %v310_v35, %v309_v34 }
  0xc7   :  { %v313_v41 = vsel %vm295_vm15, %v312_v38, %v311_v37 }
  0xc8   :  { %v178_v63 = vpop.xlane.xlu2 %177 }
  0xc9   :  { %v201_v28 = vadd.f32 %v1086_v56, %v178_v63 }
  0xcb   :  { %v314_v36 = vperm.slane %v201_v28, %v297_v27  ;;  %v1160_v28 = vld [vmem:[#allocation3] sm:$0x3] }
  0xcc   :  { %v527_v38 = vperm.slane %v1160_v28, 1  ;;  %v526_v46 = vperm.slane %v1160_v28, 0 }
  0xcd   :  { %v315_v42 = vsel %vm299_vm0, %v314_v36, %v313_v41 }
  0xd0   :  { %v145_v3 = vpop.xlane.xlu2 %144 }
  0xd1   :  { %v190_v47 = vadd.f32 %v1086_v56, %v145_v3 }
  0xd2   :  { %v221_v29 = vpop.permute.xlu0 %220 }
  0xd3   :  { %vm223_vm13 = vcmp.ge.s32.totalorder %v1084_v6, %v221_v29  ;;  %vm235_vm1 = vcmp.eq.s32.totalorder %v1084_v6, %v221_v29  ;;  %v286_v33 = vperm.slane %v190_v47, %v285_v19  ;;  %v1179_v47 = vrot.slane %v527_v38, 4  ;;  %v551_v38 = vld [vmem:[%s1413_s6 + $0x68] sm:$0xff] }
  0xd7   :  { %v229_v30 = vpop.permute.xlu1 %228 }
  0xd8   :  { %v154_v22 = vpop.xlane.xlu2 %153  ;;  %vm231_vm14 = vcmp.lt.s32.totalorder %v1084_v6, %v229_v30  ;;  %v482_v30 = vperm.slane %v1149_v18, 0 }
  0xd9   :  { %vm233_vm2 = vmand %vm223_vm13, %vm231_vm14  ;;  %v193_v5 = vadd.f32 %v1086_v56, %v154_v22  ;;  %v1154_v22 = vld [vmem:[%s1411_s4 + $0x1] ss:$2 sm:$0x3] }
  0xda   :  { %v513_v25 = vperm.slane %v1154_v22, 1  ;;  %v512_v36 = vperm.slane %v1154_v22, 0 }
  0xdb   :  { %v298_v61 = vperm.slane %v193_v5, %v297_v27  ;;  %v1158_v27 = vunpack.c.0.s8 %v469_v21  ;;  %v600_v5 = vld [vmem:[%s1413_s6 + $0x1f0] sm:$0xff]  ;;  %v554_v21 = vld [vmem:[%s1413_s6 + $0x80] sm:$0xff] }
  0xdc   :  { %v1166_v37 = vrot.slane %v513_v25, 4  ;;  %637 = vmatpush.msrb.mxu1 %v600_v5  ;;  %v552_v25 = vld [vmem:[%s1413_s6 + $0x70] sm:$0xff]  ;;  %v574_v5 = vld [vmem:[%s1413_s6 + $0x120] sm:$0xff] }
  0xe9   :  { %v249_v40 = vpop.permute.xlu2 %248 }
  0xea   :  { %vm251_vm3 = vcmp.eq.s32.totalorder %v249_v40, 1 }
  0xeb   :  { %vm253_vm4 = vmand %vm235_vm1, %vm251_vm3  ;;  %vm375_vm3 = vcmask 523264  }
  0xec   :  { %vm255_vm6 = vmor %vm233_vm2, %vm253_vm4 }
  0xed   :  { %v325_v43 = vsel %vm255_vm6, %v315_v42, -1e+30 }
  0xee   :  { %v330_v44 = vsel %vm326_vm5, %v325_v43, -inf }
  0xef   :  { %331 = vmax.xlane.f32.xlu1 %v330_v44 }
  0xf1   :  { %v246_v0 = vpop.permute.xlu2 %245 }
  0xfd   :  { %v148_v50 = vpop.xlane.xlu0 %147 }
  0xfe   :  { %v191_v54 = vadd.f32 %v1086_v56, %v148_v50 }
 0x100   :  { %v290_v59 = vperm.slane %v191_v54, %v289_v23  ;;  %v483_v23 = vperm.slane %v1149_v18, 1 }
 0x102   :  { %v142_v48 = vpop.xlane.xlu1 %141 }
 0x103   :  { %v189_v49 = vadd.f32 %v1086_v56, %v142_v48 }
 0x105   :  { %v282_v51 = vperm.slane %v189_v49, %v281_v13 }
 0x107   :  { %v284_v53 = vsel %vm283_vm10, %v282_v51, %v280_v52  ;;  %vm250_vm10 = vcmp.eq.s32.totalorder %v246_v0, 1  ;;  %v597_v0 = vld [vmem:[%s1413_s6 + $0x1d8] sm:$0xff] }
 0x108   :  { %v288_v55 = vsel %vm287_vm11, %v286_v33, %v284_v53 }
 0x109   :  { %v292_v1 = vsel %vm291_vm12, %v290_v59, %v288_v55  ;;  %v568_v55 = vld [vmem:[%s1413_s6 + $0xf0] sm:$0xff]  ;;  %v566_v59 = vld [vmem:[%s1413_s6 + $0xe0] sm:$0xff] }
 0x10a   :  { %v151_v57 = vpop.xlane.xlu1 %150  ;;  %617 = vmatpush.msrb.mxu0 %v568_v55  ;;  %v542_v55 = vld [vmem:[%s1413_s6 + $0x20] sm:$0xff] }
 0x10b   :  { %v192_v58 = vadd.f32 %v1086_v56, %v151_v57  ;;  %v569_v57 = vld [vmem:[%s1413_s6 + $0xf8] sm:$0xff] }
 0x10c   :  { %657 = vmatpush.msrb.mxu2 %v569_v57  ;;  %618 = vmatpush.msrb.mxu0 %v566_v59  ;;  %v543_v57 = vld [vmem:[%s1413_s6 + $0x28] sm:$0xff]  ;;  %v540_v59 = vld [vmem:[%s1413_s6 + $0x10] sm:$0xff] }
 0x10d   :  { %v294_v60 = vperm.slane %v192_v58, %v293_v31  ;;  %v1163_v31 = vrot.slane %v483_v23, 4  ;;  %v601_v58 = vld [vmem:[%s1413_s6 + $0x1f8] sm:$0xff]  ;;  %v586_v23 = vld [vmem:[%s1413_s6 + $0x180] sm:$0xff] }
 0x10e   :  { %677 = vmatpush.msrb.mxu3 %v601_v58  ;;  %v575_v58 = vld [vmem:[%s1413_s6 + $0x128] sm:$0xff] }
 0x10f   :  { %v296_v63 = vsel %vm295_vm15, %v294_v60, %v292_v1  ;;  %v598_v60 = vld [vmem:[%s1413_s6 + $0x1e0] sm:$0xff]  ;;  %v599_v1 = vld [vmem:[%s1413_s6 + $0x1e8] sm:$0xff] }
 0x110   :  { %v300_v62 = vsel %vm299_vm0, %v298_v61, %v296_v63  ;;  %v226_v39 = vpop.permute.xlu0 %225  ;;  %vm485_vm0 = vcmask 1043456   ;;  %v567_v61 = vld [vmem:[%s1413_s6 + $0xe8] sm:$0xff]  ;;  %v564_v63 = vld [vmem:[%s1413_s6 + $0xd0] sm:$0xff]  ;;  %638 = vmatpush.msrb.mxu1 %v598_v60  ;;  %678 = vmatpush.msrb.mxu3 %v599_v1  ;;  %v573_v1 = vld [vmem:[%s1413_s6 + $0x118] sm:$0xff] }
 0x111   :  { %vm230_vm7 = vcmp.lt.s32.totalorder %v1084_v6, %v226_v39  ;;  %v486_v42 = vsel %vm485_vm0, %v482_v30, %v1163_v31  ;;  %v515_v45 = vsel %vm485_vm0, %v512_v36, %v1166_v37  ;;  %v529_v52 = vsel %vm485_vm0, %v526_v46, %v1179_v47  ;;  %v565_v39 = vld [vmem:[%s1413_s6 + $0xd8] sm:$0xff]  ;;  %658 = vmatpush.msrb.mxu2 %v567_v61  ;;  %v572_v60 = vld [vmem:[%s1413_s6 + $0x110] sm:$0xff] }
 0x112   :  { %619 = vmatpush.msrb.mxu0 %v564_v63  ;;  %679 = vmatpush.msrb.mxu3 %v597_v0  ;;  %v541_v61 = vld [vmem:[%s1413_s6 + $0x18] sm:$0xff] }
 0x113   :  { %659 = vmatpush.msrb.mxu2 %v565_v39  ;;  %v570_v39 = vld [vmem:[%s1413_s6 + $0x100] sm:$0xff] }
 0x122   :  { %v218_v2 = vpop.permute.xlu1 %217 }
 0x123   :  { %vm222_vm8 = vcmp.ge.s32.totalorder %v1084_v6, %v218_v2  ;;  %vm234_vm9 = vcmp.eq.s32.totalorder %v1084_v6, %v218_v2  ;;  %v562_v2 = vld [vmem:[%s1413_s6 + $0xc0] sm:$0xff] }
 0x124   :  { %vm232_vm11 = vmand %vm222_vm8, %vm230_vm7  ;;  %620 = vmatpush.msrb.mxu0 %v562_v2  ;;  %v539_v2 = vld [vmem:[%s1413_s6 + $0x8] sm:$0xff] }
 0x125   :  { %vm252_vm13 = vmand %vm234_vm9, %vm250_vm10 }
 0x126   :  { %vm254_vm14 = vmor %vm232_vm11, %vm252_vm13 }
 0x127   :  { %v324_v56 = vsel %vm254_vm14, %v300_v62, -1e+30  ;;  %v596_v62 = vld [vmem:[%s1413_s6 + $0x1d0] sm:$0xff] }
 0x128   :  { %v327_v3 = vsel %vm326_vm5, %v324_v56, -inf  ;;  %639 = vmatpush.msrb.mxu1 %v596_v62  ;;  %v538_v62 = vld [vmem:[%s1413_s6] sm:$0xff] }
 0x129   :  { %328 = vmax.xlane.f32.xlu2 %v327_v3  ;;  %v563_v3 = vld [vmem:[%s1413_s6 + $0xc8] sm:$0xff] }
 0x12a   :  { %660 = vmatpush.msrb.mxu2 %v563_v3 }
 0x141   :  { %465 = vperm.xlu2 %761, %v922_v11  }
 0x149   :  { %762 = vset.pattern.permute.xlu2 %v828_v10 }
 0x14a   :  { %504 = vperm.xlu2 %762, %v916_v9  }
 0x162   :  { %v332_v4 = vpop.xlane.xlu1 %331 }
 0x163   :  { %v334_v7 = vsub.f32 %v325_v43, %v332_v4  ;;  %v595_v4 = vld [vmem:[%s1413_s6 + $0x1c8] sm:$0xff] }
 0x164   :  { %680 = vmatpush.msrb.mxu3 %v595_v4 }
 0x165   :  { %v337_v8 = vmul.f32 1.442695, %v334_v7  ;;  %v560_v7 = vld [vmem:[%s1413_s6 + $0xb0] sm:$0xff] }
 0x166   :  { %621 = vmatpush.msrb.mxu0 %v560_v7 }
 0x167   :  { %764 = vpow2.f32 %v337_v8  ;;  %v592_v8 = vld [vmem:[%s1413_s6 + $0x1b0] sm:$0xff] }
 0x16d   :  { %v765_v12 = vpop.eup %764 }
 0x16e   :  { %v342_v6 = vsel %vm326_vm5, %v765_v12, 0.0 }
 0x16f   :  { %343 = vadd.xlane.f32.xlu0 %v342_v6  ;;  %v593_v6 = vld [vmem:[%s1413_s6 + $0x1b8] sm:$0xff] }
 0x170   :  { %681 = vmatpush.msrb.mxu3 %v593_v6 }
 0x183   :  { %496 = vperm.xlu0 %760, %v922_v11  }
 0x19c   :  { %v329_v13 = vpop.xlane.xlu2 %328 }
 0x19d   :  { %v333_v14 = vsub.f32 %v324_v56, %v329_v13  ;;  %v594_v56 = vld [vmem:[%s1413_s6 + $0x1c0] sm:$0xff] }
 0x19e   :  { %640 = vmatpush.msrb.mxu1 %v594_v56  ;;  %v558_v13 = vld [vmem:[%s1413_s6 + $0xa0] sm:$0xff]  ;;  %v571_v56 = vld [vmem:[%s1413_s6 + $0x108] sm:$0xff] }
 0x19f   :  { %v335_v15 = vmul.f32 1.442695, %v333_v14  ;;  %v590_v14 = vld [vmem:[%s1413_s6 + $0x1a0] sm:$0xff]  ;;  %622 = vmatpush.msrb.mxu0 %v558_v13 }
 0x1a0   :  { %641 = vmatpush.msrb.mxu1 %v592_v8 }
 0x1a1   :  { %766 = vpow2.f32 %v335_v15  ;;  %v559_v15 = vld [vmem:[%s1413_s6 + $0xa8] sm:$0xff] }
 0x1a2   :  { %642 = vmatpush.msrb.mxu1 %v590_v14 }
 0x1a4   :  { %v466_v32 = vpop.permute.xlu2 %465 }
 0x1a5   :  { %v471_v40 = vperm.slane %v466_v32, %v1158_v27  ;;  %v585_v32 = vld [vmem:[%s1413_s6 + $0x178] sm:$0xff] }
 0x1a7   :  { %v1141_v16 = vpop.eup %766  ;;  %v491_v49 = vmul.f32 %v486_v42, %v471_v40  ;;  %v583_v40 = vld [vmem:[%s1413_s6 + $0x168] sm:$0xff]  ;;  %v580_v42 = vld [vmem:[%s1413_s6 + $0x150] sm:$0xff] }
 0x1a8   :  { %v339_v10 = vsel %vm326_vm5, %v1141_v16, 0.0 }
 0x1a9   :  { %340 = vadd.xlane.f32.xlu1 %v339_v10  ;;  %v591_v10 = vld [vmem:[%s1413_s6 + $0x1a8] sm:$0xff] }
 0x1aa   :  { %682 = vmatpush.msrb.mxu3 %v591_v10  ;;  %v516_v10 = vsel %vm485_vm0, %v1166_v37, %v512_v36 }
 0x1ac   :  { %683 = vmatpush.msrb.mxu3 %v589_v20 }
 0x1c2   :  { %474 = vperm.xlu1 %759, %v916_v9  }
 0x1e2   :  { %v344_v17 = vpop.xlane.xlu0 %343 }
 0x1e3   :  { %768 = vrcp.f32 %v344_v17  ;;  %v371_v9 = vand.u32 2147483648, %v344_v17  ;;  %v369_v29 = vand.u32 2147483647, %v344_v17  ;;  %vm365_vm15 = vweird.f32 %v344_v17 }
 0x1e5   :  { %v372_v35 = vor.u32 1.1754944e-38, %v371_v9  ;;  %vm370_vm2 = vcmp.eq.f32.partialorder %v369_v29, 8.507059e+37  ;;  %v587_v9 = vld [vmem:[%s1413_s6 + $0x188] sm:$0xff]  ;;  %v553_v29 = vld [vmem:[%s1413_s6 + $0x78] sm:$0xff] }
 0x1e6   :  { %684 = vmatpush.msrb.mxu3 %v587_v9 }
 0x1e8   :  { %685 = vmatpush.msrb.mxu3 %v585_v32 }
 0x1e9   :  { %v769_v11 = vpop.eup %768 }
 0x1ea   :  { %v361_v19 = vmul.f32 %v769_v11, %v344_v17  ;;  %vm366_vm12 = vweird.f32 %v769_v11  ;;  %v556_v17 = vld [vmem:[%s1413_s6 + $0x90] sm:$0xff]  ;;  %686 = vmatpush.msrb.mxu3 %v583_v40 }
 0x1eb   :  { %vm367_vm1 = vmor %vm365_vm15, %vm366_vm12  ;;  %623 = vmatpush.msrb.mxu0 %v556_v17  ;;  %v505_v17 = vpop.permute.xlu2 %504 }
 0x1ec   :  { %v362_v24 = vsub.f32 1.0, %v361_v19  ;;  %v557_v19 = vld [vmem:[%s1413_s6 + $0x98] sm:$0xff]  ;;  %v510_v20 = vperm.slane %v505_v17, %v1158_v27 }
 0x1ed   :  { %624 = vmatpush.msrb.mxu0 %v554_v21 }
 0x1ee   :  { %v363_v26 = vmul.f32 %v769_v11, %v362_v24  ;;  %v555_v24 = vld [vmem:[%s1413_s6 + $0x88] sm:$0xff] }
 0x1ef   :  { %625 = vmatpush.msrb.mxu0 %v552_v25 }
 0x1f0   :  { %v364_v34 = vadd.f32 %v769_v11, %v363_v26  ;;  %v584_v26 = vld [vmem:[%s1413_s6 + $0x170] sm:$0xff] }
 0x1f2   :  { %v368_v41 = vsel %vm367_vm1, %v769_v11, %v364_v34  ;;  %v588_v11 = vld [vmem:[%s1413_s6 + $0x190] sm:$0xff]  ;;  %v550_v34 = vld [vmem:[%s1413_s6 + $0x60] sm:$0xff] }
 0x1f3   :  { %v373_v43 = vsel %vm370_vm2, %v372_v35, %v368_v41  ;;  %643 = vmatpush.msrb.mxu1 %v588_v11  ;;  %v582_v35 = vld [vmem:[%s1413_s6 + $0x160] sm:$0xff]  ;;  %626 = vmatpush.msrb.mxu0 %v550_v34  ;;  %v548_v41 = vld [vmem:[%s1413_s6 + $0x50] sm:$0xff]  ;;  %v487_v11 = vsel %vm485_vm0, %v1163_v31, %v482_v30 }
 0x1f4   :  { %v374_v44 = vmul.f32 %v765_v12, %v373_v43  ;;  %v561_v12 = vld [vmem:[%s1413_s6 + $0xb8] sm:$0xff]  ;;  %v488_v21 = vrot.slane %v487_v11, 4 }
 0x1f5   :  { %v497_v48 = vpop.permute.xlu0 %496  ;;  %661 = vmatpush.msrb.mxu2 %v561_v12  ;;  %644 = vmatpush.msrb.mxu1 %v586_v23  ;;  %v549_v43 = vld [vmem:[%s1413_s6 + $0x58] sm:$0xff] }
 0x1f6   :  { %v502_v50 = vperm.slane %v497_v48, %v1158_v27  ;;  %736 = vmatmul.msk.f32.vlgmr.msra.gmra.mxu2 %vm375_vm3, %v374_v44  ;;  %737 = vmatmul.msk.f32.vlgmr.msra.gmra.mxu3 %vm375_vm3, %v374_v44  ;;  %v546_v48 = vld [vmem:[%s1413_s6 + $0x40] sm:$0xff] }
 0x1f7   :  { %662 = vmatpush.msrb.mxu2 %v559_v15  ;;  %645 = vmatpush.msrb.mxu1 %v584_v26 }
 0x1f8   :  { %v520_v51 = vmul.f32 %v515_v45, %v502_v50  ;;  %627 = vmatpush.msrb.mxu0 %v548_v41  ;;  %v581_v45 = vld [vmem:[%s1413_s6 + $0x158] sm:$0xff]  ;;  %v547_v50 = vld [vmem:[%s1413_s6 + $0x48] sm:$0xff] }
 0x1f9   :  { %663 = vmatpush.msrb.mxu2 %v557_v19  ;;  %646 = vmatpush.msrb.mxu1 %v582_v35  ;;  %v517_v19 = vrot.slane %v516_v10, 4 }
 0x1fa   :  { %v522_v33 = vadd.f32 %v520_v51, %v491_v49  ;;  %687 = vmatpush.msrb.mxu3 %v581_v45  ;;  %v578_v49 = vld [vmem:[%s1413_s6 + $0x140] sm:$0xff]  ;;  %628 = vmatpush.msrb.mxu0 %v546_v48  ;;  %v579_v51 = vld [vmem:[%s1413_s6 + $0x148] sm:$0xff] }
 0x1fb   :  { %664 = vmatpush.msrb.mxu2 %v555_v24  ;;  %647 = vmatpush.msrb.mxu1 %v580_v42  ;;  %v521_v36 = vmul.f32 %v517_v19, %v510_v20 }
 0x1fc   :  { %v534_v53 = vadd.f32 %v529_v52, %v522_v33  ;;  %688 = vmatpush.msrb.mxu3 %v579_v51  ;;  %v544_v52 = vld [vmem:[%s1413_s6 + $0x30] sm:$0xff] }
 0x1fd   :  { %665 = vmatpush.msrb.mxu2 %v553_v29  ;;  %648 = vmatpush.msrb.mxu1 %v578_v49  ;;  %v576_v33 = vld [vmem:[%s1413_s6 + $0x130] sm:$0xff] }
 0x1fe   :  { %v536_v54 = vmax.f32 %v534_v53, 0.0  ;;  %v545_v53 = vld [vmem:[%s1413_s6 + $0x38] sm:$0xff]  ;;  %629 = vmatpush.msrb.mxu0 %v544_v52 }
 0x1ff   :  { %666 = vmatpush.msrb.mxu2 %v551_v38  ;;  %649 = vmatpush.msrb.mxu1 %v576_v33 }
 0x200   :  { %610 = vst [vmem:[#allocation1] ss:$2 sm:$0xff] %v536_v54  ;;  %v577_v54 = vld [vmem:[%s1413_s6 + $0x138] sm:$0xff]  ;;  %630 = vmatpush.msrb.mxu0 %v542_v55 }
 0x201   :  { %667 = vmatpush.msrb.mxu2 %v549_v43  ;;  %689 = vmatpush.msrb.mxu3 %v577_v54 }
 0x202   :  { %650 = vmatpush.msrb.mxu1 %v574_v5  ;;  %631 = vmatpush.msrb.mxu0 %v540_v59 }
 0x203   :  { %668 = vmatpush.msrb.mxu2 %v547_v50  ;;  %690 = vmatpush.msrb.mxu3 %v575_v58 }
 0x204   :  { %651 = vmatpush.msrb.mxu1 %v572_v60  ;;  %632 = vmatpush.msrb.mxu0 %v538_v62 }
 0x205   :  { %669 = vmatpush.msrb.mxu2 %v545_v53  ;;  %691 = vmatpush.msrb.mxu3 %v573_v1 }
 0x206   :  { %652 = vmatpush.msrb.mxu1 %v570_v39 }
 0x207   :  { %670 = vmatpush.msrb.mxu2 %v543_v57  ;;  %692 = vmatpush.msrb.mxu3 %v571_v56 }
 0x209   :  { %671 = vmatpush.msrb.mxu2 %v541_v61 }
 0x20b   :  { %672 = vmatpush.msrb.mxu2 %v539_v2 }
 0x21c   :  { %v341_v44 = vpop.xlane.xlu1 %340 }
 0x21d   :  { %770 = vrcp.f32 %v341_v44  ;;  %v356_v4 = vand.u32 2147483648, %v341_v44  ;;  %v354_v8 = vand.u32 2147483647, %v341_v44  ;;  %vm350_vm5 = vweird.f32 %v341_v44 }
 0x21f   :  { %v357_v6 = vor.u32 1.1754944e-38, %v356_v4  ;;  %vm355_vm7 = vcmp.eq.f32.partialorder %v354_v8, 8.507059e+37 }
 0x223   :  { %v771_v63 = vpop.eup %770 }
 0x224   :  { %v346_v0 = vmul.f32 %v771_v63, %v341_v44  ;;  %vm351_vm4 = vweird.f32 %v771_v63 }
 0x225   :  { %vm352_vm6 = vmor %vm350_vm5, %vm351_vm4 }
 0x226   :  { %v347_v3 = vsub.f32 1.0, %v346_v0 }
 0x228   :  { %v348_v7 = vmul.f32 %v771_v63, %v347_v3 }
 0x22a   :  { %v349_v12 = vadd.f32 %v771_v63, %v348_v7 }
 0x22c   :  { %v353_v13 = vsel %vm352_vm6, %v771_v63, %v349_v12 }
 0x22d   :  { %v358_v14 = vsel %vm355_vm7, %v357_v6, %v353_v13 }
 0x22e   :  { %v359_v15 = vmul.f32 %v1141_v16, %v358_v14  ;;  %v530_v16 = vsel %vm485_vm0, %v1179_v47, %v526_v46  ;;  %v602_v46 = vld [vmem:[#allocation5] sm:$0x3] }
 0x22f   :  { %v531_v23 = vrot.slane %v530_v16, 4  ;;  %v604_v32 = vperm.slane %v602_v46, 0  ;;  %v605_v34 = vperm.slane %v602_v46, 1 }
 0x230   :  { %734 = vmatmul.msk.f32.vlgmr.msra.gmra.mxu0 %vm375_vm3, %v359_v15  ;;  %735 = vmatmul.msk.f32.vlgmr.msra.gmra.mxu1 %vm375_vm3, %v359_v15 }
 0x234   :  { %v475_v22 = vpop.permute.xlu1 %474 }
 0x235   :  { %v480_v37 = vperm.slane %v475_v22, %v1158_v27 }
 0x237   :  { %v492_v24 = vmul.f32 %v488_v21, %v480_v37 }
 0x239   :  { %v523_v9 = vadd.f32 %v521_v36, %v492_v24 }
 0x23b   :  { %v535_v18 = vadd.f32 %v531_v23, %v523_v9 }
 0x23d   :  { %v537_v25 = vmax.f32 %v535_v18, 0.0 }
 0x23f   :  { %612 = vst [vmem:[#allocation1 + $0x1] ss:$2 sm:$0xff] %v537_v25 }
 0x246   :  { %v613_v30 = vld.sshfl [vmem:[#allocation1] sm:$0xff pattern:$0x75316420]  ;;  %v614_v31 = vld.sshfl [vmem:[#allocation1 + $0x8] sm:$0xff pattern:$0x75316420] }
 0x247   :  { %633 = vmatmul.f32.vlgmr.msrb.gmra.mxu0 %v613_v30  ;;  %653 = vmatmul.f32.vlgmr.msrb.gmra.mxu1 %v614_v31 }
 0x248   :  { %673 = vmatmul.f32.vlgmr.msrb.gmra.mxu2 %v613_v30  ;;  %693 = vmatmul.f32.vlgmr.msrb.gmra.mxu3 %v614_v31 }
 0x279   :  { %v439_v26 = vpop.f32.mrf.mxu2  ;;  %v459_v29 = vpop.f32.mrf.mxu3 }
 0x27a   :  { %v702_v45 = vrot.slane %v459_v29, 4 }
 0x27c   :  { %v704_v54 = vsel %vm485_vm0, %v439_v26, %v702_v45 }
 0x2ad   :  { %v396_v28 = vpop.f32.mrf.mxu0  ;;  %v416_v47 = vpop.f32.mrf.mxu1 }
 0x2ae   :  { %v701_v42 = vrot.slane %v416_v47, 4 }
 0x2b0   :  { %v703_v50 = vsel %vm485_vm0, %v396_v28, %v701_v42 }
 0x2c4   :  { %v634_v27 = vpop.f32.mrf.mxu0  ;;  %v654_v44 = vpop.f32.mrf.mxu1 }
 0x2c5   :  { %v635_v38 = vadd.f32 %v634_v27, %v604_v32 }
 0x2c7   :  { %v655_v48 = vadd.f32 %v654_v44, %v635_v38 }
 0x2cb   :  { %v674_v35 = vpop.f32.mrf.mxu2  ;;  %v694_v41 = vpop.f32.mrf.mxu3 }
 0x2cc   :  { %v675_v40 = vadd.f32 %v674_v35, %v605_v34 }
 0x2ce   :  { %v695_v43 = vadd.f32 %v694_v41, %v675_v40 }
 0x2d0   :  { %v709_v49 = vrot.slane %v695_v43, 4 }
 0x2d2   :  { %v710_v51 = vsel %vm485_vm0, %v655_v48, %v709_v49  ;;  %v711_v52 = vsel %vm485_vm0, %v709_v49, %v655_v48 }
 0x2d3   :  { %v712_v33 = vrot.slane %v711_v52, 4  ;;  %v715_v53 = vadd.f32 %v710_v51, %v703_v50 }
 0x2d5   :  { %v716_v55 = vadd.f32 %v712_v33, %v704_v54  ;;  %719 = vst [vmem:[#allocation1] ss:$2 sm:$0xff] %v715_v53 }
 0x2d7   :  { %721 = vst [vmem:[#allocation1 + $0x1] ss:$2 sm:$0xff] %v716_v55 }
 0x2de   :  { %v722_v5 = vld.sshfl [vmem:[#allocation1] sm:$0xff pattern:$0x75316420]  ;;  %v723_v57 = vld.sshfl [vmem:[#allocation1 + $0x8] sm:$0xff pattern:$0x75316420] }
 0x2df   :  { %726 = vst [vmem:[%s1415_s8] sm:$0xff] %v722_v5 }
 0x2e0   :  { %727 = vst [vmem:[%s1415_s8 + $0x8] sm:$0xff] %v723_v57 }
 0x2e1   :  { %732 = vsyncpa [#allocation4], 1 }
 0x2e2   :  { %733 = vsyncpa [#allocation6], 1 }

// kernel: span_refining_decoder_forward.5
= control target key start
LH: loop header
LB: loop body
LE: loop exit
PB: predicated region body
PF: predicated region fallthrough
CT: control target
= control target key end

     0   :  { %s5840_s0 = inlined_call_operand.vmem [shape: f32[8,256], index: 0, kind: input, shape index: {}]   ;;  %s5841_s1 = inlined_call_operand.vmem [shape: f32[8,256], index: 1, kind: input, shape index: {}]   ;;  %s5842_s2 = inlined_call_operand.vmem [shape: f32[2,4,2], index: 2, kind: input, shape index: {}]   ;;  %s5843_s3 = inlined_call_operand.vmem [shape: f32[2,1024], index: 3, kind: input, shape index: {}]   ;;  %s5844_s4 = inlined_call_operand.vmem [shape: f32[256,256], index: 4, kind: input, shape index: {}]   ;;  %s5845_s5 = inlined_call_operand.vmem [shape: f32[1,256], index: 5, kind: input, shape index: {}]   ;;  %s5846_s6 = inlined_call_operand.vmem [shape: f32[256,256], index: 6, kind: input, shape index: {}]   ;;  %s5847_s7 = inlined_call_operand.vmem [shape: f32[1,256], index: 7, kind: input, shape index: {}]   ;;  %s5848_s8 = inlined_call_operand.vmem [shape: f32[1,256], index: 8, kind: input, shape index: {}]   ;;  %s5849_s9 = inlined_call_operand.vmem [shape: f32[1,256], index: 9, kind: input, shape index: {}]   ;;  %s5850_s10 = inlined_call_operand.vmem [shape: f32[256,256], index: 10, kind: input, shape index: {}]   ;;  %s5851_s11 = inlined_call_operand.vmem [shape: f32[1,256], index: 11, kind: input, shape index: {}]   ;;  %s5852_s12 = inlined_call_operand.vmem [shape: f32[1,256], index: 12, kind: input, shape index: {}]   ;;  %s5853_s13 = inlined_call_operand.vmem [shape: f32[1,256], index: 13, kind: input, shape index: {}]   ;;  %s5854_s14 = inlined_call_operand.vmem [shape: f32[1024,512], index: 14, kind: input, shape index: {}]   ;;  %s5855_s15 = inlined_call_operand.vmem [shape: f32[1,512], index: 15, kind: input, shape index: {}]   ;;  %s5856_s16 = inlined_call_operand.vmem [shape: f32[256,256], index: 16, kind: input, shape index: {}]   ;;  %s5857_s17 = inlined_call_operand.vmem [shape: f32[1,256], index: 17, kind: input, shape index: {}]   ;;  %s5858_s18 = inlined_call_operand.vmem [shape: f32[256,256], index: 18, kind: input, shape index: {}]   ;;  %s5859_s19 = inlined_call_operand.vmem [shape: f32[1,256], index: 19, kind: input, shape index: {}]   ;;  %s5860_s20 = inlined_call_operand.vmem [shape: f32[256,2], index: 20, kind: input, shape index: {}]   ;;  %s5861_s21 = inlined_call_operand.hbm [shape: f32[1,2], index: 21, kind: input, shape index: {}]   ;;  %s5862_s22 = inlined_call_operand.vmem [shape: f32[2,4,2], index: 22, kind: output, shape index: {0}]   ;;  %s5863_s23 = inlined_call_operand.vmem [shape: f32[8,256], index: 23, kind: output, shape index: {1}]  }
   0x1   :  { %5875 = sst [smem:[#allocation10_spill]] %s5840_s0 }
   0x2   :  { %5876 = sst [smem:[#allocation11_spill]] %s5841_s1 }
   0x3   :  { %5877 = sst [smem:[#allocation12_spill]] %s5842_s2 }
   0x4   :  { %5878 = sst [smem:[#allocation13_spill]] %s5843_s3 }
   0x5   :  { %5879 = sst [smem:[#allocation14_spill]] %s5844_s4 }
   0x6   :  { %5880 = sst [smem:[#allocation15_spill]] %s5845_s5 }
   0x7   :  { %5881 = sst [smem:[#allocation16_spill]] %s5846_s6 }
   0x8   :  { %5882 = sst [smem:[#allocation17_spill]] %s5847_s7 }
   0x9   :  { %29 = vsyncpa [#allocation3], 0  ;;  %s77_s24 = sshll.u32 %s5861_s21, 4  ;;  %s2559_s25 = smov [#allocation2]   ;;  %s78_s24 = int_to_ptr.hbm [resolvable:$true] %s77_s24 }
   0xa   :  { %s79_s5 = sshll.u32 %s2559_s25, 4  ;;  %s80_s5 = int_to_ptr.vmem [resolvable:$true] %s79_s5 }
   0xb   :  { %82 = dma.hbm_to_vmem [thread:$0]  %s78_s24, 16, %s80_s5, [#allocation3]  }
   0xc   :  { %2557 = dma.done.wait [#allocation3], 16  }
   0xd   :  { %2558 = vsyncadd [#allocation3], 4294967280  ;;  %s5883_s2 = sld [smem:[#allocation14_spill]]  ;;  %vm1959_vm12 = vcmask 1041409   ;;  %vm1957_vm13 = vcmask 1040384  }
   0xe   :  { %s5884_s7 = sld [smem:[#allocation10_spill]] }
   0xf   :  { %s5885_s25 = sld [smem:[#allocation16_spill]] }
  0x10   :  { %s5887_s4 = sld [smem:[#allocation17_spill]] }
  0x11   :  { %s5888_s5 = sld [smem:[#allocation11_spill]] }
  0x12   :  { %s5899_s21 = sld [smem:[#allocation13_spill]] }
  0x13   :  { %v124_v0 = vld [vmem:[%s5883_s2 + $0xf8] sm:$0xff]  ;;  %v122_v1 = vld [vmem:[%s5883_s2 + $0xe8] sm:$0xff]  ;;  %v123_v3 = vld [vmem:[%s5883_s2 + $0xf0] sm:$0xff] }
  0x14   :  { %v156_v2 = vld [vmem:[%s5883_s2 + $0x1f8] sm:$0xff]  ;;  %203 = vmatpush.msra.mxu2 %v124_v0  ;;  %v154_v4 = vld [vmem:[%s5883_s2 + $0x1e8] sm:$0xff]  ;;  %163 = vmatpush.msra.mxu0 %v123_v3  ;;  %v121_v6 = vld [vmem:[%s5883_s2 + $0xe0] sm:$0xff] }
  0x15   :  { %223 = vmatpush.msra.mxu3 %v156_v2  ;;  %v120_v5 = vld [vmem:[%s5883_s2 + $0xd8] sm:$0xff]  ;;  %v155_v7 = vld [vmem:[%s5883_s2 + $0x1f0] sm:$0xff]  ;;  %v153_v10 = vld [vmem:[%s5883_s2 + $0x1e0] sm:$0xff] }
  0x16   :  { %204 = vmatpush.msra.mxu2 %v122_v1  ;;  %v152_v8 = vld [vmem:[%s5883_s2 + $0x1d8] sm:$0xff]  ;;  %v119_v9 = vld [vmem:[%s5883_s2 + $0xd0] sm:$0xff]  ;;  %164 = vmatpush.msra.mxu0 %v121_v6  ;;  %v118_v11 = vld [vmem:[%s5883_s2 + $0xc8] sm:$0xff] }
  0x17   :  { %224 = vmatpush.msra.mxu3 %v154_v4  ;;  %183 = vmatpush.msra.mxu1 %v155_v7  ;;  %v150_v12 = vld [vmem:[%s5883_s2 + $0x1c8] sm:$0xff]  ;;  %v117_v13 = vld [vmem:[%s5883_s2 + $0xc0] sm:$0xff]  ;;  %v151_v14 = vld [vmem:[%s5883_s2 + $0x1d0] sm:$0xff] }
  0x18   :  { %205 = vmatpush.msra.mxu2 %v120_v5  ;;  %165 = vmatpush.msra.mxu0 %v119_v9  ;;  %v116_v15 = vld [vmem:[%s5883_s2 + $0xb8] sm:$0xff]  ;;  %v115_v17 = vld [vmem:[%s5883_s2 + $0xb0] sm:$0xff]  ;;  %v149_v18 = vld [vmem:[%s5883_s2 + $0x1c0] sm:$0xff] }
  0x19   :  { %225 = vmatpush.msra.mxu3 %v152_v8  ;;  %184 = vmatpush.msra.mxu1 %v153_v10  ;;  %v148_v16 = vld [vmem:[%s5883_s2 + $0x1b8] sm:$0xff]  ;;  %v114_v19 = vld [vmem:[%s5883_s2 + $0xa8] sm:$0xff]  ;;  %v113_v21 = vld [vmem:[%s5883_s2 + $0xa0] sm:$0xff] }
  0x1a   :  { %206 = vmatpush.msra.mxu2 %v118_v11  ;;  %166 = vmatpush.msra.mxu0 %v117_v13  ;;  %v146_v20 = vld [vmem:[%s5883_s2 + $0x1a8] sm:$0xff]  ;;  %v147_v22 = vld [vmem:[%s5883_s2 + $0x1b0] sm:$0xff]  ;;  %v112_v23 = vld [vmem:[%s5883_s2 + $0x98] sm:$0xff] }
  0x1b   :  { %226 = vmatpush.msra.mxu3 %v150_v12  ;;  %185 = vmatpush.msra.mxu1 %v151_v14  ;;  %v144_v24 = vld [vmem:[%s5883_s2 + $0x198] sm:$0xff]  ;;  %v111_v25 = vld [vmem:[%s5883_s2 + $0x90] sm:$0xff]  ;;  %v145_v26 = vld [vmem:[%s5883_s2 + $0x1a0] sm:$0xff] }
  0x1c   :  { %207 = vmatpush.msra.mxu2 %v116_v15  ;;  %167 = vmatpush.msra.mxu0 %v115_v17  ;;  %v110_v27 = vld [vmem:[%s5883_s2 + $0x88] sm:$0xff]  ;;  %v109_v29 = vld [vmem:[%s5883_s2 + $0x80] sm:$0xff]  ;;  %v143_v30 = vld [vmem:[%s5883_s2 + $0x190] sm:$0xff] }
  0x1d   :  { %227 = vmatpush.msra.mxu3 %v148_v16  ;;  %186 = vmatpush.msra.mxu1 %v149_v18  ;;  %v142_v28 = vld [vmem:[%s5883_s2 + $0x188] sm:$0xff]  ;;  %v108_v31 = vld [vmem:[%s5883_s2 + $0x78] sm:$0xff]  ;;  %v107_v33 = vld [vmem:[%s5883_s2 + $0x70] sm:$0xff] }
  0x1e   :  { %208 = vmatpush.msra.mxu2 %v114_v19  ;;  %168 = vmatpush.msra.mxu0 %v113_v21  ;;  %v140_v32 = vld [vmem:[%s5883_s2 + $0x178] sm:$0xff]  ;;  %v141_v34 = vld [vmem:[%s5883_s2 + $0x180] sm:$0xff]  ;;  %v106_v35 = vld [vmem:[%s5883_s2 + $0x68] sm:$0xff] }
  0x1f   :  { %228 = vmatpush.msra.mxu3 %v146_v20  ;;  %187 = vmatpush.msra.mxu1 %v147_v22  ;;  %v138_v36 = vld [vmem:[%s5883_s2 + $0x168] sm:$0xff]  ;;  %v105_v37 = vld [vmem:[%s5883_s2 + $0x60] sm:$0xff]  ;;  %v139_v38 = vld [vmem:[%s5883_s2 + $0x170] sm:$0xff] }
  0x20   :  { %209 = vmatpush.msra.mxu2 %v112_v23  ;;  %169 = vmatpush.msra.mxu0 %v111_v25  ;;  %v104_v39 = vld [vmem:[%s5883_s2 + $0x58] sm:$0xff]  ;;  %v103_v41 = vld [vmem:[%s5883_s2 + $0x50] sm:$0xff]  ;;  %v137_v42 = vld [vmem:[%s5883_s2 + $0x160] sm:$0xff] }
  0x21   :  { %229 = vmatpush.msra.mxu3 %v144_v24  ;;  %188 = vmatpush.msra.mxu1 %v145_v26  ;;  %v136_v40 = vld [vmem:[%s5883_s2 + $0x158] sm:$0xff]  ;;  %v102_v43 = vld [vmem:[%s5883_s2 + $0x48] sm:$0xff]  ;;  %v101_v45 = vld [vmem:[%s5883_s2 + $0x40] sm:$0xff] }
  0x22   :  { %210 = vmatpush.msra.mxu2 %v110_v27  ;;  %170 = vmatpush.msra.mxu0 %v109_v29  ;;  %v134_v44 = vld [vmem:[%s5883_s2 + $0x148] sm:$0xff]  ;;  %v135_v46 = vld [vmem:[%s5883_s2 + $0x150] sm:$0xff]  ;;  %v100_v47 = vld [vmem:[%s5883_s2 + $0x38] sm:$0xff] }
  0x23   :  { %230 = vmatpush.msra.mxu3 %v142_v28  ;;  %189 = vmatpush.msra.mxu1 %v143_v30  ;;  %v132_v48 = vld [vmem:[%s5883_s2 + $0x138] sm:$0xff]  ;;  %v99_v49 = vld [vmem:[%s5883_s2 + $0x30] sm:$0xff]  ;;  %v133_v50 = vld [vmem:[%s5883_s2 + $0x140] sm:$0xff] }
  0x24   :  { %211 = vmatpush.msra.mxu2 %v108_v31  ;;  %171 = vmatpush.msra.mxu0 %v107_v33  ;;  %v98_v51 = vld [vmem:[%s5883_s2 + $0x28] sm:$0xff]  ;;  %v97_v53 = vld [vmem:[%s5883_s2 + $0x20] sm:$0xff]  ;;  %v131_v54 = vld [vmem:[%s5883_s2 + $0x130] sm:$0xff] }
  0x25   :  { %231 = vmatpush.msra.mxu3 %v140_v32  ;;  %190 = vmatpush.msra.mxu1 %v141_v34  ;;  %v130_v52 = vld [vmem:[%s5883_s2 + $0x128] sm:$0xff]  ;;  %v96_v55 = vld [vmem:[%s5883_s2 + $0x18] sm:$0xff]  ;;  %v95_v57 = vld [vmem:[%s5883_s2 + $0x10] sm:$0xff] }
  0x26   :  { %212 = vmatpush.msra.mxu2 %v106_v35  ;;  %172 = vmatpush.msra.mxu0 %v105_v37  ;;  %v128_v56 = vld [vmem:[%s5883_s2 + $0x118] sm:$0xff]  ;;  %v129_v58 = vld [vmem:[%s5883_s2 + $0x120] sm:$0xff]  ;;  %v94_v59 = vld [vmem:[%s5883_s2 + $0x8] sm:$0xff] }
  0x27   :  { %232 = vmatpush.msra.mxu3 %v138_v36  ;;  %191 = vmatpush.msra.mxu1 %v139_v38  ;;  %v126_v60 = vld [vmem:[%s5883_s2 + $0x108] sm:$0xff]  ;;  %v87_v61 = vld [vmem:[%s5884_s7] sm:$0xff]  ;;  %v127_v0 = vld [vmem:[%s5883_s2 + $0x110] sm:$0xff] }
  0x28   :  { %213 = vmatpush.msra.mxu2 %v104_v39  ;;  %173 = vmatpush.msra.mxu0 %v103_v41  ;;  %v88_v62 = vld [vmem:[%s5884_s7 + $0x8] sm:$0xff]  ;;  %v93_v63 = vld [vmem:[%s5883_s2] sm:$0xff]  ;;  %v274_v1 = vld [vmem:[%s5885_s25 + $0xf8] sm:$0xff]  ;;  %s5902_s7 = sld [smem:[#allocation12_spill]] }
  0x29   :  { %233 = vmatpush.msra.mxu3 %v136_v40  ;;  %192 = vmatpush.msra.mxu1 %v137_v42  ;;  %v125_v2 = vld [vmem:[%s5883_s2 + $0x100] sm:$0xff]  ;;  %v273_v3 = vld [vmem:[%s5885_s25 + $0xf0] sm:$0xff]  ;;  %v272_v4 = vld [vmem:[%s5885_s25 + $0xe8] sm:$0xff]  ;;  %s5886_s2 = sld [smem:[#allocation15_spill]] }
  0x2a   :  { %214 = vmatpush.msra.mxu2 %v102_v43  ;;  %174 = vmatpush.msra.mxu0 %v101_v45  ;;  %v271_v5 = vld [vmem:[%s5885_s25 + $0xe0] sm:$0xff]  ;;  %v305_v6 = vld [vmem:[%s5885_s25 + $0x1f0] sm:$0xff]  ;;  %v306_v7 = vld [vmem:[%s5885_s25 + $0x1f8] sm:$0xff] }
  0x2b   :  { %234 = vmatpush.msra.mxu3 %v134_v44  ;;  %193 = vmatpush.msra.mxu1 %v135_v46  ;;  %v270_v8 = vld [vmem:[%s5885_s25 + $0xd8] sm:$0xff]  ;;  %v269_v9 = vld [vmem:[%s5885_s25 + $0xd0] sm:$0xff]  ;;  %v303_v10 = vld [vmem:[%s5885_s25 + $0x1e0] sm:$0xff] }
  0x2c   :  { %215 = vmatpush.msra.mxu2 %v100_v47  ;;  %175 = vmatpush.msra.mxu0 %v99_v49  ;;  %v304_v11 = vld [vmem:[%s5885_s25 + $0x1e8] sm:$0xff]  ;;  %v267_v13 = vld [vmem:[%s5885_s25 + $0xc0] sm:$0xff]  ;;  %v301_v14 = vld [vmem:[%s5885_s25 + $0x1d0] sm:$0xff] }
  0x2d   :  { %235 = vmatpush.msra.mxu3 %v132_v48  ;;  %194 = vmatpush.msra.mxu1 %v133_v50  ;;  %v268_v12 = vld [vmem:[%s5885_s25 + $0xc8] sm:$0xff]  ;;  %v302_v15 = vld [vmem:[%s5885_s25 + $0x1d8] sm:$0xff]  ;;  %v265_v17 = vld [vmem:[%s5885_s25 + $0xb0] sm:$0xff] }
  0x2e   :  { %216 = vmatpush.msra.mxu2 %v98_v51  ;;  %176 = vmatpush.msra.mxu0 %v97_v53  ;;  %v266_v16 = vld [vmem:[%s5885_s25 + $0xb8] sm:$0xff]  ;;  %v299_v18 = vld [vmem:[%s5885_s25 + $0x1c0] sm:$0xff]  ;;  %v300_v19 = vld [vmem:[%s5885_s25 + $0x1c8] sm:$0xff] }
  0x2f   :  { %236 = vmatpush.msra.mxu3 %v130_v52  ;;  %195 = vmatpush.msra.mxu1 %v131_v54  ;;  %v264_v20 = vld [vmem:[%s5885_s25 + $0xa8] sm:$0xff]  ;;  %v263_v21 = vld [vmem:[%s5885_s25 + $0xa0] sm:$0xff]  ;;  %v297_v22 = vld [vmem:[%s5885_s25 + $0x1b0] sm:$0xff] }
  0x30   :  { %217 = vmatpush.msra.mxu2 %v96_v55  ;;  %177 = vmatpush.msra.mxu0 %v95_v57  ;;  %v298_v23 = vld [vmem:[%s5885_s25 + $0x1b8] sm:$0xff]  ;;  %v261_v25 = vld [vmem:[%s5885_s25 + $0x90] sm:$0xff]  ;;  %v295_v26 = vld [vmem:[%s5885_s25 + $0x1a0] sm:$0xff] }
  0x31   :  { %237 = vmatpush.msra.mxu3 %v128_v56  ;;  %196 = vmatpush.msra.mxu1 %v129_v58  ;;  %v262_v24 = vld [vmem:[%s5885_s25 + $0x98] sm:$0xff]  ;;  %v296_v27 = vld [vmem:[%s5885_s25 + $0x1a8] sm:$0xff]  ;;  %v259_v29 = vld [vmem:[%s5885_s25 + $0x80] sm:$0xff] }
  0x32   :  { %218 = vmatpush.msra.mxu2 %v94_v59  ;;  %178 = vmatpush.msra.mxu0 %v93_v63  ;;  %v260_v28 = vld [vmem:[%s5885_s25 + $0x88] sm:$0xff]  ;;  %v293_v30 = vld [vmem:[%s5885_s25 + $0x190] sm:$0xff]  ;;  %v294_v31 = vld [vmem:[%s5885_s25 + $0x198] sm:$0xff] }
  0x33   :  { %238 = vmatpush.msra.mxu3 %v126_v60  ;;  %219 = vmatmul.f32.vlgmr.msra.gmra.mxu2 %v87_v61  ;;  %v258_v32 = vld [vmem:[%s5885_s25 + $0x78] sm:$0xff]  ;;  %v257_v33 = vld [vmem:[%s5885_s25 + $0x70] sm:$0xff]  ;;  %v291_v34 = vld [vmem:[%s5885_s25 + $0x180] sm:$0xff] }
  0x34   :  { %239 = vmatmul.f32.vlgmr.msra.gmra.mxu3 %v88_v62  ;;  %197 = vmatpush.msra.mxu1 %v127_v0  ;;  %v292_v35 = vld [vmem:[%s5885_s25 + $0x188] sm:$0xff]  ;;  %v255_v37 = vld [vmem:[%s5885_s25 + $0x60] sm:$0xff]  ;;  %v289_v38 = vld [vmem:[%s5885_s25 + $0x170] sm:$0xff] }
  0x35   :  { %179 = vmatmul.f32.vlgmr.msra.gmra.mxu0 %v87_v61  ;;  %353 = vmatpush.msrb.mxu2 %v274_v1  ;;  %v256_v36 = vld [vmem:[%s5885_s25 + $0x68] sm:$0xff]  ;;  %v290_v39 = vld [vmem:[%s5885_s25 + $0x178] sm:$0xff]  ;;  %v253_v41 = vld [vmem:[%s5885_s25 + $0x50] sm:$0xff] }
  0x36   :  { %198 = vmatpush.msra.mxu1 %v125_v2  ;;  %313 = vmatpush.msrb.mxu0 %v273_v3  ;;  %v254_v40 = vld [vmem:[%s5885_s25 + $0x58] sm:$0xff]  ;;  %v287_v42 = vld [vmem:[%s5885_s25 + $0x160] sm:$0xff]  ;;  %v288_v43 = vld [vmem:[%s5885_s25 + $0x168] sm:$0xff] }
  0x37   :  { %199 = vmatmul.f32.vlgmr.msra.gmra.mxu1 %v88_v62  ;;  %354 = vmatpush.msrb.mxu2 %v272_v4  ;;  %v252_v44 = vld [vmem:[%s5885_s25 + $0x48] sm:$0xff]  ;;  %v251_v45 = vld [vmem:[%s5885_s25 + $0x40] sm:$0xff]  ;;  %v285_v46 = vld [vmem:[%s5885_s25 + $0x150] sm:$0xff] }
  0x38   :  { %314 = vmatpush.msrb.mxu0 %v271_v5  ;;  %333 = vmatpush.msrb.mxu1 %v305_v6  ;;  %v286_v47 = vld [vmem:[%s5885_s25 + $0x158] sm:$0xff]  ;;  %v249_v49 = vld [vmem:[%s5885_s25 + $0x30] sm:$0xff]  ;;  %v283_v50 = vld [vmem:[%s5885_s25 + $0x140] sm:$0xff] }
  0x39   :  { %373 = vmatpush.msrb.mxu3 %v306_v7  ;;  %355 = vmatpush.msrb.mxu2 %v270_v8  ;;  %v250_v48 = vld [vmem:[%s5885_s25 + $0x38] sm:$0xff]  ;;  %v284_v51 = vld [vmem:[%s5885_s25 + $0x148] sm:$0xff]  ;;  %v247_v52 = vld [vmem:[%s5885_s25 + $0x20] sm:$0xff] }
  0x3a   :  { %315 = vmatpush.msrb.mxu0 %v269_v9  ;;  %334 = vmatpush.msrb.mxu1 %v303_v10  ;;  %v281_v53 = vld [vmem:[%s5885_s25 + $0x130] sm:$0xff]  ;;  %v248_v54 = vld [vmem:[%s5885_s25 + $0x28] sm:$0xff]  ;;  %v282_v55 = vld [vmem:[%s5885_s25 + $0x138] sm:$0xff] }
  0x3b   :  { %374 = vmatpush.msrb.mxu3 %v304_v11  ;;  %356 = vmatpush.msrb.mxu2 %v268_v12  ;;  %v245_v56 = vld [vmem:[%s5885_s25 + $0x10] sm:$0xff]  ;;  %v279_v57 = vld [vmem:[%s5885_s25 + $0x120] sm:$0xff]  ;;  %v246_v58 = vld [vmem:[%s5885_s25 + $0x18] sm:$0xff] }
  0x3c   :  { %316 = vmatpush.msrb.mxu0 %v267_v13  ;;  %335 = vmatpush.msrb.mxu1 %v301_v14  ;;  %v280_v59 = vld [vmem:[%s5885_s25 + $0x128] sm:$0xff]  ;;  %v243_v60 = vld [vmem:[%s5885_s25] sm:$0xff]  ;;  %v277_v61 = vld [vmem:[%s5885_s25 + $0x110] sm:$0xff] }
  0x3d   :  { %375 = vmatpush.msrb.mxu3 %v302_v15  ;;  %357 = vmatpush.msrb.mxu2 %v266_v16  ;;  %v244_v62 = vld [vmem:[%s5885_s25 + $0x8] sm:$0xff]  ;;  %v278_v63 = vld [vmem:[%s5885_s25 + $0x118] sm:$0xff]  ;;  %v275_v0 = vld [vmem:[%s5885_s25 + $0x100] sm:$0xff] }
  0x3e   :  { %317 = vmatpush.msrb.mxu0 %v265_v17  ;;  %336 = vmatpush.msrb.mxu1 %v299_v18  ;;  %v276_v1 = vld [vmem:[%s5885_s25 + $0x108] sm:$0xff]  ;;  %v157_v2 = vld [vmem:[%s5886_s2] sm:$0x3] }
  0x3f   :  { %376 = vmatpush.msrb.mxu3 %v300_v19  ;;  %358 = vmatpush.msrb.mxu2 %v264_v20  ;;  %v159_v3 = vperm.slane %v157_v2, 0  ;;  %v160_v6 = vperm.slane %v157_v2, 1  ;;  %v307_v13 = vld [vmem:[%s5887_s4] sm:$0x3]  ;;  %v3240_v2 = vld [vmem:[%s5850_s10 + $0x1a8] sm:$0xff] }
  0x40   :  { %318 = vmatpush.msrb.mxu0 %v263_v21  ;;  %337 = vmatpush.msrb.mxu1 %v297_v22  ;;  %v309_v14 = vperm.slane %v307_v13, 0  ;;  %v310_v16 = vperm.slane %v307_v13, 1  ;;  %v3305_v13 = vld [vmem:[%s5850_s10 + $0x78] sm:$0xff] }
  0x41   :  { %377 = vmatpush.msrb.mxu3 %v298_v23  ;;  %359 = vmatpush.msrb.mxu2 %v262_v24  ;;  %v89_v23 = vld [vmem:[%s5888_s5] sm:$0xff]  ;;  %v90_v24 = vld [vmem:[%s5888_s5 + $0x8] sm:$0xff] }
  0x42   :  { %319 = vmatpush.msrb.mxu0 %v261_v25  ;;  %338 = vmatpush.msrb.mxu1 %v295_v26 }
  0x43   :  { %378 = vmatpush.msrb.mxu3 %v296_v27  ;;  %360 = vmatpush.msrb.mxu2 %v260_v28 }
  0x44   :  { %320 = vmatpush.msrb.mxu0 %v259_v29  ;;  %339 = vmatpush.msrb.mxu1 %v293_v30  ;;  %v2560_v29 = vmov 256.0   ;;  %v3092_v30 = vld [vmem:[%s5850_s10 + $0xf0] sm:$0xff] }
  0x45   :  { %379 = vmatpush.msrb.mxu3 %v294_v31  ;;  %361 = vmatpush.msrb.mxu2 %v258_v32  ;;  %2505 = vrcp.f32 %v2560_v29  ;;  %v3097_v31 = vld [vmem:[%s5850_s10 + $0x1f0] sm:$0xff]  ;;  %v3102_v32 = vld [vmem:[%s5850_s10 + $0xf8] sm:$0xff] }
  0x46   :  { %321 = vmatpush.msrb.mxu0 %v257_v33  ;;  %340 = vmatpush.msrb.mxu1 %v291_v34  ;;  %v3109_v33 = vld [vmem:[%s5850_s10 + $0x1f8] sm:$0xff]  ;;  %v3114_v34 = vld [vmem:[%s5850_s10 + $0xe0] sm:$0xff] }
  0x47   :  { %380 = vmatpush.msrb.mxu3 %v292_v35  ;;  %362 = vmatpush.msrb.mxu2 %v256_v36  ;;  %v3119_v35 = vld [vmem:[%s5850_s10 + $0x1e0] sm:$0xff]  ;;  %v3401_v29 = vld [vmem:[%s5850_s10 + $0x38] sm:$0xff] }
  0x48   :  { %322 = vmatpush.msrb.mxu0 %v255_v37  ;;  %341 = vmatpush.msrb.mxu1 %v289_v38  ;;  %v3126_v37 = vld [vmem:[%s5850_s10 + $0xe8] sm:$0xff] }
  0x49   :  { %381 = vmatpush.msrb.mxu3 %v290_v39  ;;  %363 = vmatpush.msrb.mxu2 %v254_v40  ;;  %v3131_v38 = vld [vmem:[%s5850_s10 + $0x1e8] sm:$0xff] }
  0x4a   :  { %323 = vmatpush.msrb.mxu0 %v253_v41  ;;  %342 = vmatpush.msrb.mxu1 %v287_v42 }
  0x4b   :  { %382 = vmatpush.msrb.mxu3 %v288_v43  ;;  %364 = vmatpush.msrb.mxu2 %v252_v44  ;;  %v2506_v36 = vpop.eup %2505 }
  0x4c   :  { %324 = vmatpush.msrb.mxu0 %v251_v45  ;;  %343 = vmatpush.msrb.mxu1 %v285_v46  ;;  %v401_v39 = vmul.f32 256.0, %v2506_v36  ;;  %vm405_vm0 = vweird.f32 %v2506_v36 }
  0x4d   :  { %383 = vmatpush.msrb.mxu3 %v286_v47  ;;  %365 = vmatpush.msrb.mxu2 %v250_v48 }
  0x4e   :  { %325 = vmatpush.msrb.mxu0 %v249_v49  ;;  %344 = vmatpush.msrb.mxu1 %v283_v50  ;;  %v402_v40 = vsub.f32 1.0, %v401_v39  ;;  %v3415_v39 = vld [vmem:[%s5850_s10 + $0x20] sm:$0xff] }
  0x4f   :  { %384 = vmatpush.msrb.mxu3 %v284_v51  ;;  %366 = vmatpush.msrb.mxu2 %v248_v54  ;;  %v3151_v51 = vld [vmem:[%s5850_s10 + $0xd0] sm:$0xff]  ;;  %v3168_v54 = vld [vmem:[%s5850_s10 + $0x1d8] sm:$0xff]  ;;  %5889 = vst [vmem:[#allocation5_spill] sm:$0xff] %v3415_v39 }
  0x50   :  { %326 = vmatpush.msrb.mxu0 %v247_v52  ;;  %345 = vmatpush.msrb.mxu1 %v281_v53  ;;  %v403_v41 = vmul.f32 %v2506_v36, %v402_v40  ;;  %v3156_v52 = vld [vmem:[%s5850_s10 + $0x1d0] sm:$0xff]  ;;  %v3161_v53 = vld [vmem:[%s5850_s10 + $0xd8] sm:$0xff]  ;;  %v3420_v40 = vld [vmem:[%s5850_s10 + $0x120] sm:$0xff] }
  0x51   :  { %385 = vmatpush.msrb.mxu3 %v282_v55  ;;  %367 = vmatpush.msrb.mxu2 %v246_v58  ;;  %v3175_v55 = vld [vmem:[%s5850_s10 + $0xc0] sm:$0xff]  ;;  %v3192_v58 = vld [vmem:[%s5850_s10 + $0x1c8] sm:$0xff]  ;;  %5890 = vst [vmem:[#allocation6_spill] sm:$0xff] %v3420_v40 }
  0x52   :  { %327 = vmatpush.msrb.mxu0 %v245_v56  ;;  %346 = vmatpush.msrb.mxu1 %v279_v57  ;;  %v404_v42 = vadd.f32 %v2506_v36, %v403_v41  ;;  %v3180_v56 = vld [vmem:[%s5850_s10 + $0x1c0] sm:$0xff]  ;;  %v3185_v57 = vld [vmem:[%s5850_s10 + $0xc8] sm:$0xff] }
  0x53   :  { %386 = vmatpush.msrb.mxu3 %v280_v59  ;;  %368 = vmatpush.msrb.mxu2 %v244_v62  ;;  %v3199_v59 = vld [vmem:[%s5850_s10 + $0xb0] sm:$0xff]  ;;  %v3216_v62 = vld [vmem:[%s5850_s10 + $0x1b8] sm:$0xff]  ;;  %v3425_v41 = vld [vmem:[%s5850_s10 + $0x28] sm:$0xff] }
  0x54   :  { %328 = vmatpush.msrb.mxu0 %v243_v60  ;;  %347 = vmatpush.msrb.mxu1 %v277_v61  ;;  %v3137_v43 = vsel %vm405_vm0, %v2506_v36, %v404_v42  ;;  %v3204_v60 = vld [vmem:[%s5850_s10 + $0x1b0] sm:$0xff]  ;;  %v3209_v61 = vld [vmem:[%s5850_s10 + $0xb8] sm:$0xff]  ;;  %v3432_v42 = vld [vmem:[%s5850_s10 + $0x128] sm:$0xff] }
  0x55   :  { %387 = vmatpush.msrb.mxu3 %v278_v63  ;;  %553 = vmatpush.msra.mxu2 %v3102_v32  ;;  %v3223_v63 = vld [vmem:[%s5850_s10 + $0xa0] sm:$0xff]  ;;  %v3408_v36 = vld [vmem:[%s5850_s10 + $0x138] sm:$0xff]  ;;  %5891 = vst [vmem:[#allocation7_spill] sm:$0xff] %v3432_v42 }
  0x56   :  { %348 = vmatpush.msrb.mxu1 %v275_v0  ;;  %513 = vmatpush.msra.mxu0 %v3092_v30  ;;  %v3228_v0 = vld [vmem:[%s5850_s10 + $0x1a0] sm:$0xff] }
  0x57   :  { %388 = vmatpush.msrb.mxu3 %v276_v1  ;;  %554 = vmatpush.msra.mxu2 %v3126_v37  ;;  %v3233_v1 = vld [vmem:[%s5850_s10 + $0xa8] sm:$0xff] }
  0x58   :  { %533 = vmatpush.msra.mxu1 %v3097_v31  ;;  %514 = vmatpush.msra.mxu0 %v3114_v34 }
  0x59   :  { %573 = vmatpush.msra.mxu3 %v3109_v33  ;;  %555 = vmatpush.msra.mxu2 %v3161_v53 }
  0x5a   :  { %534 = vmatpush.msra.mxu1 %v3119_v35  ;;  %515 = vmatpush.msra.mxu0 %v3151_v51 }
  0x5b   :  { %574 = vmatpush.msra.mxu3 %v3131_v38  ;;  %556 = vmatpush.msra.mxu2 %v3185_v57 }
  0x5c   :  { %535 = vmatpush.msra.mxu1 %v3156_v52  ;;  %516 = vmatpush.msra.mxu0 %v3175_v55 }
  0x5d   :  { %575 = vmatpush.msra.mxu3 %v3168_v54  ;;  %557 = vmatpush.msra.mxu2 %v3209_v61 }
  0x5e   :  { %536 = vmatpush.msra.mxu1 %v3180_v56  ;;  %517 = vmatpush.msra.mxu0 %v3199_v59 }
  0x5f   :  { %576 = vmatpush.msra.mxu3 %v3192_v58  ;;  %558 = vmatpush.msra.mxu2 %v3233_v1 }
  0x60   :  { %537 = vmatpush.msra.mxu1 %v3204_v60  ;;  %518 = vmatpush.msra.mxu0 %v3223_v63 }
  0x61   :  { %577 = vmatpush.msra.mxu3 %v3216_v62 }
  0x62   :  { %538 = vmatpush.msra.mxu1 %v3228_v0 }
  0x63   :  { %578 = vmatpush.msra.mxu3 %v3240_v2 }
  0xb2   :  { %v180_v4 = vpop.f32.mrf.mxu0 }
  0xb3   :  { %v181_v5 = vadd.f32 %v180_v4, %v159_v3  ;;  %v3247_v3 = vld [vmem:[%s5850_s10 + $0x90] sm:$0xff] }
  0xb4   :  { %v200_v7 = vpop.f32.mrf.mxu1  ;;  %v3252_v4 = vld [vmem:[%s5850_s10 + $0x190] sm:$0xff]  ;;  %519 = vmatpush.msra.mxu0 %v3247_v3 }
  0xb5   :  { %v201_v8 = vadd.f32 %v200_v7, %v181_v5  ;;  %v3257_v5 = vld [vmem:[%s5850_s10 + $0x98] sm:$0xff]  ;;  %539 = vmatpush.msra.mxu1 %v3252_v4  ;;  %v3271_v7 = vld [vmem:[%s5850_s10 + $0x80] sm:$0xff] }
  0xb6   :  { %v220_v9 = vpop.f32.mrf.mxu2  ;;  %559 = vmatpush.msra.mxu2 %v3257_v5  ;;  %520 = vmatpush.msra.mxu0 %v3271_v7 }
  0xb7   :  { %v240_v10 = vpop.f32.mrf.mxu3  ;;  %v221_v11 = vadd.f32 %v220_v9, %v160_v6  ;;  %329 = vmatmul.f32.vlgmr.msrb.gmra.mxu0 %v201_v8  ;;  %369 = vmatmul.f32.vlgmr.msrb.gmra.mxu2 %v201_v8  ;;  %v3264_v6 = vld [vmem:[%s5850_s10 + $0x198] sm:$0xff]  ;;  %v3276_v8 = vld [vmem:[%s5850_s10 + $0x180] sm:$0xff]  ;;  %v3281_v9 = vld [vmem:[%s5850_s10 + $0x88] sm:$0xff] }
  0xb8   :  { %579 = vmatpush.msra.mxu3 %v3264_v6  ;;  %540 = vmatpush.msra.mxu1 %v3276_v8 }
  0xb9   :  { %v241_v12 = vadd.f32 %v240_v10, %v221_v11  ;;  %v3288_v10 = vld [vmem:[%s5850_s10 + $0x188] sm:$0xff]  ;;  %560 = vmatpush.msra.mxu2 %v3281_v9  ;;  %v3295_v11 = vld [vmem:[%s5850_s10 + $0x70] sm:$0xff] }
  0xba   :  { %580 = vmatpush.msra.mxu3 %v3288_v10  ;;  %521 = vmatpush.msra.mxu0 %v3295_v11 }
  0xbb   :  { %349 = vmatmul.f32.vlgmr.msrb.gmra.mxu1 %v241_v12  ;;  %389 = vmatmul.f32.vlgmr.msrb.gmra.mxu3 %v241_v12  ;;  %v3300_v12 = vld [vmem:[%s5850_s10 + $0x170] sm:$0xff] }
  0xbc   :  { %541 = vmatpush.msra.mxu1 %v3300_v12  ;;  %561 = vmatpush.msra.mxu2 %v3305_v13 }
 0x134   :  { %v330_v15 = vpop.f32.mrf.mxu0 }
 0x135   :  { %v331_v17 = vadd.f32 %v330_v15, %v309_v14  ;;  %v3312_v14 = vld [vmem:[%s5850_s10 + $0x178] sm:$0xff]  ;;  %v3319_v15 = vld [vmem:[%s5850_s10 + $0x60] sm:$0xff] }
 0x136   :  { %581 = vmatpush.msra.mxu3 %v3312_v14  ;;  %522 = vmatpush.msra.mxu0 %v3319_v15 }
 0x138   :  { %v350_v18 = vpop.f32.mrf.mxu1 }
 0x139   :  { %v351_v21 = vadd.f32 %v350_v18, %v331_v17  ;;  %v3329_v17 = vld [vmem:[%s5850_s10 + $0x68] sm:$0xff] }
 0x13a   :  { %v370_v19 = vpop.f32.mrf.mxu2  ;;  %v3336_v18 = vld [vmem:[%s5850_s10 + $0x168] sm:$0xff]  ;;  %562 = vmatpush.msra.mxu2 %v3329_v17 }
 0x13b   :  { %v371_v20 = vadd.f32 %v370_v19, %v310_v16  ;;  %v393_v26 = vadd.f32 %v351_v21, %v89_v23  ;;  %v3324_v16 = vld [vmem:[%s5850_s10 + $0x160] sm:$0xff]  ;;  %582 = vmatpush.msra.mxu3 %v3336_v18  ;;  %v3343_v19 = vld [vmem:[%s5850_s10 + $0x50] sm:$0xff]  ;;  %v3353_v21 = vld [vmem:[%s5850_s10 + $0x58] sm:$0xff] }
 0x13c   :  { %542 = vmatpush.msra.mxu1 %v3324_v16  ;;  %523 = vmatpush.msra.mxu0 %v3343_v19  ;;  %v3367_v23 = vld [vmem:[%s5850_s10 + $0x40] sm:$0xff] }
 0x13d   :  { %563 = vmatpush.msra.mxu2 %v3353_v21 }
 0x13e   :  { %v390_v22 = vpop.f32.mrf.mxu3  ;;  %524 = vmatpush.msra.mxu0 %v3367_v23 }
 0x13f   :  { %v391_v25 = vadd.f32 %v390_v22, %v371_v20  ;;  %v3348_v20 = vld [vmem:[%s5850_s10 + $0x150] sm:$0xff]  ;;  %v3360_v22 = vld [vmem:[%s5850_s10 + $0x158] sm:$0xff] }
 0x140   :  { %543 = vmatpush.msra.mxu1 %v3348_v20  ;;  %583 = vmatpush.msra.mxu3 %v3360_v22 }
 0x141   :  { %v394_v27 = vadd.f32 %v391_v25, %v90_v24  ;;  %v3372_v24 = vld [vmem:[%s5850_s10 + $0x140] sm:$0xff]  ;;  %v3377_v25 = vld [vmem:[%s5850_s10 + $0x48] sm:$0xff] }
 0x142   :  { %544 = vmatpush.msra.mxu1 %v3372_v24  ;;  %564 = vmatpush.msra.mxu2 %v3377_v25 }
 0x143   :  { %v397_v28 = vadd.f32 %v394_v27, %v393_v26 }
 0x144   :  { %565 = vmatpush.msra.mxu2 %v3401_v29 }
 0x145   :  { %398 = vadd.xlane.f32.xlu0 %v397_v28  ;;  %v3396_v28 = vld [vmem:[%s5850_s10 + $0x130] sm:$0xff] }
 0x146   :  { %545 = vmatpush.msra.mxu1 %v3396_v28  ;;  %566 = vmatpush.msra.mxu2 %v3425_v41 }
 0x148   :  { %546 = vmatpush.msra.mxu1 %v3420_v40  ;;  %v3466_v40 = vld [vmem:[%s5850_s10 + $0x100] sm:$0xff] }
 0x1b8   :  { %v399_v44 = vpop.xlane.xlu0 %398 }
 0x1b9   :  { %v407_v45 = vmul.f32 %v3137_v43, %v399_v44  ;;  %v3437_v44 = vld [vmem:[%s5850_s10 + $0x10] sm:$0xff] }
 0x1bb   :  { %v3140_v46 = vsub.f32 %v393_v26, %v407_v45  ;;  %v3142_v47 = vsub.f32 %v394_v27, %v407_v45  ;;  %v3384_v26 = vld [vmem:[%s5850_s10 + $0x148] sm:$0xff]  ;;  %v3391_v27 = vld [vmem:[%s5850_s10 + $0x30] sm:$0xff] }
 0x1bc   :  { %584 = vmatpush.msra.mxu3 %v3384_v26  ;;  %525 = vmatpush.msra.mxu0 %v3391_v27  ;;  %v3442_v45 = vld [vmem:[%s5850_s10 + $0x110] sm:$0xff] }
 0x1bd   :  { %v410_v48 = vmul.f32 %v3140_v46, %v3140_v46  ;;  %v411_v49 = vmul.f32 %v3142_v47, %v3142_v47  ;;  %5892 = vst [vmem:[#allocation8_spill] sm:$0xff] %v3442_v45  ;;  %547 = vmatpush.msra.mxu1 %v3442_v45 }
 0x1be   :  { %585 = vmatpush.msra.mxu3 %v3408_v36  ;;  %526 = vmatpush.msra.mxu0 %v3415_v39  ;;  %v3476_v39 = vld [vmem:[%s5850_s10 + $0x108] sm:$0xff] }
 0x1bf   :  { %v412_v50 = vadd.f32 %v411_v49, %v410_v48  ;;  %v3449_v48 = vld [vmem:[%s5850_s10 + $0x18] sm:$0xff]  ;;  %548 = vmatpush.msra.mxu1 %v3466_v40 }
 0x1c0   :  { %586 = vmatpush.msra.mxu3 %v3432_v42  ;;  %v3454_v49 = vld [vmem:[%s5850_s10 + $0x118] sm:$0xff]  ;;  %527 = vmatpush.msra.mxu0 %v3437_v44  ;;  %v3471_v42 = vld [vmem:[%s5850_s10 + $0x8] sm:$0xff] }
 0x1c1   :  { %413 = vadd.xlane.f32.xlu0 %v412_v50  ;;  %v3459_v50 = vld [vmem:[%s5850_s10] sm:$0xff]  ;;  %567 = vmatpush.msra.mxu2 %v3449_v48  ;;  %s2562_s10 = smov 127  }
 0x1c2   :  { %5893 = vst [vmem:[#allocation9_spill] sm:$0xff] %v3459_v50  ;;  %587 = vmatpush.msra.mxu3 %v3454_v49  ;;  %528 = vmatpush.msra.mxu0 %v3459_v50 }
 0x1c3   :  { %568 = vmatpush.msra.mxu2 %v3471_v42  ;;  %615 = vmatpush.msrb.mxu1 %v3097_v31 }
 0x1c4   :  { %588 = vmatpush.msra.mxu3 %v3476_v39  ;;  %595 = vmatpush.msrb.mxu0 %v3092_v30 }
 0x1c5   :  { %635 = vmatpush.msrb.mxu2 %v3102_v32  ;;  %616 = vmatpush.msrb.mxu1 %v3119_v35 }
 0x1c6   :  { %655 = vmatpush.msrb.mxu3 %v3109_v33  ;;  %596 = vmatpush.msrb.mxu0 %v3114_v34 }
 0x1c7   :  { %636 = vmatpush.msrb.mxu2 %v3126_v37  ;;  %617 = vmatpush.msrb.mxu1 %v3156_v52  ;;  %v395_v37 = vld [vmem:[%s5848_s8] sm:$0x3] }
 0x1c8   :  { %656 = vmatpush.msrb.mxu3 %v3131_v38  ;;  %597 = vmatpush.msrb.mxu0 %v3151_v51  ;;  %v396_v51 = vld [vmem:[%s5849_s9] sm:$0x3]  ;;  %v430_v52 = vperm.slane %v395_v37, 0 }
 0x1c9   :  { %637 = vmatpush.msrb.mxu2 %v3161_v53  ;;  %618 = vmatpush.msrb.mxu1 %v3180_v56  ;;  %v431_v53 = vperm.slane %v395_v37, 1  ;;  %v778_v37 = vld [vmem:[%s5854_s14 + $0x80] sm:$0xff] }
 0x1ca   :  { %657 = vmatpush.msrb.mxu3 %v3168_v54  ;;  %598 = vmatpush.msrb.mxu0 %v3175_v55 }
 0x1cb   :  { %638 = vmatpush.msrb.mxu2 %v3185_v57  ;;  %619 = vmatpush.msrb.mxu1 %v3204_v60  ;;  %v437_v57 = vperm.slane %v396_v51, 0 }
 0x1cc   :  { %658 = vmatpush.msrb.mxu3 %v3192_v58  ;;  %599 = vmatpush.msrb.mxu0 %v3199_v59  ;;  %v438_v58 = vperm.slane %v396_v51, 1  ;;  %v5894_v59 = vld [vmem:[#allocation5_spill] sm:$0xff]  ;;  %v902_v51 = vld [vmem:[%s5854_s14 + $0x460] sm:$0xff] }
 0x1cd   :  { %639 = vmatpush.msrb.mxu2 %v3209_v61  ;;  %620 = vmatpush.msrb.mxu1 %v3228_v0  ;;  %v5897_v0 = vld [vmem:[#allocation8_spill] sm:$0xff] }
 0x1ce   :  { %659 = vmatpush.msrb.mxu3 %v3216_v62  ;;  %600 = vmatpush.msrb.mxu0 %v3223_v63  ;;  %v5895_v62 = vld [vmem:[#allocation7_spill] sm:$0xff]  ;;  %v5896_v63 = vld [vmem:[#allocation6_spill] sm:$0xff] }
 0x1cf   :  { %640 = vmatpush.msrb.mxu2 %v3233_v1  ;;  %621 = vmatpush.msrb.mxu1 %v3252_v4  ;;  %v950_v1 = vld [vmem:[%s5854_s14 + $0x5e0] sm:$0xff] }
 0x1d0   :  { %660 = vmatpush.msrb.mxu3 %v3240_v2  ;;  %601 = vmatpush.msrb.mxu0 %v3247_v3  ;;  %v5898_v2 = vld [vmem:[#allocation9_spill] sm:$0xff]  ;;  %v822_v3 = vld [vmem:[%s5854_s14 + $0x1e0] sm:$0xff] }
 0x1d1   :  { %641 = vmatpush.msrb.mxu2 %v3257_v5  ;;  %622 = vmatpush.msrb.mxu1 %v3276_v8  ;;  %v1014_v4 = vld [vmem:[%s5854_s14 + $0x7e0] sm:$0xff] }
 0x1d2   :  { %661 = vmatpush.msrb.mxu3 %v3264_v6  ;;  %602 = vmatpush.msrb.mxu0 %v3271_v7  ;;  %v946_v5 = vld [vmem:[%s5854_s14 + $0x5c0] sm:$0xff] }
 0x1d3   :  { %642 = vmatpush.msrb.mxu2 %v3281_v9  ;;  %623 = vmatpush.msrb.mxu1 %v3300_v12  ;;  %v818_v6 = vld [vmem:[%s5854_s14 + $0x1c0] sm:$0xff] }
 0x1d4   :  { %662 = vmatpush.msrb.mxu3 %v3288_v10  ;;  %603 = vmatpush.msrb.mxu0 %v3295_v11  ;;  %v886_v7 = vld [vmem:[%s5854_s14 + $0x3e0] sm:$0xff] }
 0x1d5   :  { %643 = vmatpush.msrb.mxu2 %v3305_v13  ;;  %624 = vmatpush.msrb.mxu1 %v3324_v16  ;;  %v942_v8 = vld [vmem:[%s5854_s14 + $0x5a0] sm:$0xff] }
 0x1d6   :  { %663 = vmatpush.msrb.mxu3 %v3312_v14  ;;  %604 = vmatpush.msrb.mxu0 %v3319_v15  ;;  %v1010_v9 = vld [vmem:[%s5854_s14 + $0x7c0] sm:$0xff] }
 0x1d7   :  { %644 = vmatpush.msrb.mxu2 %v3329_v17  ;;  %625 = vmatpush.msrb.mxu1 %v3348_v20  ;;  %v814_v10 = vld [vmem:[%s5854_s14 + $0x1a0] sm:$0xff] }
 0x1d8   :  { %664 = vmatpush.msrb.mxu3 %v3336_v18  ;;  %605 = vmatpush.msrb.mxu0 %v3343_v19  ;;  %v882_v11 = vld [vmem:[%s5854_s14 + $0x3c0] sm:$0xff] }
 0x1d9   :  { %645 = vmatpush.msrb.mxu2 %v3353_v21  ;;  %626 = vmatpush.msrb.mxu1 %v3372_v24  ;;  %v938_v12 = vld [vmem:[%s5854_s14 + $0x580] sm:$0xff] }
 0x1da   :  { %665 = vmatpush.msrb.mxu3 %v3360_v22  ;;  %606 = vmatpush.msrb.mxu0 %v3367_v23  ;;  %v1006_v13 = vld [vmem:[%s5854_s14 + $0x7a0] sm:$0xff] }
 0x1db   :  { %646 = vmatpush.msrb.mxu2 %v3377_v25  ;;  %627 = vmatpush.msrb.mxu1 %v3396_v28  ;;  %v810_v14 = vld [vmem:[%s5854_s14 + $0x180] sm:$0xff] }
 0x1dc   :  { %666 = vmatpush.msrb.mxu3 %v3384_v26  ;;  %607 = vmatpush.msrb.mxu0 %v3391_v27  ;;  %v878_v15 = vld [vmem:[%s5854_s14 + $0x3a0] sm:$0xff] }
 0x1dd   :  { %647 = vmatpush.msrb.mxu2 %v3401_v29  ;;  %628 = vmatpush.msrb.mxu1 %v5896_v63  ;;  %v934_v16 = vld [vmem:[%s5854_s14 + $0x560] sm:$0xff] }
 0x1de   :  { %667 = vmatpush.msrb.mxu3 %v3408_v36  ;;  %608 = vmatpush.msrb.mxu0 %v5894_v59  ;;  %v1002_v17 = vld [vmem:[%s5854_s14 + $0x780] sm:$0xff] }
 0x1df   :  { %648 = vmatpush.msrb.mxu2 %v3425_v41  ;;  %629 = vmatpush.msrb.mxu1 %v5897_v0  ;;  %v806_v18 = vld [vmem:[%s5854_s14 + $0x160] sm:$0xff] }
 0x1e0   :  { %668 = vmatpush.msrb.mxu3 %v5895_v62  ;;  %609 = vmatpush.msrb.mxu0 %v3437_v44  ;;  %v874_v19 = vld [vmem:[%s5854_s14 + $0x380] sm:$0xff] }
 0x1e1   :  { %649 = vmatpush.msrb.mxu2 %v3449_v48  ;;  %630 = vmatpush.msrb.mxu1 %v3466_v40  ;;  %v930_v20 = vld [vmem:[%s5854_s14 + $0x540] sm:$0xff] }
 0x1e2   :  { %669 = vmatpush.msrb.mxu3 %v3454_v49  ;;  %610 = vmatpush.msrb.mxu0 %v5898_v2  ;;  %v998_v21 = vld [vmem:[%s5854_s14 + $0x760] sm:$0xff] }
 0x1e3   :  { %650 = vmatpush.msrb.mxu2 %v3471_v42  ;;  %v802_v22 = vld [vmem:[%s5854_s14 + $0x140] sm:$0xff] }
 0x1e4   :  { %670 = vmatpush.msrb.mxu3 %v3476_v39  ;;  %v870_v23 = vld [vmem:[%s5854_s14 + $0x360] sm:$0xff] }
 0x1e5   :  { %v926_v24 = vld [vmem:[%s5854_s14 + $0x520] sm:$0xff] }
 0x1e6   :  { %v994_v25 = vld [vmem:[%s5854_s14 + $0x740] sm:$0xff] }
 0x1e7   :  { %v798_v26 = vld [vmem:[%s5854_s14 + $0x120] sm:$0xff] }
 0x1e8   :  { %v866_v27 = vld [vmem:[%s5854_s14 + $0x340] sm:$0xff] }
 0x1e9   :  { %v922_v28 = vld [vmem:[%s5854_s14 + $0x500] sm:$0xff] }
 0x1ea   :  { %v990_v29 = vld [vmem:[%s5854_s14 + $0x720] sm:$0xff] }
 0x1eb   :  { %v794_v36 = vld [vmem:[%s5854_s14 + $0x100] sm:$0xff] }
 0x1ec   :  { %v862_v39 = vld [vmem:[%s5854_s14 + $0x320] sm:$0xff] }
 0x1ed   :  { %v918_v40 = vld [vmem:[%s5854_s14 + $0x4e0] sm:$0xff] }
 0x1ee   :  { %v986_v41 = vld [vmem:[%s5854_s14 + $0x700] sm:$0xff] }
 0x1ef   :  { %v790_v42 = vld [vmem:[%s5854_s14 + $0xe0] sm:$0xff] }
 0x1f0   :  { %v858_v44 = vld [vmem:[%s5854_s14 + $0x300] sm:$0xff] }
 0x1f1   :  { %v982_v48 = vld [vmem:[%s5854_s14 + $0x6e0] sm:$0xff] }
 0x1f2   :  { %v786_v49 = vld [vmem:[%s5854_s14 + $0xc0] sm:$0xff] }
 0x1f3   :  { %v770_v59 = vld [vmem:[%s5854_s14 + $0x40] sm:$0xff] }
 0x1f4   :  { %v962_v62 = vld [vmem:[%s5854_s14 + $0x640] sm:$0xff] }
 0x1f5   :  { %v766_v63 = vld [vmem:[%s5854_s14 + $0x20] sm:$0xff] }
 0x1f6   :  { %v834_v0 = vld [vmem:[%s5854_s14 + $0x240] sm:$0xff] }
 0x1f7   :  { %v958_v2 = vld [vmem:[%s5854_s14 + $0x620] sm:$0xff] }
 0x234   :  { %v414_v45 = vpop.xlane.xlu0 %413 }
 0x235   :  { %v415_v50 = vmul.f32 %v414_v45, %v3137_v43  ;;  %v914_v45 = vld [vmem:[%s5854_s14 + $0x4c0] sm:$0xff] }
 0x237   :  { %v416_v30 = vadd.f32 1e-05, %v415_v50  ;;  %v854_v50 = vld [vmem:[%s5854_s14 + $0x2e0] sm:$0xff] }
 0x239   :  { %2507 = vrsqrt.f32 %v416_v30  ;;  %vm423_vm2 = vweird.f32 %v416_v30 }
 0x23f   :  { %v2508_v31 = vpop.eup %2507 }
 0x240   :  { %v418_v32 = vmul.f32 %v2508_v31, %v416_v30  ;;  %vm424_vm1 = vweird.f32 %v2508_v31  ;;  %v910_v30 = vld [vmem:[%s5854_s14 + $0x4a0] sm:$0xff] }
 0x241   :  { %vm425_vm3 = vmor %vm423_vm2, %vm424_vm1  ;;  %vm1948_vm1 = vcmask 1043456  }
 0x242   :  { %v419_v33 = vmul.f32 %v2508_v31, %v418_v32  ;;  %v782_v32 = vld [vmem:[%s5854_s14 + $0xa0] sm:$0xff] }
 0x244   :  { %v420_v34 = vmul.f32 0.5, %v419_v33  ;;  %v850_v33 = vld [vmem:[%s5854_s14 + $0x2c0] sm:$0xff] }
 0x246   :  { %v421_v35 = vsub.f32 1.5, %v420_v34  ;;  %v906_v34 = vld [vmem:[%s5854_s14 + $0x480] sm:$0xff] }
 0x248   :  { %v422_v38 = vmul.f32 %v2508_v31, %v421_v35  ;;  %v974_v35 = vld [vmem:[%s5854_s14 + $0x6a0] sm:$0xff] }
 0x24a   :  { %v426_v54 = vsel %vm425_vm3, %v2508_v31, %v422_v38  ;;  %v978_v31 = vld [vmem:[%s5854_s14 + $0x6c0] sm:$0xff] }
 0x24b   :  { %v427_v55 = vmul.f32 %v426_v54, %v3140_v46  ;;  %v428_v56 = vmul.f32 %v426_v54, %v3142_v47  ;;  %v846_v38 = vld [vmem:[%s5854_s14 + $0x2a0] sm:$0xff] }
 0x24c   :  { %v774_v54 = vld [vmem:[%s5854_s14 + $0x60] sm:$0xff] }
 0x24d   :  { %v434_v60 = vmul.f32 %v430_v52, %v427_v55  ;;  %v435_v61 = vmul.f32 %v431_v53, %v428_v56  ;;  %v970_v52 = vld [vmem:[%s5854_s14 + $0x680] sm:$0xff] }
 0x24e   :  { %v720_v53 = vld [vmem:[%s5899_s21] sm:$0xff] }
 0x24f   :  { %v3551_v46 = vadd.f32 %v437_v57, %v434_v60  ;;  %v3553_v47 = vadd.f32 %v438_v58, %v435_v61  ;;  %v842_v55 = vld [vmem:[%s5854_s14 + $0x280] sm:$0xff]  ;;  %v2496_v57 = vmul.f32 -1.442695, %v720_v53 }
 0x250   :  { %v898_v56 = vld [vmem:[%s5854_s14 + $0x440] sm:$0xff] }
 0x251   :  { %529 = vmatmul.f32.vlgmr.msra.gmra.mxu0 %v3551_v46  ;;  %549 = vmatmul.f32.vlgmr.msra.gmra.mxu1 %v3553_v47  ;;  %v966_v58 = vld [vmem:[%s5854_s14 + $0x660] sm:$0xff]  ;;  %2509 = vpow2.f32 %v2496_v57 }
 0x252   :  { %569 = vmatmul.f32.vlgmr.msra.gmra.mxu2 %v3551_v46  ;;  %589 = vmatmul.f32.vlgmr.msra.gmra.mxu3 %v3553_v47  ;;  %v838_v60 = vld [vmem:[%s5854_s14 + $0x260] sm:$0xff] }
 0x253   :  { %1345 = vmatpush.msra.mxu2 %v950_v1  ;;  %1305 = vmatpush.msra.mxu0 %v822_v3  ;;  %v894_v61 = vld [vmem:[%s5854_s14 + $0x420] sm:$0xff] }
 0x254   :  { %1365 = vmatpush.msra.mxu3 %v1014_v4  ;;  %1325 = vmatpush.msra.mxu1 %v886_v7  ;;  %v890_v1 = vld [vmem:[%s5854_s14 + $0x400] sm:$0xff] }
 0x255   :  { %1346 = vmatpush.msra.mxu2 %v946_v5  ;;  %1306 = vmatpush.msra.mxu0 %v818_v6  ;;  %v762_v3 = vld [vmem:[%s5854_s14] sm:$0xff] }
 0x256   :  { %1366 = vmatpush.msra.mxu3 %v1010_v9  ;;  %1326 = vmatpush.msra.mxu1 %v882_v11  ;;  %v830_v4 = vld [vmem:[%s5854_s14 + $0x220] sm:$0xff] }
 0x257   :  { %1347 = vmatpush.msra.mxu2 %v942_v8  ;;  %1307 = vmatpush.msra.mxu0 %v814_v10  ;;  %v954_v5 = vld [vmem:[%s5854_s14 + $0x600] sm:$0xff]  ;;  %v2510_v6 = vpop.eup %2509 }
 0x258   :  { %1367 = vmatpush.msra.mxu3 %v1006_v13  ;;  %1327 = vmatpush.msra.mxu1 %v878_v15  ;;  %v826_v7 = vld [vmem:[%s5854_s14 + $0x200] sm:$0xff]  ;;  %v728_v8 = vadd.f32 1.0, %v2510_v6 }
 0x259   :  { %1348 = vmatpush.msra.mxu2 %v938_v12  ;;  %1308 = vmatpush.msra.mxu0 %v810_v14  ;;  %v3763_v11 = vld [vmem:[%s5851_s11] sm:$0x3] }
 0x25a   :  { %1368 = vmatpush.msra.mxu3 %v1002_v17  ;;  %1328 = vmatpush.msra.mxu1 %v874_v19  ;;  %2511 = vrcp.f32 %v728_v8  ;;  %v509_v14 = vperm.slane %v3763_v11, 0  ;;  %v741_v15 = vand.u32 2147483648, %v728_v8  ;;  %vm735_vm4 = vweird.f32 %v728_v8  ;;  %v1058_v57 = vld [vmem:[%s5854_s14 + $0x940] sm:$0xff] }
 0x25b   :  { %1349 = vmatpush.msra.mxu2 %v934_v16  ;;  %1309 = vmatpush.msra.mxu0 %v806_v18  ;;  %v739_v17 = vand.u32 2147483647, %v728_v8 }
 0x25c   :  { %1369 = vmatpush.msra.mxu3 %v998_v21  ;;  %1329 = vmatpush.msra.mxu1 %v870_v23  ;;  %v742_v18 = vor.u32 1.1754944e-38, %v741_v15  ;;  %v1114_v15 = vld [vmem:[%s5854_s14 + $0xb00] sm:$0xff] }
 0x25d   :  { %1350 = vmatpush.msra.mxu2 %v930_v20  ;;  %1310 = vmatpush.msra.mxu0 %v802_v22  ;;  %vm740_vm7 = vcmp.eq.f32.partialorder %v739_v17, 8.507059e+37  ;;  %v1038_v17 = vld [vmem:[%s5854_s14 + $0x8a0] sm:$0xff] }
 0x25e   :  { %1370 = vmatpush.msra.mxu3 %v994_v25  ;;  %1330 = vmatpush.msra.mxu1 %v866_v27 }
 0x25f   :  { %1351 = vmatpush.msra.mxu2 %v926_v24  ;;  %1311 = vmatpush.msra.mxu0 %v798_v26  ;;  %v510_v26 = vperm.slane %v3763_v11, 1  ;;  %v1132_v11 = vld [vmem:[%s5854_s14 + $0xb90] sm:$0xff] }
 0x260   :  { %1371 = vmatpush.msra.mxu3 %v990_v29  ;;  %1331 = vmatpush.msra.mxu1 %v862_v39  ;;  %v2512_v9 = vpop.eup %2511  ;;  %v1078_v29 = vld [vmem:[%s5854_s14 + $0x9e0] sm:$0xff] }
 0x261   :  { %1352 = vmatpush.msra.mxu2 %v922_v28  ;;  %1312 = vmatpush.msra.mxu0 %v794_v36  ;;  %v731_v10 = vmul.f32 %v2512_v9, %v728_v8  ;;  %vm736_vm5 = vweird.f32 %v2512_v9  ;;  %v1206_v28 = vld [vmem:[%s5854_s14 + $0xde0] sm:$0xff]  ;;  %v3778_v36 = vld [vmem:[%s5899_s21 + $0x8] sm:$0xff] }
 0x262   :  { %1372 = vmatpush.msra.mxu3 %v986_v41  ;;  %1332 = vmatpush.msra.mxu1 %v858_v44  ;;  %vm737_vm6 = vmor %vm735_vm4, %vm736_vm5  ;;  %v1074_v41 = vld [vmem:[%s5854_s14 + $0x9c0] sm:$0xff] }
 0x263   :  { %1353 = vmatpush.msra.mxu2 %v918_v40  ;;  %1313 = vmatpush.msra.mxu0 %v790_v42  ;;  %v732_v12 = vsub.f32 1.0, %v731_v10  ;;  %v1202_v40 = vld [vmem:[%s5854_s14 + $0xdc0] sm:$0xff]  ;;  %v2497_v42 = vmul.f32 -1.442695, %v3778_v36 }
 0x264   :  { %1373 = vmatpush.msra.mxu3 %v982_v48  ;;  %1333 = vmatpush.msra.mxu1 %v854_v50  ;;  %v1198_v48 = vld [vmem:[%s5854_s14 + $0xda0] sm:$0xff] }
 0x265   :  { %1354 = vmatpush.msra.mxu2 %v914_v45  ;;  %1314 = vmatpush.msra.mxu0 %v786_v49  ;;  %v733_v13 = vmul.f32 %v2512_v9, %v732_v12  ;;  %v1070_v49 = vld [vmem:[%s5854_s14 + $0x9a0] sm:$0xff]  ;;  %2513 = vpow2.f32 %v2497_v42 }
 0x266   :  { %1374 = vmatpush.msra.mxu3 %v978_v31  ;;  %1334 = vmatpush.msra.mxu1 %v850_v33  ;;  %v1270_v31 = vld [vmem:[%s5854_s14 + $0xfe0] sm:$0xff] }
 0x267   :  { %1355 = vmatpush.msra.mxu2 %v910_v30  ;;  %1315 = vmatpush.msra.mxu0 %v782_v32  ;;  %v734_v16 = vadd.f32 %v2512_v9, %v733_v13  ;;  %v1142_v32 = vld [vmem:[%s5854_s14 + $0xbe0] sm:$0xff] }
 0x268   :  { %1375 = vmatpush.msra.mxu3 %v974_v35  ;;  %1335 = vmatpush.msra.mxu1 %v846_v38  ;;  %v1194_v33 = vld [vmem:[%s5854_s14 + $0xd80] sm:$0xff] }
 0x269   :  { %1356 = vmatpush.msra.mxu2 %v906_v34  ;;  %1316 = vmatpush.msra.mxu0 %v778_v37  ;;  %v738_v21 = vsel %vm737_vm6, %v2512_v9, %v734_v16  ;;  %v1066_v34 = vld [vmem:[%s5854_s14 + $0x980] sm:$0xff] }
 0x26a   :  { %1376 = vmatpush.msra.mxu3 %v970_v52  ;;  %1336 = vmatpush.msra.mxu1 %v842_v55  ;;  %v743_v23 = vsel %vm740_vm7, %v742_v18, %v738_v21  ;;  %v1266_v35 = vld [vmem:[%s5854_s14 + $0xfc0] sm:$0xff]  ;;  %vm2479_vm7 = vcmask 7168  }
 0x26b   :  { %1357 = vmatpush.msra.mxu2 %v902_v51  ;;  %1317 = vmatpush.msra.mxu0 %v774_v54  ;;  %v760_v25 = vmul.f32 %v743_v23, %v720_v53  ;;  %v1138_v37 = vld [vmem:[%s5854_s14 + $0xbc0] sm:$0xff]  ;;  %v2514_v38 = vpop.eup %2513 }
 0x26c   :  { %1377 = vmatpush.msra.mxu3 %v966_v58  ;;  %1337 = vmatpush.msra.mxu1 %v838_v60  ;;  %v1190_v51 = vld [vmem:[%s5854_s14 + $0xd60] sm:$0xff]  ;;  %v3825_v55 = vadd.f32 1.0, %v2514_v38 }
 0x26d   :  { %1358 = vmatpush.msra.mxu2 %v898_v56  ;;  %1318 = vmatpush.msra.mxu0 %v770_v59  ;;  %1286 = vst [vmem:[#allocation1] ss:$4 sm:$0xff] %v760_v25  ;;  %v1062_v52 = vld [vmem:[%s5854_s14 + $0x960] sm:$0xff] }
 0x26e   :  { %1378 = vmatpush.msra.mxu3 %v962_v62  ;;  %1338 = vmatpush.msra.mxu1 %v834_v0  ;;  %v1262_v53 = vld [vmem:[%s5854_s14 + $0xfa0] sm:$0xff]  ;;  %2515 = vrcp.f32 %v3825_v55  ;;  %vm750_vm8 = vweird.f32 %v3825_v55 }
 0x26f   :  { %1359 = vmatpush.msra.mxu2 %v894_v61  ;;  %1319 = vmatpush.msra.mxu0 %v766_v63  ;;  %v1134_v54 = vld [vmem:[%s5854_s14 + $0xba0] sm:$0xff] }
 0x270   :  { %1379 = vmatpush.msra.mxu3 %v958_v2  ;;  %1339 = vmatpush.msra.mxu1 %v830_v4  ;;  %v1186_v56 = vld [vmem:[%s5854_s14 + $0xd40] sm:$0xff] }
 0x271   :  { %1360 = vmatpush.msra.mxu2 %v890_v1  ;;  %1320 = vmatpush.msra.mxu0 %v762_v3  ;;  %v1258_v58 = vld [vmem:[%s5854_s14 + $0xf80] sm:$0xff] }
 0x272   :  { %1380 = vmatpush.msra.mxu3 %v954_v5  ;;  %1340 = vmatpush.msra.mxu1 %v826_v7  ;;  %v1130_v59 = vld [vmem:[%s5854_s14 + $0xb80] sm:$0xff] }
 0x273   :  { %v1182_v60 = vld [vmem:[%s5854_s14 + $0xd20] sm:$0xff] }
 0x274   :  { %v1054_v61 = vld [vmem:[%s5854_s14 + $0x920] sm:$0xff]  ;;  %v2516_v6 = vpop.eup %2515 }
 0x275   :  { %v1254_v62 = vld [vmem:[%s5854_s14 + $0xf60] sm:$0xff]  ;;  %v746_v12 = vmul.f32 %v2516_v6, %v3825_v55  ;;  %vm751_vm9 = vweird.f32 %v2516_v6 }
 0x276   :  { %v1126_v63 = vld [vmem:[%s5854_s14 + $0xb60] sm:$0xff]  ;;  %vm3922_vm10 = vmor %vm750_vm8, %vm751_vm9  ;;  %vm2484_vm8 = vcmask 11264  }
 0x277   :  { %v1178_v0 = vld [vmem:[%s5854_s14 + $0xd00] sm:$0xff]  ;;  %v747_v18 = vsub.f32 1.0, %v746_v12  ;;  %v935_v12 = vld [vmem:[%s5854_s14 + $0x568] sm:$0xff] }
 0x278   :  { %v1050_v1 = vld [vmem:[%s5854_s14 + $0x900] sm:$0xff] }
 0x279   :  { %v1250_v2 = vld [vmem:[%s5854_s14 + $0xf40] sm:$0xff]  ;;  %v748_v23 = vmul.f32 %v2516_v6, %v747_v18  ;;  %v875_v18 = vld [vmem:[%s5854_s14 + $0x388] sm:$0xff] }
 0x27a   :  { %v1122_v3 = vld [vmem:[%s5854_s14 + $0xb40] sm:$0xff] }
 0x27b   :  { %v1174_v4 = vld [vmem:[%s5854_s14 + $0xce0] sm:$0xff] }
 0x27c   :  { %v1046_v5 = vld [vmem:[%s5854_s14 + $0x8e0] sm:$0xff] }
 0x27d   :  { %v1246_v7 = vld [vmem:[%s5854_s14 + $0xf20] sm:$0xff] }
 0x27e   :  { %v1118_v8 = vld [vmem:[%s5854_s14 + $0xb20] sm:$0xff] }
 0x27f   :  { %v1170_v9 = vld [vmem:[%s5854_s14 + $0xcc0] sm:$0xff] }
 0x280   :  { %v1042_v10 = vld [vmem:[%s5854_s14 + $0x8c0] sm:$0xff] }
 0x281   :  { %v1242_v13 = vld [vmem:[%s5854_s14 + $0xf00] sm:$0xff] }
 0x282   :  { %v1166_v16 = vld [vmem:[%s5854_s14 + $0xca0] sm:$0xff] }
 0x283   :  { %v1162_v21 = vld [vmem:[%s5854_s14 + $0xc80] sm:$0xff] }
 0x284   :  { %v1234_v25 = vld [vmem:[%s5854_s14 + $0xec0] sm:$0xff] }
 0x285   :  { %v1094_v38 = vld [vmem:[%s5854_s14 + $0xa60] sm:$0xff] }
 0x2ce   :  { %v530_v19 = vpop.f32.mrf.mxu0  ;;  %v550_v22 = vpop.f32.mrf.mxu1 }
 0x2cf   :  { %v531_v20 = vadd.f32 %v530_v19, %v509_v14  ;;  %v1238_v19 = vld [vmem:[%s5854_s14 + $0xee0] sm:$0xff] }
 0x2d1   :  { %v551_v24 = vadd.f32 %v550_v22, %v531_v20  ;;  %v1110_v20 = vld [vmem:[%s5854_s14 + $0xae0] sm:$0xff] }
 0x2d2   :  { %v1034_v22 = vld [vmem:[%s5854_s14 + $0x880] sm:$0xff] }
 0x2d3   :  { %v593_v27 = vmax.f32 %v551_v24, 0.0  ;;  %v756_v24 = vand.u32 2147483648, %v3825_v55 }
 0x2d5   :  { %v570_v39 = vpop.f32.mrf.mxu2  ;;  %611 = vmatmul.f32.vlgmr.msrb.gmra.mxu0 %v593_v27  ;;  %651 = vmatmul.f32.vlgmr.msrb.gmra.mxu2 %v593_v27  ;;  %v590_v45 = vpop.f32.mrf.mxu3  ;;  %v1106_v27 = vld [vmem:[%s5854_s14 + $0xac0] sm:$0xff]  ;;  %v757_v42 = vor.u32 1.1754944e-38, %v756_v24  ;;  %v799_v24 = vld [vmem:[%s5854_s14 + $0x128] sm:$0xff] }
 0x2d6   :  { %v571_v44 = vadd.f32 %v570_v39, %v510_v26  ;;  %1425 = vmatpush.msrb.mxu2 %v1206_v28  ;;  %1385 = vmatpush.msrb.mxu0 %v1078_v29  ;;  %v754_v28 = vand.u32 2147483647, %v3825_v55  ;;  %v1158_v29 = vld [vmem:[%s5854_s14 + $0xc60] sm:$0xff] }
 0x2d7   :  { %v1030_v39 = vld [vmem:[%s5854_s14 + $0x860] sm:$0xff] }
 0x2d8   :  { %v591_v50 = vadd.f32 %v590_v45, %v571_v44  ;;  %1426 = vmatpush.msrb.mxu2 %v1202_v40  ;;  %1386 = vmatpush.msrb.mxu0 %v1074_v41  ;;  %v749_v40 = vadd.f32 %v2516_v6, %v748_v23  ;;  %v1230_v44 = vld [vmem:[%s5854_s14 + $0xea0] sm:$0xff]  ;;  %vm755_vm11 = vcmp.eq.f32.partialorder %v754_v28, 8.507059e+37  ;;  %v995_v23 = vld [vmem:[%s5854_s14 + $0x748] sm:$0xff] }
 0x2d9   :  { %v1102_v45 = vld [vmem:[%s5854_s14 + $0xaa0] sm:$0xff]  ;;  %v991_v28 = vld [vmem:[%s5854_s14 + $0x728] sm:$0xff] }
 0x2da   :  { %v594_v30 = vmax.f32 %v591_v50, 0.0  ;;  %1427 = vmatpush.msrb.mxu2 %v1198_v48  ;;  %1387 = vmatpush.msrb.mxu0 %v1070_v49  ;;  %v1154_v48 = vld [vmem:[%s5854_s14 + $0xc40] sm:$0xff]  ;;  %v753_v50 = vsel %vm3922_vm10, %v2516_v6, %v749_v40  ;;  %v815_v6 = vld [vmem:[%s5854_s14 + $0x1a8] sm:$0xff] }
 0x2db   :  { %v1026_v49 = vld [vmem:[%s5854_s14 + $0x840] sm:$0xff]  ;;  %v863_v40 = vld [vmem:[%s5854_s14 + $0x328] sm:$0xff] }
 0x2dc   :  { %631 = vmatmul.f32.vlgmr.msrb.gmra.mxu1 %v594_v30  ;;  %671 = vmatmul.f32.vlgmr.msrb.gmra.mxu3 %v594_v30  ;;  %v1226_v30 = vld [vmem:[%s5854_s14 + $0xe80] sm:$0xff]  ;;  %v987_v41 = vld [vmem:[%s5854_s14 + $0x708] sm:$0xff] }
 0x2dd   :  { %1445 = vmatpush.msrb.mxu3 %v1270_v31  ;;  %1405 = vmatpush.msrb.mxu1 %v1142_v32  ;;  %v1098_v31 = vld [vmem:[%s5854_s14 + $0xa80] sm:$0xff]  ;;  %v758_v32 = vsel %vm755_vm11, %v757_v42, %v753_v50  ;;  %v791_v42 = vld [vmem:[%s5854_s14 + $0xe8] sm:$0xff] }
 0x2de   :  { %1428 = vmatpush.msrb.mxu2 %v1194_v33  ;;  %1388 = vmatpush.msrb.mxu0 %v1066_v34  ;;  %v1150_v33 = vld [vmem:[%s5854_s14 + $0xc20] sm:$0xff]  ;;  %v911_v50 = vld [vmem:[%s5854_s14 + $0x4a8] sm:$0xff] }
 0x2df   :  { %1446 = vmatpush.msrb.mxu3 %v1266_v35  ;;  %1406 = vmatpush.msrb.mxu1 %v1138_v37  ;;  %v1022_v34 = vld [vmem:[%s5854_s14 + $0x820] sm:$0xff]  ;;  %v761_v35 = vmul.f32 %v758_v32, %v3778_v36  ;;  %v783_v32 = vld [vmem:[%s5854_s14 + $0xa8] sm:$0xff] }
 0x2e0   :  { %1429 = vmatpush.msrb.mxu2 %v1190_v51  ;;  %1389 = vmatpush.msrb.mxu0 %v1062_v52  ;;  %v1222_v37 = vld [vmem:[%s5854_s14 + $0xe60] sm:$0xff] }
 0x2e1   :  { %1447 = vmatpush.msrb.mxu3 %v1262_v53  ;;  %1407 = vmatpush.msrb.mxu1 %v1134_v54  ;;  %v1146_v51 = vld [vmem:[%s5854_s14 + $0xc00] sm:$0xff]  ;;  %1288 = vst [vmem:[#allocation1 + $0x20] ss:$4 sm:$0xff] %v761_v35  ;;  %v3971_v54 = vld.sshfl [vmem:[#allocation1 + $0x10] sm:$0xff pattern:$0x73625140] }
 0x2e2   :  { %1430 = vmatpush.msrb.mxu2 %v1186_v56  ;;  %1390 = vmatpush.msrb.mxu0 %v1058_v57  ;;  %v1018_v36 = vld [vmem:[%s5854_s14 + $0x800] sm:$0xff]  ;;  %v951_v57 = vld [vmem:[%s5854_s14 + $0x5e8] sm:$0xff] }
 0x2e3   :  { %1448 = vmatpush.msrb.mxu3 %v1258_v58  ;;  %1408 = vmatpush.msrb.mxu1 %v1130_v59  ;;  %v1218_v52 = vld [vmem:[%s5854_s14 + $0xe40] sm:$0xff]  ;;  %v3984_v59 = vld.sshfl [vmem:[#allocation1 + $0x18] sm:$0xff pattern:$0x73625140]  ;;  %v975_v35 = vld [vmem:[%s5854_s14 + $0x6a8] sm:$0xff] }
 0x2e4   :  { %1431 = vmatpush.msrb.mxu2 %v1182_v60  ;;  %1391 = vmatpush.msrb.mxu0 %v1054_v61  ;;  %v1090_v53 = vld [vmem:[%s5854_s14 + $0xa40] sm:$0xff]  ;;  %v823_v61 = vld [vmem:[%s5854_s14 + $0x1e8] sm:$0xff] }
 0x2e5   :  { %1449 = vmatpush.msrb.mxu3 %v1254_v62  ;;  %1409 = vmatpush.msrb.mxu1 %v1126_v63  ;;  %v3973_v55 = vld.sshfl [vmem:[#allocation1] sm:$0xff pattern:$0x73625140]  ;;  %v947_v62 = vld [vmem:[%s5854_s14 + $0x5c8] sm:$0xff] }
 0x2e6   :  { %1432 = vmatpush.msrb.mxu2 %v1178_v0  ;;  %1392 = vmatpush.msrb.mxu0 %v1050_v1  ;;  %v1214_v56 = vld [vmem:[%s5854_s14 + $0xe20] sm:$0xff]  ;;  %v1015_v63 = vld [vmem:[%s5854_s14 + $0x7e8] sm:$0xff] }
 0x2e7   :  { %1450 = vmatpush.msrb.mxu3 %v1250_v2  ;;  %1410 = vmatpush.msrb.mxu1 %v1122_v3  ;;  %v1086_v58 = vld [vmem:[%s5854_s14 + $0xa20] sm:$0xff]  ;;  %v819_v1 = vld [vmem:[%s5854_s14 + $0x1c8] sm:$0xff] }
 0x2e8   :  { %1433 = vmatpush.msrb.mxu2 %v1174_v4  ;;  %1393 = vmatpush.msrb.mxu0 %v1046_v5  ;;  %v1210_v60 = vld [vmem:[%s5854_s14 + $0xe00] sm:$0xff]  ;;  %v4007_v2 = vld.sshfl [vmem:[#allocation1 + $0x8] sm:$0xff pattern:$0x73625140] }
 0x2e9   :  { %1451 = vmatpush.msrb.mxu3 %v1246_v7  ;;  %1411 = vmatpush.msrb.mxu1 %v1118_v8  ;;  %v1082_v0 = vld [vmem:[%s5854_s14 + $0xa00] sm:$0xff]  ;;  %v943_v3 = vld [vmem:[%s5854_s14 + $0x5a8] sm:$0xff] }
 0x2ea   :  { %1434 = vmatpush.msrb.mxu2 %v1170_v9  ;;  %1394 = vmatpush.msrb.mxu0 %v1042_v10  ;;  %v887_v4 = vld [vmem:[%s5854_s14 + $0x3e8] sm:$0xff] }
 0x2eb   :  { %1452 = vmatpush.msrb.mxu3 %v1242_v13  ;;  %1412 = vmatpush.msrb.mxu1 %v1114_v15  ;;  %v1011_v5 = vld [vmem:[%s5854_s14 + $0x7c8] sm:$0xff] }
 0x2ec   :  { %1435 = vmatpush.msrb.mxu2 %v1166_v16  ;;  %1395 = vmatpush.msrb.mxu0 %v1038_v17  ;;  %v939_v7 = vld [vmem:[%s5854_s14 + $0x588] sm:$0xff] }
 0x2ed   :  { %1453 = vmatpush.msrb.mxu3 %v1238_v19  ;;  %1413 = vmatpush.msrb.mxu1 %v1110_v20  ;;  %v883_v8 = vld [vmem:[%s5854_s14 + $0x3c8] sm:$0xff] }
 0x2ee   :  { %1436 = vmatpush.msrb.mxu2 %v1162_v21  ;;  %1396 = vmatpush.msrb.mxu0 %v1034_v22  ;;  %v1007_v9 = vld [vmem:[%s5854_s14 + $0x7a8] sm:$0xff] }
 0x2ef   :  { %1454 = vmatpush.msrb.mxu3 %v1234_v25  ;;  %1414 = vmatpush.msrb.mxu1 %v1106_v27  ;;  %v811_v10 = vld [vmem:[%s5854_s14 + $0x188] sm:$0xff] }
 0x2f0   :  { %1437 = vmatpush.msrb.mxu2 %v1158_v29  ;;  %1397 = vmatpush.msrb.mxu0 %v1030_v39  ;;  %v879_v13 = vld [vmem:[%s5854_s14 + $0x3a8] sm:$0xff] }
 0x2f1   :  { %1455 = vmatpush.msrb.mxu3 %v1230_v44  ;;  %1415 = vmatpush.msrb.mxu1 %v1102_v45  ;;  %v1003_v15 = vld [vmem:[%s5854_s14 + $0x788] sm:$0xff] }
 0x2f2   :  { %1438 = vmatpush.msrb.mxu2 %v1154_v48  ;;  %1398 = vmatpush.msrb.mxu0 %v1026_v49  ;;  %v807_v16 = vld [vmem:[%s5854_s14 + $0x168] sm:$0xff] }
 0x2f3   :  { %1456 = vmatpush.msrb.mxu3 %v1226_v30  ;;  %1416 = vmatpush.msrb.mxu1 %v1098_v31  ;;  %v931_v17 = vld [vmem:[%s5854_s14 + $0x548] sm:$0xff] }
 0x2f4   :  { %1439 = vmatpush.msrb.mxu2 %v1150_v33  ;;  %1399 = vmatpush.msrb.mxu0 %v1022_v34  ;;  %v999_v19 = vld [vmem:[%s5854_s14 + $0x768] sm:$0xff] }
 0x2f5   :  { %1457 = vmatpush.msrb.mxu3 %v1222_v37  ;;  %1417 = vmatpush.msrb.mxu1 %v1094_v38  ;;  %v803_v20 = vld [vmem:[%s5854_s14 + $0x148] sm:$0xff] }
 0x2f6   :  { %1440 = vmatpush.msrb.mxu2 %v1146_v51  ;;  %1400 = vmatpush.msrb.mxu0 %v1018_v36  ;;  %v927_v21 = vld [vmem:[%s5854_s14 + $0x528] sm:$0xff] }
 0x2f7   :  { %1458 = vmatpush.msrb.mxu3 %v1218_v52  ;;  %1418 = vmatpush.msrb.mxu1 %v1090_v53  ;;  %v871_v22 = vld [vmem:[%s5854_s14 + $0x368] sm:$0xff] }
 0x2f8   :  { %1361 = vmatmul.f32.vlgmr.msra.gmra.mxu2 %v3971_v54  ;;  %1321 = vmatmul.f32.vlgmr.msra.gmra.mxu0 %v3973_v55  ;;  %v923_v25 = vld [vmem:[%s5854_s14 + $0x508] sm:$0xff] }
 0x2f9   :  { %1459 = vmatpush.msrb.mxu3 %v1214_v56  ;;  %1505 = vmatpush.msra.mxu2 %v951_v57  ;;  %v867_v27 = vld [vmem:[%s5854_s14 + $0x348] sm:$0xff] }
 0x2fa   :  { %1419 = vmatpush.msrb.mxu1 %v1086_v58  ;;  %1381 = vmatmul.f32.vlgmr.msra.gmra.mxu3 %v3984_v59  ;;  %v795_v29 = vld [vmem:[%s5854_s14 + $0x108] sm:$0xff] }
 0x2fb   :  { %1460 = vmatpush.msrb.mxu3 %v1210_v60  ;;  %1465 = vmatpush.msra.mxu0 %v823_v61  ;;  %v919_v39 = vld [vmem:[%s5854_s14 + $0x4e8] sm:$0xff] }
 0x2fc   :  { %1506 = vmatpush.msra.mxu2 %v947_v62  ;;  %1420 = vmatpush.msrb.mxu1 %v1082_v0  ;;  %v915_v44 = vld [vmem:[%s5854_s14 + $0x4c8] sm:$0xff] }
 0x2fd   :  { %1525 = vmatpush.msra.mxu3 %v1015_v63  ;;  %1466 = vmatpush.msra.mxu0 %v819_v1  ;;  %v859_v45 = vld [vmem:[%s5854_s14 + $0x308] sm:$0xff] }
 0x2fe   :  { %1341 = vmatmul.f32.vlgmr.msra.gmra.mxu1 %v4007_v2  ;;  %1507 = vmatpush.msra.mxu2 %v943_v3  ;;  %v983_v48 = vld [vmem:[%s5854_s14 + $0x6e8] sm:$0xff] }
 0x2ff   :  { %1485 = vmatpush.msra.mxu1 %v887_v4  ;;  %1526 = vmatpush.msra.mxu3 %v1011_v5  ;;  %v787_v49 = vld [vmem:[%s5854_s14 + $0xc8] sm:$0xff]  ;;  %v4175_v4 = vld.sshfl [vmem:[#allocation1 + $0x30] sm:$0xff pattern:$0x73625140] }
 0x300   :  { %1467 = vmatpush.msra.mxu0 %v815_v6  ;;  %1508 = vmatpush.msra.mxu2 %v939_v7  ;;  %v855_v30 = vld [vmem:[%s5854_s14 + $0x2e8] sm:$0xff] }
 0x301   :  { %1486 = vmatpush.msra.mxu1 %v883_v8  ;;  %1527 = vmatpush.msra.mxu3 %v1007_v9  ;;  %v979_v31 = vld [vmem:[%s5854_s14 + $0x6c8] sm:$0xff]  ;;  %v4189_v9 = vld.sshfl [vmem:[#allocation1 + $0x20] sm:$0xff pattern:$0x73625140] }
 0x302   :  { %1468 = vmatpush.msra.mxu0 %v811_v10  ;;  %1509 = vmatpush.msra.mxu2 %v935_v12  ;;  %v907_v33 = vld [vmem:[%s5854_s14 + $0x488] sm:$0xff]  ;;  %v4192_v10 = vld.sshfl [vmem:[#allocation1 + $0x38] sm:$0xff pattern:$0x73625140] }
 0x303   :  { %1487 = vmatpush.msra.mxu1 %v879_v13  ;;  %1528 = vmatpush.msra.mxu3 %v1003_v15  ;;  %v851_v34 = vld [vmem:[%s5854_s14 + $0x2c8] sm:$0xff] }
 0x304   :  { %1469 = vmatpush.msra.mxu0 %v807_v16  ;;  %1510 = vmatpush.msra.mxu2 %v931_v17  ;;  %v779_v37 = vld [vmem:[%s5854_s14 + $0x88] sm:$0xff] }
 0x305   :  { %1488 = vmatpush.msra.mxu1 %v875_v18  ;;  %1529 = vmatpush.msra.mxu3 %v999_v19  ;;  %v903_v38 = vld [vmem:[%s5854_s14 + $0x468] sm:$0xff] }
 0x306   :  { %1470 = vmatpush.msra.mxu0 %v803_v20  ;;  %1511 = vmatpush.msra.mxu2 %v927_v21  ;;  %v847_v51 = vld [vmem:[%s5854_s14 + $0x2a8] sm:$0xff] }
 0x307   :  { %1489 = vmatpush.msra.mxu1 %v871_v22  ;;  %1530 = vmatpush.msra.mxu3 %v995_v23  ;;  %v971_v36 = vld [vmem:[%s5854_s14 + $0x688] sm:$0xff] }
 0x308   :  { %1471 = vmatpush.msra.mxu0 %v799_v24  ;;  %1512 = vmatpush.msra.mxu2 %v923_v25  ;;  %v775_v52 = vld [vmem:[%s5854_s14 + $0x68] sm:$0xff] }
 0x309   :  { %1490 = vmatpush.msra.mxu1 %v867_v27  ;;  %1531 = vmatpush.msra.mxu3 %v991_v28  ;;  %v899_v53 = vld [vmem:[%s5854_s14 + $0x448] sm:$0xff] }
 0x30a   :  { %1472 = vmatpush.msra.mxu0 %v795_v29  ;;  %1513 = vmatpush.msra.mxu2 %v919_v39  ;;  %v843_v56 = vld [vmem:[%s5854_s14 + $0x288] sm:$0xff] }
 0x30b   :  { %1491 = vmatpush.msra.mxu1 %v863_v40  ;;  %1532 = vmatpush.msra.mxu3 %v987_v41  ;;  %v967_v57 = vld [vmem:[%s5854_s14 + $0x668] sm:$0xff] }
 0x30c   :  { %1473 = vmatpush.msra.mxu0 %v791_v42  ;;  %1514 = vmatpush.msra.mxu2 %v915_v44  ;;  %v771_v58 = vld [vmem:[%s5854_s14 + $0x48] sm:$0xff] }
 0x30d   :  { %1492 = vmatpush.msra.mxu1 %v859_v45  ;;  %1533 = vmatpush.msra.mxu3 %v983_v48  ;;  %v895_v60 = vld [vmem:[%s5854_s14 + $0x428] sm:$0xff] }
 0x30e   :  { %1474 = vmatpush.msra.mxu0 %v787_v49  ;;  %1515 = vmatpush.msra.mxu2 %v911_v50  ;;  %v839_v61 = vld [vmem:[%s5854_s14 + $0x268] sm:$0xff] }
 0x30f   :  { %1493 = vmatpush.msra.mxu1 %v855_v30  ;;  %1534 = vmatpush.msra.mxu3 %v979_v31  ;;  %v963_v62 = vld [vmem:[%s5854_s14 + $0x648] sm:$0xff] }
 0x310   :  { %1475 = vmatpush.msra.mxu0 %v783_v32  ;;  %1516 = vmatpush.msra.mxu2 %v907_v33  ;;  %v767_v63 = vld [vmem:[%s5854_s14 + $0x28] sm:$0xff] }
 0x311   :  { %1494 = vmatpush.msra.mxu1 %v851_v34  ;;  %1535 = vmatpush.msra.mxu3 %v975_v35  ;;  %v891_v0 = vld [vmem:[%s5854_s14 + $0x408] sm:$0xff] }
 0x312   :  { %1476 = vmatpush.msra.mxu0 %v779_v37  ;;  %1517 = vmatpush.msra.mxu2 %v903_v38  ;;  %v835_v1 = vld [vmem:[%s5854_s14 + $0x248] sm:$0xff] }
 0x313   :  { %1495 = vmatpush.msra.mxu1 %v847_v51  ;;  %1536 = vmatpush.msra.mxu3 %v971_v36  ;;  %v959_v3 = vld [vmem:[%s5854_s14 + $0x628] sm:$0xff] }
 0x314   :  { %1477 = vmatpush.msra.mxu0 %v775_v52  ;;  %1518 = vmatpush.msra.mxu2 %v899_v53  ;;  %v763_v5 = vld [vmem:[%s5854_s14 + $0x8] sm:$0xff] }
 0x315   :  { %1496 = vmatpush.msra.mxu1 %v843_v56  ;;  %1537 = vmatpush.msra.mxu3 %v967_v57  ;;  %v1207_v6 = vld [vmem:[%s5854_s14 + $0xde8] sm:$0xff] }
 0x316   :  { %1478 = vmatpush.msra.mxu0 %v771_v58  ;;  %1519 = vmatpush.msra.mxu2 %v895_v60  ;;  %v831_v7 = vld [vmem:[%s5854_s14 + $0x228] sm:$0xff] }
 0x317   :  { %1497 = vmatpush.msra.mxu1 %v839_v61  ;;  %1538 = vmatpush.msra.mxu3 %v963_v62  ;;  %v955_v8 = vld [vmem:[%s5854_s14 + $0x608] sm:$0xff] }
 0x318   :  { %1479 = vmatpush.msra.mxu0 %v767_v63  ;;  %1520 = vmatpush.msra.mxu2 %v891_v0  ;;  %v1079_v12 = vld [vmem:[%s5854_s14 + $0x9e8] sm:$0xff] }
 0x319   :  { %1498 = vmatpush.msra.mxu1 %v835_v1  ;;  %1539 = vmatpush.msra.mxu3 %v959_v3  ;;  %v1203_v13 = vld [vmem:[%s5854_s14 + $0xdc8] sm:$0xff] }
 0x31a   :  { %1441 = vmatmul.f32.vlgmr.msrb.gmra.mxu2 %v4175_v4  ;;  %1480 = vmatpush.msra.mxu0 %v763_v5  ;;  %v1271_v15 = vld [vmem:[%s5854_s14 + $0xfe8] sm:$0xff] }
 0x31b   :  { %1585 = vmatpush.msrb.mxu2 %v1207_v6  ;;  %1499 = vmatpush.msra.mxu1 %v831_v7  ;;  %v827_v16 = vld [vmem:[%s5854_s14 + $0x208] sm:$0xff] }
 0x31c   :  { %1540 = vmatpush.msra.mxu3 %v955_v8  ;;  %1401 = vmatmul.f32.vlgmr.msrb.gmra.mxu0 %v4189_v9  ;;  %v1075_v17 = vld [vmem:[%s5854_s14 + $0x9c8] sm:$0xff] }
 0x31d   :  { %1461 = vmatmul.f32.vlgmr.msrb.gmra.mxu3 %v4192_v10  ;;  %1545 = vmatpush.msrb.mxu0 %v1079_v12  ;;  %v4211_v18 = vld.sshfl [vmem:[#allocation1 + $0x28] sm:$0xff pattern:$0x73625140] }
 0x31e   :  { %v1199_v19 = vld [vmem:[%s5854_s14 + $0xda8] sm:$0xff]  ;;  %1586 = vmatpush.msrb.mxu2 %v1203_v13  ;;  %1605 = vmatpush.msrb.mxu3 %v1271_v15 }
 0x31f   :  { %v1143_v20 = vld [vmem:[%s5854_s14 + $0xbe8] sm:$0xff]  ;;  %1500 = vmatpush.msra.mxu1 %v827_v16  ;;  %1546 = vmatpush.msrb.mxu0 %v1075_v17 }
 0x320   :  { %v1267_v21 = vld [vmem:[%s5854_s14 + $0xfc8] sm:$0xff]  ;;  %1421 = vmatmul.f32.vlgmr.msrb.gmra.mxu1 %v4211_v18  ;;  %1587 = vmatpush.msrb.mxu2 %v1199_v19 }
 0x321   :  { %v1071_v22 = vld [vmem:[%s5854_s14 + $0x9a8] sm:$0xff]  ;;  %1565 = vmatpush.msrb.mxu1 %v1143_v20  ;;  %1606 = vmatpush.msrb.mxu3 %v1267_v21  ;;  %v952_v21 = vld [vmem:[%s5854_s14 + $0x5f0] sm:$0xff] }
 0x322   :  { %v1195_v23 = vld [vmem:[%s5854_s14 + $0xd88] sm:$0xff]  ;;  %1547 = vmatpush.msrb.mxu0 %v1071_v22  ;;  %1521 = vmatmul.f32.vlgmr.msra.gmra.mxu2 %v3971_v54 }
 0x323   :  { %v1139_v24 = vld [vmem:[%s5854_s14 + $0xbc8] sm:$0xff]  ;;  %1588 = vmatpush.msrb.mxu2 %v1195_v23 }
 0x324   :  { %v1263_v25 = vld [vmem:[%s5854_s14 + $0xfa8] sm:$0xff]  ;;  %1566 = vmatpush.msrb.mxu1 %v1139_v24  ;;  %1481 = vmatmul.f32.vlgmr.msra.gmra.mxu0 %v3973_v55  ;;  %v824_v24 = vld [vmem:[%s5854_s14 + $0x1f0] sm:$0xff] }
 0x325   :  { %v1067_v27 = vld [vmem:[%s5854_s14 + $0x988] sm:$0xff]  ;;  %1607 = vmatpush.msrb.mxu3 %v1263_v25  ;;  %v948_v25 = vld [vmem:[%s5854_s14 + $0x5d0] sm:$0xff] }
 0x326   :  { %v1191_v28 = vld [vmem:[%s5854_s14 + $0xd68] sm:$0xff]  ;;  %1548 = vmatpush.msrb.mxu0 %v1067_v27  ;;  %1541 = vmatmul.f32.vlgmr.msra.gmra.mxu3 %v3984_v59  ;;  %v1016_v27 = vld [vmem:[%s5854_s14 + $0x7f0] sm:$0xff] }
 0x327   :  { %v1135_v29 = vld [vmem:[%s5854_s14 + $0xba8] sm:$0xff]  ;;  %1589 = vmatpush.msrb.mxu2 %v1191_v28  ;;  %v820_v28 = vld [vmem:[%s5854_s14 + $0x1d0] sm:$0xff] }
 0x328   :  { %v1259_v39 = vld [vmem:[%s5854_s14 + $0xf88] sm:$0xff]  ;;  %1567 = vmatpush.msrb.mxu1 %v1135_v29  ;;  %v944_v29 = vld [vmem:[%s5854_s14 + $0x5b0] sm:$0xff] }
 0x329   :  { %v1063_v40 = vld [vmem:[%s5854_s14 + $0x968] sm:$0xff]  ;;  %1608 = vmatpush.msrb.mxu3 %v1259_v39  ;;  %1501 = vmatmul.f32.vlgmr.msra.gmra.mxu1 %v4007_v2  ;;  %v1012_v39 = vld [vmem:[%s5854_s14 + $0x7d0] sm:$0xff] }
 0x32a   :  { %v1187_v41 = vld [vmem:[%s5854_s14 + $0xd48] sm:$0xff]  ;;  %1549 = vmatpush.msrb.mxu0 %v1063_v40  ;;  %v940_v40 = vld [vmem:[%s5854_s14 + $0x590] sm:$0xff] }
 0x32b   :  { %v1131_v42 = vld [vmem:[%s5854_s14 + $0xb88] sm:$0xff]  ;;  %1590 = vmatpush.msrb.mxu2 %v1187_v41  ;;  %v884_v41 = vld [vmem:[%s5854_s14 + $0x3d0] sm:$0xff] }
 0x32c   :  { %v1255_v44 = vld [vmem:[%s5854_s14 + $0xf68] sm:$0xff]  ;;  %1568 = vmatpush.msrb.mxu1 %v1131_v42  ;;  %v1008_v42 = vld [vmem:[%s5854_s14 + $0x7b0] sm:$0xff] }
 0x32d   :  { %v1059_v45 = vld [vmem:[%s5854_s14 + $0x948] sm:$0xff]  ;;  %1609 = vmatpush.msrb.mxu3 %v1255_v44  ;;  %v812_v44 = vld [vmem:[%s5854_s14 + $0x190] sm:$0xff] }
 0x32e   :  { %v1183_v48 = vld [vmem:[%s5854_s14 + $0xd28] sm:$0xff]  ;;  %1550 = vmatpush.msrb.mxu0 %v1059_v45  ;;  %v936_v45 = vld [vmem:[%s5854_s14 + $0x570] sm:$0xff] }
 0x32f   :  { %v1127_v49 = vld [vmem:[%s5854_s14 + $0xb68] sm:$0xff]  ;;  %1591 = vmatpush.msrb.mxu2 %v1183_v48  ;;  %v1004_v48 = vld [vmem:[%s5854_s14 + $0x790] sm:$0xff] }
 0x330   :  { %v1251_v50 = vld [vmem:[%s5854_s14 + $0xf48] sm:$0xff]  ;;  %1569 = vmatpush.msrb.mxu1 %v1127_v49  ;;  %v808_v49 = vld [vmem:[%s5854_s14 + $0x170] sm:$0xff] }
 0x331   :  { %v1055_v30 = vld [vmem:[%s5854_s14 + $0x928] sm:$0xff]  ;;  %1610 = vmatpush.msrb.mxu3 %v1251_v50  ;;  %v932_v50 = vld [vmem:[%s5854_s14 + $0x550] sm:$0xff] }
 0x332   :  { %v1179_v31 = vld [vmem:[%s5854_s14 + $0xd08] sm:$0xff]  ;;  %1551 = vmatpush.msrb.mxu0 %v1055_v30  ;;  %v876_v30 = vld [vmem:[%s5854_s14 + $0x390] sm:$0xff] }
 0x333   :  { %v1123_v32 = vld [vmem:[%s5854_s14 + $0xb48] sm:$0xff]  ;;  %1592 = vmatpush.msrb.mxu2 %v1179_v31  ;;  %v1000_v31 = vld [vmem:[%s5854_s14 + $0x770] sm:$0xff] }
 0x334   :  { %v1247_v33 = vld [vmem:[%s5854_s14 + $0xf28] sm:$0xff]  ;;  %1570 = vmatpush.msrb.mxu1 %v1123_v32  ;;  %v804_v32 = vld [vmem:[%s5854_s14 + $0x150] sm:$0xff] }
 0x335   :  { %v1051_v34 = vld [vmem:[%s5854_s14 + $0x908] sm:$0xff]  ;;  %1611 = vmatpush.msrb.mxu3 %v1247_v33  ;;  %v928_v33 = vld [vmem:[%s5854_s14 + $0x530] sm:$0xff] }
 0x336   :  { %v1175_v35 = vld [vmem:[%s5854_s14 + $0xce8] sm:$0xff]  ;;  %1552 = vmatpush.msrb.mxu0 %v1051_v34  ;;  %v872_v34 = vld [vmem:[%s5854_s14 + $0x370] sm:$0xff] }
 0x337   :  { %v1119_v37 = vld [vmem:[%s5854_s14 + $0xb28] sm:$0xff]  ;;  %1593 = vmatpush.msrb.mxu2 %v1175_v35  ;;  %v996_v35 = vld [vmem:[%s5854_s14 + $0x750] sm:$0xff] }
 0x338   :  { %v1243_v38 = vld [vmem:[%s5854_s14 + $0xf08] sm:$0xff]  ;;  %1571 = vmatpush.msrb.mxu1 %v1119_v37  ;;  %v800_v37 = vld [vmem:[%s5854_s14 + $0x130] sm:$0xff] }
 0x339   :  { %v1047_v51 = vld [vmem:[%s5854_s14 + $0x8e8] sm:$0xff]  ;;  %1612 = vmatpush.msrb.mxu3 %v1243_v38  ;;  %v924_v38 = vld [vmem:[%s5854_s14 + $0x510] sm:$0xff] }
 0x33a   :  { %v1171_v36 = vld [vmem:[%s5854_s14 + $0xcc8] sm:$0xff]  ;;  %1553 = vmatpush.msrb.mxu0 %v1047_v51  ;;  %v868_v51 = vld [vmem:[%s5854_s14 + $0x350] sm:$0xff] }
 0x33b   :  { %v1115_v52 = vld [vmem:[%s5854_s14 + $0xb08] sm:$0xff]  ;;  %1594 = vmatpush.msrb.mxu2 %v1171_v36  ;;  %v992_v36 = vld [vmem:[%s5854_s14 + $0x730] sm:$0xff] }
 0x33c   :  { %v1239_v53 = vld [vmem:[%s5854_s14 + $0xee8] sm:$0xff]  ;;  %1572 = vmatpush.msrb.mxu1 %v1115_v52  ;;  %v796_v52 = vld [vmem:[%s5854_s14 + $0x110] sm:$0xff] }
 0x33d   :  { %v1043_v56 = vld [vmem:[%s5854_s14 + $0x8c8] sm:$0xff]  ;;  %1613 = vmatpush.msrb.mxu3 %v1239_v53  ;;  %v920_v53 = vld [vmem:[%s5854_s14 + $0x4f0] sm:$0xff] }
 0x33e   :  { %v1167_v57 = vld [vmem:[%s5854_s14 + $0xca8] sm:$0xff]  ;;  %1554 = vmatpush.msrb.mxu0 %v1043_v56  ;;  %v864_v56 = vld [vmem:[%s5854_s14 + $0x330] sm:$0xff] }
 0x33f   :  { %v1111_v58 = vld [vmem:[%s5854_s14 + $0xae8] sm:$0xff]  ;;  %1595 = vmatpush.msrb.mxu2 %v1167_v57  ;;  %v988_v57 = vld [vmem:[%s5854_s14 + $0x710] sm:$0xff] }
 0x340   :  { %v1235_v60 = vld [vmem:[%s5854_s14 + $0xec8] sm:$0xff]  ;;  %1573 = vmatpush.msrb.mxu1 %v1111_v58  ;;  %v792_v58 = vld [vmem:[%s5854_s14 + $0xf0] sm:$0xff] }
 0x341   :  { %v1039_v61 = vld [vmem:[%s5854_s14 + $0x8a8] sm:$0xff]  ;;  %1614 = vmatpush.msrb.mxu3 %v1235_v60  ;;  %v916_v60 = vld [vmem:[%s5854_s14 + $0x4d0] sm:$0xff] }
 0x342   :  { %v1163_v62 = vld [vmem:[%s5854_s14 + $0xc88] sm:$0xff]  ;;  %1555 = vmatpush.msrb.mxu0 %v1039_v61  ;;  %v860_v61 = vld [vmem:[%s5854_s14 + $0x310] sm:$0xff] }
 0x343   :  { %v1107_v63 = vld [vmem:[%s5854_s14 + $0xac8] sm:$0xff]  ;;  %1596 = vmatpush.msrb.mxu2 %v1163_v62  ;;  %v984_v62 = vld [vmem:[%s5854_s14 + $0x6f0] sm:$0xff] }
 0x344   :  { %v1231_v0 = vld [vmem:[%s5854_s14 + $0xea8] sm:$0xff]  ;;  %1574 = vmatpush.msrb.mxu1 %v1107_v63  ;;  %v788_v63 = vld [vmem:[%s5854_s14 + $0xd0] sm:$0xff] }
 0x345   :  { %v1035_v1 = vld [vmem:[%s5854_s14 + $0x888] sm:$0xff]  ;;  %1615 = vmatpush.msrb.mxu3 %v1231_v0  ;;  %v912_v0 = vld [vmem:[%s5854_s14 + $0x4b0] sm:$0xff] }
 0x346   :  { %v1103_v3 = vld [vmem:[%s5854_s14 + $0xaa8] sm:$0xff]  ;;  %1556 = vmatpush.msrb.mxu0 %v1035_v1  ;;  %v856_v1 = vld [vmem:[%s5854_s14 + $0x2f0] sm:$0xff] }
 0x347   :  { %v1159_v5 = vld [vmem:[%s5854_s14 + $0xc68] sm:$0xff]  ;;  %1575 = vmatpush.msrb.mxu1 %v1103_v3  ;;  %v980_v3 = vld [vmem:[%s5854_s14 + $0x6d0] sm:$0xff] }
 0x348   :  { %v1227_v6 = vld [vmem:[%s5854_s14 + $0xe88] sm:$0xff]  ;;  %1597 = vmatpush.msrb.mxu2 %v1159_v5  ;;  %v784_v5 = vld [vmem:[%s5854_s14 + $0xb0] sm:$0xff] }
 0x349   :  { %v1031_v7 = vld [vmem:[%s5854_s14 + $0x868] sm:$0xff]  ;;  %1616 = vmatpush.msrb.mxu3 %v1227_v6  ;;  %v908_v6 = vld [vmem:[%s5854_s14 + $0x490] sm:$0xff] }
 0x34a   :  { %v1099_v8 = vld [vmem:[%s5854_s14 + $0xa88] sm:$0xff]  ;;  %1557 = vmatpush.msrb.mxu0 %v1031_v7  ;;  %v852_v7 = vld [vmem:[%s5854_s14 + $0x2d0] sm:$0xff] }
 0x34b   :  { %v1155_v12 = vld [vmem:[%s5854_s14 + $0xc48] sm:$0xff]  ;;  %1576 = vmatpush.msrb.mxu1 %v1099_v8  ;;  %v976_v8 = vld [vmem:[%s5854_s14 + $0x6b0] sm:$0xff] }
 0x34c   :  { %v1223_v54 = vld [vmem:[%s5854_s14 + $0xe68] sm:$0xff]  ;;  %1598 = vmatpush.msrb.mxu2 %v1155_v12  ;;  %v780_v12 = vld [vmem:[%s5854_s14 + $0x90] sm:$0xff] }
 0x34d   :  { %v1027_v13 = vld [vmem:[%s5854_s14 + $0x848] sm:$0xff]  ;;  %1617 = vmatpush.msrb.mxu3 %v1223_v54  ;;  %v904_v54 = vld [vmem:[%s5854_s14 + $0x470] sm:$0xff] }
 0x34e   :  { %v1095_v15 = vld [vmem:[%s5854_s14 + $0xa68] sm:$0xff]  ;;  %1558 = vmatpush.msrb.mxu0 %v1027_v13  ;;  %v848_v13 = vld [vmem:[%s5854_s14 + $0x2b0] sm:$0xff] }
 0x34f   :  { %v1151_v55 = vld [vmem:[%s5854_s14 + $0xc28] sm:$0xff]  ;;  %1577 = vmatpush.msrb.mxu1 %v1095_v15  ;;  %v972_v15 = vld [vmem:[%s5854_s14 + $0x690] sm:$0xff] }
 0x350   :  { %v1219_v16 = vld [vmem:[%s5854_s14 + $0xe48] sm:$0xff]  ;;  %1599 = vmatpush.msrb.mxu2 %v1151_v55  ;;  %v776_v55 = vld [vmem:[%s5854_s14 + $0x70] sm:$0xff] }
 0x351   :  { %v1023_v59 = vld [vmem:[%s5854_s14 + $0x828] sm:$0xff]  ;;  %1618 = vmatpush.msrb.mxu3 %v1219_v16  ;;  %v900_v16 = vld [vmem:[%s5854_s14 + $0x450] sm:$0xff] }
 0x352   :  { %v1091_v17 = vld [vmem:[%s5854_s14 + $0xa48] sm:$0xff]  ;;  %1559 = vmatpush.msrb.mxu0 %v1023_v59  ;;  %v844_v59 = vld [vmem:[%s5854_s14 + $0x290] sm:$0xff] }
 0x353   :  { %v1147_v19 = vld [vmem:[%s5854_s14 + $0xc08] sm:$0xff]  ;;  %1578 = vmatpush.msrb.mxu1 %v1091_v17  ;;  %v968_v17 = vld [vmem:[%s5854_s14 + $0x670] sm:$0xff] }
 0x354   :  { %v1215_v20 = vld [vmem:[%s5854_s14 + $0xe28] sm:$0xff]  ;;  %1600 = vmatpush.msrb.mxu2 %v1147_v19  ;;  %v772_v19 = vld [vmem:[%s5854_s14 + $0x50] sm:$0xff] }
 0x355   :  { %v1019_v2 = vld [vmem:[%s5854_s14 + $0x808] sm:$0xff]  ;;  %1619 = vmatpush.msrb.mxu3 %v1215_v20  ;;  %1601 = vmatmul.f32.vlgmr.msrb.gmra.mxu2 %v4175_v4  ;;  %v896_v20 = vld [vmem:[%s5854_s14 + $0x430] sm:$0xff] }
 0x356   :  { %v1087_v22 = vld [vmem:[%s5854_s14 + $0xa28] sm:$0xff]  ;;  %1560 = vmatpush.msrb.mxu0 %v1019_v2  ;;  %1665 = vmatpush.msra.mxu2 %v952_v21  ;;  %v840_v2 = vld [vmem:[%s5854_s14 + $0x270] sm:$0xff] }
 0x357   :  { %v1211_v23 = vld [vmem:[%s5854_s14 + $0xe08] sm:$0xff]  ;;  %1579 = vmatpush.msrb.mxu1 %v1087_v22  ;;  %1561 = vmatmul.f32.vlgmr.msrb.gmra.mxu0 %v4189_v9  ;;  %v888_v9 = vld [vmem:[%s5854_s14 + $0x3f0] sm:$0xff] }
 0x358   :  { %1620 = vmatpush.msrb.mxu3 %v1211_v23  ;;  %v1083_v4 = vld [vmem:[%s5854_s14 + $0xa08] sm:$0xff]  ;;  %1625 = vmatpush.msra.mxu0 %v824_v24  ;;  %v964_v21 = vld [vmem:[%s5854_s14 + $0x650] sm:$0xff] }
 0x359   :  { %1621 = vmatmul.f32.vlgmr.msrb.gmra.mxu3 %v4192_v10  ;;  %1666 = vmatpush.msra.mxu2 %v948_v25  ;;  %v816_v10 = vld [vmem:[%s5854_s14 + $0x1b0] sm:$0xff] }
 0x35a   :  { %1685 = vmatpush.msra.mxu3 %v1016_v27  ;;  %1580 = vmatpush.msrb.mxu1 %v1083_v4  ;;  %v768_v22 = vld [vmem:[%s5854_s14 + $0x30] sm:$0xff] }
 0x35b   :  { %1626 = vmatpush.msra.mxu0 %v820_v28  ;;  %1581 = vmatmul.f32.vlgmr.msrb.gmra.mxu1 %v4211_v18  ;;  %v880_v18 = vld [vmem:[%s5854_s14 + $0x3b0] sm:$0xff] }
 0x35c   :  { %1667 = vmatpush.msra.mxu2 %v944_v29  ;;  %1645 = vmatpush.msra.mxu1 %v888_v9  ;;  %v892_v23 = vld [vmem:[%s5854_s14 + $0x410] sm:$0xff] }
 0x35d   :  { %1686 = vmatpush.msra.mxu3 %v1012_v39  ;;  %1627 = vmatpush.msra.mxu0 %v816_v10  ;;  %v836_v24 = vld [vmem:[%s5854_s14 + $0x250] sm:$0xff] }
 0x35e   :  { %1668 = vmatpush.msra.mxu2 %v940_v40  ;;  %1646 = vmatpush.msra.mxu1 %v884_v41  ;;  %v960_v25 = vld [vmem:[%s5854_s14 + $0x630] sm:$0xff]  ;;  %v652_v41 = vpop.f32.mrf.mxu2 }
 0x35f   :  { %1687 = vmatpush.msra.mxu3 %v1008_v42  ;;  %1628 = vmatpush.msra.mxu0 %v812_v44  ;;  %v1208_v27 = vld [vmem:[%s5854_s14 + $0xdf0] sm:$0xff] }
 0x360   :  { %1669 = vmatpush.msra.mxu2 %v936_v45  ;;  %1647 = vmatpush.msra.mxu1 %v880_v18  ;;  %v764_v4 = vld [vmem:[%s5854_s14 + $0x10] sm:$0xff] }
 0x361   :  { %1688 = vmatpush.msra.mxu3 %v1004_v48  ;;  %1629 = vmatpush.msra.mxu0 %v808_v49  ;;  %v832_v28 = vld [vmem:[%s5854_s14 + $0x230] sm:$0xff]  ;;  %v612_v48 = vpop.f32.mrf.mxu0 }
 0x362   :  { %1670 = vmatpush.msra.mxu2 %v932_v50  ;;  %1648 = vmatpush.msra.mxu1 %v876_v30  ;;  %v956_v29 = vld [vmem:[%s5854_s14 + $0x610] sm:$0xff]  ;;  %v672_v30 = vpop.f32.mrf.mxu3 }
 0x363   :  { %1689 = vmatpush.msra.mxu3 %v1000_v31  ;;  %1630 = vmatpush.msra.mxu0 %v804_v32  ;;  %v1080_v9 = vld [vmem:[%s5854_s14 + $0x9f0] sm:$0xff]  ;;  %v653_v31 = vadd.f32 %v652_v41, %v510_v26 }
 0x364   :  { %1671 = vmatpush.msra.mxu2 %v928_v33  ;;  %1649 = vmatpush.msra.mxu1 %v872_v34  ;;  %v1204_v39 = vld [vmem:[%s5854_s14 + $0xdd0] sm:$0xff]  ;;  %v632_v34 = vpop.f32.mrf.mxu1 }
 0x365   :  { %1690 = vmatpush.msra.mxu3 %v996_v35  ;;  %1631 = vmatpush.msra.mxu0 %v800_v37  ;;  %v1272_v10 = vld [vmem:[%s5854_s14 + $0xff0] sm:$0xff]  ;;  %v613_v37 = vadd.f32 %v612_v48, %v509_v14 }
 0x366   :  { %1672 = vmatpush.msra.mxu2 %v924_v38  ;;  %1650 = vmatpush.msra.mxu1 %v868_v51  ;;  %v828_v40 = vld [vmem:[%s5854_s14 + $0x210] sm:$0xff] }
 0x367   :  { %1691 = vmatpush.msra.mxu3 %v992_v36  ;;  %1632 = vmatpush.msra.mxu0 %v796_v52  ;;  %v1076_v42 = vld [vmem:[%s5854_s14 + $0x9d0] sm:$0xff]  ;;  %v673_v36 = vadd.f32 %v672_v30, %v653_v31  ;;  %v633_v14 = vadd.f32 %v632_v34, %v613_v37  ;;  %v825_v31 = vld [vmem:[%s5854_s14 + $0x1f8] sm:$0xff] }
 0x368   :  { %1673 = vmatpush.msra.mxu2 %v920_v53  ;;  %1651 = vmatpush.msra.mxu1 %v864_v56  ;;  %v1144_v44 = vld [vmem:[%s5854_s14 + $0xbf0] sm:$0xff]  ;;  %v821_v37 = vld [vmem:[%s5854_s14 + $0x1d8] sm:$0xff] }
 0x369   :  { %1692 = vmatpush.msra.mxu3 %v988_v57  ;;  %1633 = vmatpush.msra.mxu0 %v792_v58  ;;  %v1200_v45 = vld [vmem:[%s5854_s14 + $0xdb0] sm:$0xff] }
 0x36a   :  { %1674 = vmatpush.msra.mxu2 %v916_v60  ;;  %1652 = vmatpush.msra.mxu1 %v860_v61  ;;  %v1268_v18 = vld [vmem:[%s5854_s14 + $0xfd0] sm:$0xff] }
 0x36b   :  { %1693 = vmatpush.msra.mxu3 %v984_v62  ;;  %1634 = vmatpush.msra.mxu0 %v788_v63  ;;  %v1072_v49 = vld [vmem:[%s5854_s14 + $0x9b0] sm:$0xff]  ;;  %v4668_v62 = vadd.f32 %v673_v36, %v3553_v47  ;;  %v1013_v36 = vld [vmem:[%s5854_s14 + $0x7d8] sm:$0xff] }
 0x36c   :  { %1675 = vmatpush.msra.mxu2 %v912_v0  ;;  %1653 = vmatpush.msra.mxu1 %v856_v1  ;;  %v1140_v50 = vld [vmem:[%s5854_s14 + $0xbd0] sm:$0xff] }
 0x36d   :  { %1694 = vmatpush.msra.mxu3 %v980_v3  ;;  %1635 = vmatpush.msra.mxu0 %v784_v5  ;;  %v1196_v32 = vld [vmem:[%s5854_s14 + $0xd90] sm:$0xff]  ;;  %v4683_v3 = vadd.f32 %v633_v14, %v3551_v46  ;;  %v885_v14 = vld [vmem:[%s5854_s14 + $0x3d8] sm:$0xff] }
 0x36e   :  { %1676 = vmatpush.msra.mxu2 %v908_v6  ;;  %1654 = vmatpush.msra.mxu1 %v852_v7  ;;  %v1264_v33 = vld [vmem:[%s5854_s14 + $0xfb0] sm:$0xff] }
 0x36f   :  { %1695 = vmatpush.msra.mxu3 %v976_v8  ;;  %1636 = vmatpush.msra.mxu0 %v780_v12  ;;  %v1068_v35 = vld [vmem:[%s5854_s14 + $0x990] sm:$0xff]  ;;  %v679_v8 = vadd.f32 %v4668_v62, %v4683_v3 }
 0x370   :  { %1677 = vmatpush.msra.mxu2 %v904_v54  ;;  %1655 = vmatpush.msra.mxu1 %v848_v13  ;;  %v1136_v26 = vld [vmem:[%s5854_s14 + $0xbb0] sm:$0xff] }
 0x371   :  { %1696 = vmatpush.msra.mxu3 %v972_v15  ;;  %1637 = vmatpush.msra.mxu0 %v776_v55  ;;  %v1192_v38 = vld [vmem:[%s5854_s14 + $0xd70] sm:$0xff] }
 0x372   :  { %1678 = vmatpush.msra.mxu2 %v900_v16  ;;  %1656 = vmatpush.msra.mxu1 %v844_v59  ;;  %v1260_v51 = vld [vmem:[%s5854_s14 + $0xf90] sm:$0xff] }
 0x373   :  { %1697 = vmatpush.msra.mxu3 %v968_v17  ;;  %1638 = vmatpush.msra.mxu0 %v772_v19  ;;  %v1064_v52 = vld [vmem:[%s5854_s14 + $0x970] sm:$0xff] }
 0x374   :  { %1679 = vmatpush.msra.mxu2 %v896_v20  ;;  %1657 = vmatpush.msra.mxu1 %v840_v2  ;;  %v1188_v53 = vld [vmem:[%s5854_s14 + $0xd50] sm:$0xff] }
 0x375   :  { %1698 = vmatpush.msra.mxu3 %v964_v21  ;;  %1639 = vmatpush.msra.mxu0 %v768_v22  ;;  %v1256_v56 = vld [vmem:[%s5854_s14 + $0xf70] sm:$0xff] }
 0x376   :  { %1680 = vmatpush.msra.mxu2 %v892_v23  ;;  %1658 = vmatpush.msra.mxu1 %v836_v24  ;;  %v1060_v57 = vld [vmem:[%s5854_s14 + $0x950] sm:$0xff] }
 0x377   :  { %1699 = vmatpush.msra.mxu3 %v960_v25  ;;  %1640 = vmatpush.msra.mxu0 %v764_v4  ;;  %v1128_v58 = vld [vmem:[%s5854_s14 + $0xb70] sm:$0xff] }
 0x378   :  { %1745 = vmatpush.msrb.mxu2 %v1208_v27  ;;  %1659 = vmatpush.msra.mxu1 %v832_v28  ;;  %v1184_v60 = vld [vmem:[%s5854_s14 + $0xd30] sm:$0xff] }
 0x379   :  { %1700 = vmatpush.msra.mxu3 %v956_v29  ;;  %1705 = vmatpush.msrb.mxu0 %v1080_v9  ;;  %v1252_v61 = vld [vmem:[%s5854_s14 + $0xf50] sm:$0xff] }
 0x37a   :  { %1746 = vmatpush.msrb.mxu2 %v1204_v39  ;;  %1660 = vmatpush.msra.mxu1 %v828_v40  ;;  %v1056_v63 = vld [vmem:[%s5854_s14 + $0x930] sm:$0xff] }
 0x37b   :  { %1765 = vmatpush.msrb.mxu3 %v1272_v10  ;;  %1706 = vmatpush.msrb.mxu0 %v1076_v42  ;;  %v1124_v0 = vld [vmem:[%s5854_s14 + $0xb50] sm:$0xff] }
 0x37c   :  { %1725 = vmatpush.msrb.mxu1 %v1144_v44  ;;  %1747 = vmatpush.msrb.mxu2 %v1200_v45  ;;  %v1180_v1 = vld [vmem:[%s5854_s14 + $0xd10] sm:$0xff] }
 0x37d   :  { %1766 = vmatpush.msrb.mxu3 %v1268_v18  ;;  %1707 = vmatpush.msrb.mxu0 %v1072_v49  ;;  %v1248_v47 = vld [vmem:[%s5854_s14 + $0xf30] sm:$0xff]  ;;  %v953_v18 = vld [vmem:[%s5854_s14 + $0x5f8] sm:$0xff] }
 0x37e   :  { %1726 = vmatpush.msrb.mxu1 %v1140_v50  ;;  %1748 = vmatpush.msrb.mxu2 %v1196_v32  ;;  %v1052_v5 = vld [vmem:[%s5854_s14 + $0x910] sm:$0xff]  ;;  %v949_v32 = vld [vmem:[%s5854_s14 + $0x5d8] sm:$0xff] }
 0x37f   :  { %1767 = vmatpush.msrb.mxu3 %v1264_v33  ;;  %1708 = vmatpush.msrb.mxu0 %v1068_v35  ;;  %v1120_v6 = vld [vmem:[%s5854_s14 + $0xb30] sm:$0xff]  ;;  %v1017_v33 = vld [vmem:[%s5854_s14 + $0x7f8] sm:$0xff]  ;;  %v4810_v35 = vld.sshfl [vmem:[#allocation1] sm:$0xff pattern:$0x73625140] }
 0x380   :  { %1727 = vmatpush.msrb.mxu1 %v1136_v26  ;;  %1749 = vmatpush.msrb.mxu2 %v1192_v38  ;;  %v1176_v7 = vld [vmem:[%s5854_s14 + $0xcf0] sm:$0xff]  ;;  %v4813_v26 = vld.sshfl [vmem:[#allocation1 + $0x18] sm:$0xff pattern:$0x73625140] }
 0x381   :  { %1768 = vmatpush.msrb.mxu3 %v1260_v51  ;;  %1709 = vmatpush.msrb.mxu0 %v1064_v52  ;;  %v1244_v46 = vld [vmem:[%s5854_s14 + $0xf10] sm:$0xff]  ;;  %v889_v38 = vld [vmem:[%s5854_s14 + $0x3f8] sm:$0xff] }
 0x382   :  { %1728 = vmatpush.msrb.mxu1 %v1132_v11  ;;  %1750 = vmatpush.msrb.mxu2 %v1188_v53  ;;  %v1048_v12 = vld [vmem:[%s5854_s14 + $0x8f0] sm:$0xff]  ;;  %v945_v51 = vld [vmem:[%s5854_s14 + $0x5b8] sm:$0xff]  ;;  %v4831_v11 = vld.sshfl [vmem:[#allocation1 + $0x8] sm:$0xff pattern:$0x73625140] }
 0x383   :  { %1769 = vmatpush.msrb.mxu3 %v1256_v56  ;;  %1710 = vmatpush.msrb.mxu0 %v1060_v57  ;;  %v1116_v54 = vld [vmem:[%s5854_s14 + $0xb10] sm:$0xff]  ;;  %v817_v52 = vld [vmem:[%s5854_s14 + $0x1b8] sm:$0xff] }
 0x384   :  { %1729 = vmatpush.msrb.mxu1 %v1128_v58  ;;  %1751 = vmatpush.msrb.mxu2 %v1184_v60  ;;  %v1172_v13 = vld [vmem:[%s5854_s14 + $0xcd0] sm:$0xff]  ;;  %v941_v53 = vld [vmem:[%s5854_s14 + $0x598] sm:$0xff] }
 0x385   :  { %1770 = vmatpush.msrb.mxu3 %v1252_v61  ;;  %1711 = vmatpush.msrb.mxu0 %v1056_v63  ;;  %v1240_v15 = vld [vmem:[%s5854_s14 + $0xef0] sm:$0xff]  ;;  %v1009_v56 = vld [vmem:[%s5854_s14 + $0x7b8] sm:$0xff] }
 0x386   :  { %1730 = vmatpush.msrb.mxu1 %v1124_v0  ;;  %1752 = vmatpush.msrb.mxu2 %v1180_v1  ;;  %v1044_v55 = vld [vmem:[%s5854_s14 + $0x8d0] sm:$0xff]  ;;  %v813_v57 = vld [vmem:[%s5854_s14 + $0x198] sm:$0xff] }
 0x387   :  { %1771 = vmatpush.msrb.mxu3 %v1248_v47  ;;  %1712 = vmatpush.msrb.mxu0 %v1052_v5  ;;  %v1112_v16 = vld [vmem:[%s5854_s14 + $0xaf0] sm:$0xff]  ;;  %v881_v58 = vld [vmem:[%s5854_s14 + $0x3b8] sm:$0xff] }
 0x388   :  { %1731 = vmatpush.msrb.mxu1 %v1120_v6  ;;  %1753 = vmatpush.msrb.mxu2 %v1176_v7  ;;  %v1168_v59 = vld [vmem:[%s5854_s14 + $0xcb0] sm:$0xff]  ;;  %v937_v60 = vld [vmem:[%s5854_s14 + $0x578] sm:$0xff] }
 0x389   :  { %1772 = vmatpush.msrb.mxu3 %v1244_v46  ;;  %680 = vadd.xlane.f32.xlu1 %v679_v8  ;;  %v1236_v17 = vld [vmem:[%s5854_s14 + $0xed0] sm:$0xff]  ;;  %v1005_v61 = vld [vmem:[%s5854_s14 + $0x798] sm:$0xff] }
 0x38a   :  { %1713 = vmatpush.msrb.mxu0 %v1048_v12  ;;  %1732 = vmatpush.msrb.mxu1 %v1116_v54  ;;  %v1040_v19 = vld [vmem:[%s5854_s14 + $0x8b0] sm:$0xff]  ;;  %v809_v63 = vld [vmem:[%s5854_s14 + $0x178] sm:$0xff] }
 0x38b   :  { %1754 = vmatpush.msrb.mxu2 %v1172_v13  ;;  %1773 = vmatpush.msrb.mxu3 %v1240_v15  ;;  %v1108_v20 = vld [vmem:[%s5854_s14 + $0xad0] sm:$0xff]  ;;  %v877_v0 = vld [vmem:[%s5854_s14 + $0x398] sm:$0xff] }
 0x38c   :  { %1714 = vmatpush.msrb.mxu0 %v1044_v55  ;;  %v1164_v2 = vld [vmem:[%s5854_s14 + $0xc90] sm:$0xff]  ;;  %1733 = vmatpush.msrb.mxu1 %v1112_v16  ;;  %v933_v1 = vld [vmem:[%s5854_s14 + $0x558] sm:$0xff] }
 0x38d   :  { %1755 = vmatpush.msrb.mxu2 %v1168_v59  ;;  %v1232_v21 = vld [vmem:[%s5854_s14 + $0xeb0] sm:$0xff]  ;;  %1774 = vmatpush.msrb.mxu3 %v1236_v17  ;;  %v1001_v47 = vld [vmem:[%s5854_s14 + $0x778] sm:$0xff] }
 0x38e   :  { %v1036_v22 = vld [vmem:[%s5854_s14 + $0x890] sm:$0xff]  ;;  %1715 = vmatpush.msrb.mxu0 %v1040_v19  ;;  %1734 = vmatpush.msrb.mxu1 %v1108_v20  ;;  %v805_v5 = vld [vmem:[%s5854_s14 + $0x158] sm:$0xff] }
 0x38f   :  { %v1104_v23 = vld [vmem:[%s5854_s14 + $0xab0] sm:$0xff]  ;;  %1756 = vmatpush.msrb.mxu2 %v1164_v2  ;;  %1775 = vmatpush.msrb.mxu3 %v1232_v21  ;;  %v873_v6 = vld [vmem:[%s5854_s14 + $0x378] sm:$0xff] }
 0x390   :  { %v1160_v24 = vld [vmem:[%s5854_s14 + $0xc70] sm:$0xff]  ;;  %1716 = vmatpush.msrb.mxu0 %v1036_v22  ;;  %1735 = vmatpush.msrb.mxu1 %v1104_v23  ;;  %v929_v7 = vld [vmem:[%s5854_s14 + $0x538] sm:$0xff] }
 0x391   :  { %v1228_v25 = vld [vmem:[%s5854_s14 + $0xe90] sm:$0xff]  ;;  %1757 = vmatpush.msrb.mxu2 %v1160_v24  ;;  %1641 = vmatmul.f32.vlgmr.msra.gmra.mxu0 %v4810_v35  ;;  %v997_v46 = vld [vmem:[%s5854_s14 + $0x758] sm:$0xff] }
 0x392   :  { %v1032_v27 = vld [vmem:[%s5854_s14 + $0x870] sm:$0xff]  ;;  %1776 = vmatpush.msrb.mxu3 %v1228_v25  ;;  %1661 = vmatmul.f32.vlgmr.msra.gmra.mxu1 %v4831_v11  ;;  %v801_v8 = vld [vmem:[%s5854_s14 + $0x138] sm:$0xff] }
 0x393   :  { %v1100_v4 = vld [vmem:[%s5854_s14 + $0xa90] sm:$0xff]  ;;  %1717 = vmatpush.msrb.mxu0 %v1032_v27  ;;  %1701 = vmatmul.f32.vlgmr.msra.gmra.mxu3 %v4813_v26  ;;  %v869_v12 = vld [vmem:[%s5854_s14 + $0x358] sm:$0xff] }
 0x394   :  { %v1156_v28 = vld [vmem:[%s5854_s14 + $0xc50] sm:$0xff]  ;;  %1736 = vmatpush.msrb.mxu1 %v1100_v4  ;;  %v925_v54 = vld [vmem:[%s5854_s14 + $0x518] sm:$0xff] }
 0x395   :  { %v1224_v29 = vld [vmem:[%s5854_s14 + $0xe70] sm:$0xff]  ;;  %1758 = vmatpush.msrb.mxu2 %v1156_v28  ;;  %v993_v13 = vld [vmem:[%s5854_s14 + $0x738] sm:$0xff] }
 0x396   :  { %v1028_v9 = vld [vmem:[%s5854_s14 + $0x850] sm:$0xff]  ;;  %1777 = vmatpush.msrb.mxu3 %v1224_v29  ;;  %v797_v15 = vld [vmem:[%s5854_s14 + $0x118] sm:$0xff] }
 0x397   :  { %v1096_v39 = vld [vmem:[%s5854_s14 + $0xa70] sm:$0xff]  ;;  %1718 = vmatpush.msrb.mxu0 %v1028_v9  ;;  %v865_v55 = vld [vmem:[%s5854_s14 + $0x338] sm:$0xff] }
 0x398   :  { %v1152_v10 = vld [vmem:[%s5854_s14 + $0xc30] sm:$0xff]  ;;  %1737 = vmatpush.msrb.mxu1 %v1096_v39  ;;  %v921_v16 = vld [vmem:[%s5854_s14 + $0x4f8] sm:$0xff] }
 0x399   :  { %v1220_v40 = vld [vmem:[%s5854_s14 + $0xe50] sm:$0xff]  ;;  %1759 = vmatpush.msrb.mxu2 %v1152_v10  ;;  %v989_v59 = vld [vmem:[%s5854_s14 + $0x718] sm:$0xff] }
 0x39a   :  { %v1024_v41 = vld [vmem:[%s5854_s14 + $0x830] sm:$0xff]  ;;  %1778 = vmatpush.msrb.mxu3 %v1220_v40  ;;  %v793_v17 = vld [vmem:[%s5854_s14 + $0xf8] sm:$0xff] }
 0x39b   :  { %v1092_v42 = vld [vmem:[%s5854_s14 + $0xa50] sm:$0xff]  ;;  %1719 = vmatpush.msrb.mxu0 %v1024_v41  ;;  %v861_v19 = vld [vmem:[%s5854_s14 + $0x318] sm:$0xff] }
 0x39c   :  { %v1148_v44 = vld [vmem:[%s5854_s14 + $0xc10] sm:$0xff]  ;;  %1738 = vmatpush.msrb.mxu1 %v1092_v42  ;;  %v917_v20 = vld [vmem:[%s5854_s14 + $0x4d8] sm:$0xff] }
 0x39d   :  { %v1216_v45 = vld [vmem:[%s5854_s14 + $0xe30] sm:$0xff]  ;;  %1760 = vmatpush.msrb.mxu2 %v1148_v44  ;;  %v985_v2 = vld [vmem:[%s5854_s14 + $0x6f8] sm:$0xff] }
 0x39e   :  { %v1020_v48 = vld [vmem:[%s5854_s14 + $0x810] sm:$0xff]  ;;  %1779 = vmatpush.msrb.mxu3 %v1216_v45  ;;  %v789_v21 = vld [vmem:[%s5854_s14 + $0xd8] sm:$0xff] }
 0x39f   :  { %v1088_v49 = vld [vmem:[%s5854_s14 + $0xa30] sm:$0xff]  ;;  %1720 = vmatpush.msrb.mxu0 %v1020_v48  ;;  %v857_v22 = vld [vmem:[%s5854_s14 + $0x2f8] sm:$0xff] }
 0x3a0   :  { %v1212_v50 = vld [vmem:[%s5854_s14 + $0xe10] sm:$0xff]  ;;  %1739 = vmatpush.msrb.mxu1 %v1088_v49  ;;  %v913_v23 = vld [vmem:[%s5854_s14 + $0x4b8] sm:$0xff] }
 0x3a1   :  { %v4795_v30 = vld.sshfl [vmem:[#allocation1 + $0x10] sm:$0xff pattern:$0x73625140]  ;;  %1780 = vmatpush.msrb.mxu3 %v1212_v50  ;;  %1785 = vmatpush.msra.mxu0 %v825_v31  ;;  %v981_v24 = vld [vmem:[%s5854_s14 + $0x6d8] sm:$0xff] }
 0x3a2   :  { %1681 = vmatmul.f32.vlgmr.msra.gmra.mxu2 %v4795_v30  ;;  %v1084_v34 = vld [vmem:[%s5854_s14 + $0xa10] sm:$0xff]  ;;  %v785_v25 = vld [vmem:[%s5854_s14 + $0xb8] sm:$0xff] }
 0x3a3   :  { %1825 = vmatpush.msra.mxu2 %v953_v18  ;;  %1845 = vmatpush.msra.mxu3 %v1017_v33  ;;  %v853_v27 = vld [vmem:[%s5854_s14 + $0x2d8] sm:$0xff] }
 0x3a4   :  { %1740 = vmatpush.msrb.mxu1 %v1084_v34  ;;  %1786 = vmatpush.msra.mxu0 %v821_v37  ;;  %v909_v4 = vld [vmem:[%s5854_s14 + $0x498] sm:$0xff] }
 0x3a5   :  { %1826 = vmatpush.msra.mxu2 %v949_v32  ;;  %1846 = vmatpush.msra.mxu3 %v1013_v36  ;;  %v977_v28 = vld [vmem:[%s5854_s14 + $0x6b8] sm:$0xff]  ;;  %v4999_v36 = vld.sshfl [vmem:[#allocation1 + $0x30] sm:$0xff pattern:$0x73625140] }
 0x3a6   :  { %1805 = vmatpush.msra.mxu1 %v889_v38  ;;  %1787 = vmatpush.msra.mxu0 %v817_v52  ;;  %v781_v29 = vld [vmem:[%s5854_s14 + $0x98] sm:$0xff] }
 0x3a7   :  { %1827 = vmatpush.msra.mxu2 %v945_v51  ;;  %1847 = vmatpush.msra.mxu3 %v1009_v56  ;;  %v849_v9 = vld [vmem:[%s5854_s14 + $0x2b8] sm:$0xff] }
 0x3a8   :  { %1806 = vmatpush.msra.mxu1 %v885_v14  ;;  %1788 = vmatpush.msra.mxu0 %v813_v57  ;;  %v905_v39 = vld [vmem:[%s5854_s14 + $0x478] sm:$0xff]  ;;  %v5014_v57 = vld.sshfl [vmem:[#allocation1 + $0x20] sm:$0xff pattern:$0x73625140] }
 0x3a9   :  { %1828 = vmatpush.msra.mxu2 %v941_v53  ;;  %1848 = vmatpush.msra.mxu3 %v1005_v61  ;;  %v973_v10 = vld [vmem:[%s5854_s14 + $0x698] sm:$0xff] }
 0x3aa   :  { %1807 = vmatpush.msra.mxu1 %v881_v58  ;;  %1789 = vmatpush.msra.mxu0 %v809_v63  ;;  %v777_v40 = vld [vmem:[%s5854_s14 + $0x78] sm:$0xff] }
 0x3ab   :  { %1829 = vmatpush.msra.mxu2 %v937_v60  ;;  %1849 = vmatpush.msra.mxu3 %v1001_v47  ;;  %v845_v41 = vld [vmem:[%s5854_s14 + $0x298] sm:$0xff]  ;;  %v5035_v47 = vld.sshfl [vmem:[#allocation1 + $0x28] sm:$0xff pattern:$0x73625140] }
 0x3ac   :  { %1808 = vmatpush.msra.mxu1 %v877_v0  ;;  %1790 = vmatpush.msra.mxu0 %v805_v5  ;;  %v901_v42 = vld [vmem:[%s5854_s14 + $0x458] sm:$0xff] }
 0x3ad   :  { %1830 = vmatpush.msra.mxu2 %v933_v1  ;;  %1850 = vmatpush.msra.mxu3 %v997_v46  ;;  %v969_v44 = vld [vmem:[%s5854_s14 + $0x678] sm:$0xff] }
 0x3ae   :  { %1809 = vmatpush.msra.mxu1 %v873_v6  ;;  %1791 = vmatpush.msra.mxu0 %v801_v8  ;;  %v773_v45 = vld [vmem:[%s5854_s14 + $0x58] sm:$0xff] }
 0x3af   :  { %1831 = vmatpush.msra.mxu2 %v929_v7  ;;  %1851 = vmatpush.msra.mxu3 %v993_v13  ;;  %v841_v18 = vld [vmem:[%s5854_s14 + $0x278] sm:$0xff] }
 0x3b0   :  { %1810 = vmatpush.msra.mxu1 %v869_v12  ;;  %1792 = vmatpush.msra.mxu0 %v797_v15  ;;  %v897_v48 = vld [vmem:[%s5854_s14 + $0x438] sm:$0xff] }
 0x3b1   :  { %1832 = vmatpush.msra.mxu2 %v925_v54  ;;  %1852 = vmatpush.msra.mxu3 %v989_v59  ;;  %v965_v49 = vld [vmem:[%s5854_s14 + $0x658] sm:$0xff] }
 0x3b2   :  { %1811 = vmatpush.msra.mxu1 %v865_v55  ;;  %1793 = vmatpush.msra.mxu0 %v793_v17  ;;  %v769_v50 = vld [vmem:[%s5854_s14 + $0x38] sm:$0xff] }
 0x3b3   :  { %1833 = vmatpush.msra.mxu2 %v921_v16  ;;  %1853 = vmatpush.msra.mxu3 %v985_v2  ;;  %v837_v31 = vld [vmem:[%s5854_s14 + $0x258] sm:$0xff] }
 0x3b4   :  { %1812 = vmatpush.msra.mxu1 %v861_v19  ;;  %1794 = vmatpush.msra.mxu0 %v789_v21  ;;  %v893_v32 = vld [vmem:[%s5854_s14 + $0x418] sm:$0xff] }
 0x3b5   :  { %1834 = vmatpush.msra.mxu2 %v917_v20  ;;  %1854 = vmatpush.msra.mxu3 %v981_v24  ;;  %v961_v33 = vld [vmem:[%s5854_s14 + $0x638] sm:$0xff] }
 0x3b6   :  { %1813 = vmatpush.msra.mxu1 %v857_v22  ;;  %1795 = vmatpush.msra.mxu0 %v785_v25  ;;  %v1209_v34 = vld [vmem:[%s5854_s14 + $0xdf8] sm:$0xff] }
 0x3b7   :  { %1835 = vmatpush.msra.mxu2 %v913_v23  ;;  %1855 = vmatpush.msra.mxu3 %v977_v28  ;;  %v765_v37 = vld [vmem:[%s5854_s14 + $0x18] sm:$0xff] }
 0x3b8   :  { %1814 = vmatpush.msra.mxu1 %v853_v27  ;;  %1796 = vmatpush.msra.mxu0 %v781_v29  ;;  %v833_v38 = vld [vmem:[%s5854_s14 + $0x238] sm:$0xff] }
 0x3b9   :  { %1836 = vmatpush.msra.mxu2 %v909_v4  ;;  %1856 = vmatpush.msra.mxu3 %v973_v10  ;;  %v957_v51 = vld [vmem:[%s5854_s14 + $0x618] sm:$0xff] }
 0x3ba   :  { %1815 = vmatpush.msra.mxu1 %v849_v9  ;;  %1797 = vmatpush.msra.mxu0 %v777_v40  ;;  %v1081_v52 = vld [vmem:[%s5854_s14 + $0x9f8] sm:$0xff] }
 0x3bb   :  { %1837 = vmatpush.msra.mxu2 %v905_v39  ;;  %1857 = vmatpush.msra.mxu3 %v969_v44  ;;  %v1205_v14 = vld [vmem:[%s5854_s14 + $0xdd8] sm:$0xff] }
 0x3bc   :  { %1816 = vmatpush.msra.mxu1 %v845_v41  ;;  %1798 = vmatpush.msra.mxu0 %v773_v45  ;;  %v1273_v53 = vld [vmem:[%s5854_s14 + $0xff8] sm:$0xff] }
 0x3bd   :  { %1838 = vmatpush.msra.mxu2 %v901_v42  ;;  %1858 = vmatpush.msra.mxu3 %v965_v49  ;;  %v829_v56 = vld [vmem:[%s5854_s14 + $0x218] sm:$0xff] }
 0x3be   :  { %1817 = vmatpush.msra.mxu1 %v841_v18  ;;  %1799 = vmatpush.msra.mxu0 %v769_v50  ;;  %v5017_v58 = vld.sshfl [vmem:[#allocation1 + $0x38] sm:$0xff pattern:$0x73625140] }
 0x3bf   :  { %1839 = vmatpush.msra.mxu2 %v897_v48  ;;  %1859 = vmatpush.msra.mxu3 %v961_v33  ;;  %v1077_v60 = vld [vmem:[%s5854_s14 + $0x9d8] sm:$0xff] }
 0x3c0   :  { %1818 = vmatpush.msra.mxu1 %v837_v31  ;;  %1761 = vmatmul.f32.vlgmr.msrb.gmra.mxu2 %v4999_v36  ;;  %v1145_v61 = vld [vmem:[%s5854_s14 + $0xbf8] sm:$0xff] }
 0x3c1   :  { %1840 = vmatpush.msra.mxu2 %v893_v32  ;;  %1800 = vmatpush.msra.mxu0 %v765_v37  ;;  %v1201_v63 = vld [vmem:[%s5854_s14 + $0xdb8] sm:$0xff] }
 0x3c2   :  { %1819 = vmatpush.msra.mxu1 %v833_v38  ;;  %1860 = vmatpush.msra.mxu3 %v957_v51  ;;  %v1269_v0 = vld [vmem:[%s5854_s14 + $0xfd8] sm:$0xff] }
 0x3c3   :  { %1905 = vmatpush.msrb.mxu2 %v1209_v34  ;;  %1721 = vmatmul.f32.vlgmr.msrb.gmra.mxu0 %v5014_v57  ;;  %v1073_v1 = vld [vmem:[%s5854_s14 + $0x9b8] sm:$0xff] }
 0x3c4   :  { %1781 = vmatmul.f32.vlgmr.msrb.gmra.mxu3 %v5017_v58  ;;  %1865 = vmatpush.msrb.mxu0 %v1081_v52  ;;  %v1141_v5 = vld [vmem:[%s5854_s14 + $0xbd8] sm:$0xff] }
 0x3c5   :  { %1906 = vmatpush.msrb.mxu2 %v1205_v14  ;;  %1925 = vmatpush.msrb.mxu3 %v1273_v53  ;;  %v1197_v6 = vld [vmem:[%s5854_s14 + $0xd98] sm:$0xff] }
 0x3c6   :  { %1820 = vmatpush.msra.mxu1 %v829_v56  ;;  %1866 = vmatpush.msrb.mxu0 %v1077_v60  ;;  %v1265_v7 = vld [vmem:[%s5854_s14 + $0xfb8] sm:$0xff] }
 0x3c7   :  { %1741 = vmatmul.f32.vlgmr.msrb.gmra.mxu1 %v5035_v47  ;;  %1907 = vmatpush.msrb.mxu2 %v1201_v63  ;;  %v1069_v46 = vld [vmem:[%s5854_s14 + $0x998] sm:$0xff] }
 0x3c8   :  { %1885 = vmatpush.msrb.mxu1 %v1145_v61  ;;  %1926 = vmatpush.msrb.mxu3 %v1269_v0  ;;  %v1137_v8 = vld [vmem:[%s5854_s14 + $0xbb8] sm:$0xff] }
 0x3c9   :  { %1867 = vmatpush.msrb.mxu0 %v1073_v1  ;;  %v1193_v12 = vld [vmem:[%s5854_s14 + $0xd78] sm:$0xff]  ;;  %1908 = vmatpush.msrb.mxu2 %v1197_v6 }
 0x3ca   :  { %1886 = vmatpush.msrb.mxu1 %v1141_v5  ;;  %v1261_v54 = vld [vmem:[%s5854_s14 + $0xf98] sm:$0xff]  ;;  %1927 = vmatpush.msrb.mxu3 %v1265_v7 }
 0x3cb   :  { %v1065_v13 = vld [vmem:[%s5854_s14 + $0x978] sm:$0xff]  ;;  %1868 = vmatpush.msrb.mxu0 %v1069_v46  ;;  %1909 = vmatpush.msrb.mxu2 %v1193_v12  ;;  %v1342_v46 = vpop.f32.mrf.mxu1  ;;  %v5224_v12 = vpop.f32.mrf.mxu3 }
 0x3cc   :  { %v1133_v15 = vld [vmem:[%s5854_s14 + $0xb98] sm:$0xff]  ;;  %1887 = vmatpush.msrb.mxu1 %v1137_v8  ;;  %1928 = vmatpush.msrb.mxu3 %v1261_v54 }
 0x3cd   :  { %v1189_v55 = vld [vmem:[%s5854_s14 + $0xd58] sm:$0xff]  ;;  %1869 = vmatpush.msrb.mxu0 %v1065_v13  ;;  %1841 = vmatmul.f32.vlgmr.msra.gmra.mxu2 %v4795_v30 }
 0x3ce   :  { %v1257_v16 = vld [vmem:[%s5854_s14 + $0xf78] sm:$0xff]  ;;  %1888 = vmatpush.msrb.mxu1 %v1133_v15  ;;  %1910 = vmatpush.msrb.mxu2 %v1189_v55 }
 0x3cf   :  { %v1061_v59 = vld [vmem:[%s5854_s14 + $0x958] sm:$0xff]  ;;  %1929 = vmatpush.msrb.mxu3 %v1257_v16  ;;  %1801 = vmatmul.f32.vlgmr.msra.gmra.mxu0 %v4810_v35 }
 0x3d0   :  { %v1129_v17 = vld [vmem:[%s5854_s14 + $0xb78] sm:$0xff]  ;;  %1870 = vmatpush.msrb.mxu0 %v1061_v59  ;;  %1861 = vmatmul.f32.vlgmr.msra.gmra.mxu3 %v4813_v26 }
 0x3d1   :  { %v1185_v19 = vld [vmem:[%s5854_s14 + $0xd38] sm:$0xff]  ;;  %1889 = vmatpush.msrb.mxu1 %v1129_v17 }
 0x3d2   :  { %v1253_v20 = vld [vmem:[%s5854_s14 + $0xf58] sm:$0xff]  ;;  %1911 = vmatpush.msrb.mxu2 %v1185_v19  ;;  %1821 = vmatmul.f32.vlgmr.msra.gmra.mxu1 %v4831_v11 }
 0x3d3   :  { %v1057_v2 = vld [vmem:[%s5854_s14 + $0x938] sm:$0xff]  ;;  %1930 = vmatpush.msrb.mxu3 %v1253_v20  ;;  %v5230_v13 = vpop.f32.mrf.mxu3 }
 0x3d4   :  { %v1125_v21 = vld [vmem:[%s5854_s14 + $0xb58] sm:$0xff]  ;;  %1871 = vmatpush.msrb.mxu0 %v1057_v2 }
 0x3d5   :  { %v1181_v22 = vld [vmem:[%s5854_s14 + $0xd18] sm:$0xff]  ;;  %1890 = vmatpush.msrb.mxu1 %v1125_v21 }
 0x3d6   :  { %v1249_v23 = vld [vmem:[%s5854_s14 + $0xf38] sm:$0xff]  ;;  %1912 = vmatpush.msrb.mxu2 %v1181_v22 }
 0x3d7   :  { %v1053_v24 = vld [vmem:[%s5854_s14 + $0x918] sm:$0xff]  ;;  %1931 = vmatpush.msrb.mxu3 %v1249_v23 }
 0x3d8   :  { %v1121_v25 = vld [vmem:[%s5854_s14 + $0xb38] sm:$0xff]  ;;  %1872 = vmatpush.msrb.mxu0 %v1053_v24  ;;  %v1274_v24 = vld [vmem:[%s5855_s15] sm:$0xf] }
 0x3d9   :  { %v1177_v27 = vld [vmem:[%s5854_s14 + $0xcf8] sm:$0xff]  ;;  %1891 = vmatpush.msrb.mxu1 %v1121_v25 }
 0x3da   :  { %v1245_v4 = vld [vmem:[%s5854_s14 + $0xf18] sm:$0xff]  ;;  %1913 = vmatpush.msrb.mxu2 %v1177_v27  ;;  %v1277_v27 = vperm.slane %v1274_v24, 1 }
 0x3db   :  { %v1049_v28 = vld [vmem:[%s5854_s14 + $0x8f8] sm:$0xff]  ;;  %1932 = vmatpush.msrb.mxu3 %v1245_v4  ;;  %v1542_v59 = vpop.f32.mrf.mxu3 }
 0x3dc   :  { %v1117_v29 = vld [vmem:[%s5854_s14 + $0xb18] sm:$0xff]  ;;  %1873 = vmatpush.msrb.mxu0 %v1049_v28 }
 0x3dd   :  { %v1173_v9 = vld [vmem:[%s5854_s14 + $0xcd8] sm:$0xff]  ;;  %1892 = vmatpush.msrb.mxu1 %v1117_v29 }
 0x3de   :  { %v1241_v39 = vld [vmem:[%s5854_s14 + $0xef8] sm:$0xff]  ;;  %1914 = vmatpush.msrb.mxu2 %v1173_v9  ;;  %v1276_v9 = vperm.slane %v1274_v24, 0 }
 0x3df   :  { %v1045_v10 = vld [vmem:[%s5854_s14 + $0x8d8] sm:$0xff]  ;;  %1933 = vmatpush.msrb.mxu3 %v1241_v39  ;;  %v1279_v39 = vperm.slane %v1274_v24, 3 }
 0x3e0   :  { %v1113_v40 = vld [vmem:[%s5854_s14 + $0xaf8] sm:$0xff]  ;;  %1874 = vmatpush.msrb.mxu0 %v1045_v10 }
 0x3e1   :  { %v1169_v41 = vld [vmem:[%s5854_s14 + $0xcb8] sm:$0xff]  ;;  %1893 = vmatpush.msrb.mxu1 %v1113_v40 }
 0x3e2   :  { %v1237_v42 = vld [vmem:[%s5854_s14 + $0xed8] sm:$0xff]  ;;  %1915 = vmatpush.msrb.mxu2 %v1169_v41 }
 0x3e3   :  { %v1041_v44 = vld [vmem:[%s5854_s14 + $0x8b8] sm:$0xff]  ;;  %1934 = vmatpush.msrb.mxu3 %v1237_v42  ;;  %v5236_v2 = vpop.f32.mrf.mxu3 }
 0x3e4   :  { %v1109_v45 = vld [vmem:[%s5854_s14 + $0xad8] sm:$0xff]  ;;  %1875 = vmatpush.msrb.mxu0 %v1041_v44 }
 0x3e5   :  { %v1165_v18 = vld [vmem:[%s5854_s14 + $0xc98] sm:$0xff]  ;;  %1894 = vmatpush.msrb.mxu1 %v1109_v45 }
 0x3e6   :  { %v1233_v48 = vld [vmem:[%s5854_s14 + $0xeb8] sm:$0xff]  ;;  %1916 = vmatpush.msrb.mxu2 %v1165_v18 }
 0x3e7   :  { %v1037_v49 = vld [vmem:[%s5854_s14 + $0x898] sm:$0xff]  ;;  %1935 = vmatpush.msrb.mxu3 %v1233_v48  ;;  %v1278_v48 = vperm.slane %v1274_v24, 2  ;;  %v2018_v24 = vld [vmem:[%s5856_s16 + $0xa0] sm:$0xff] }
 0x3e8   :  { %v1105_v50 = vld [vmem:[%s5854_s14 + $0xab8] sm:$0xff]  ;;  %1876 = vmatpush.msrb.mxu0 %v1037_v49 }
 0x3e9   :  { %v1161_v31 = vld [vmem:[%s5854_s14 + $0xc78] sm:$0xff]  ;;  %1895 = vmatpush.msrb.mxu1 %v1105_v50 }
 0x3ea   :  { %v1229_v32 = vld [vmem:[%s5854_s14 + $0xe98] sm:$0xff]  ;;  %1917 = vmatpush.msrb.mxu2 %v1161_v31 }
 0x3eb   :  { %v1033_v33 = vld [vmem:[%s5854_s14 + $0x878] sm:$0xff]  ;;  %1936 = vmatpush.msrb.mxu3 %v1229_v32 }
 0x3ec   :  { %v1101_v34 = vld [vmem:[%s5854_s14 + $0xa98] sm:$0xff]  ;;  %1877 = vmatpush.msrb.mxu0 %v1033_v33 }
 0x3ed   :  { %v1157_v37 = vld [vmem:[%s5854_s14 + $0xc58] sm:$0xff]  ;;  %1896 = vmatpush.msrb.mxu1 %v1101_v34  ;;  %v2028_v34 = vld [vmem:[%s5856_s16 + $0xf0] sm:$0xff] }
 0x3ee   :  { %v1225_v30 = vld [vmem:[%s5854_s14 + $0xe78] sm:$0xff]  ;;  %1918 = vmatpush.msrb.mxu2 %v1157_v37  ;;  %v2060_v37 = vld [vmem:[%s5856_s16 + $0x1f0] sm:$0xff] }
 0x3ef   :  { %v1029_v38 = vld [vmem:[%s5854_s14 + $0x858] sm:$0xff]  ;;  %1937 = vmatpush.msrb.mxu3 %v1225_v30 }
 0x3f0   :  { %v1097_v51 = vld [vmem:[%s5854_s14 + $0xa78] sm:$0xff]  ;;  %1878 = vmatpush.msrb.mxu0 %v1029_v38 }
 0x3f1   :  { %v1153_v52 = vld [vmem:[%s5854_s14 + $0xc38] sm:$0xff]  ;;  %1897 = vmatpush.msrb.mxu1 %v1097_v51 }
 0x3f2   :  { %v1221_v35 = vld [vmem:[%s5854_s14 + $0xe58] sm:$0xff]  ;;  %1919 = vmatpush.msrb.mxu2 %v1153_v52 }
 0x3f3   :  { %v1025_v26 = vld [vmem:[%s5854_s14 + $0x838] sm:$0xff]  ;;  %1938 = vmatpush.msrb.mxu3 %v1221_v35  ;;  %v2026_v35 = vld [vmem:[%s5856_s16 + $0xe0] sm:$0xff] }
 0x3f4   :  { %v1093_v14 = vld [vmem:[%s5854_s14 + $0xa58] sm:$0xff]  ;;  %1879 = vmatpush.msrb.mxu0 %v1025_v26  ;;  %v2058_v26 = vld [vmem:[%s5856_s16 + $0x1e0] sm:$0xff] }
 0x3f5   :  { %v1149_v53 = vld [vmem:[%s5854_s14 + $0xc18] sm:$0xff]  ;;  %1898 = vmatpush.msrb.mxu1 %v1093_v14  ;;  %v2027_v14 = vld [vmem:[%s5856_s16 + $0xe8] sm:$0xff] }
 0x3f6   :  { %v1217_v56 = vld [vmem:[%s5854_s14 + $0xe38] sm:$0xff]  ;;  %1920 = vmatpush.msrb.mxu2 %v1149_v53 }
 0x3f7   :  { %v1021_v11 = vld [vmem:[%s5854_s14 + $0x818] sm:$0xff]  ;;  %1939 = vmatpush.msrb.mxu3 %v1217_v56  ;;  %1921 = vmatmul.f32.vlgmr.msrb.gmra.mxu2 %v4999_v36  ;;  %v2059_v56 = vld [vmem:[%s5856_s16 + $0x1e8] sm:$0xff] }
 0x3f8   :  { %v1089_v60 = vld [vmem:[%s5854_s14 + $0xa38] sm:$0xff]  ;;  %1880 = vmatpush.msrb.mxu0 %v1021_v11 }
 0x3f9   :  { %v1213_v61 = vld [vmem:[%s5854_s14 + $0xe18] sm:$0xff]  ;;  %1899 = vmatpush.msrb.mxu1 %v1089_v60  ;;  %1881 = vmatmul.f32.vlgmr.msrb.gmra.mxu0 %v5014_v57 }
 0x3fa   :  { %v1085_v63 = vld [vmem:[%s5854_s14 + $0xa18] sm:$0xff]  ;;  %1940 = vmatpush.msrb.mxu3 %v1213_v61  ;;  %2077 = vmatpush.msra.mxu0 %v2028_v34  ;;  %v2024_v61 = vld [vmem:[%s5856_s16 + $0xd0] sm:$0xff] }
 0x3fb   :  { %1941 = vmatmul.f32.vlgmr.msrb.gmra.mxu3 %v5017_v58  ;;  %1900 = vmatpush.msrb.mxu1 %v1085_v63  ;;  %v1322_v58 = vpop.f32.mrf.mxu0  ;;  %v2029_v30 = vld [vmem:[%s5856_s16 + $0xf8] sm:$0xff]  ;;  %v2056_v63 = vld [vmem:[%s5856_s16 + $0x1d0] sm:$0xff] }
 0x3fc   :  { %1901 = vmatmul.f32.vlgmr.msrb.gmra.mxu1 %v5035_v47  ;;  %v681_v0 = vpop.xlane.xlu1 %680  ;;  %v1362_v47 = vpop.f32.mrf.mxu2  ;;  %v1323_v42 = vadd.f32 %v1322_v58, %v1276_v9  ;;  %v2061_v38 = vld [vmem:[%s5856_s16 + $0x1f8] sm:$0xff]  ;;  %2117 = vmatpush.msra.mxu2 %v2029_v30  ;;  %v2054_v58 = vld [vmem:[%s5856_s16 + $0x1c0] sm:$0xff]  ;;  %v2012_v34 = vld [vmem:[%s5856_s16 + $0x70] sm:$0xff] }
 0x3fd   :  { %v682_v1 = vmul.f32 %v681_v0, %v3137_v43  ;;  %2097 = vmatpush.msra.mxu1 %v2060_v37  ;;  %2137 = vmatpush.msra.mxu3 %v2061_v38  ;;  %v2025_v0 = vld [vmem:[%s5856_s16 + $0xd8] sm:$0xff]  ;;  %v2044_v37 = vld [vmem:[%s5856_s16 + $0x170] sm:$0xff]  ;;  %v2042_v38 = vld [vmem:[%s5856_s16 + $0x160] sm:$0xff] }
 0x3fe   :  { %v1343_v49 = vadd.f32 %v1342_v46, %v1323_v42  ;;  %2078 = vmatpush.msra.mxu0 %v2026_v35  ;;  %2118 = vmatpush.msra.mxu2 %v2027_v14  ;;  %v2023_v46 = vld [vmem:[%s5856_s16 + $0xc8] sm:$0xff]  ;;  %v2016_v42 = vld [vmem:[%s5856_s16 + $0x90] sm:$0xff]  ;;  %v2013_v30 = vld [vmem:[%s5856_s16 + $0x78] sm:$0xff] }
 0x3ff   :  { %v5213_v5 = vsub.f32 %v4683_v3, %v682_v1  ;;  %v5216_v36 = vsub.f32 %v4668_v62, %v682_v1  ;;  %v5226_v3 = vpop.f32.mrf.mxu1  ;;  %2098 = vmatpush.msra.mxu1 %v2058_v26  ;;  %2138 = vmatpush.msra.mxu3 %v2059_v56  ;;  %v2057_v1 = vld [vmem:[%s5856_s16 + $0x1d8] sm:$0xff]  ;;  %v2011_v35 = vld [vmem:[%s5856_s16 + $0x68] sm:$0xff]  ;;  %v2008_v14 = vld [vmem:[%s5856_s16 + $0x50] sm:$0xff] }
 0x400   :  { %v1363_v51 = vadd.f32 %v1362_v47, %v1343_v49  ;;  %2079 = vmatpush.msra.mxu0 %v2024_v61  ;;  %2119 = vmatpush.msra.mxu2 %v2025_v0  ;;  %v2046_v49 = vld [vmem:[%s5856_s16 + $0x180] sm:$0xff]  ;;  %v2043_v26 = vld [vmem:[%s5856_s16 + $0x168] sm:$0xff]  ;;  %v2009_v56 = vld [vmem:[%s5856_s16 + $0x58] sm:$0xff] }
 0x401   :  { %v685_v6 = vmul.f32 %v5213_v5, %v5213_v5  ;;  %v686_v57 = vmul.f32 %v5216_v36, %v5216_v36  ;;  %2099 = vmatpush.msra.mxu1 %v2056_v63  ;;  %2139 = vmatpush.msra.mxu3 %v2057_v1  ;;  %v2006_v63 = vld [vmem:[%s5856_s16 + $0x40] sm:$0xff] }
 0x402   :  { %2120 = vmatpush.msra.mxu2 %v2023_v46  ;;  %v2038_v0 = vld [vmem:[%s5856_s16 + $0x140] sm:$0xff]  ;;  %v2004_v46 = vld [vmem:[%s5856_s16 + $0x30] sm:$0xff] }
 0x403   :  { %v687_v7 = vadd.f32 %v686_v57, %v685_v6  ;;  %v5222_v8 = vpop.f32.mrf.mxu0  ;;  %v1383_v6 = vadd.f32 %v5224_v12, %v1363_v51  ;;  %2100 = vmatpush.msra.mxu1 %v2054_v58  ;;  %v2055_v12 = vld [vmem:[%s5856_s16 + $0x1c8] sm:$0xff] }
 0x404   :  { %v5228_v54 = vpop.f32.mrf.mxu2  ;;  %2140 = vmatpush.msra.mxu3 %v2055_v12  ;;  %v2037_v12 = vld [vmem:[%s5856_s16 + $0x138] sm:$0xff] }
 0x405   :  { %688 = vadd.xlane.f32.xlu1 %v687_v7  ;;  %v2022_v7 = vld [vmem:[%s5856_s16 + $0xc0] sm:$0xff] }
 0x406   :  { %2080 = vmatpush.msra.mxu0 %v2022_v7 }
 0x407   :  { %v1502_v15 = vpop.f32.mrf.mxu1 }
 0x40b   :  { %v1482_v62 = vpop.f32.mrf.mxu0 }
 0x40c   :  { %v1522_v55 = vpop.f32.mrf.mxu2  ;;  %v1483_v28 = vadd.f32 %v1482_v62, %v1277_v27  ;;  %v2050_v27 = vld [vmem:[%s5856_s16 + $0x1a0] sm:$0xff] }
 0x40e   :  { %v1503_v40 = vadd.f32 %v1502_v15, %v1483_v28  ;;  %v2019_v28 = vld [vmem:[%s5856_s16 + $0xa8] sm:$0xff] }
 0x40f   :  { %v5232_v17 = vpop.f32.mrf.mxu1 }
 0x410   :  { %v1523_v18 = vadd.f32 %v1522_v55, %v1503_v40  ;;  %v2020_v55 = vld [vmem:[%s5856_s16 + $0xb0] sm:$0xff] }
 0x411   :  { %2081 = vmatpush.msra.mxu0 %v2020_v55 }
 0x412   :  { %v1543_v32 = vadd.f32 %v1542_v59, %v1523_v18  ;;  %v2021_v59 = vld [vmem:[%s5856_s16 + $0xb8] sm:$0xff] }
 0x413   :  { %v1562_v16 = vpop.f32.mrf.mxu0  ;;  %2121 = vmatpush.msra.mxu2 %v2021_v59  ;;  %2082 = vmatpush.msra.mxu0 %v2018_v24  ;;  %v2034_v59 = vld [vmem:[%s5856_s16 + $0x120] sm:$0xff]  ;;  %v2000_v24 = vld [vmem:[%s5856_s16 + $0x10] sm:$0xff] }
 0x414   :  { %v5234_v19 = vpop.f32.mrf.mxu2  ;;  %v1563_v11 = vadd.f32 %v1562_v16, %v1543_v32  ;;  %v2052_v16 = vld [vmem:[%s5856_s16 + $0x1b0] sm:$0xff] }
 0x415   :  { %2101 = vmatpush.msra.mxu1 %v2052_v16  ;;  %2122 = vmatpush.msra.mxu2 %v2019_v28  ;;  %v2002_v16 = vld [vmem:[%s5856_s16 + $0x20] sm:$0xff] }
 0x416   :  { %v5243_v25 = vpop.f32.mrf.mxu3  ;;  %v1583_v62 = vadd.f32 %v5232_v17, %v1563_v11  ;;  %v2053_v17 = vld [vmem:[%s5856_s16 + $0x1b8] sm:$0xff]  ;;  %2083 = vmatpush.msra.mxu0 %v2016_v42 }
 0x417   :  { %v1662_v21 = vpop.f32.mrf.mxu1  ;;  %2141 = vmatpush.msra.mxu3 %v2053_v17  ;;  %2102 = vmatpush.msra.mxu1 %v2050_v27  ;;  %v2041_v11 = vld [vmem:[%s5856_s16 + $0x158] sm:$0xff]  ;;  %v2032_v27 = vld [vmem:[%s5856_s16 + $0x110] sm:$0xff] }
 0x41b   :  { %v1642_v20 = vpop.f32.mrf.mxu0 }
 0x41c   :  { %v1643_v33 = vadd.f32 %v1642_v20, %v1278_v48  ;;  %v1403_v20 = vadd.f32 %v5222_v8, %v1383_v6  ;;  %v2051_v8 = vld [vmem:[%s5856_s16 + $0x1a8] sm:$0xff]  ;;  %v2014_v48 = vld [vmem:[%s5856_s16 + $0x80] sm:$0xff] }
 0x41d   :  { %2142 = vmatpush.msra.mxu3 %v2051_v8  ;;  %2084 = vmatpush.msra.mxu0 %v2014_v48  ;;  %v2007_v6 = vld [vmem:[%s5856_s16 + $0x48] sm:$0xff] }
 0x41e   :  { %v1663_v60 = vadd.f32 %v1662_v21, %v1643_v33 }
 0x41f   :  { %2085 = vmatpush.msra.mxu0 %v2012_v34 }
 0x425   :  { %v1682_v22 = vpop.f32.mrf.mxu2 }
 0x426   :  { %v1683_v15 = vadd.f32 %v1682_v22, %v1663_v60 }
 0x428   :  { %v1703_v40 = vadd.f32 %v5243_v25, %v1683_v15  ;;  %v1423_v25 = vadd.f32 %v5226_v3, %v1403_v20  ;;  %v2047_v3 = vld [vmem:[%s5856_s16 + $0x188] sm:$0xff] }
 0x429   :  { %v2035_v20 = vld [vmem:[%s5856_s16 + $0x128] sm:$0xff] }
 0x42a   :  { %v1443_v51 = vadd.f32 %v5228_v54, %v1423_v25  ;;  %v2040_v54 = vld [vmem:[%s5856_s16 + $0x150] sm:$0xff]  ;;  %v2031_v25 = vld [vmem:[%s5856_s16 + $0x108] sm:$0xff] }
 0x440   :  { %v5238_v23 = vpop.f32.mrf.mxu0 }
 0x441   :  { %v1723_v33 = vadd.f32 %v5238_v23, %v1703_v40  ;;  %v2010_v23 = vld [vmem:[%s5856_s16 + $0x60] sm:$0xff] }
 0x442   :  { %2086 = vmatpush.msra.mxu0 %v2010_v23  ;;  %v677_v40 = vld [vmem:[%s5852_s12] sm:$0x3] }
 0x443   :  { %v5247_v29 = vpop.f32.mrf.mxu2  ;;  %v2187_v23 = vld [vmem:[%s5858_s18 + $0xe0] sm:$0xff] }
 0x444   :  { %v5245_v4 = vpop.f32.mrf.mxu1  ;;  %2087 = vmatpush.msra.mxu0 %v2008_v14  ;;  %v2219_v14 = vld [vmem:[%s5858_s18 + $0x1e0] sm:$0xff] }
 0x445   :  { %v1743_v61 = vadd.f32 %v5245_v4, %v1723_v33  ;;  %v2039_v4 = vld [vmem:[%s5856_s16 + $0x148] sm:$0xff]  ;;  %v2222_v33 = vld [vmem:[%s5858_s18 + $0x1f8] sm:$0xff] }
 0x446   :  { %2088 = vmatpush.msra.mxu0 %v2006_v63  ;;  %v2218_v63 = vld [vmem:[%s5858_s18 + $0x1d8] sm:$0xff] }
 0x447   :  { %v5249_v41 = vpop.f32.mrf.mxu3  ;;  %v1763_v15 = vadd.f32 %v5247_v29, %v1743_v61  ;;  %v2003_v29 = vld [vmem:[%s5856_s16 + $0x28] sm:$0xff]  ;;  %v2217_v61 = vld [vmem:[%s5858_s18 + $0x1d0] sm:$0xff] }
 0x448   :  { %2089 = vmatpush.msra.mxu0 %v2004_v46  ;;  %v2216_v46 = vld [vmem:[%s5858_s18 + $0x1c8] sm:$0xff] }
 0x44a   :  { %2090 = vmatpush.msra.mxu0 %v2002_v16  ;;  %v2213_v16 = vld [vmem:[%s5858_s18 + $0x1b0] sm:$0xff] }
 0x44c   :  { %v1802_v10 = vpop.f32.mrf.mxu0  ;;  %2091 = vmatpush.msra.mxu0 %v2000_v24 }
 0x44d   :  { %v1803_v44 = vadd.f32 %v1802_v10, %v1279_v39  ;;  %v1603_v10 = vadd.f32 %v5234_v19, %v1583_v62  ;;  %v2049_v19 = vld [vmem:[%s5856_s16 + $0x198] sm:$0xff] }
 0x44e   :  { %2143 = vmatpush.msra.mxu3 %v2049_v19  ;;  %v1999_v19 = vld [vmem:[%s5856_s16 + $0x8] sm:$0xff] }
 0x44f   :  { %v1822_v45 = vpop.f32.mrf.mxu1  ;;  %v1623_v32 = vadd.f32 %v5236_v2, %v1603_v10  ;;  %v2045_v2 = vld [vmem:[%s5856_s16 + $0x178] sm:$0xff]  ;;  %v1783_v10 = vadd.f32 %v5249_v41, %v1763_v15  ;;  %v678_v41 = vld [vmem:[%s5853_s13] sm:$0x3] }
 0x450   :  { %v1823_v50 = vadd.f32 %v1822_v45, %v1803_v44  ;;  %v1842_v31 = vpop.f32.mrf.mxu2  ;;  %v2017_v44 = vld [vmem:[%s5856_s16 + $0x98] sm:$0xff]  ;;  %2144 = vmatpush.msra.mxu3 %v2047_v3  ;;  %v705_v3 = vperm.slane %v677_v40, 0 }
 0x451   :  { %2123 = vmatpush.msra.mxu2 %v2017_v44  ;;  %v1956_v60 = vrot.slane %v1623_v32, 7  ;;  %v2030_v44 = vld [vmem:[%s5856_s16 + $0x100] sm:$0xff]  ;;  %v706_v32 = vperm.slane %v677_v40, 1  ;;  %v2177_v40 = vld [vmem:[%s5858_s18 + $0x90] sm:$0xff] }
 0x452   :  { %v1843_v52 = vadd.f32 %v1842_v31, %v1823_v50  ;;  %v2015_v50 = vld [vmem:[%s5856_s16 + $0x88] sm:$0xff]  ;;  %2145 = vmatpush.msra.mxu3 %v2045_v2 }
 0x453   :  { %v1862_v53 = vpop.f32.mrf.mxu3  ;;  %2124 = vmatpush.msra.mxu2 %v2015_v50  ;;  %v2190_v50 = vld [vmem:[%s5858_s18 + $0xf8] sm:$0xff] }
 0x454   :  { %v1863_v57 = vadd.f32 %v1862_v53, %v1843_v52  ;;  %2146 = vmatpush.msra.mxu3 %v2043_v26 }
 0x455   :  { %2125 = vmatpush.msra.mxu2 %v2013_v30  ;;  %v712_v30 = vperm.slane %v678_v41, 0 }
 0x456   :  { %2147 = vmatpush.msra.mxu3 %v2041_v11 }
 0x457   :  { %2126 = vmatpush.msra.mxu2 %v2011_v35 }
 0x458   :  { %2148 = vmatpush.msra.mxu3 %v2039_v4 }
 0x459   :  { %2127 = vmatpush.msra.mxu2 %v2009_v56 }
 0x45a   :  { %2149 = vmatpush.msra.mxu3 %v2037_v12  ;;  %v2182_v12 = vld [vmem:[%s5858_s18 + $0xb8] sm:$0xff] }
 0x45b   :  { %2128 = vmatpush.msra.mxu2 %v2007_v6  ;;  %v2184_v6 = vld [vmem:[%s5858_s18 + $0xc8] sm:$0xff] }
 0x45c   :  { %2150 = vmatpush.msra.mxu3 %v2035_v20  ;;  %v2179_v20 = vld [vmem:[%s5858_s18 + $0xa0] sm:$0xff] }
 0x476   :  { %v1882_v47 = vpop.f32.mrf.mxu0 }
 0x477   :  { %v1883_v21 = vadd.f32 %v1882_v47, %v1863_v57  ;;  %v1463_v57 = vadd.f32 %v5230_v13, %v1443_v51  ;;  %v2036_v47 = vld [vmem:[%s5856_s16 + $0x130] sm:$0xff]  ;;  %v2005_v13 = vld [vmem:[%s5856_s16 + $0x38] sm:$0xff] }
 0x478   :  { %v689_v22 = vpop.xlane.xlu1 %688  ;;  %2129 = vmatpush.msra.mxu2 %v2005_v13  ;;  %v2181_v13 = vld [vmem:[%s5858_s18 + $0xb0] sm:$0xff] }
 0x479   :  { %v1902_v9 = vpop.f32.mrf.mxu1  ;;  %v690_v39 = vmul.f32 %v689_v22, %v3137_v43  ;;  %v2048_v43 = vld [vmem:[%s5856_s16 + $0x190] sm:$0xff]  ;;  %v1960_v62 = vsel %vm1959_vm12, %v1463_v57, %v1956_v60  ;;  %v1958_v17 = vsel %vm1957_vm13, %v1463_v57, %v1956_v60 }
 0x47a   :  { %2103 = vmatpush.msra.mxu1 %v2048_v43  ;;  %v1903_v18 = vadd.f32 %v1902_v9, %v1883_v21  ;;  %v1922_v31 = vpop.f32.mrf.mxu2  ;;  %v1961_v28 = vrot.slane %v1960_v62, 1  ;;  %v2001_v9 = vld [vmem:[%s5856_s16 + $0x18] sm:$0xff]  ;;  %v5457_v8 = vadd.f32 1.0, %v1958_v17  ;;  %2130 = vmatpush.msra.mxu2 %v2003_v29  ;;  %v1998_v43 = vld [vmem:[%s5856_s16] sm:$0xff] }
 0x47b   :  { %v5338_v45 = vadd.f32 1e-05, %v690_v39  ;;  %v2033_v39 = vld [vmem:[%s5856_s16 + $0x118] sm:$0xff]  ;;  %2092 = vmatpush.msra.mxu0 %v1998_v43  ;;  %s2561_s16 = smov 1  }
 0x47c   :  { %2104 = vmatpush.msra.mxu1 %v2046_v49  ;;  %v1923_v52 = vadd.f32 %v1922_v31, %v1903_v18  ;;  %2131 = vmatpush.msra.mxu2 %v2001_v9  ;;  %v2189_v49 = vld [vmem:[%s5858_s18 + $0xf0] sm:$0xff]  ;;  %v5490_v31 = vadd.f32 1.0, %v1961_v28  ;;  %v1969_v34 = vperm.slane %v5457_v8, 1  ;;  %v2211_v9 = vld [vmem:[%s5858_s18 + $0x1a0] sm:$0xff] }
 0x47d   :  { %2517 = vrsqrt.f32 %v5338_v45  ;;  %vm698_vm15 = vweird.f32 %v5338_v45  ;;  %2151 = vmatpush.msra.mxu3 %v2033_v39  ;;  %2229 = vmatpush.msrb.mxu0 %v2189_v49  ;;  %v2212_v39 = vld [vmem:[%s5858_s18 + $0x1a8] sm:$0xff] }
 0x47e   :  { %2105 = vmatpush.msra.mxu1 %v2044_v37  ;;  %v1942_v53 = vpop.f32.mrf.mxu3  ;;  %2132 = vmatpush.msra.mxu2 %v1999_v19  ;;  %v1970_v17 = vperm.slane %v5490_v31, 0  ;;  %v2209_v19 = vld [vmem:[%s5858_s18 + $0x190] sm:$0xff] }
 0x47f   :  { %v5412_v7 = vadd.f32 %v1942_v53, %v1923_v52  ;;  %2152 = vmatpush.msra.mxu3 %v2031_v25  ;;  %v713_v52 = vperm.slane %v678_v41, 1  ;;  %v2220_v53 = vld [vmem:[%s5858_s18 + $0x1e8] sm:$0xff]  ;;  %2230 = vmatpush.msrb.mxu0 %v2187_v23  ;;  %v2210_v25 = vld [vmem:[%s5858_s18 + $0x198] sm:$0xff] }
 0x480   :  { %2106 = vmatpush.msra.mxu1 %v2042_v38  ;;  %v2188_v38 = vld [vmem:[%s5858_s18 + $0xe8] sm:$0xff]  ;;  %2269 = vmatpush.msrb.mxu2 %v2190_v50  ;;  %v2175_v50 = vld [vmem:[%s5858_s18 + $0x80] sm:$0xff] }
 0x481   :  { %v1982_v21 = vrot.slane %v5412_v7, 7  ;;  %2289 = vmatpush.msrb.mxu3 %v2222_v33  ;;  %v2173_v33 = vld [vmem:[%s5858_s18 + $0x70] sm:$0xff]  ;;  %v2172_v23 = vld [vmem:[%s5858_s18 + $0x68] sm:$0xff] }
 0x482   :  { %2107 = vmatpush.msra.mxu1 %v2040_v54  ;;  %v2185_v54 = vld [vmem:[%s5858_s18 + $0xd0] sm:$0xff]  ;;  %2270 = vmatpush.msrb.mxu2 %v2188_v38 }
 0x483   :  { %v5403_v1 = vpop.eup %2517  ;;  %v5480_v18 = vsel %vm1959_vm12, %v1783_v10, %v1982_v21  ;;  %v5502_v37 = vsel %vm1957_vm13, %v1783_v10, %v1982_v21  ;;  %2290 = vmatpush.msrb.mxu3 %v2220_v53  ;;  %2231 = vmatpush.msrb.mxu0 %v2185_v54  ;;  %v2180_v21 = vld [vmem:[%s5858_s18 + $0xa8] sm:$0xff]  ;;  %v2169_v38 = vld [vmem:[%s5858_s18 + $0x50] sm:$0xff]  ;;  %v2203_v54 = vld [vmem:[%s5858_s18 + $0x160] sm:$0xff] }
 0x484   :  { %v693_v58 = vmul.f32 %v5403_v1, %v5338_v45  ;;  %2108 = vmatpush.msra.mxu1 %v2038_v0  ;;  %vm699_vm14 = vweird.f32 %v5403_v1  ;;  %v2221_v45 = vld [vmem:[%s5858_s18 + $0x1f0] sm:$0xff]  ;;  %v1985_v51 = vrot.slane %v5480_v18, 1  ;;  %v1987_v56 = vperm.slane %v5502_v37, 1  ;;  %v2176_v18 = vld [vmem:[%s5858_s18 + $0x88] sm:$0xff] }
 0x485   :  { %vm700_vm0 = vmor %vm698_vm15, %vm699_vm14  ;;  %v1972_v0 = vrot.slane %v1969_v34, 4  ;;  %2291 = vmatpush.msrb.mxu3 %v2218_v63  ;;  %v2174_v34 = vld [vmem:[%s5858_s18 + $0x78] sm:$0xff]  ;;  %v2165_v53 = vld [vmem:[%s5858_s18 + $0x30] sm:$0xff] }
 0x486   :  { %v694_v55 = vmul.f32 %v5403_v1, %v693_v58  ;;  %2109 = vmatpush.msra.mxu1 %v2036_v47  ;;  %v1989_v4 = vperm.slane %v1985_v51, 1  ;;  %v2215_v58 = vld [vmem:[%s5858_s18 + $0x1c0] sm:$0xff]  ;;  %v1968_v47 = vperm.slane %v5457_v8, 0  ;;  %v1990_v15 = vrot.slane %v1987_v56, 4  ;;  %v2161_v63 = vld [vmem:[%s5858_s18 + $0x10] sm:$0xff] }
 0x487   :  { %2292 = vmatpush.msrb.mxu3 %v2216_v46  ;;  %v2163_v56 = vld [vmem:[%s5858_s18 + $0x20] sm:$0xff] }
 0x488   :  { %v695_v22 = vmul.f32 0.5, %v694_v55  ;;  %2110 = vmatpush.msra.mxu1 %v2034_v59  ;;  %v2214_v59 = vld [vmem:[%s5858_s18 + $0x1b8] sm:$0xff]  ;;  %v1974_v29 = vsel %vm1948_vm1, %v1968_v47, %v1972_v0  ;;  %v1991_v24 = vrot.slane %v1989_v4, 4  ;;  %v2199_v0 = vld [vmem:[%s5858_s18 + $0x140] sm:$0xff]  ;;  %v2196_v47 = vld [vmem:[%s5858_s18 + $0x128] sm:$0xff] }
 0x489   :  { %2293 = vmatpush.msrb.mxu3 %v2214_v59  ;;  %v2159_v4 = vld [vmem:[%s5858_s18] sm:$0xff]  ;;  %v2192_v59 = vld [vmem:[%s5858_s18 + $0x108] sm:$0xff] }
 0x48a   :  { %v696_v42 = vsub.f32 1.5, %v695_v22  ;;  %2111 = vmatpush.msra.mxu1 %v2032_v27  ;;  %v1986_v22 = vperm.slane %v5502_v37, 0  ;;  %v2205_v37 = vld [vmem:[%s5858_s18 + $0x170] sm:$0xff]  ;;  %v2195_v46 = vld [vmem:[%s5858_s18 + $0x120] sm:$0xff] }
 0x48b   :  { %2294 = vmatpush.msrb.mxu3 %v2212_v39  ;;  %v2338_v39 = vld [vmem:[%s5860_s20 + $0xd8] sm:$0xff] }
 0x48c   :  { %v697_v48 = vmul.f32 %v5403_v1, %v696_v42  ;;  %2112 = vmatpush.msra.mxu1 %v2030_v44  ;;  %v2178_v42 = vld [vmem:[%s5858_s18 + $0x98] sm:$0xff]  ;;  %v1988_v44 = vperm.slane %v1985_v51, 0  ;;  %v1992_v41 = vsel %vm1948_vm1, %v1986_v22, %v1990_v15  ;;  %v2191_v15 = vld [vmem:[%s5858_s18 + $0x100] sm:$0xff] }
 0x48d   :  { %2295 = vmatpush.msrb.mxu3 %v2210_v25  ;;  %v2170_v51 = vld [vmem:[%s5858_s18 + $0x58] sm:$0xff]  ;;  %v5737_v22 = vld [vmem:[%s5902_s7 + $0x4] sm:$0xf]  ;;  %v2317_v25 = vld [vmem:[%s5860_s20 + $0x30] sm:$0xff] }
 0x48e   :  { %v701_v2 = vsel %vm700_vm0, %v5403_v1, %v697_v48  ;;  %2249 = vmatpush.msrb.mxu1 %v2221_v45  ;;  %v2183_v1 = vld [vmem:[%s5858_s18 + $0xc0] sm:$0xff] }
 0x48f   :  { %v702_v35 = vmul.f32 %v701_v2, %v5213_v5  ;;  %v703_v26 = vmul.f32 %v701_v2, %v5216_v36  ;;  %v2186_v5 = vld [vmem:[%s5858_s18 + $0xd8] sm:$0xff]  ;;  %v1971_v36 = vperm.slane %v5490_v31, 1  ;;  %2232 = vmatpush.msrb.mxu0 %v2183_v1  ;;  %v1993_v31 = vsel %vm1948_vm1, %v1988_v44, %v1991_v24  ;;  %v2171_v2 = vld [vmem:[%s5858_s18 + $0x60] sm:$0xff]  ;;  %v2340_v24 = vld [vmem:[%s5860_s20 + $0xe8] sm:$0xff] }
 0x490   :  { %2250 = vmatpush.msrb.mxu1 %v2219_v14  ;;  %2271 = vmatpush.msrb.mxu2 %v2186_v5  ;;  %v2166_v5 = vld [vmem:[%s5858_s18 + $0x38] sm:$0xff]  ;;  %v2336_v44 = vld [vmem:[%s5860_s20 + $0xc8] sm:$0xff] }
 0x491   :  { %v709_v11 = vmul.f32 %v705_v3, %v702_v35  ;;  %v710_v60 = vmul.f32 %v706_v32, %v703_v26  ;;  %v1973_v62 = vrot.slane %v1971_v36, 4  ;;  %2233 = vmatpush.msrb.mxu0 %v2181_v13  ;;  %v2207_v3 = vld [vmem:[%s5858_s18 + $0x180] sm:$0xff]  ;;  %v2208_v32 = vld [vmem:[%s5858_s18 + $0x188] sm:$0xff]  ;;  %v2162_v1 = vld [vmem:[%s5858_s18 + $0x18] sm:$0xff] }
 0x492   :  { %2251 = vmatpush.msrb.mxu1 %v2217_v61  ;;  %2272 = vmatpush.msrb.mxu2 %v2184_v6  ;;  %v2168_v35 = vld [vmem:[%s5858_s18 + $0x48] sm:$0xff]  ;;  %v2202_v61 = vld [vmem:[%s5858_s18 + $0x158] sm:$0xff]  ;;  %v2193_v13 = vld [vmem:[%s5858_s18 + $0x110] sm:$0xff] }
 0x493   :  { %v716_v57 = vadd.f32 %v712_v30, %v709_v11  ;;  %v717_v7 = vadd.f32 %v713_v52, %v710_v60  ;;  %v1975_v43 = vsel %vm1948_vm1, %v1970_v17, %v1973_v62  ;;  %2234 = vmatpush.msrb.mxu0 %v2179_v20  ;;  %v2206_v30 = vld [vmem:[%s5858_s18 + $0x178] sm:$0xff]  ;;  %2296 = vmatpush.msrb.mxu3 %v2208_v32  ;;  %v2167_v52 = vld [vmem:[%s5858_s18 + $0x40] sm:$0xff]  ;;  %v2204_v36 = vld [vmem:[%s5858_s18 + $0x168] sm:$0xff] }
 0x494   :  { %2252 = vmatpush.msrb.mxu1 %v2215_v58  ;;  %2273 = vmatpush.msrb.mxu2 %v2182_v12  ;;  %v2201_v11 = vld [vmem:[%s5858_s18 + $0x150] sm:$0xff]  ;;  %v2164_v60 = vld [vmem:[%s5858_s18 + $0x28] sm:$0xff]  ;;  %v2198_v58 = vld [vmem:[%s5858_s18 + $0x138] sm:$0xff] }
 0x495   :  { %718 = vst [vmem:[%s5863_s23] sm:$0xff] %v716_v57  ;;  %v1947_v55 = vrot.slane %v717_v7, 4  ;;  %2235 = vmatpush.msrb.mxu0 %v2177_v40  ;;  %2297 = vmatpush.msrb.mxu3 %v2206_v30  ;;  %v2200_v6 = vld [vmem:[%s5858_s18 + $0x148] sm:$0xff]  ;;  %v2194_v12 = vld [vmem:[%s5858_s18 + $0x118] sm:$0xff]  ;;  %v5706_v62 = vld [vmem:[%s5902_s7] sm:$0xf] }
 0x496   :  { %719 = vst [vmem:[%s5863_s23 + $0x8] sm:$0xff] %v717_v7  ;;  %2253 = vmatpush.msrb.mxu1 %v2213_v16  ;;  %2274 = vmatpush.msrb.mxu2 %v2180_v21  ;;  %v2160_v7 = vld [vmem:[%s5858_s18 + $0x8] sm:$0xff]  ;;  %v2325_v16 = vld [vmem:[%s5860_s20 + $0x70] sm:$0xff]  ;;  %v2342_v17 = vld [vmem:[%s5860_s20 + $0xf8] sm:$0xff] }
 0x497   :  { %v1949_v27 = vsel %vm1948_vm1, %v716_v57, %v1947_v55  ;;  %v1950_v28 = vsel %vm1948_vm1, %v1947_v55, %v716_v57  ;;  %2236 = vmatpush.msrb.mxu0 %v2175_v50  ;;  %2298 = vmatpush.msrb.mxu3 %v2204_v36  ;;  %v2197_v57 = vld [vmem:[%s5858_s18 + $0x130] sm:$0xff]  ;;  %v2326_v55 = vld [vmem:[%s5860_s20 + $0x78] sm:$0xff]  ;;  %v2323_v21 = vld [vmem:[%s5860_s20 + $0x60] sm:$0xff] }
 0x498   :  { %v1951_v8 = vrot.slane %v1950_v28, 4  ;;  %v1978_v10 = vmul.f32 %v1974_v29, %v1949_v27  ;;  %2254 = vmatpush.msrb.mxu1 %v2211_v9  ;;  %2275 = vmatpush.msrb.mxu2 %v2178_v42  ;;  %v2324_v29 = vld [vmem:[%s5860_s20 + $0x68] sm:$0xff]  ;;  %v2341_v20 = vld [vmem:[%s5860_s20 + $0xf0] sm:$0xff]  ;;  %v2322_v27 = vld [vmem:[%s5860_s20 + $0x58] sm:$0xff] }
 0x499   :  { %2237 = vmatpush.msrb.mxu0 %v2173_v33  ;;  %2299 = vmatpush.msrb.mxu3 %v2202_v61  ;;  %v2339_v28 = vld [vmem:[%s5860_s20 + $0xe0] sm:$0xff]  ;;  %v2321_v9 = vld [vmem:[%s5860_s20 + $0x50] sm:$0xff]  ;;  %v2328_v36 = vld [vmem:[%s5860_s20 + $0x88] sm:$0xff] }
 0x49a   :  { %v1979_v48 = vmul.f32 %v1975_v43, %v1951_v8  ;;  %v1996_v49 = vadd.f32 %v1992_v41, %v1978_v10  ;;  %2255 = vmatpush.msrb.mxu1 %v2209_v19  ;;  %2276 = vmatpush.msrb.mxu2 %v2176_v18  ;;  %v2062_v8 = vld [vmem:[%s5857_s17] sm:$0x3]  ;;  %v2320_v10 = vld [vmem:[%s5860_s20 + $0x48] sm:$0xff]  ;;  %v2337_v40 = vld [vmem:[%s5860_s20 + $0xd0] sm:$0xff] }
 0x49b   :  { %2238 = vmatpush.msrb.mxu0 %v2171_v2  ;;  %2300 = vmatpush.msrb.mxu3 %v2200_v6  ;;  %v2319_v42 = vld [vmem:[%s5860_s20 + $0x40] sm:$0xff]  ;;  %v2064_v43 = vperm.slane %v2062_v8, 0  ;;  %v2318_v41 = vld [vmem:[%s5860_s20 + $0x38] sm:$0xff]  ;;  %v2065_v18 = vperm.slane %v2062_v8, 1 }
 0x49c   :  { %v1997_v45 = vadd.f32 %v1993_v31, %v1979_v48  ;;  %2070 = vst [vmem:[#allocation1] ss:$2 sm:$0xff] %v1996_v49  ;;  %2256 = vmatpush.msrb.mxu1 %v2207_v3  ;;  %2277 = vmatpush.msrb.mxu2 %v2174_v34  ;;  %v2335_v30 = vld [vmem:[%s5860_s20 + $0xc0] sm:$0xff] }
 0x49d   :  { %2239 = vmatpush.msrb.mxu0 %v2169_v38  ;;  %2301 = vmatpush.msrb.mxu3 %v2198_v58  ;;  %v2315_v2 = vld [vmem:[%s5860_s20 + $0x20] sm:$0xff]  ;;  %v2314_v38 = vld [vmem:[%s5860_s20 + $0x18] sm:$0xff] }
 0x49e   :  { %2072 = vst [vmem:[#allocation1 + $0x1] ss:$2 sm:$0xff] %v1997_v45  ;;  %2257 = vmatpush.msrb.mxu1 %v2205_v37  ;;  %2278 = vmatpush.msrb.mxu2 %v2172_v23  ;;  %v2316_v37 = vld [vmem:[%s5860_s20 + $0x28] sm:$0xff]  ;;  %v2334_v23 = vld [vmem:[%s5860_s20 + $0xb8] sm:$0xff]  ;;  %v2223_v6 = vld [vmem:[%s5859_s19] sm:$0x3] }
 0x49f   :  { %2240 = vmatpush.msrb.mxu0 %v2167_v52  ;;  %2302 = vmatpush.msrb.mxu3 %v2196_v47  ;;  %v2313_v52 = vld [vmem:[%s5860_s20 + $0x10] sm:$0xff]  ;;  %v2226_v47 = vperm.slane %v2223_v6, 1 }
 0x4a0   :  { %2279 = vmatpush.msrb.mxu2 %v2170_v51  ;;  %2258 = vmatpush.msrb.mxu1 %v2203_v54  ;;  %v2333_v51 = vld [vmem:[%s5860_s20 + $0xb0] sm:$0xff]  ;;  %v2330_v54 = vld [vmem:[%s5860_s20 + $0x98] sm:$0xff] }
 0x4a1   :  { %2241 = vmatpush.msrb.mxu0 %v2165_v53  ;;  %2389 = vrot.lane.b32.xlu2 %v5706_v62, %s2561_s16  ;;  %v2311_v53 = vld [vmem:[%s5860_s20] sm:$0xff] }
 0x4a2   :  { %2280 = vmatpush.msrb.mxu2 %v2168_v35  ;;  %2259 = vmatpush.msrb.mxu1 %v2201_v11  ;;  %v2332_v35 = vld [vmem:[%s5860_s20 + $0xa8] sm:$0xff] }
 0x4a3   :  { %2242 = vmatpush.msrb.mxu0 %v2163_v56  ;;  %2303 = vmatpush.msrb.mxu3 %v2194_v12  ;;  %v2327_v56 = vld [vmem:[%s5860_s20 + $0x80] sm:$0xff] }
 0x4a4   :  { %2281 = vmatpush.msrb.mxu2 %v2166_v5  ;;  %2260 = vmatpush.msrb.mxu1 %v2199_v0  ;;  %v2329_v5 = vld [vmem:[%s5860_s20 + $0x90] sm:$0xff] }
 0x4a5   :  { %v2073_v26 = vld.sshfl [vmem:[#allocation1] sm:$0xff pattern:$0x75316420]  ;;  %v2074_v14 = vld.sshfl [vmem:[#allocation1 + $0x8] sm:$0xff pattern:$0x75316420]  ;;  %2243 = vmatpush.msrb.mxu0 %v2161_v63  ;;  %2304 = vmatpush.msrb.mxu3 %v2192_v59 }
 0x4a6   :  { %2093 = vmatmul.f32.vlgmr.msra.gmra.mxu0 %v2073_v26  ;;  %2113 = vmatmul.f32.vlgmr.msra.gmra.mxu1 %v2074_v14 }
 0x4a7   :  { %2133 = vmatmul.f32.vlgmr.msra.gmra.mxu2 %v2073_v26  ;;  %2153 = vmatmul.f32.vlgmr.msra.gmra.mxu3 %v2074_v14  ;;  %v2312_v26 = vld [vmem:[%s5860_s20 + $0x8] sm:$0xff]  ;;  %v2331_v14 = vld [vmem:[%s5860_s20 + $0xa0] sm:$0xff] }
 0x4a8   :  { %2282 = vmatpush.msrb.mxu2 %v2164_v60  ;;  %2244 = vmatpush.msrb.mxu0 %v2159_v4  ;;  %v2225_v4 = vperm.slane %v2223_v6, 0 }
 0x4a9   :  { %2261 = vmatpush.msrb.mxu1 %v2197_v57  ;;  %2391 = vrot.lane.b32.xlu2 %v5737_v22, %s2561_s16 }
 0x4aa   :  { %2283 = vmatpush.msrb.mxu2 %v2162_v1  ;;  %2347 = vmatpush.msra.mxu0 %v2326_v55 }
 0x4ab   :  { %2262 = vmatpush.msrb.mxu1 %v2195_v46 }
 0x4ac   :  { %2284 = vmatpush.msrb.mxu2 %v2160_v7  ;;  %2348 = vmatpush.msra.mxu0 %v2325_v16 }
 0x4ad   :  { %2263 = vmatpush.msrb.mxu1 %v2193_v13 }
 0x4ae   :  { %2349 = vmatpush.msra.mxu0 %v2324_v29 }
 0x4af   :  { %2264 = vmatpush.msrb.mxu1 %v2191_v15 }
 0x4b0   :  { %2350 = vmatpush.msra.mxu0 %v2323_v21 }
 0x4b1   :  { %2367 = vmatpush.msra.mxu1 %v2342_v17  ;;  %v2504_v17 = vld [vmem:[#allocation2] ss:$0 sm:$0xff] }
 0x4b2   :  { %2351 = vmatpush.msra.mxu0 %v2322_v27 }
 0x4b3   :  { %2368 = vmatpush.msra.mxu1 %v2341_v20 }
 0x4b4   :  { %2352 = vmatpush.msra.mxu0 %v2321_v9 }
 0x4b5   :  { %2369 = vmatpush.msra.mxu1 %v2340_v24 }
 0x4b6   :  { %2353 = vmatpush.msra.mxu0 %v2320_v10 }
 0x4b7   :  { %2370 = vmatpush.msra.mxu1 %v2339_v28 }
 0x4b8   :  { %2354 = vmatpush.msra.mxu0 %v2319_v42 }
 0x4b9   :  { %2371 = vmatpush.msra.mxu1 %v2338_v39 }
 0x4ba   :  { %2355 = vmatpush.msra.mxu0 %v2318_v41 }
 0x4bb   :  { %2372 = vmatpush.msra.mxu1 %v2337_v40 }
 0x4bc   :  { %2356 = vmatpush.msra.mxu0 %v2317_v25 }
 0x4bd   :  { %2373 = vmatpush.msra.mxu1 %v2336_v44 }
 0x4be   :  { %2357 = vmatpush.msra.mxu0 %v2316_v37 }
 0x4bf   :  { %2374 = vmatpush.msra.mxu1 %v2335_v30 }
 0x4c0   :  { %2358 = vmatpush.msra.mxu0 %v2315_v2 }
 0x4c1   :  { %2375 = vmatpush.msra.mxu1 %v2334_v23 }
 0x4c2   :  { %2359 = vmatpush.msra.mxu0 %v2314_v38 }
 0x4c3   :  { %2376 = vmatpush.msra.mxu1 %v2333_v51 }
 0x4c4   :  { %2360 = vmatpush.msra.mxu0 %v2313_v52 }
 0x4c5   :  { %2377 = vmatpush.msra.mxu1 %v2332_v35 }
 0x4c6   :  { %2361 = vmatpush.msra.mxu0 %v2312_v26 }
 0x4c7   :  { %2378 = vmatpush.msra.mxu1 %v2331_v14 }
 0x4c8   :  { %2362 = vmatpush.msra.mxu0 %v2311_v53 }
 0x4c9   :  { %2379 = vmatpush.msra.mxu1 %v2330_v54 }
 0x4cb   :  { %2380 = vmatpush.msra.mxu1 %v2329_v5 }
 0x4cd   :  { %2381 = vmatpush.msra.mxu1 %v2328_v36 }
 0x4cf   :  { %2382 = vmatpush.msra.mxu1 %v2327_v56 }
 0x4fb   :  { %v2390_v11 = vpop.permute.xlu2 %2389 }
 0x4fc   :  { %v2395_v60 = vsub.f32 %v5706_v62, %v2390_v11 }
 0x4fe   :  { %v2397_v61 = vmul.f32 0.5, %v2395_v60  ;;  %2425 = vst [vmem:[#allocation1] ss:$2 sm:$0xff] %v2395_v60 }
 0x500   :  { %2401 = vrot.lane.b32.xlu0 %v2397_v61, %s2562_s10 }
 0x503   :  { %v2392_v63 = vpop.permute.xlu2 %2391 }
 0x504   :  { %v2396_v0 = vsub.f32 %v5737_v22, %v2392_v63 }
 0x506   :  { %v2398_v1 = vmul.f32 0.5, %v2396_v0  ;;  %2427 = vst [vmem:[#allocation1 + $0x1] ss:$2 sm:$0xff] %v2396_v0 }
 0x508   :  { %2403 = vrot.lane.b32.xlu1 %v2398_v1, %s2562_s10 }
 0x50d   :  { %v2428_v28 = vld.sshfl [vmem:[#allocation1] sm:$0xff pattern:$0x75316420] }
 0x523   :  { %v2094_v19 = vpop.f32.mrf.mxu0  ;;  %v2114_v49 = vpop.f32.mrf.mxu1 }
 0x524   :  { %v2095_v48 = vadd.f32 %v2094_v19, %v2064_v43 }
 0x526   :  { %v2115_v50 = vadd.f32 %v2114_v49, %v2095_v48 }
 0x528   :  { %v2157_v31 = vmax.f32 %v2115_v50, 0.0 }
 0x52a   :  { %v2134_v3 = vpop.f32.mrf.mxu2  ;;  %2245 = vmatmul.f32.vlgmr.msrb.gmra.mxu0 %v2157_v31  ;;  %2285 = vmatmul.f32.vlgmr.msrb.gmra.mxu2 %v2157_v31  ;;  %v2154_v45 = vpop.f32.mrf.mxu3 }
 0x52b   :  { %v2135_v32 = vadd.f32 %v2134_v3, %v2065_v18  ;;  %v2563_v3 = vmov 2.0  }
 0x52d   :  { %v2155_v33 = vadd.f32 %v2154_v45, %v2135_v32 }
 0x52f   :  { %v2158_v34 = vmax.f32 %v2155_v33, 0.0 }
 0x531   :  { %2265 = vmatmul.f32.vlgmr.msrb.gmra.mxu1 %v2158_v34  ;;  %2305 = vmatmul.f32.vlgmr.msrb.gmra.mxu3 %v2158_v34 }
 0x572   :  { %v2402_v2 = vpop.permute.xlu0 %2401 }
 0x573   :  { %v2407_v38 = vadd.f32 %v2402_v2, %v5706_v62 }
 0x57a   :  { %v2404_v52 = vpop.permute.xlu1 %2403 }
 0x57b   :  { %v2408_v53 = vadd.f32 %v2404_v52, %v5737_v22 }
 0x5a7   :  { %v2246_v57 = vpop.f32.mrf.mxu0 }
 0x5a8   :  { %v2247_v7 = vadd.f32 %v2246_v57, %v2225_v4 }
 0x5ad   :  { %v2286_v13 = vpop.f32.mrf.mxu2 }
 0x5ae   :  { %v2266_v58 = vpop.f32.mrf.mxu1  ;;  %v2287_v15 = vadd.f32 %v2286_v13, %v2226_v47 }
 0x5af   :  { %v2267_v46 = vadd.f32 %v2266_v58, %v2247_v7 }
 0x5b1   :  { %v2309_v12 = vmax.f32 %v2267_v46, 0.0 }
 0x5b3   :  { %2363 = vmatmul.f32.vlgmr.msra.gmra.mxu0 %v2309_v12 }
 0x5b4   :  { %v2306_v55 = vpop.f32.mrf.mxu3 }
 0x5b5   :  { %v2307_v16 = vadd.f32 %v2306_v55, %v2287_v15 }
 0x5b7   :  { %v2310_v59 = vmax.f32 %v2307_v16, 0.0 }
 0x5b9   :  { %2383 = vmatmul.f32.vlgmr.msra.gmra.mxu1 %v2310_v59 }
 0x630   :  { %v2364_v29 = vpop.f32.mrf.mxu0 }
 0x631   :  { %v2365_v20 = vadd.f32 %v2504_v17, %v2364_v29 }
 0x636   :  { %v2384_v21 = vpop.f32.mrf.mxu1 }
 0x637   :  { %v2385_v24 = vadd.f32 %v2384_v21, %v2365_v20 }
 0x639   :  { %v2417_v27 = vmin.f32 %v2385_v24, 5.0 }
 0x63b   :  { %v2430_v9 = vadd.f32 %v2428_v28, %v2417_v27 }
 0x63d   :  { %v2498_v39 = vmul.f32 -1.442695, %v2430_v9 }
 0x63f   :  { %2519 = vpow2.f32 %v2498_v39 }
 0x645   :  { %v2520_v8 = vpop.eup %2519 }
 0x646   :  { %v2434_v10 = vadd.f32 1.0, %v2520_v8 }
 0x648   :  { %2521 = vrcp.f32 %v2434_v10  ;;  %v2446_v44 = vand.u32 2147483648, %v2434_v10  ;;  %v2444_v19 = vand.u32 2147483647, %v2434_v10  ;;  %vm2440_vm3 = vweird.f32 %v2434_v10 }
 0x649   :  { %2523 = vrcp.f32 %v2563_v3 }
 0x64a   :  { %v2447_v48 = vor.u32 1.1754944e-38, %v2446_v44  ;;  %vm2445_vm5 = vcmp.eq.f32.partialorder %v2444_v19, 8.507059e+37 }
 0x64e   :  { %v2522_v40 = vpop.eup %2521 }
 0x64f   :  { %v2436_v42 = vmul.f32 %v2522_v40, %v2434_v10  ;;  %vm2441_vm2 = vweird.f32 %v2522_v40  ;;  %v2524_v32 = vpop.eup %2523 }
 0x650   :  { %vm2442_vm4 = vmor %vm2440_vm3, %vm2441_vm2  ;;  %v2410_v45 = vmul.f32 2.0, %v2524_v32  ;;  %vm2414_vm6 = vweird.f32 %v2524_v32 }
 0x651   :  { %v2437_v43 = vsub.f32 1.0, %v2436_v42 }
 0x652   :  { %v2411_v33 = vsub.f32 1.0, %v2410_v45 }
 0x653   :  { %v2438_v41 = vmul.f32 %v2522_v40, %v2437_v43 }
 0x654   :  { %v2412_v34 = vmul.f32 %v2524_v32, %v2411_v33 }
 0x655   :  { %v2439_v25 = vadd.f32 %v2522_v40, %v2438_v41 }
 0x656   :  { %v2413_v37 = vadd.f32 %v2524_v32, %v2412_v34 }
 0x657   :  { %v2443_v49 = vsel %vm2442_vm4, %v2522_v40, %v2439_v25 }
 0x658   :  { %v2448_v50 = vsel %vm2445_vm5, %v2447_v48, %v2443_v49  ;;  %v2415_v30 = vsel %vm2414_vm6, %v2524_v32, %v2413_v37 }
 0x659   :  { %v2450_v18 = vmul.f32 0.5, %v2448_v50  ;;  %v2416_v23 = vmul.f32 %v2415_v30, %v2385_v24 }
 0x65b   :  { %2453 = vrot.lane.b32.xlu2 %v2450_v18, %s2562_s10  ;;  %v2452_v31 = vrot.slane %v2450_v18, 4  ;;  %v2421_v51 = vadd.f32 %v2416_v23, %v2407_v38  ;;  %v2419_v14 = vrot.slane %v2416_v23, 4 }
 0x65d   :  { %v2422_v54 = vadd.f32 %v2419_v14, %v2408_v53 }
 0x663   :  { %2455 = vrot.lane.b32.xlu2 %v2452_v31, %s2562_s10 }
 0x6b5   :  { %v2454_v35 = vpop.permute.xlu2 %2453 }
 0x6b6   :  { %v2459_v26 = vsub.f32 %v2421_v51, %v2454_v35  ;;  %v2461_v56 = vadd.f32 %v2454_v35, %v2421_v51 }
 0x6b8   :  { %2465 = vst [vmem:[#allocation1] ss:$2 sm:$0xff] %v2459_v26 }
 0x6bd   :  { %v2456_v5 = vpop.permute.xlu2 %2455 }
 0x6be   :  { %v2460_v36 = vsub.f32 %v2422_v54, %v2456_v5  ;;  %v2462_v11 = vadd.f32 %v2456_v5, %v2422_v54 }
 0x6c0   :  { %2467 = vst [vmem:[#allocation1 + $0x1] ss:$2 sm:$0xff] %v2460_v36 }
 0x6c7   :  { %v2468_v60 = vld.sshfl [vmem:[#allocation1] sm:$0xff pattern:$0x75316420] }
 0x6c8   :  { %2472 = vst [vmem:[#allocation1] ss:$2 sm:$0xff] %v2461_v56 }
 0x6c9   :  { %2474 = vst [vmem:[#allocation1 + $0x1] ss:$2 sm:$0xff] %v2462_v11 }
 0x6d0   :  { %v2475_v61 = vld.sshfl [vmem:[#allocation1] sm:$0xff pattern:$0x75316420] }
 0x6d1   :  { %2476 = vrot.lane.b32.xlu2 %v2475_v61, %s2561_s16 }
 0x72b   :  { %v2477_v62 = vpop.permute.xlu2 %2476 }
 0x72c   :  { %v2480_v63 = vsel %vm2479_vm7, %v2468_v60, %v2477_v62 }
 0x72d   :  { %v2482_v0 = vrot.slane %v2480_v63, 4  ;;  %2485 = vst.msk [vmem:[%s5862_s22] sm:$0xf] %vm2484_vm8, %v2480_v63 }
 0x72f   :  { %2486 = vst.msk [vmem:[%s5862_s22 + $0x4] sm:$0xf] %vm2484_vm8, %v2482_v0 }
 0x730   :  { %2495 = vsyncpa [#allocation3], 1 }

// kernel: span_refining_decoder_forward.7
= control target key start
LH: loop header
LB: loop body
LE: loop exit
PB: predicated region body
PF: predicated region fallthrough
CT: control target
= control target key end

     0   :  { %s5960_s0 = inlined_call_operand.vmem [shape: f32[8,256], index: 0, kind: input, shape index: {}]   ;;  %s5961_s1 = inlined_call_operand.vmem [shape: f32[8,256], index: 1, kind: input, shape index: {}]   ;;  %s5962_s2 = inlined_call_operand.vmem [shape: f32[2,4,2], index: 2, kind: input, shape index: {}]   ;;  %s5963_s3 = inlined_call_operand.vmem [shape: f32[2,1024], index: 3, kind: input, shape index: {}]   ;;  %s5964_s4 = inlined_call_operand.vmem [shape: f32[256,256], index: 4, kind: input, shape index: {}]   ;;  %s5965_s5 = inlined_call_operand.vmem [shape: f32[1,256], index: 5, kind: input, shape index: {}]   ;;  %s5966_s6 = inlined_call_operand.vmem [shape: f32[256,256], index: 6, kind: input, shape index: {}]   ;;  %s5967_s7 = inlined_call_operand.vmem [shape: f32[1,256], index: 7, kind: input, shape index: {}]   ;;  %s5968_s8 = inlined_call_operand.vmem [shape: f32[1,256], index: 8, kind: input, shape index: {}]   ;;  %s5969_s9 = inlined_call_operand.vmem [shape: f32[1,256], index: 9, kind: input, shape index: {}]   ;;  %s5970_s10 = inlined_call_operand.vmem [shape: f32[256,256], index: 10, kind: input, shape index: {}]   ;;  %s5971_s11 = inlined_call_operand.vmem [shape: f32[1,256], index: 11, kind: input, shape index: {}]   ;;  %s5972_s12 = inlined_call_operand.vmem [shape: f32[1,256], index: 12, kind: input, shape index: {}]   ;;  %s5973_s13 = inlined_call_operand.vmem [shape: f32[1,256], index: 13, kind: input, shape index: {}]   ;;  %s5974_s14 = inlined_call_operand.vmem [shape: f32[1024,512], index: 14, kind: input, shape index: {}]   ;;  %s5975_s15 = inlined_call_operand.vmem [shape: f32[1,512], index: 15, kind: input, shape index: {}]   ;;  %s5976_s16 = inlined_call_operand.vmem [shape: f32[256,256], index: 16, kind: input, shape index: {}]   ;;  %s5977_s17 = inlined_call_operand.hbm [shape: f32[1,256], index: 17, kind: input, shape index: {}]   ;;  %s5978_s18 = inlined_call_operand.vmem [shape: f32[256,256], index: 18, kind: input, shape index: {}]   ;;  %s5979_s19 = inlined_call_operand.hbm [shape: f32[1,256], index: 19, kind: input, shape index: {}]   ;;  %s5980_s20 = inlined_call_operand.vmem [shape: f32[256,2], index: 20, kind: input, shape index: {}]   ;;  %s5981_s21 = inlined_call_operand.hbm [shape: f32[1,2], index: 21, kind: input, shape index: {}]   ;;  %s5982_s22 = inlined_call_operand.vmem [shape: f32[2,4,2], index: 22, kind: output, shape index: {0}]   ;;  %s5983_s23 = inlined_call_operand.hbm [shape: f32[8,256], index: 23, kind: output, shape index: {1}]  }
   0x1   :  { %5995 = sst [smem:[#allocation17_spill]] %s5960_s0 }
   0x2   :  { %5996 = sst [smem:[#allocation18_spill]] %s5961_s1 }
   0x3   :  { %5997 = sst [smem:[#allocation19_spill]] %s5962_s2 }
   0x4   :  { %5998 = sst [smem:[#allocation20_spill]] %s5963_s3 }
   0x5   :  { %5999 = sst [smem:[#allocation21_spill]] %s5964_s4 }
   0x6   :  { %6000 = sst [smem:[#allocation22_spill]] %s5965_s5 }
   0x7   :  { %6001 = sst [smem:[#allocation23_spill]] %s5966_s6 }
   0x8   :  { %6002 = sst [smem:[#allocation24_spill]] %s5967_s7 }
   0x9   :  { %29 = vsyncpa [#allocation3], 0 }
   0xa   :  { %30 = vsyncpa [#allocation6], 0  ;;  %s84_s24 = sshll.u32 %s5979_s19, 4  ;;  %s85_s24 = int_to_ptr.hbm [resolvable:$true] %s84_s24 }
   0xb   :  { %31 = vsyncpa [#allocation4], 0  ;;  %s2679_s25 = smov [#allocation5]   ;;  %s71_s2 = sshll.u32 %s5977_s17, 4  ;;  %s72_s2 = int_to_ptr.hbm [resolvable:$true] %s71_s2 }
   0xc   :  { %s86_s5 = sshll.u32 %s2679_s25, 4  ;;  %s2680_s6 = smov [#allocation2]   ;;  %s87_s5 = int_to_ptr.vmem [resolvable:$true] %s86_s5 }
   0xd   :  { %89 = dma.hbm_to_vmem [thread:$0]  %s85_s24, 32, %s87_s5, [#allocation6]  }
   0xe   :  { %s73_s27 = sshll.u32 %s2680_s6, 4  ;;  %s97_s29 = sshll.u32 %s5981_s21, 4  ;;  %s74_s27 = int_to_ptr.vmem [resolvable:$true] %s73_s27  ;;  %s98_s29 = int_to_ptr.hbm [resolvable:$true] %s97_s29 }
   0xf   :  { %76 = dma.hbm_to_vmem [thread:$0]  %s72_s2, 32, %s74_s27, [#allocation3]  }
  0x10   :  { %s2681_s19 = smov [#allocation7]  }
  0x11   :  { %s99_s3 = sshll.u32 %s2681_s19, 4  ;;  %s100_s3 = int_to_ptr.vmem [resolvable:$true] %s99_s3 }
  0x12   :  { %102 = dma.hbm_to_vmem [thread:$0]  %s98_s29, 16, %s100_s3, [#allocation6]  }
  0x13   :  { %2673 = dma.done.wait [#allocation3], 32  }
  0x14   :  { %2674 = vsyncadd [#allocation3], 4294967264 }
  0x15   :  { %2675 = dma.done.wait [#allocation6], 48  }
  0x16   :  { %2676 = vsyncadd [#allocation6], 4294967248  ;;  %s6003_s4 = sld [smem:[#allocation21_spill]]  ;;  %vm1987_vm12 = vcmask 1041409   ;;  %vm1985_vm13 = vcmask 1040384  }
  0x17   :  { %s6004_s25 = sld [smem:[#allocation17_spill]] }
  0x18   :  { %s6005_s29 = sld [smem:[#allocation23_spill]] }
  0x19   :  { %s6006_s26 = sld [smem:[#allocation22_spill]] }
  0x1a   :  { %s6007_s6 = sld [smem:[#allocation24_spill]] }
  0x1b   :  { %s6008_s28 = sld [smem:[#allocation18_spill]] }
  0x1c   :  { %v152_v0 = vld [vmem:[%s6003_s4 + $0xf8] sm:$0xff]  ;;  %v150_v1 = vld [vmem:[%s6003_s4 + $0xe8] sm:$0xff]  ;;  %v151_v3 = vld [vmem:[%s6003_s4 + $0xf0] sm:$0xff]  ;;  %s6019_s3 = sld [smem:[#allocation20_spill]] }
  0x1d   :  { %v184_v2 = vld [vmem:[%s6003_s4 + $0x1f8] sm:$0xff]  ;;  %231 = vmatpush.msra.mxu2 %v152_v0  ;;  %v182_v4 = vld [vmem:[%s6003_s4 + $0x1e8] sm:$0xff]  ;;  %191 = vmatpush.msra.mxu0 %v151_v3  ;;  %v149_v6 = vld [vmem:[%s6003_s4 + $0xe0] sm:$0xff] }
  0x1e   :  { %251 = vmatpush.msra.mxu3 %v184_v2  ;;  %v148_v5 = vld [vmem:[%s6003_s4 + $0xd8] sm:$0xff]  ;;  %v183_v7 = vld [vmem:[%s6003_s4 + $0x1f0] sm:$0xff]  ;;  %v181_v10 = vld [vmem:[%s6003_s4 + $0x1e0] sm:$0xff] }
  0x1f   :  { %232 = vmatpush.msra.mxu2 %v150_v1  ;;  %v180_v8 = vld [vmem:[%s6003_s4 + $0x1d8] sm:$0xff]  ;;  %v147_v9 = vld [vmem:[%s6003_s4 + $0xd0] sm:$0xff]  ;;  %192 = vmatpush.msra.mxu0 %v149_v6  ;;  %v146_v11 = vld [vmem:[%s6003_s4 + $0xc8] sm:$0xff] }
  0x20   :  { %252 = vmatpush.msra.mxu3 %v182_v4  ;;  %211 = vmatpush.msra.mxu1 %v183_v7  ;;  %v178_v12 = vld [vmem:[%s6003_s4 + $0x1c8] sm:$0xff]  ;;  %v145_v13 = vld [vmem:[%s6003_s4 + $0xc0] sm:$0xff]  ;;  %v179_v14 = vld [vmem:[%s6003_s4 + $0x1d0] sm:$0xff] }
  0x21   :  { %233 = vmatpush.msra.mxu2 %v148_v5  ;;  %193 = vmatpush.msra.mxu0 %v147_v9  ;;  %v144_v15 = vld [vmem:[%s6003_s4 + $0xb8] sm:$0xff]  ;;  %v143_v17 = vld [vmem:[%s6003_s4 + $0xb0] sm:$0xff]  ;;  %v177_v18 = vld [vmem:[%s6003_s4 + $0x1c0] sm:$0xff] }
  0x22   :  { %253 = vmatpush.msra.mxu3 %v180_v8  ;;  %212 = vmatpush.msra.mxu1 %v181_v10  ;;  %v176_v16 = vld [vmem:[%s6003_s4 + $0x1b8] sm:$0xff]  ;;  %v142_v19 = vld [vmem:[%s6003_s4 + $0xa8] sm:$0xff]  ;;  %v141_v21 = vld [vmem:[%s6003_s4 + $0xa0] sm:$0xff] }
  0x23   :  { %234 = vmatpush.msra.mxu2 %v146_v11  ;;  %194 = vmatpush.msra.mxu0 %v145_v13  ;;  %v174_v20 = vld [vmem:[%s6003_s4 + $0x1a8] sm:$0xff]  ;;  %v175_v22 = vld [vmem:[%s6003_s4 + $0x1b0] sm:$0xff]  ;;  %v140_v23 = vld [vmem:[%s6003_s4 + $0x98] sm:$0xff] }
  0x24   :  { %254 = vmatpush.msra.mxu3 %v178_v12  ;;  %213 = vmatpush.msra.mxu1 %v179_v14  ;;  %v172_v24 = vld [vmem:[%s6003_s4 + $0x198] sm:$0xff]  ;;  %v139_v25 = vld [vmem:[%s6003_s4 + $0x90] sm:$0xff]  ;;  %v173_v26 = vld [vmem:[%s6003_s4 + $0x1a0] sm:$0xff] }
  0x25   :  { %235 = vmatpush.msra.mxu2 %v144_v15  ;;  %195 = vmatpush.msra.mxu0 %v143_v17  ;;  %v138_v27 = vld [vmem:[%s6003_s4 + $0x88] sm:$0xff]  ;;  %v137_v29 = vld [vmem:[%s6003_s4 + $0x80] sm:$0xff]  ;;  %v171_v30 = vld [vmem:[%s6003_s4 + $0x190] sm:$0xff] }
  0x26   :  { %255 = vmatpush.msra.mxu3 %v176_v16  ;;  %214 = vmatpush.msra.mxu1 %v177_v18  ;;  %v170_v28 = vld [vmem:[%s6003_s4 + $0x188] sm:$0xff]  ;;  %v136_v31 = vld [vmem:[%s6003_s4 + $0x78] sm:$0xff]  ;;  %v135_v33 = vld [vmem:[%s6003_s4 + $0x70] sm:$0xff] }
  0x27   :  { %236 = vmatpush.msra.mxu2 %v142_v19  ;;  %196 = vmatpush.msra.mxu0 %v141_v21  ;;  %v168_v32 = vld [vmem:[%s6003_s4 + $0x178] sm:$0xff]  ;;  %v169_v34 = vld [vmem:[%s6003_s4 + $0x180] sm:$0xff]  ;;  %v134_v35 = vld [vmem:[%s6003_s4 + $0x68] sm:$0xff] }
  0x28   :  { %256 = vmatpush.msra.mxu3 %v174_v20  ;;  %215 = vmatpush.msra.mxu1 %v175_v22  ;;  %v166_v36 = vld [vmem:[%s6003_s4 + $0x168] sm:$0xff]  ;;  %v133_v37 = vld [vmem:[%s6003_s4 + $0x60] sm:$0xff]  ;;  %v167_v38 = vld [vmem:[%s6003_s4 + $0x170] sm:$0xff] }
  0x29   :  { %237 = vmatpush.msra.mxu2 %v140_v23  ;;  %197 = vmatpush.msra.mxu0 %v139_v25  ;;  %v132_v39 = vld [vmem:[%s6003_s4 + $0x58] sm:$0xff]  ;;  %v131_v41 = vld [vmem:[%s6003_s4 + $0x50] sm:$0xff]  ;;  %v165_v42 = vld [vmem:[%s6003_s4 + $0x160] sm:$0xff] }
  0x2a   :  { %257 = vmatpush.msra.mxu3 %v172_v24  ;;  %216 = vmatpush.msra.mxu1 %v173_v26  ;;  %v164_v40 = vld [vmem:[%s6003_s4 + $0x158] sm:$0xff]  ;;  %v130_v43 = vld [vmem:[%s6003_s4 + $0x48] sm:$0xff]  ;;  %v129_v45 = vld [vmem:[%s6003_s4 + $0x40] sm:$0xff] }
  0x2b   :  { %238 = vmatpush.msra.mxu2 %v138_v27  ;;  %198 = vmatpush.msra.mxu0 %v137_v29  ;;  %v162_v44 = vld [vmem:[%s6003_s4 + $0x148] sm:$0xff]  ;;  %v163_v46 = vld [vmem:[%s6003_s4 + $0x150] sm:$0xff]  ;;  %v128_v47 = vld [vmem:[%s6003_s4 + $0x38] sm:$0xff] }
  0x2c   :  { %258 = vmatpush.msra.mxu3 %v170_v28  ;;  %217 = vmatpush.msra.mxu1 %v171_v30  ;;  %v160_v48 = vld [vmem:[%s6003_s4 + $0x138] sm:$0xff]  ;;  %v127_v49 = vld [vmem:[%s6003_s4 + $0x30] sm:$0xff]  ;;  %v161_v50 = vld [vmem:[%s6003_s4 + $0x140] sm:$0xff] }
  0x2d   :  { %239 = vmatpush.msra.mxu2 %v136_v31  ;;  %199 = vmatpush.msra.mxu0 %v135_v33  ;;  %v126_v51 = vld [vmem:[%s6003_s4 + $0x28] sm:$0xff]  ;;  %v125_v53 = vld [vmem:[%s6003_s4 + $0x20] sm:$0xff]  ;;  %v159_v54 = vld [vmem:[%s6003_s4 + $0x130] sm:$0xff] }
  0x2e   :  { %259 = vmatpush.msra.mxu3 %v168_v32  ;;  %218 = vmatpush.msra.mxu1 %v169_v34  ;;  %v158_v52 = vld [vmem:[%s6003_s4 + $0x128] sm:$0xff]  ;;  %v124_v55 = vld [vmem:[%s6003_s4 + $0x18] sm:$0xff]  ;;  %v123_v57 = vld [vmem:[%s6003_s4 + $0x10] sm:$0xff] }
  0x2f   :  { %240 = vmatpush.msra.mxu2 %v134_v35  ;;  %200 = vmatpush.msra.mxu0 %v133_v37  ;;  %v156_v56 = vld [vmem:[%s6003_s4 + $0x118] sm:$0xff]  ;;  %v157_v58 = vld [vmem:[%s6003_s4 + $0x120] sm:$0xff]  ;;  %v122_v59 = vld [vmem:[%s6003_s4 + $0x8] sm:$0xff] }
  0x30   :  { %260 = vmatpush.msra.mxu3 %v166_v36  ;;  %219 = vmatpush.msra.mxu1 %v167_v38  ;;  %v154_v60 = vld [vmem:[%s6003_s4 + $0x108] sm:$0xff]  ;;  %v115_v61 = vld [vmem:[%s6004_s25] sm:$0xff]  ;;  %v155_v0 = vld [vmem:[%s6003_s4 + $0x110] sm:$0xff] }
  0x31   :  { %241 = vmatpush.msra.mxu2 %v132_v39  ;;  %201 = vmatpush.msra.mxu0 %v131_v41  ;;  %v116_v62 = vld [vmem:[%s6004_s25 + $0x8] sm:$0xff]  ;;  %v121_v63 = vld [vmem:[%s6003_s4] sm:$0xff]  ;;  %v302_v1 = vld [vmem:[%s6005_s29 + $0xf8] sm:$0xff]  ;;  %s2686_s25 = smov [#allocation8]  }
  0x32   :  { %261 = vmatpush.msra.mxu3 %v164_v40  ;;  %220 = vmatpush.msra.mxu1 %v165_v42  ;;  %v153_v2 = vld [vmem:[%s6003_s4 + $0x100] sm:$0xff]  ;;  %v301_v3 = vld [vmem:[%s6005_s29 + $0xf0] sm:$0xff]  ;;  %v300_v4 = vld [vmem:[%s6005_s29 + $0xe8] sm:$0xff]  ;;  %s2522_s5 = sshll.u32 %s2686_s25, 4  ;;  %s2523_s5 = int_to_ptr.vmem [resolvable:$true] %s2522_s5 }
  0x33   :  { %242 = vmatpush.msra.mxu2 %v130_v43  ;;  %202 = vmatpush.msra.mxu0 %v129_v45  ;;  %v299_v5 = vld [vmem:[%s6005_s29 + $0xe0] sm:$0xff]  ;;  %v333_v6 = vld [vmem:[%s6005_s29 + $0x1f0] sm:$0xff]  ;;  %v334_v7 = vld [vmem:[%s6005_s29 + $0x1f8] sm:$0xff] }
  0x34   :  { %262 = vmatpush.msra.mxu3 %v162_v44  ;;  %221 = vmatpush.msra.mxu1 %v163_v46  ;;  %v298_v8 = vld [vmem:[%s6005_s29 + $0xd8] sm:$0xff]  ;;  %v297_v9 = vld [vmem:[%s6005_s29 + $0xd0] sm:$0xff]  ;;  %v331_v10 = vld [vmem:[%s6005_s29 + $0x1e0] sm:$0xff] }
  0x35   :  { %243 = vmatpush.msra.mxu2 %v128_v47  ;;  %203 = vmatpush.msra.mxu0 %v127_v49  ;;  %v332_v11 = vld [vmem:[%s6005_s29 + $0x1e8] sm:$0xff]  ;;  %v295_v13 = vld [vmem:[%s6005_s29 + $0xc0] sm:$0xff]  ;;  %v329_v14 = vld [vmem:[%s6005_s29 + $0x1d0] sm:$0xff] }
  0x36   :  { %263 = vmatpush.msra.mxu3 %v160_v48  ;;  %222 = vmatpush.msra.mxu1 %v161_v50  ;;  %v296_v12 = vld [vmem:[%s6005_s29 + $0xc8] sm:$0xff]  ;;  %v330_v15 = vld [vmem:[%s6005_s29 + $0x1d8] sm:$0xff]  ;;  %v293_v17 = vld [vmem:[%s6005_s29 + $0xb0] sm:$0xff] }
  0x37   :  { %244 = vmatpush.msra.mxu2 %v126_v51  ;;  %204 = vmatpush.msra.mxu0 %v125_v53  ;;  %v294_v16 = vld [vmem:[%s6005_s29 + $0xb8] sm:$0xff]  ;;  %v327_v18 = vld [vmem:[%s6005_s29 + $0x1c0] sm:$0xff]  ;;  %v328_v19 = vld [vmem:[%s6005_s29 + $0x1c8] sm:$0xff] }
  0x38   :  { %264 = vmatpush.msra.mxu3 %v158_v52  ;;  %223 = vmatpush.msra.mxu1 %v159_v54  ;;  %v292_v20 = vld [vmem:[%s6005_s29 + $0xa8] sm:$0xff]  ;;  %v291_v21 = vld [vmem:[%s6005_s29 + $0xa0] sm:$0xff]  ;;  %v325_v22 = vld [vmem:[%s6005_s29 + $0x1b0] sm:$0xff] }
  0x39   :  { %245 = vmatpush.msra.mxu2 %v124_v55  ;;  %205 = vmatpush.msra.mxu0 %v123_v57  ;;  %v326_v23 = vld [vmem:[%s6005_s29 + $0x1b8] sm:$0xff]  ;;  %v289_v25 = vld [vmem:[%s6005_s29 + $0x90] sm:$0xff]  ;;  %v323_v26 = vld [vmem:[%s6005_s29 + $0x1a0] sm:$0xff] }
  0x3a   :  { %265 = vmatpush.msra.mxu3 %v156_v56  ;;  %224 = vmatpush.msra.mxu1 %v157_v58  ;;  %v290_v24 = vld [vmem:[%s6005_s29 + $0x98] sm:$0xff]  ;;  %v324_v27 = vld [vmem:[%s6005_s29 + $0x1a8] sm:$0xff]  ;;  %v287_v29 = vld [vmem:[%s6005_s29 + $0x80] sm:$0xff] }
  0x3b   :  { %246 = vmatpush.msra.mxu2 %v122_v59  ;;  %206 = vmatpush.msra.mxu0 %v121_v63  ;;  %v288_v28 = vld [vmem:[%s6005_s29 + $0x88] sm:$0xff]  ;;  %v321_v30 = vld [vmem:[%s6005_s29 + $0x190] sm:$0xff]  ;;  %v322_v31 = vld [vmem:[%s6005_s29 + $0x198] sm:$0xff] }
  0x3c   :  { %266 = vmatpush.msra.mxu3 %v154_v60  ;;  %247 = vmatmul.f32.vlgmr.msra.gmra.mxu2 %v115_v61  ;;  %v286_v32 = vld [vmem:[%s6005_s29 + $0x78] sm:$0xff]  ;;  %v285_v33 = vld [vmem:[%s6005_s29 + $0x70] sm:$0xff]  ;;  %v319_v34 = vld [vmem:[%s6005_s29 + $0x180] sm:$0xff] }
  0x3d   :  { %267 = vmatmul.f32.vlgmr.msra.gmra.mxu3 %v116_v62  ;;  %225 = vmatpush.msra.mxu1 %v155_v0  ;;  %v320_v35 = vld [vmem:[%s6005_s29 + $0x188] sm:$0xff]  ;;  %v283_v37 = vld [vmem:[%s6005_s29 + $0x60] sm:$0xff]  ;;  %v317_v38 = vld [vmem:[%s6005_s29 + $0x170] sm:$0xff] }
  0x3e   :  { %207 = vmatmul.f32.vlgmr.msra.gmra.mxu0 %v115_v61  ;;  %381 = vmatpush.msrb.mxu2 %v302_v1  ;;  %v284_v36 = vld [vmem:[%s6005_s29 + $0x68] sm:$0xff]  ;;  %v318_v39 = vld [vmem:[%s6005_s29 + $0x178] sm:$0xff]  ;;  %v281_v41 = vld [vmem:[%s6005_s29 + $0x50] sm:$0xff] }
  0x3f   :  { %226 = vmatpush.msra.mxu1 %v153_v2  ;;  %341 = vmatpush.msrb.mxu0 %v301_v3  ;;  %v282_v40 = vld [vmem:[%s6005_s29 + $0x58] sm:$0xff]  ;;  %v315_v42 = vld [vmem:[%s6005_s29 + $0x160] sm:$0xff]  ;;  %v316_v43 = vld [vmem:[%s6005_s29 + $0x168] sm:$0xff] }
  0x40   :  { %227 = vmatmul.f32.vlgmr.msra.gmra.mxu1 %v116_v62  ;;  %382 = vmatpush.msrb.mxu2 %v300_v4  ;;  %v280_v44 = vld [vmem:[%s6005_s29 + $0x48] sm:$0xff]  ;;  %v279_v45 = vld [vmem:[%s6005_s29 + $0x40] sm:$0xff]  ;;  %v313_v46 = vld [vmem:[%s6005_s29 + $0x150] sm:$0xff] }
  0x41   :  { %342 = vmatpush.msrb.mxu0 %v299_v5  ;;  %361 = vmatpush.msrb.mxu1 %v333_v6  ;;  %v314_v47 = vld [vmem:[%s6005_s29 + $0x158] sm:$0xff]  ;;  %v277_v49 = vld [vmem:[%s6005_s29 + $0x30] sm:$0xff]  ;;  %v311_v50 = vld [vmem:[%s6005_s29 + $0x140] sm:$0xff] }
  0x42   :  { %401 = vmatpush.msrb.mxu3 %v334_v7  ;;  %383 = vmatpush.msrb.mxu2 %v298_v8  ;;  %v278_v48 = vld [vmem:[%s6005_s29 + $0x38] sm:$0xff]  ;;  %v312_v51 = vld [vmem:[%s6005_s29 + $0x148] sm:$0xff]  ;;  %v275_v52 = vld [vmem:[%s6005_s29 + $0x20] sm:$0xff] }
  0x43   :  { %343 = vmatpush.msrb.mxu0 %v297_v9  ;;  %362 = vmatpush.msrb.mxu1 %v331_v10  ;;  %v309_v53 = vld [vmem:[%s6005_s29 + $0x130] sm:$0xff]  ;;  %v276_v54 = vld [vmem:[%s6005_s29 + $0x28] sm:$0xff]  ;;  %v310_v55 = vld [vmem:[%s6005_s29 + $0x138] sm:$0xff] }
  0x44   :  { %402 = vmatpush.msrb.mxu3 %v332_v11  ;;  %384 = vmatpush.msrb.mxu2 %v296_v12  ;;  %v273_v56 = vld [vmem:[%s6005_s29 + $0x10] sm:$0xff]  ;;  %v307_v57 = vld [vmem:[%s6005_s29 + $0x120] sm:$0xff]  ;;  %v274_v58 = vld [vmem:[%s6005_s29 + $0x18] sm:$0xff] }
  0x45   :  { %344 = vmatpush.msrb.mxu0 %v295_v13  ;;  %363 = vmatpush.msrb.mxu1 %v329_v14  ;;  %v308_v59 = vld [vmem:[%s6005_s29 + $0x128] sm:$0xff]  ;;  %v271_v60 = vld [vmem:[%s6005_s29] sm:$0xff]  ;;  %v305_v61 = vld [vmem:[%s6005_s29 + $0x110] sm:$0xff] }
  0x46   :  { %403 = vmatpush.msrb.mxu3 %v330_v15  ;;  %385 = vmatpush.msrb.mxu2 %v294_v16  ;;  %v272_v62 = vld [vmem:[%s6005_s29 + $0x8] sm:$0xff]  ;;  %v306_v63 = vld [vmem:[%s6005_s29 + $0x118] sm:$0xff]  ;;  %v303_v0 = vld [vmem:[%s6005_s29 + $0x100] sm:$0xff] }
  0x47   :  { %345 = vmatpush.msrb.mxu0 %v293_v17  ;;  %364 = vmatpush.msrb.mxu1 %v327_v18  ;;  %v304_v1 = vld [vmem:[%s6005_s29 + $0x108] sm:$0xff]  ;;  %v185_v2 = vld [vmem:[%s6006_s26] sm:$0x3]  ;;  %s6022_s29 = sld [smem:[#allocation19_spill]] }
  0x48   :  { %404 = vmatpush.msrb.mxu3 %v328_v19  ;;  %386 = vmatpush.msrb.mxu2 %v292_v20  ;;  %v187_v3 = vperm.slane %v185_v2, 0  ;;  %v188_v6 = vperm.slane %v185_v2, 1  ;;  %v335_v13 = vld [vmem:[%s6007_s6] sm:$0x3]  ;;  %v3369_v2 = vld [vmem:[%s5970_s10 + $0x1a8] sm:$0xff]  ;;  %s2683_s6 = smov 1  }
  0x49   :  { %346 = vmatpush.msrb.mxu0 %v291_v21  ;;  %365 = vmatpush.msrb.mxu1 %v325_v22  ;;  %v337_v14 = vperm.slane %v335_v13, 0  ;;  %v338_v16 = vperm.slane %v335_v13, 1  ;;  %v3434_v13 = vld [vmem:[%s5970_s10 + $0x78] sm:$0xff] }
  0x4a   :  { %405 = vmatpush.msrb.mxu3 %v326_v23  ;;  %387 = vmatpush.msrb.mxu2 %v290_v24  ;;  %v117_v23 = vld [vmem:[%s6008_s28] sm:$0xff]  ;;  %v118_v24 = vld [vmem:[%s6008_s28 + $0x8] sm:$0xff] }
  0x4b   :  { %347 = vmatpush.msrb.mxu0 %v289_v25  ;;  %366 = vmatpush.msrb.mxu1 %v323_v26 }
  0x4c   :  { %406 = vmatpush.msrb.mxu3 %v324_v27  ;;  %388 = vmatpush.msrb.mxu2 %v288_v28 }
  0x4d   :  { %348 = vmatpush.msrb.mxu0 %v287_v29  ;;  %367 = vmatpush.msrb.mxu1 %v321_v30  ;;  %v2682_v29 = vmov 256.0   ;;  %v3221_v30 = vld [vmem:[%s5970_s10 + $0xf0] sm:$0xff] }
  0x4e   :  { %407 = vmatpush.msrb.mxu3 %v322_v31  ;;  %389 = vmatpush.msrb.mxu2 %v286_v32  ;;  %2549 = vrcp.f32 %v2682_v29  ;;  %v3226_v31 = vld [vmem:[%s5970_s10 + $0x1f0] sm:$0xff]  ;;  %v3231_v32 = vld [vmem:[%s5970_s10 + $0xf8] sm:$0xff] }
  0x4f   :  { %349 = vmatpush.msrb.mxu0 %v285_v33  ;;  %368 = vmatpush.msrb.mxu1 %v319_v34  ;;  %v3238_v33 = vld [vmem:[%s5970_s10 + $0x1f8] sm:$0xff]  ;;  %v3243_v34 = vld [vmem:[%s5970_s10 + $0xe0] sm:$0xff] }
  0x50   :  { %408 = vmatpush.msrb.mxu3 %v320_v35  ;;  %390 = vmatpush.msrb.mxu2 %v284_v36  ;;  %v3248_v35 = vld [vmem:[%s5970_s10 + $0x1e0] sm:$0xff]  ;;  %v3530_v29 = vld [vmem:[%s5970_s10 + $0x38] sm:$0xff] }
  0x51   :  { %350 = vmatpush.msrb.mxu0 %v283_v37  ;;  %369 = vmatpush.msrb.mxu1 %v317_v38  ;;  %v3255_v37 = vld [vmem:[%s5970_s10 + $0xe8] sm:$0xff] }
  0x52   :  { %409 = vmatpush.msrb.mxu3 %v318_v39  ;;  %391 = vmatpush.msrb.mxu2 %v282_v40  ;;  %v3260_v38 = vld [vmem:[%s5970_s10 + $0x1e8] sm:$0xff] }
  0x53   :  { %351 = vmatpush.msrb.mxu0 %v281_v41  ;;  %370 = vmatpush.msrb.mxu1 %v315_v42 }
  0x54   :  { %410 = vmatpush.msrb.mxu3 %v316_v43  ;;  %392 = vmatpush.msrb.mxu2 %v280_v44  ;;  %v2550_v36 = vpop.eup %2549 }
  0x55   :  { %352 = vmatpush.msrb.mxu0 %v279_v45  ;;  %371 = vmatpush.msrb.mxu1 %v313_v46  ;;  %v429_v39 = vmul.f32 256.0, %v2550_v36  ;;  %vm433_vm0 = vweird.f32 %v2550_v36 }
  0x56   :  { %411 = vmatpush.msrb.mxu3 %v314_v47  ;;  %393 = vmatpush.msrb.mxu2 %v278_v48 }
  0x57   :  { %353 = vmatpush.msrb.mxu0 %v277_v49  ;;  %372 = vmatpush.msrb.mxu1 %v311_v50  ;;  %v430_v40 = vsub.f32 1.0, %v429_v39  ;;  %v3544_v39 = vld [vmem:[%s5970_s10 + $0x20] sm:$0xff] }
  0x58   :  { %412 = vmatpush.msrb.mxu3 %v312_v51  ;;  %394 = vmatpush.msrb.mxu2 %v276_v54  ;;  %v3280_v51 = vld [vmem:[%s5970_s10 + $0xd0] sm:$0xff]  ;;  %v3297_v54 = vld [vmem:[%s5970_s10 + $0x1d8] sm:$0xff]  ;;  %6009 = vst [vmem:[#allocation12_spill] sm:$0xff] %v3544_v39 }
  0x59   :  { %354 = vmatpush.msrb.mxu0 %v275_v52  ;;  %373 = vmatpush.msrb.mxu1 %v309_v53  ;;  %v431_v41 = vmul.f32 %v2550_v36, %v430_v40  ;;  %v3285_v52 = vld [vmem:[%s5970_s10 + $0x1d0] sm:$0xff]  ;;  %v3290_v53 = vld [vmem:[%s5970_s10 + $0xd8] sm:$0xff]  ;;  %v3549_v40 = vld [vmem:[%s5970_s10 + $0x120] sm:$0xff] }
  0x5a   :  { %413 = vmatpush.msrb.mxu3 %v310_v55  ;;  %395 = vmatpush.msrb.mxu2 %v274_v58  ;;  %v3304_v55 = vld [vmem:[%s5970_s10 + $0xc0] sm:$0xff]  ;;  %v3321_v58 = vld [vmem:[%s5970_s10 + $0x1c8] sm:$0xff]  ;;  %6010 = vst [vmem:[#allocation13_spill] sm:$0xff] %v3549_v40 }
  0x5b   :  { %355 = vmatpush.msrb.mxu0 %v273_v56  ;;  %374 = vmatpush.msrb.mxu1 %v307_v57  ;;  %v432_v42 = vadd.f32 %v2550_v36, %v431_v41  ;;  %v3309_v56 = vld [vmem:[%s5970_s10 + $0x1c0] sm:$0xff]  ;;  %v3314_v57 = vld [vmem:[%s5970_s10 + $0xc8] sm:$0xff] }
  0x5c   :  { %414 = vmatpush.msrb.mxu3 %v308_v59  ;;  %396 = vmatpush.msrb.mxu2 %v272_v62  ;;  %v3328_v59 = vld [vmem:[%s5970_s10 + $0xb0] sm:$0xff]  ;;  %v3345_v62 = vld [vmem:[%s5970_s10 + $0x1b8] sm:$0xff]  ;;  %v3554_v41 = vld [vmem:[%s5970_s10 + $0x28] sm:$0xff] }
  0x5d   :  { %356 = vmatpush.msrb.mxu0 %v271_v60  ;;  %375 = vmatpush.msrb.mxu1 %v305_v61  ;;  %v3266_v43 = vsel %vm433_vm0, %v2550_v36, %v432_v42  ;;  %v3333_v60 = vld [vmem:[%s5970_s10 + $0x1b0] sm:$0xff]  ;;  %v3338_v61 = vld [vmem:[%s5970_s10 + $0xb8] sm:$0xff]  ;;  %v3561_v42 = vld [vmem:[%s5970_s10 + $0x128] sm:$0xff] }
  0x5e   :  { %415 = vmatpush.msrb.mxu3 %v306_v63  ;;  %581 = vmatpush.msra.mxu2 %v3231_v32  ;;  %v3352_v63 = vld [vmem:[%s5970_s10 + $0xa0] sm:$0xff]  ;;  %v3537_v36 = vld [vmem:[%s5970_s10 + $0x138] sm:$0xff]  ;;  %6011 = vst [vmem:[#allocation14_spill] sm:$0xff] %v3561_v42 }
  0x5f   :  { %376 = vmatpush.msrb.mxu1 %v303_v0  ;;  %541 = vmatpush.msra.mxu0 %v3221_v30  ;;  %v3357_v0 = vld [vmem:[%s5970_s10 + $0x1a0] sm:$0xff] }
  0x60   :  { %416 = vmatpush.msrb.mxu3 %v304_v1  ;;  %582 = vmatpush.msra.mxu2 %v3255_v37  ;;  %v3362_v1 = vld [vmem:[%s5970_s10 + $0xa8] sm:$0xff] }
  0x61   :  { %561 = vmatpush.msra.mxu1 %v3226_v31  ;;  %542 = vmatpush.msra.mxu0 %v3243_v34 }
  0x62   :  { %601 = vmatpush.msra.mxu3 %v3238_v33  ;;  %583 = vmatpush.msra.mxu2 %v3290_v53 }
  0x63   :  { %562 = vmatpush.msra.mxu1 %v3248_v35  ;;  %543 = vmatpush.msra.mxu0 %v3280_v51 }
  0x64   :  { %602 = vmatpush.msra.mxu3 %v3260_v38  ;;  %584 = vmatpush.msra.mxu2 %v3314_v57 }
  0x65   :  { %563 = vmatpush.msra.mxu1 %v3285_v52  ;;  %544 = vmatpush.msra.mxu0 %v3304_v55 }
  0x66   :  { %603 = vmatpush.msra.mxu3 %v3297_v54  ;;  %585 = vmatpush.msra.mxu2 %v3338_v61 }
  0x67   :  { %564 = vmatpush.msra.mxu1 %v3309_v56  ;;  %545 = vmatpush.msra.mxu0 %v3328_v59 }
  0x68   :  { %604 = vmatpush.msra.mxu3 %v3321_v58  ;;  %586 = vmatpush.msra.mxu2 %v3362_v1 }
  0x69   :  { %565 = vmatpush.msra.mxu1 %v3333_v60  ;;  %546 = vmatpush.msra.mxu0 %v3352_v63 }
  0x6a   :  { %605 = vmatpush.msra.mxu3 %v3345_v62 }
  0x6b   :  { %566 = vmatpush.msra.mxu1 %v3357_v0 }
  0x6c   :  { %606 = vmatpush.msra.mxu3 %v3369_v2 }
  0xbb   :  { %v208_v4 = vpop.f32.mrf.mxu0 }
  0xbc   :  { %v209_v5 = vadd.f32 %v208_v4, %v187_v3  ;;  %v3376_v3 = vld [vmem:[%s5970_s10 + $0x90] sm:$0xff] }
  0xbd   :  { %v228_v7 = vpop.f32.mrf.mxu1  ;;  %v3381_v4 = vld [vmem:[%s5970_s10 + $0x190] sm:$0xff]  ;;  %547 = vmatpush.msra.mxu0 %v3376_v3 }
  0xbe   :  { %v229_v8 = vadd.f32 %v228_v7, %v209_v5  ;;  %v3386_v5 = vld [vmem:[%s5970_s10 + $0x98] sm:$0xff]  ;;  %567 = vmatpush.msra.mxu1 %v3381_v4  ;;  %v3400_v7 = vld [vmem:[%s5970_s10 + $0x80] sm:$0xff] }
  0xbf   :  { %v248_v9 = vpop.f32.mrf.mxu2  ;;  %587 = vmatpush.msra.mxu2 %v3386_v5  ;;  %548 = vmatpush.msra.mxu0 %v3400_v7 }
  0xc0   :  { %v268_v10 = vpop.f32.mrf.mxu3  ;;  %v249_v11 = vadd.f32 %v248_v9, %v188_v6  ;;  %357 = vmatmul.f32.vlgmr.msrb.gmra.mxu0 %v229_v8  ;;  %397 = vmatmul.f32.vlgmr.msrb.gmra.mxu2 %v229_v8  ;;  %v3393_v6 = vld [vmem:[%s5970_s10 + $0x198] sm:$0xff]  ;;  %v3405_v8 = vld [vmem:[%s5970_s10 + $0x180] sm:$0xff]  ;;  %v3410_v9 = vld [vmem:[%s5970_s10 + $0x88] sm:$0xff] }
  0xc1   :  { %607 = vmatpush.msra.mxu3 %v3393_v6  ;;  %568 = vmatpush.msra.mxu1 %v3405_v8 }
  0xc2   :  { %v269_v12 = vadd.f32 %v268_v10, %v249_v11  ;;  %v3417_v10 = vld [vmem:[%s5970_s10 + $0x188] sm:$0xff]  ;;  %588 = vmatpush.msra.mxu2 %v3410_v9  ;;  %v3424_v11 = vld [vmem:[%s5970_s10 + $0x70] sm:$0xff] }
  0xc3   :  { %608 = vmatpush.msra.mxu3 %v3417_v10  ;;  %549 = vmatpush.msra.mxu0 %v3424_v11 }
  0xc4   :  { %377 = vmatmul.f32.vlgmr.msrb.gmra.mxu1 %v269_v12  ;;  %417 = vmatmul.f32.vlgmr.msrb.gmra.mxu3 %v269_v12  ;;  %v3429_v12 = vld [vmem:[%s5970_s10 + $0x170] sm:$0xff] }
  0xc5   :  { %569 = vmatpush.msra.mxu1 %v3429_v12  ;;  %589 = vmatpush.msra.mxu2 %v3434_v13 }
 0x13d   :  { %v358_v15 = vpop.f32.mrf.mxu0 }
 0x13e   :  { %v359_v17 = vadd.f32 %v358_v15, %v337_v14  ;;  %v3441_v14 = vld [vmem:[%s5970_s10 + $0x178] sm:$0xff]  ;;  %v3448_v15 = vld [vmem:[%s5970_s10 + $0x60] sm:$0xff] }
 0x13f   :  { %609 = vmatpush.msra.mxu3 %v3441_v14  ;;  %550 = vmatpush.msra.mxu0 %v3448_v15 }
 0x141   :  { %v378_v18 = vpop.f32.mrf.mxu1 }
 0x142   :  { %v379_v21 = vadd.f32 %v378_v18, %v359_v17  ;;  %v3458_v17 = vld [vmem:[%s5970_s10 + $0x68] sm:$0xff] }
 0x143   :  { %v398_v19 = vpop.f32.mrf.mxu2  ;;  %v3465_v18 = vld [vmem:[%s5970_s10 + $0x168] sm:$0xff]  ;;  %590 = vmatpush.msra.mxu2 %v3458_v17 }
 0x144   :  { %v399_v20 = vadd.f32 %v398_v19, %v338_v16  ;;  %v421_v26 = vadd.f32 %v379_v21, %v117_v23  ;;  %v3453_v16 = vld [vmem:[%s5970_s10 + $0x160] sm:$0xff]  ;;  %610 = vmatpush.msra.mxu3 %v3465_v18  ;;  %v3472_v19 = vld [vmem:[%s5970_s10 + $0x50] sm:$0xff]  ;;  %v3482_v21 = vld [vmem:[%s5970_s10 + $0x58] sm:$0xff] }
 0x145   :  { %570 = vmatpush.msra.mxu1 %v3453_v16  ;;  %551 = vmatpush.msra.mxu0 %v3472_v19  ;;  %v3496_v23 = vld [vmem:[%s5970_s10 + $0x40] sm:$0xff] }
 0x146   :  { %591 = vmatpush.msra.mxu2 %v3482_v21 }
 0x147   :  { %v418_v22 = vpop.f32.mrf.mxu3  ;;  %552 = vmatpush.msra.mxu0 %v3496_v23 }
 0x148   :  { %v419_v25 = vadd.f32 %v418_v22, %v399_v20  ;;  %v3477_v20 = vld [vmem:[%s5970_s10 + $0x150] sm:$0xff]  ;;  %v3489_v22 = vld [vmem:[%s5970_s10 + $0x158] sm:$0xff] }
 0x149   :  { %571 = vmatpush.msra.mxu1 %v3477_v20  ;;  %611 = vmatpush.msra.mxu3 %v3489_v22 }
 0x14a   :  { %v422_v27 = vadd.f32 %v419_v25, %v118_v24  ;;  %v3501_v24 = vld [vmem:[%s5970_s10 + $0x140] sm:$0xff]  ;;  %v3506_v25 = vld [vmem:[%s5970_s10 + $0x48] sm:$0xff] }
 0x14b   :  { %572 = vmatpush.msra.mxu1 %v3501_v24  ;;  %592 = vmatpush.msra.mxu2 %v3506_v25 }
 0x14c   :  { %v425_v28 = vadd.f32 %v422_v27, %v421_v26 }
 0x14d   :  { %593 = vmatpush.msra.mxu2 %v3530_v29 }
 0x14e   :  { %426 = vadd.xlane.f32.xlu0 %v425_v28  ;;  %v3525_v28 = vld [vmem:[%s5970_s10 + $0x130] sm:$0xff] }
 0x14f   :  { %573 = vmatpush.msra.mxu1 %v3525_v28  ;;  %594 = vmatpush.msra.mxu2 %v3554_v41 }
 0x151   :  { %574 = vmatpush.msra.mxu1 %v3549_v40  ;;  %v3595_v40 = vld [vmem:[%s5970_s10 + $0x100] sm:$0xff] }
 0x1c1   :  { %v427_v44 = vpop.xlane.xlu0 %426 }
 0x1c2   :  { %v435_v45 = vmul.f32 %v3266_v43, %v427_v44  ;;  %v3566_v44 = vld [vmem:[%s5970_s10 + $0x10] sm:$0xff] }
 0x1c4   :  { %v3269_v46 = vsub.f32 %v421_v26, %v435_v45  ;;  %v3271_v47 = vsub.f32 %v422_v27, %v435_v45  ;;  %v3513_v26 = vld [vmem:[%s5970_s10 + $0x148] sm:$0xff]  ;;  %v3520_v27 = vld [vmem:[%s5970_s10 + $0x30] sm:$0xff] }
 0x1c5   :  { %612 = vmatpush.msra.mxu3 %v3513_v26  ;;  %553 = vmatpush.msra.mxu0 %v3520_v27  ;;  %v3571_v45 = vld [vmem:[%s5970_s10 + $0x110] sm:$0xff] }
 0x1c6   :  { %v438_v48 = vmul.f32 %v3269_v46, %v3269_v46  ;;  %v439_v49 = vmul.f32 %v3271_v47, %v3271_v47  ;;  %6012 = vst [vmem:[#allocation15_spill] sm:$0xff] %v3571_v45  ;;  %575 = vmatpush.msra.mxu1 %v3571_v45 }
 0x1c7   :  { %613 = vmatpush.msra.mxu3 %v3537_v36  ;;  %554 = vmatpush.msra.mxu0 %v3544_v39  ;;  %v3605_v39 = vld [vmem:[%s5970_s10 + $0x108] sm:$0xff] }
 0x1c8   :  { %v440_v50 = vadd.f32 %v439_v49, %v438_v48  ;;  %v3578_v48 = vld [vmem:[%s5970_s10 + $0x18] sm:$0xff]  ;;  %576 = vmatpush.msra.mxu1 %v3595_v40 }
 0x1c9   :  { %614 = vmatpush.msra.mxu3 %v3561_v42  ;;  %v3583_v49 = vld [vmem:[%s5970_s10 + $0x118] sm:$0xff]  ;;  %555 = vmatpush.msra.mxu0 %v3566_v44  ;;  %v3600_v42 = vld [vmem:[%s5970_s10 + $0x8] sm:$0xff] }
 0x1ca   :  { %441 = vadd.xlane.f32.xlu0 %v440_v50  ;;  %v3588_v50 = vld [vmem:[%s5970_s10] sm:$0xff]  ;;  %595 = vmatpush.msra.mxu2 %v3578_v48 }
 0x1cb   :  { %6013 = vst [vmem:[#allocation16_spill] sm:$0xff] %v3588_v50  ;;  %615 = vmatpush.msra.mxu3 %v3583_v49  ;;  %556 = vmatpush.msra.mxu0 %v3588_v50 }
 0x1cc   :  { %596 = vmatpush.msra.mxu2 %v3600_v42  ;;  %643 = vmatpush.msrb.mxu1 %v3226_v31 }
 0x1cd   :  { %616 = vmatpush.msra.mxu3 %v3605_v39  ;;  %623 = vmatpush.msrb.mxu0 %v3221_v30 }
 0x1ce   :  { %663 = vmatpush.msrb.mxu2 %v3231_v32  ;;  %644 = vmatpush.msrb.mxu1 %v3248_v35 }
 0x1cf   :  { %683 = vmatpush.msrb.mxu3 %v3238_v33  ;;  %624 = vmatpush.msrb.mxu0 %v3243_v34 }
 0x1d0   :  { %664 = vmatpush.msrb.mxu2 %v3255_v37  ;;  %645 = vmatpush.msrb.mxu1 %v3285_v52  ;;  %v423_v37 = vld [vmem:[%s5968_s8] sm:$0x3] }
 0x1d1   :  { %684 = vmatpush.msrb.mxu3 %v3260_v38  ;;  %625 = vmatpush.msrb.mxu0 %v3280_v51  ;;  %v424_v51 = vld [vmem:[%s5969_s9] sm:$0x3]  ;;  %v458_v52 = vperm.slane %v423_v37, 0  ;;  %s2524_s9 = sshll.u32 %s5983_s23, 4  ;;  %s2525_s9 = int_to_ptr.hbm [resolvable:$true] %s2524_s9 }
 0x1d2   :  { %665 = vmatpush.msrb.mxu2 %v3290_v53  ;;  %646 = vmatpush.msrb.mxu1 %v3309_v56  ;;  %v459_v53 = vperm.slane %v423_v37, 1  ;;  %v806_v37 = vld [vmem:[%s5974_s14 + $0x80] sm:$0xff] }
 0x1d3   :  { %685 = vmatpush.msrb.mxu3 %v3297_v54  ;;  %626 = vmatpush.msrb.mxu0 %v3304_v55 }
 0x1d4   :  { %666 = vmatpush.msrb.mxu2 %v3314_v57  ;;  %647 = vmatpush.msrb.mxu1 %v3333_v60  ;;  %v465_v57 = vperm.slane %v424_v51, 0 }
 0x1d5   :  { %686 = vmatpush.msrb.mxu3 %v3321_v58  ;;  %627 = vmatpush.msrb.mxu0 %v3328_v59  ;;  %v466_v58 = vperm.slane %v424_v51, 1  ;;  %v6014_v59 = vld [vmem:[#allocation12_spill] sm:$0xff] }
 0x1d6   :  { %667 = vmatpush.msrb.mxu2 %v3338_v61  ;;  %648 = vmatpush.msrb.mxu1 %v3357_v0  ;;  %v6017_v0 = vld [vmem:[#allocation15_spill] sm:$0xff]  ;;  %v930_v51 = vld [vmem:[%s5974_s14 + $0x460] sm:$0xff] }
 0x1d7   :  { %687 = vmatpush.msrb.mxu3 %v3345_v62  ;;  %628 = vmatpush.msrb.mxu0 %v3352_v63  ;;  %v6015_v62 = vld [vmem:[#allocation14_spill] sm:$0xff]  ;;  %v6016_v63 = vld [vmem:[#allocation13_spill] sm:$0xff] }
 0x1d8   :  { %668 = vmatpush.msrb.mxu2 %v3362_v1  ;;  %649 = vmatpush.msrb.mxu1 %v3381_v4  ;;  %v978_v1 = vld [vmem:[%s5974_s14 + $0x5e0] sm:$0xff] }
 0x1d9   :  { %688 = vmatpush.msrb.mxu3 %v3369_v2  ;;  %629 = vmatpush.msrb.mxu0 %v3376_v3  ;;  %v6018_v2 = vld [vmem:[#allocation16_spill] sm:$0xff] }
 0x1da   :  { %669 = vmatpush.msrb.mxu2 %v3386_v5  ;;  %650 = vmatpush.msrb.mxu1 %v3405_v8  ;;  %v850_v3 = vld [vmem:[%s5974_s14 + $0x1e0] sm:$0xff] }
 0x1db   :  { %689 = vmatpush.msrb.mxu3 %v3393_v6  ;;  %630 = vmatpush.msrb.mxu0 %v3400_v7  ;;  %v1042_v4 = vld [vmem:[%s5974_s14 + $0x7e0] sm:$0xff] }
 0x1dc   :  { %670 = vmatpush.msrb.mxu2 %v3410_v9  ;;  %651 = vmatpush.msrb.mxu1 %v3429_v12  ;;  %v974_v5 = vld [vmem:[%s5974_s14 + $0x5c0] sm:$0xff] }
 0x1dd   :  { %690 = vmatpush.msrb.mxu3 %v3417_v10  ;;  %631 = vmatpush.msrb.mxu0 %v3424_v11  ;;  %v846_v6 = vld [vmem:[%s5974_s14 + $0x1c0] sm:$0xff] }
 0x1de   :  { %671 = vmatpush.msrb.mxu2 %v3434_v13  ;;  %652 = vmatpush.msrb.mxu1 %v3453_v16  ;;  %v914_v7 = vld [vmem:[%s5974_s14 + $0x3e0] sm:$0xff] }
 0x1df   :  { %691 = vmatpush.msrb.mxu3 %v3441_v14  ;;  %632 = vmatpush.msrb.mxu0 %v3448_v15  ;;  %v970_v8 = vld [vmem:[%s5974_s14 + $0x5a0] sm:$0xff] }
 0x1e0   :  { %672 = vmatpush.msrb.mxu2 %v3458_v17  ;;  %653 = vmatpush.msrb.mxu1 %v3477_v20  ;;  %v1038_v9 = vld [vmem:[%s5974_s14 + $0x7c0] sm:$0xff] }
 0x1e1   :  { %692 = vmatpush.msrb.mxu3 %v3465_v18  ;;  %633 = vmatpush.msrb.mxu0 %v3472_v19  ;;  %v842_v10 = vld [vmem:[%s5974_s14 + $0x1a0] sm:$0xff] }
 0x1e2   :  { %673 = vmatpush.msrb.mxu2 %v3482_v21  ;;  %654 = vmatpush.msrb.mxu1 %v3501_v24  ;;  %v910_v11 = vld [vmem:[%s5974_s14 + $0x3c0] sm:$0xff] }
 0x1e3   :  { %693 = vmatpush.msrb.mxu3 %v3489_v22  ;;  %634 = vmatpush.msrb.mxu0 %v3496_v23  ;;  %v966_v12 = vld [vmem:[%s5974_s14 + $0x580] sm:$0xff] }
 0x1e4   :  { %674 = vmatpush.msrb.mxu2 %v3506_v25  ;;  %655 = vmatpush.msrb.mxu1 %v3525_v28  ;;  %v1034_v13 = vld [vmem:[%s5974_s14 + $0x7a0] sm:$0xff] }
 0x1e5   :  { %694 = vmatpush.msrb.mxu3 %v3513_v26  ;;  %635 = vmatpush.msrb.mxu0 %v3520_v27  ;;  %v838_v14 = vld [vmem:[%s5974_s14 + $0x180] sm:$0xff] }
 0x1e6   :  { %675 = vmatpush.msrb.mxu2 %v3530_v29  ;;  %656 = vmatpush.msrb.mxu1 %v6016_v63  ;;  %v906_v15 = vld [vmem:[%s5974_s14 + $0x3a0] sm:$0xff] }
 0x1e7   :  { %695 = vmatpush.msrb.mxu3 %v3537_v36  ;;  %636 = vmatpush.msrb.mxu0 %v6014_v59  ;;  %v962_v16 = vld [vmem:[%s5974_s14 + $0x560] sm:$0xff] }
 0x1e8   :  { %676 = vmatpush.msrb.mxu2 %v3554_v41  ;;  %657 = vmatpush.msrb.mxu1 %v6017_v0  ;;  %v1030_v17 = vld [vmem:[%s5974_s14 + $0x780] sm:$0xff] }
 0x1e9   :  { %696 = vmatpush.msrb.mxu3 %v6015_v62  ;;  %637 = vmatpush.msrb.mxu0 %v3566_v44  ;;  %v834_v18 = vld [vmem:[%s5974_s14 + $0x160] sm:$0xff] }
 0x1ea   :  { %677 = vmatpush.msrb.mxu2 %v3578_v48  ;;  %658 = vmatpush.msrb.mxu1 %v3595_v40  ;;  %v902_v19 = vld [vmem:[%s5974_s14 + $0x380] sm:$0xff] }
 0x1eb   :  { %697 = vmatpush.msrb.mxu3 %v3583_v49  ;;  %638 = vmatpush.msrb.mxu0 %v6018_v2  ;;  %v958_v20 = vld [vmem:[%s5974_s14 + $0x540] sm:$0xff] }
 0x1ec   :  { %678 = vmatpush.msrb.mxu2 %v3600_v42  ;;  %v1026_v21 = vld [vmem:[%s5974_s14 + $0x760] sm:$0xff] }
 0x1ed   :  { %698 = vmatpush.msrb.mxu3 %v3605_v39  ;;  %v830_v22 = vld [vmem:[%s5974_s14 + $0x140] sm:$0xff] }
 0x1ee   :  { %v898_v23 = vld [vmem:[%s5974_s14 + $0x360] sm:$0xff] }
 0x1ef   :  { %v954_v24 = vld [vmem:[%s5974_s14 + $0x520] sm:$0xff] }
 0x1f0   :  { %v1022_v25 = vld [vmem:[%s5974_s14 + $0x740] sm:$0xff] }
 0x1f1   :  { %v826_v26 = vld [vmem:[%s5974_s14 + $0x120] sm:$0xff] }
 0x1f2   :  { %v894_v27 = vld [vmem:[%s5974_s14 + $0x340] sm:$0xff] }
 0x1f3   :  { %v950_v28 = vld [vmem:[%s5974_s14 + $0x500] sm:$0xff] }
 0x1f4   :  { %v1018_v29 = vld [vmem:[%s5974_s14 + $0x720] sm:$0xff] }
 0x1f5   :  { %v822_v36 = vld [vmem:[%s5974_s14 + $0x100] sm:$0xff] }
 0x1f6   :  { %v890_v39 = vld [vmem:[%s5974_s14 + $0x320] sm:$0xff] }
 0x1f7   :  { %v946_v40 = vld [vmem:[%s5974_s14 + $0x4e0] sm:$0xff] }
 0x1f8   :  { %v1014_v41 = vld [vmem:[%s5974_s14 + $0x700] sm:$0xff] }
 0x1f9   :  { %v818_v42 = vld [vmem:[%s5974_s14 + $0xe0] sm:$0xff] }
 0x1fa   :  { %v886_v44 = vld [vmem:[%s5974_s14 + $0x300] sm:$0xff] }
 0x1fb   :  { %v1010_v48 = vld [vmem:[%s5974_s14 + $0x6e0] sm:$0xff] }
 0x1fc   :  { %v814_v49 = vld [vmem:[%s5974_s14 + $0xc0] sm:$0xff] }
 0x1fd   :  { %v798_v59 = vld [vmem:[%s5974_s14 + $0x40] sm:$0xff] }
 0x1fe   :  { %v990_v62 = vld [vmem:[%s5974_s14 + $0x640] sm:$0xff] }
 0x1ff   :  { %v794_v63 = vld [vmem:[%s5974_s14 + $0x20] sm:$0xff] }
 0x200   :  { %v862_v0 = vld [vmem:[%s5974_s14 + $0x240] sm:$0xff] }
 0x201   :  { %v986_v2 = vld [vmem:[%s5974_s14 + $0x620] sm:$0xff] }
 0x23d   :  { %v442_v45 = vpop.xlane.xlu0 %441 }
 0x23e   :  { %v443_v50 = vmul.f32 %v442_v45, %v3266_v43  ;;  %v942_v45 = vld [vmem:[%s5974_s14 + $0x4c0] sm:$0xff] }
 0x240   :  { %v444_v30 = vadd.f32 1e-05, %v443_v50  ;;  %v882_v50 = vld [vmem:[%s5974_s14 + $0x2e0] sm:$0xff] }
 0x242   :  { %2551 = vrsqrt.f32 %v444_v30  ;;  %vm451_vm2 = vweird.f32 %v444_v30 }
 0x248   :  { %v2552_v31 = vpop.eup %2551 }
 0x249   :  { %v446_v32 = vmul.f32 %v2552_v31, %v444_v30  ;;  %vm452_vm1 = vweird.f32 %v2552_v31  ;;  %v938_v30 = vld [vmem:[%s5974_s14 + $0x4a0] sm:$0xff] }
 0x24a   :  { %vm453_vm3 = vmor %vm451_vm2, %vm452_vm1  ;;  %vm1976_vm1 = vcmask 1043456  }
 0x24b   :  { %v447_v33 = vmul.f32 %v2552_v31, %v446_v32  ;;  %v810_v32 = vld [vmem:[%s5974_s14 + $0xa0] sm:$0xff] }
 0x24d   :  { %v448_v34 = vmul.f32 0.5, %v447_v33  ;;  %v878_v33 = vld [vmem:[%s5974_s14 + $0x2c0] sm:$0xff] }
 0x24f   :  { %v449_v35 = vsub.f32 1.5, %v448_v34  ;;  %v934_v34 = vld [vmem:[%s5974_s14 + $0x480] sm:$0xff] }
 0x251   :  { %v450_v38 = vmul.f32 %v2552_v31, %v449_v35  ;;  %v1002_v35 = vld [vmem:[%s5974_s14 + $0x6a0] sm:$0xff] }
 0x253   :  { %v454_v54 = vsel %vm453_vm3, %v2552_v31, %v450_v38  ;;  %v1006_v31 = vld [vmem:[%s5974_s14 + $0x6c0] sm:$0xff] }
 0x254   :  { %v455_v55 = vmul.f32 %v454_v54, %v3269_v46  ;;  %v456_v56 = vmul.f32 %v454_v54, %v3271_v47  ;;  %v874_v38 = vld [vmem:[%s5974_s14 + $0x2a0] sm:$0xff] }
 0x255   :  { %v802_v54 = vld [vmem:[%s5974_s14 + $0x60] sm:$0xff] }
 0x256   :  { %v462_v60 = vmul.f32 %v458_v52, %v455_v55  ;;  %v463_v61 = vmul.f32 %v459_v53, %v456_v56  ;;  %v998_v52 = vld [vmem:[%s5974_s14 + $0x680] sm:$0xff] }
 0x257   :  { %v748_v53 = vld [vmem:[%s6019_s3] sm:$0xff] }
 0x258   :  { %v3680_v46 = vadd.f32 %v465_v57, %v462_v60  ;;  %v3682_v47 = vadd.f32 %v466_v58, %v463_v61  ;;  %v870_v55 = vld [vmem:[%s5974_s14 + $0x280] sm:$0xff]  ;;  %v2537_v57 = vmul.f32 -1.442695, %v748_v53 }
 0x259   :  { %v926_v56 = vld [vmem:[%s5974_s14 + $0x440] sm:$0xff] }
 0x25a   :  { %557 = vmatmul.f32.vlgmr.msra.gmra.mxu0 %v3680_v46  ;;  %577 = vmatmul.f32.vlgmr.msra.gmra.mxu1 %v3682_v47  ;;  %v994_v58 = vld [vmem:[%s5974_s14 + $0x660] sm:$0xff]  ;;  %2553 = vpow2.f32 %v2537_v57 }
 0x25b   :  { %597 = vmatmul.f32.vlgmr.msra.gmra.mxu2 %v3680_v46  ;;  %617 = vmatmul.f32.vlgmr.msra.gmra.mxu3 %v3682_v47  ;;  %v866_v60 = vld [vmem:[%s5974_s14 + $0x260] sm:$0xff] }
 0x25c   :  { %1373 = vmatpush.msra.mxu2 %v978_v1  ;;  %1333 = vmatpush.msra.mxu0 %v850_v3  ;;  %v922_v61 = vld [vmem:[%s5974_s14 + $0x420] sm:$0xff] }
 0x25d   :  { %1393 = vmatpush.msra.mxu3 %v1042_v4  ;;  %1353 = vmatpush.msra.mxu1 %v914_v7  ;;  %v918_v1 = vld [vmem:[%s5974_s14 + $0x400] sm:$0xff] }
 0x25e   :  { %1374 = vmatpush.msra.mxu2 %v974_v5  ;;  %1334 = vmatpush.msra.mxu0 %v846_v6  ;;  %v790_v3 = vld [vmem:[%s5974_s14] sm:$0xff] }
 0x25f   :  { %1394 = vmatpush.msra.mxu3 %v1038_v9  ;;  %1354 = vmatpush.msra.mxu1 %v910_v11  ;;  %v858_v4 = vld [vmem:[%s5974_s14 + $0x220] sm:$0xff] }
 0x260   :  { %1375 = vmatpush.msra.mxu2 %v970_v8  ;;  %1335 = vmatpush.msra.mxu0 %v842_v10  ;;  %v982_v5 = vld [vmem:[%s5974_s14 + $0x600] sm:$0xff]  ;;  %v2554_v6 = vpop.eup %2553 }
 0x261   :  { %1395 = vmatpush.msra.mxu3 %v1034_v13  ;;  %1355 = vmatpush.msra.mxu1 %v906_v15  ;;  %v854_v7 = vld [vmem:[%s5974_s14 + $0x200] sm:$0xff]  ;;  %v756_v8 = vadd.f32 1.0, %v2554_v6 }
 0x262   :  { %1376 = vmatpush.msra.mxu2 %v966_v12  ;;  %1336 = vmatpush.msra.mxu0 %v838_v14  ;;  %v3892_v11 = vld [vmem:[%s5971_s11] sm:$0x3] }
 0x263   :  { %1396 = vmatpush.msra.mxu3 %v1030_v17  ;;  %1356 = vmatpush.msra.mxu1 %v902_v19  ;;  %2555 = vrcp.f32 %v756_v8  ;;  %v537_v14 = vperm.slane %v3892_v11, 0  ;;  %v769_v15 = vand.u32 2147483648, %v756_v8  ;;  %vm763_vm4 = vweird.f32 %v756_v8  ;;  %v1086_v57 = vld [vmem:[%s5974_s14 + $0x940] sm:$0xff] }
 0x264   :  { %1377 = vmatpush.msra.mxu2 %v962_v16  ;;  %1337 = vmatpush.msra.mxu0 %v834_v18  ;;  %v767_v17 = vand.u32 2147483647, %v756_v8 }
 0x265   :  { %1397 = vmatpush.msra.mxu3 %v1026_v21  ;;  %1357 = vmatpush.msra.mxu1 %v898_v23  ;;  %v770_v18 = vor.u32 1.1754944e-38, %v769_v15  ;;  %v1142_v15 = vld [vmem:[%s5974_s14 + $0xb00] sm:$0xff] }
 0x266   :  { %1378 = vmatpush.msra.mxu2 %v958_v20  ;;  %1338 = vmatpush.msra.mxu0 %v830_v22  ;;  %vm768_vm7 = vcmp.eq.f32.partialorder %v767_v17, 8.507059e+37  ;;  %v1066_v17 = vld [vmem:[%s5974_s14 + $0x8a0] sm:$0xff] }
 0x267   :  { %1398 = vmatpush.msra.mxu3 %v1022_v25  ;;  %1358 = vmatpush.msra.mxu1 %v894_v27 }
 0x268   :  { %1379 = vmatpush.msra.mxu2 %v954_v24  ;;  %1339 = vmatpush.msra.mxu0 %v826_v26  ;;  %v538_v26 = vperm.slane %v3892_v11, 1  ;;  %v1160_v11 = vld [vmem:[%s5974_s14 + $0xb90] sm:$0xff] }
 0x269   :  { %1399 = vmatpush.msra.mxu3 %v1018_v29  ;;  %1359 = vmatpush.msra.mxu1 %v890_v39  ;;  %v2556_v9 = vpop.eup %2555  ;;  %v1106_v29 = vld [vmem:[%s5974_s14 + $0x9e0] sm:$0xff] }
 0x26a   :  { %1380 = vmatpush.msra.mxu2 %v950_v28  ;;  %1340 = vmatpush.msra.mxu0 %v822_v36  ;;  %v759_v10 = vmul.f32 %v2556_v9, %v756_v8  ;;  %vm764_vm5 = vweird.f32 %v2556_v9  ;;  %v1234_v28 = vld [vmem:[%s5974_s14 + $0xde0] sm:$0xff]  ;;  %v3907_v36 = vld [vmem:[%s6019_s3 + $0x8] sm:$0xff] }
 0x26b   :  { %1400 = vmatpush.msra.mxu3 %v1014_v41  ;;  %1360 = vmatpush.msra.mxu1 %v886_v44  ;;  %vm765_vm6 = vmor %vm763_vm4, %vm764_vm5  ;;  %v1102_v41 = vld [vmem:[%s5974_s14 + $0x9c0] sm:$0xff] }
 0x26c   :  { %1381 = vmatpush.msra.mxu2 %v946_v40  ;;  %1341 = vmatpush.msra.mxu0 %v818_v42  ;;  %v760_v12 = vsub.f32 1.0, %v759_v10  ;;  %v1230_v40 = vld [vmem:[%s5974_s14 + $0xdc0] sm:$0xff]  ;;  %v2538_v42 = vmul.f32 -1.442695, %v3907_v36 }
 0x26d   :  { %1401 = vmatpush.msra.mxu3 %v1010_v48  ;;  %1361 = vmatpush.msra.mxu1 %v882_v50  ;;  %v1226_v48 = vld [vmem:[%s5974_s14 + $0xda0] sm:$0xff] }
 0x26e   :  { %1382 = vmatpush.msra.mxu2 %v942_v45  ;;  %1342 = vmatpush.msra.mxu0 %v814_v49  ;;  %v761_v13 = vmul.f32 %v2556_v9, %v760_v12  ;;  %v1098_v49 = vld [vmem:[%s5974_s14 + $0x9a0] sm:$0xff]  ;;  %2557 = vpow2.f32 %v2538_v42 }
 0x26f   :  { %1402 = vmatpush.msra.mxu3 %v1006_v31  ;;  %1362 = vmatpush.msra.mxu1 %v878_v33  ;;  %v1298_v31 = vld [vmem:[%s5974_s14 + $0xfe0] sm:$0xff] }
 0x270   :  { %1383 = vmatpush.msra.mxu2 %v938_v30  ;;  %1343 = vmatpush.msra.mxu0 %v810_v32  ;;  %v762_v16 = vadd.f32 %v2556_v9, %v761_v13  ;;  %v1170_v32 = vld [vmem:[%s5974_s14 + $0xbe0] sm:$0xff] }
 0x271   :  { %1403 = vmatpush.msra.mxu3 %v1002_v35  ;;  %1363 = vmatpush.msra.mxu1 %v874_v38  ;;  %v1222_v33 = vld [vmem:[%s5974_s14 + $0xd80] sm:$0xff] }
 0x272   :  { %1384 = vmatpush.msra.mxu2 %v934_v34  ;;  %1344 = vmatpush.msra.mxu0 %v806_v37  ;;  %v766_v21 = vsel %vm765_vm6, %v2556_v9, %v762_v16  ;;  %v1094_v34 = vld [vmem:[%s5974_s14 + $0x980] sm:$0xff] }
 0x273   :  { %1404 = vmatpush.msra.mxu3 %v998_v52  ;;  %1364 = vmatpush.msra.mxu1 %v870_v55  ;;  %v771_v23 = vsel %vm768_vm7, %v770_v18, %v766_v21  ;;  %v1294_v35 = vld [vmem:[%s5974_s14 + $0xfc0] sm:$0xff]  ;;  %vm2507_vm7 = vcmask 7168  }
 0x274   :  { %1385 = vmatpush.msra.mxu2 %v930_v51  ;;  %1345 = vmatpush.msra.mxu0 %v802_v54  ;;  %v788_v25 = vmul.f32 %v771_v23, %v748_v53  ;;  %v1166_v37 = vld [vmem:[%s5974_s14 + $0xbc0] sm:$0xff]  ;;  %v2558_v38 = vpop.eup %2557 }
 0x275   :  { %1405 = vmatpush.msra.mxu3 %v994_v58  ;;  %1365 = vmatpush.msra.mxu1 %v866_v60  ;;  %v1218_v51 = vld [vmem:[%s5974_s14 + $0xd60] sm:$0xff]  ;;  %v3954_v55 = vadd.f32 1.0, %v2558_v38 }
 0x276   :  { %1386 = vmatpush.msra.mxu2 %v926_v56  ;;  %1346 = vmatpush.msra.mxu0 %v798_v59  ;;  %1314 = vst [vmem:[#allocation1] ss:$4 sm:$0xff] %v788_v25  ;;  %v1090_v52 = vld [vmem:[%s5974_s14 + $0x960] sm:$0xff] }
 0x277   :  { %1406 = vmatpush.msra.mxu3 %v990_v62  ;;  %1366 = vmatpush.msra.mxu1 %v862_v0  ;;  %v1290_v53 = vld [vmem:[%s5974_s14 + $0xfa0] sm:$0xff]  ;;  %2559 = vrcp.f32 %v3954_v55  ;;  %vm778_vm8 = vweird.f32 %v3954_v55 }
 0x278   :  { %1387 = vmatpush.msra.mxu2 %v922_v61  ;;  %1347 = vmatpush.msra.mxu0 %v794_v63  ;;  %v1162_v54 = vld [vmem:[%s5974_s14 + $0xba0] sm:$0xff] }
 0x279   :  { %1407 = vmatpush.msra.mxu3 %v986_v2  ;;  %1367 = vmatpush.msra.mxu1 %v858_v4  ;;  %v1214_v56 = vld [vmem:[%s5974_s14 + $0xd40] sm:$0xff] }
 0x27a   :  { %1388 = vmatpush.msra.mxu2 %v918_v1  ;;  %1348 = vmatpush.msra.mxu0 %v790_v3  ;;  %v1286_v58 = vld [vmem:[%s5974_s14 + $0xf80] sm:$0xff] }
 0x27b   :  { %1408 = vmatpush.msra.mxu3 %v982_v5  ;;  %1368 = vmatpush.msra.mxu1 %v854_v7  ;;  %v1158_v59 = vld [vmem:[%s5974_s14 + $0xb80] sm:$0xff] }
 0x27c   :  { %v1210_v60 = vld [vmem:[%s5974_s14 + $0xd20] sm:$0xff] }
 0x27d   :  { %v1082_v61 = vld [vmem:[%s5974_s14 + $0x920] sm:$0xff]  ;;  %v2560_v6 = vpop.eup %2559 }
 0x27e   :  { %v1282_v62 = vld [vmem:[%s5974_s14 + $0xf60] sm:$0xff]  ;;  %v774_v12 = vmul.f32 %v2560_v6, %v3954_v55  ;;  %vm779_vm9 = vweird.f32 %v2560_v6 }
 0x27f   :  { %v1154_v63 = vld [vmem:[%s5974_s14 + $0xb60] sm:$0xff]  ;;  %vm4051_vm10 = vmor %vm778_vm8, %vm779_vm9  ;;  %vm2512_vm8 = vcmask 11264  }
 0x280   :  { %v1206_v0 = vld [vmem:[%s5974_s14 + $0xd00] sm:$0xff]  ;;  %v775_v18 = vsub.f32 1.0, %v774_v12  ;;  %v963_v12 = vld [vmem:[%s5974_s14 + $0x568] sm:$0xff] }
 0x281   :  { %v1078_v1 = vld [vmem:[%s5974_s14 + $0x900] sm:$0xff] }
 0x282   :  { %v1278_v2 = vld [vmem:[%s5974_s14 + $0xf40] sm:$0xff]  ;;  %v776_v23 = vmul.f32 %v2560_v6, %v775_v18  ;;  %v903_v18 = vld [vmem:[%s5974_s14 + $0x388] sm:$0xff] }
 0x283   :  { %v1150_v3 = vld [vmem:[%s5974_s14 + $0xb40] sm:$0xff] }
 0x284   :  { %v1202_v4 = vld [vmem:[%s5974_s14 + $0xce0] sm:$0xff] }
 0x285   :  { %v1074_v5 = vld [vmem:[%s5974_s14 + $0x8e0] sm:$0xff] }
 0x286   :  { %v1274_v7 = vld [vmem:[%s5974_s14 + $0xf20] sm:$0xff] }
 0x287   :  { %v1146_v8 = vld [vmem:[%s5974_s14 + $0xb20] sm:$0xff] }
 0x288   :  { %v1198_v9 = vld [vmem:[%s5974_s14 + $0xcc0] sm:$0xff] }
 0x289   :  { %v1070_v10 = vld [vmem:[%s5974_s14 + $0x8c0] sm:$0xff] }
 0x28a   :  { %v1270_v13 = vld [vmem:[%s5974_s14 + $0xf00] sm:$0xff] }
 0x28b   :  { %v1194_v16 = vld [vmem:[%s5974_s14 + $0xca0] sm:$0xff] }
 0x28c   :  { %v1190_v21 = vld [vmem:[%s5974_s14 + $0xc80] sm:$0xff] }
 0x28d   :  { %v1262_v25 = vld [vmem:[%s5974_s14 + $0xec0] sm:$0xff] }
 0x28e   :  { %v1122_v38 = vld [vmem:[%s5974_s14 + $0xa60] sm:$0xff] }
 0x2d7   :  { %v558_v19 = vpop.f32.mrf.mxu0  ;;  %v578_v22 = vpop.f32.mrf.mxu1 }
 0x2d8   :  { %v559_v20 = vadd.f32 %v558_v19, %v537_v14  ;;  %v1266_v19 = vld [vmem:[%s5974_s14 + $0xee0] sm:$0xff] }
 0x2da   :  { %v579_v24 = vadd.f32 %v578_v22, %v559_v20  ;;  %v1138_v20 = vld [vmem:[%s5974_s14 + $0xae0] sm:$0xff] }
 0x2db   :  { %v1062_v22 = vld [vmem:[%s5974_s14 + $0x880] sm:$0xff] }
 0x2dc   :  { %v621_v27 = vmax.f32 %v579_v24, 0.0  ;;  %v784_v24 = vand.u32 2147483648, %v3954_v55 }
 0x2de   :  { %v598_v39 = vpop.f32.mrf.mxu2  ;;  %639 = vmatmul.f32.vlgmr.msrb.gmra.mxu0 %v621_v27  ;;  %679 = vmatmul.f32.vlgmr.msrb.gmra.mxu2 %v621_v27  ;;  %v618_v45 = vpop.f32.mrf.mxu3  ;;  %v1134_v27 = vld [vmem:[%s5974_s14 + $0xac0] sm:$0xff]  ;;  %v785_v42 = vor.u32 1.1754944e-38, %v784_v24  ;;  %v827_v24 = vld [vmem:[%s5974_s14 + $0x128] sm:$0xff] }
 0x2df   :  { %v599_v44 = vadd.f32 %v598_v39, %v538_v26  ;;  %1453 = vmatpush.msrb.mxu2 %v1234_v28  ;;  %1413 = vmatpush.msrb.mxu0 %v1106_v29  ;;  %v782_v28 = vand.u32 2147483647, %v3954_v55  ;;  %v1186_v29 = vld [vmem:[%s5974_s14 + $0xc60] sm:$0xff] }
 0x2e0   :  { %v1058_v39 = vld [vmem:[%s5974_s14 + $0x860] sm:$0xff] }
 0x2e1   :  { %v619_v50 = vadd.f32 %v618_v45, %v599_v44  ;;  %1454 = vmatpush.msrb.mxu2 %v1230_v40  ;;  %1414 = vmatpush.msrb.mxu0 %v1102_v41  ;;  %v777_v40 = vadd.f32 %v2560_v6, %v776_v23  ;;  %v1258_v44 = vld [vmem:[%s5974_s14 + $0xea0] sm:$0xff]  ;;  %vm783_vm11 = vcmp.eq.f32.partialorder %v782_v28, 8.507059e+37  ;;  %v1023_v23 = vld [vmem:[%s5974_s14 + $0x748] sm:$0xff] }
 0x2e2   :  { %v1130_v45 = vld [vmem:[%s5974_s14 + $0xaa0] sm:$0xff]  ;;  %v1019_v28 = vld [vmem:[%s5974_s14 + $0x728] sm:$0xff] }
 0x2e3   :  { %v622_v30 = vmax.f32 %v619_v50, 0.0  ;;  %1455 = vmatpush.msrb.mxu2 %v1226_v48  ;;  %1415 = vmatpush.msrb.mxu0 %v1098_v49  ;;  %v1182_v48 = vld [vmem:[%s5974_s14 + $0xc40] sm:$0xff]  ;;  %v781_v50 = vsel %vm4051_vm10, %v2560_v6, %v777_v40  ;;  %v843_v6 = vld [vmem:[%s5974_s14 + $0x1a8] sm:$0xff] }
 0x2e4   :  { %v1054_v49 = vld [vmem:[%s5974_s14 + $0x840] sm:$0xff]  ;;  %v891_v40 = vld [vmem:[%s5974_s14 + $0x328] sm:$0xff] }
 0x2e5   :  { %659 = vmatmul.f32.vlgmr.msrb.gmra.mxu1 %v622_v30  ;;  %699 = vmatmul.f32.vlgmr.msrb.gmra.mxu3 %v622_v30  ;;  %v1254_v30 = vld [vmem:[%s5974_s14 + $0xe80] sm:$0xff]  ;;  %v1015_v41 = vld [vmem:[%s5974_s14 + $0x708] sm:$0xff] }
 0x2e6   :  { %1473 = vmatpush.msrb.mxu3 %v1298_v31  ;;  %1433 = vmatpush.msrb.mxu1 %v1170_v32  ;;  %v1126_v31 = vld [vmem:[%s5974_s14 + $0xa80] sm:$0xff]  ;;  %v786_v32 = vsel %vm783_vm11, %v785_v42, %v781_v50  ;;  %v819_v42 = vld [vmem:[%s5974_s14 + $0xe8] sm:$0xff] }
 0x2e7   :  { %1456 = vmatpush.msrb.mxu2 %v1222_v33  ;;  %1416 = vmatpush.msrb.mxu0 %v1094_v34  ;;  %v1178_v33 = vld [vmem:[%s5974_s14 + $0xc20] sm:$0xff]  ;;  %v939_v50 = vld [vmem:[%s5974_s14 + $0x4a8] sm:$0xff] }
 0x2e8   :  { %1474 = vmatpush.msrb.mxu3 %v1294_v35  ;;  %1434 = vmatpush.msrb.mxu1 %v1166_v37  ;;  %v1050_v34 = vld [vmem:[%s5974_s14 + $0x820] sm:$0xff]  ;;  %v789_v35 = vmul.f32 %v786_v32, %v3907_v36  ;;  %v811_v32 = vld [vmem:[%s5974_s14 + $0xa8] sm:$0xff] }
 0x2e9   :  { %1457 = vmatpush.msrb.mxu2 %v1218_v51  ;;  %1417 = vmatpush.msrb.mxu0 %v1090_v52  ;;  %v1250_v37 = vld [vmem:[%s5974_s14 + $0xe60] sm:$0xff] }
 0x2ea   :  { %1475 = vmatpush.msrb.mxu3 %v1290_v53  ;;  %1435 = vmatpush.msrb.mxu1 %v1162_v54  ;;  %v1174_v51 = vld [vmem:[%s5974_s14 + $0xc00] sm:$0xff]  ;;  %1316 = vst [vmem:[#allocation1 + $0x20] ss:$4 sm:$0xff] %v789_v35  ;;  %v4100_v54 = vld.sshfl [vmem:[#allocation1 + $0x10] sm:$0xff pattern:$0x73625140] }
 0x2eb   :  { %1458 = vmatpush.msrb.mxu2 %v1214_v56  ;;  %1418 = vmatpush.msrb.mxu0 %v1086_v57  ;;  %v1046_v36 = vld [vmem:[%s5974_s14 + $0x800] sm:$0xff]  ;;  %v979_v57 = vld [vmem:[%s5974_s14 + $0x5e8] sm:$0xff] }
 0x2ec   :  { %1476 = vmatpush.msrb.mxu3 %v1286_v58  ;;  %1436 = vmatpush.msrb.mxu1 %v1158_v59  ;;  %v1246_v52 = vld [vmem:[%s5974_s14 + $0xe40] sm:$0xff]  ;;  %v4113_v59 = vld.sshfl [vmem:[#allocation1 + $0x18] sm:$0xff pattern:$0x73625140]  ;;  %v1003_v35 = vld [vmem:[%s5974_s14 + $0x6a8] sm:$0xff] }
 0x2ed   :  { %1459 = vmatpush.msrb.mxu2 %v1210_v60  ;;  %1419 = vmatpush.msrb.mxu0 %v1082_v61  ;;  %v1118_v53 = vld [vmem:[%s5974_s14 + $0xa40] sm:$0xff]  ;;  %v851_v61 = vld [vmem:[%s5974_s14 + $0x1e8] sm:$0xff] }
 0x2ee   :  { %1477 = vmatpush.msrb.mxu3 %v1282_v62  ;;  %1437 = vmatpush.msrb.mxu1 %v1154_v63  ;;  %v4102_v55 = vld.sshfl [vmem:[#allocation1] sm:$0xff pattern:$0x73625140]  ;;  %v975_v62 = vld [vmem:[%s5974_s14 + $0x5c8] sm:$0xff] }
 0x2ef   :  { %1460 = vmatpush.msrb.mxu2 %v1206_v0  ;;  %1420 = vmatpush.msrb.mxu0 %v1078_v1  ;;  %v1242_v56 = vld [vmem:[%s5974_s14 + $0xe20] sm:$0xff]  ;;  %v1043_v63 = vld [vmem:[%s5974_s14 + $0x7e8] sm:$0xff] }
 0x2f0   :  { %1478 = vmatpush.msrb.mxu3 %v1278_v2  ;;  %1438 = vmatpush.msrb.mxu1 %v1150_v3  ;;  %v1114_v58 = vld [vmem:[%s5974_s14 + $0xa20] sm:$0xff]  ;;  %v847_v1 = vld [vmem:[%s5974_s14 + $0x1c8] sm:$0xff] }
 0x2f1   :  { %1461 = vmatpush.msrb.mxu2 %v1202_v4  ;;  %1421 = vmatpush.msrb.mxu0 %v1074_v5  ;;  %v1238_v60 = vld [vmem:[%s5974_s14 + $0xe00] sm:$0xff]  ;;  %v4136_v2 = vld.sshfl [vmem:[#allocation1 + $0x8] sm:$0xff pattern:$0x73625140] }
 0x2f2   :  { %1479 = vmatpush.msrb.mxu3 %v1274_v7  ;;  %1439 = vmatpush.msrb.mxu1 %v1146_v8  ;;  %v1110_v0 = vld [vmem:[%s5974_s14 + $0xa00] sm:$0xff]  ;;  %v971_v3 = vld [vmem:[%s5974_s14 + $0x5a8] sm:$0xff] }
 0x2f3   :  { %1462 = vmatpush.msrb.mxu2 %v1198_v9  ;;  %1422 = vmatpush.msrb.mxu0 %v1070_v10  ;;  %v915_v4 = vld [vmem:[%s5974_s14 + $0x3e8] sm:$0xff] }
 0x2f4   :  { %1480 = vmatpush.msrb.mxu3 %v1270_v13  ;;  %1440 = vmatpush.msrb.mxu1 %v1142_v15  ;;  %v1039_v5 = vld [vmem:[%s5974_s14 + $0x7c8] sm:$0xff] }
 0x2f5   :  { %1463 = vmatpush.msrb.mxu2 %v1194_v16  ;;  %1423 = vmatpush.msrb.mxu0 %v1066_v17  ;;  %v967_v7 = vld [vmem:[%s5974_s14 + $0x588] sm:$0xff] }
 0x2f6   :  { %1481 = vmatpush.msrb.mxu3 %v1266_v19  ;;  %1441 = vmatpush.msrb.mxu1 %v1138_v20  ;;  %v911_v8 = vld [vmem:[%s5974_s14 + $0x3c8] sm:$0xff] }
 0x2f7   :  { %1464 = vmatpush.msrb.mxu2 %v1190_v21  ;;  %1424 = vmatpush.msrb.mxu0 %v1062_v22  ;;  %v1035_v9 = vld [vmem:[%s5974_s14 + $0x7a8] sm:$0xff] }
 0x2f8   :  { %1482 = vmatpush.msrb.mxu3 %v1262_v25  ;;  %1442 = vmatpush.msrb.mxu1 %v1134_v27  ;;  %v839_v10 = vld [vmem:[%s5974_s14 + $0x188] sm:$0xff] }
 0x2f9   :  { %1465 = vmatpush.msrb.mxu2 %v1186_v29  ;;  %1425 = vmatpush.msrb.mxu0 %v1058_v39  ;;  %v907_v13 = vld [vmem:[%s5974_s14 + $0x3a8] sm:$0xff] }
 0x2fa   :  { %1483 = vmatpush.msrb.mxu3 %v1258_v44  ;;  %1443 = vmatpush.msrb.mxu1 %v1130_v45  ;;  %v1031_v15 = vld [vmem:[%s5974_s14 + $0x788] sm:$0xff] }
 0x2fb   :  { %1466 = vmatpush.msrb.mxu2 %v1182_v48  ;;  %1426 = vmatpush.msrb.mxu0 %v1054_v49  ;;  %v835_v16 = vld [vmem:[%s5974_s14 + $0x168] sm:$0xff] }
 0x2fc   :  { %1484 = vmatpush.msrb.mxu3 %v1254_v30  ;;  %1444 = vmatpush.msrb.mxu1 %v1126_v31  ;;  %v959_v17 = vld [vmem:[%s5974_s14 + $0x548] sm:$0xff] }
 0x2fd   :  { %1467 = vmatpush.msrb.mxu2 %v1178_v33  ;;  %1427 = vmatpush.msrb.mxu0 %v1050_v34  ;;  %v1027_v19 = vld [vmem:[%s5974_s14 + $0x768] sm:$0xff] }
 0x2fe   :  { %1485 = vmatpush.msrb.mxu3 %v1250_v37  ;;  %1445 = vmatpush.msrb.mxu1 %v1122_v38  ;;  %v831_v20 = vld [vmem:[%s5974_s14 + $0x148] sm:$0xff] }
 0x2ff   :  { %1468 = vmatpush.msrb.mxu2 %v1174_v51  ;;  %1428 = vmatpush.msrb.mxu0 %v1046_v36  ;;  %v955_v21 = vld [vmem:[%s5974_s14 + $0x528] sm:$0xff] }
 0x300   :  { %1486 = vmatpush.msrb.mxu3 %v1246_v52  ;;  %1446 = vmatpush.msrb.mxu1 %v1118_v53  ;;  %v899_v22 = vld [vmem:[%s5974_s14 + $0x368] sm:$0xff] }
 0x301   :  { %1389 = vmatmul.f32.vlgmr.msra.gmra.mxu2 %v4100_v54  ;;  %1349 = vmatmul.f32.vlgmr.msra.gmra.mxu0 %v4102_v55  ;;  %v951_v25 = vld [vmem:[%s5974_s14 + $0x508] sm:$0xff] }
 0x302   :  { %1487 = vmatpush.msrb.mxu3 %v1242_v56  ;;  %1533 = vmatpush.msra.mxu2 %v979_v57  ;;  %v895_v27 = vld [vmem:[%s5974_s14 + $0x348] sm:$0xff] }
 0x303   :  { %1447 = vmatpush.msrb.mxu1 %v1114_v58  ;;  %1409 = vmatmul.f32.vlgmr.msra.gmra.mxu3 %v4113_v59  ;;  %v823_v29 = vld [vmem:[%s5974_s14 + $0x108] sm:$0xff] }
 0x304   :  { %1488 = vmatpush.msrb.mxu3 %v1238_v60  ;;  %1493 = vmatpush.msra.mxu0 %v851_v61  ;;  %v947_v39 = vld [vmem:[%s5974_s14 + $0x4e8] sm:$0xff] }
 0x305   :  { %1534 = vmatpush.msra.mxu2 %v975_v62  ;;  %1448 = vmatpush.msrb.mxu1 %v1110_v0  ;;  %v943_v44 = vld [vmem:[%s5974_s14 + $0x4c8] sm:$0xff] }
 0x306   :  { %1553 = vmatpush.msra.mxu3 %v1043_v63  ;;  %1494 = vmatpush.msra.mxu0 %v847_v1  ;;  %v887_v45 = vld [vmem:[%s5974_s14 + $0x308] sm:$0xff] }
 0x307   :  { %1369 = vmatmul.f32.vlgmr.msra.gmra.mxu1 %v4136_v2  ;;  %1535 = vmatpush.msra.mxu2 %v971_v3  ;;  %v1011_v48 = vld [vmem:[%s5974_s14 + $0x6e8] sm:$0xff] }
 0x308   :  { %1513 = vmatpush.msra.mxu1 %v915_v4  ;;  %1554 = vmatpush.msra.mxu3 %v1039_v5  ;;  %v815_v49 = vld [vmem:[%s5974_s14 + $0xc8] sm:$0xff]  ;;  %v4304_v4 = vld.sshfl [vmem:[#allocation1 + $0x30] sm:$0xff pattern:$0x73625140] }
 0x309   :  { %1495 = vmatpush.msra.mxu0 %v843_v6  ;;  %1536 = vmatpush.msra.mxu2 %v967_v7  ;;  %v883_v30 = vld [vmem:[%s5974_s14 + $0x2e8] sm:$0xff] }
 0x30a   :  { %1514 = vmatpush.msra.mxu1 %v911_v8  ;;  %1555 = vmatpush.msra.mxu3 %v1035_v9  ;;  %v1007_v31 = vld [vmem:[%s5974_s14 + $0x6c8] sm:$0xff]  ;;  %v4318_v9 = vld.sshfl [vmem:[#allocation1 + $0x20] sm:$0xff pattern:$0x73625140] }
 0x30b   :  { %1496 = vmatpush.msra.mxu0 %v839_v10  ;;  %1537 = vmatpush.msra.mxu2 %v963_v12  ;;  %v935_v33 = vld [vmem:[%s5974_s14 + $0x488] sm:$0xff]  ;;  %v4321_v10 = vld.sshfl [vmem:[#allocation1 + $0x38] sm:$0xff pattern:$0x73625140] }
 0x30c   :  { %1515 = vmatpush.msra.mxu1 %v907_v13  ;;  %1556 = vmatpush.msra.mxu3 %v1031_v15  ;;  %v879_v34 = vld [vmem:[%s5974_s14 + $0x2c8] sm:$0xff] }
 0x30d   :  { %1497 = vmatpush.msra.mxu0 %v835_v16  ;;  %1538 = vmatpush.msra.mxu2 %v959_v17  ;;  %v807_v37 = vld [vmem:[%s5974_s14 + $0x88] sm:$0xff] }
 0x30e   :  { %1516 = vmatpush.msra.mxu1 %v903_v18  ;;  %1557 = vmatpush.msra.mxu3 %v1027_v19  ;;  %v931_v38 = vld [vmem:[%s5974_s14 + $0x468] sm:$0xff] }
 0x30f   :  { %1498 = vmatpush.msra.mxu0 %v831_v20  ;;  %1539 = vmatpush.msra.mxu2 %v955_v21  ;;  %v875_v51 = vld [vmem:[%s5974_s14 + $0x2a8] sm:$0xff] }
 0x310   :  { %1517 = vmatpush.msra.mxu1 %v899_v22  ;;  %1558 = vmatpush.msra.mxu3 %v1023_v23  ;;  %v999_v36 = vld [vmem:[%s5974_s14 + $0x688] sm:$0xff] }
 0x311   :  { %1499 = vmatpush.msra.mxu0 %v827_v24  ;;  %1540 = vmatpush.msra.mxu2 %v951_v25  ;;  %v803_v52 = vld [vmem:[%s5974_s14 + $0x68] sm:$0xff] }
 0x312   :  { %1518 = vmatpush.msra.mxu1 %v895_v27  ;;  %1559 = vmatpush.msra.mxu3 %v1019_v28  ;;  %v927_v53 = vld [vmem:[%s5974_s14 + $0x448] sm:$0xff] }
 0x313   :  { %1500 = vmatpush.msra.mxu0 %v823_v29  ;;  %1541 = vmatpush.msra.mxu2 %v947_v39  ;;  %v871_v56 = vld [vmem:[%s5974_s14 + $0x288] sm:$0xff] }
 0x314   :  { %1519 = vmatpush.msra.mxu1 %v891_v40  ;;  %1560 = vmatpush.msra.mxu3 %v1015_v41  ;;  %v995_v57 = vld [vmem:[%s5974_s14 + $0x668] sm:$0xff] }
 0x315   :  { %1501 = vmatpush.msra.mxu0 %v819_v42  ;;  %1542 = vmatpush.msra.mxu2 %v943_v44  ;;  %v799_v58 = vld [vmem:[%s5974_s14 + $0x48] sm:$0xff] }
 0x316   :  { %1520 = vmatpush.msra.mxu1 %v887_v45  ;;  %1561 = vmatpush.msra.mxu3 %v1011_v48  ;;  %v923_v60 = vld [vmem:[%s5974_s14 + $0x428] sm:$0xff] }
 0x317   :  { %1502 = vmatpush.msra.mxu0 %v815_v49  ;;  %1543 = vmatpush.msra.mxu2 %v939_v50  ;;  %v867_v61 = vld [vmem:[%s5974_s14 + $0x268] sm:$0xff] }
 0x318   :  { %1521 = vmatpush.msra.mxu1 %v883_v30  ;;  %1562 = vmatpush.msra.mxu3 %v1007_v31  ;;  %v991_v62 = vld [vmem:[%s5974_s14 + $0x648] sm:$0xff] }
 0x319   :  { %1503 = vmatpush.msra.mxu0 %v811_v32  ;;  %1544 = vmatpush.msra.mxu2 %v935_v33  ;;  %v795_v63 = vld [vmem:[%s5974_s14 + $0x28] sm:$0xff] }
 0x31a   :  { %1522 = vmatpush.msra.mxu1 %v879_v34  ;;  %1563 = vmatpush.msra.mxu3 %v1003_v35  ;;  %v919_v0 = vld [vmem:[%s5974_s14 + $0x408] sm:$0xff] }
 0x31b   :  { %1504 = vmatpush.msra.mxu0 %v807_v37  ;;  %1545 = vmatpush.msra.mxu2 %v931_v38  ;;  %v863_v1 = vld [vmem:[%s5974_s14 + $0x248] sm:$0xff] }
 0x31c   :  { %1523 = vmatpush.msra.mxu1 %v875_v51  ;;  %1564 = vmatpush.msra.mxu3 %v999_v36  ;;  %v987_v3 = vld [vmem:[%s5974_s14 + $0x628] sm:$0xff] }
 0x31d   :  { %1505 = vmatpush.msra.mxu0 %v803_v52  ;;  %1546 = vmatpush.msra.mxu2 %v927_v53  ;;  %v791_v5 = vld [vmem:[%s5974_s14 + $0x8] sm:$0xff] }
 0x31e   :  { %1524 = vmatpush.msra.mxu1 %v871_v56  ;;  %1565 = vmatpush.msra.mxu3 %v995_v57  ;;  %v1235_v6 = vld [vmem:[%s5974_s14 + $0xde8] sm:$0xff] }
 0x31f   :  { %1506 = vmatpush.msra.mxu0 %v799_v58  ;;  %1547 = vmatpush.msra.mxu2 %v923_v60  ;;  %v859_v7 = vld [vmem:[%s5974_s14 + $0x228] sm:$0xff] }
 0x320   :  { %1525 = vmatpush.msra.mxu1 %v867_v61  ;;  %1566 = vmatpush.msra.mxu3 %v991_v62  ;;  %v983_v8 = vld [vmem:[%s5974_s14 + $0x608] sm:$0xff] }
 0x321   :  { %1507 = vmatpush.msra.mxu0 %v795_v63  ;;  %1548 = vmatpush.msra.mxu2 %v919_v0  ;;  %v1107_v12 = vld [vmem:[%s5974_s14 + $0x9e8] sm:$0xff] }
 0x322   :  { %1526 = vmatpush.msra.mxu1 %v863_v1  ;;  %1567 = vmatpush.msra.mxu3 %v987_v3  ;;  %v1231_v13 = vld [vmem:[%s5974_s14 + $0xdc8] sm:$0xff] }
 0x323   :  { %1469 = vmatmul.f32.vlgmr.msrb.gmra.mxu2 %v4304_v4  ;;  %1508 = vmatpush.msra.mxu0 %v791_v5  ;;  %v1299_v15 = vld [vmem:[%s5974_s14 + $0xfe8] sm:$0xff] }
 0x324   :  { %1613 = vmatpush.msrb.mxu2 %v1235_v6  ;;  %1527 = vmatpush.msra.mxu1 %v859_v7  ;;  %v855_v16 = vld [vmem:[%s5974_s14 + $0x208] sm:$0xff] }
 0x325   :  { %1568 = vmatpush.msra.mxu3 %v983_v8  ;;  %1429 = vmatmul.f32.vlgmr.msrb.gmra.mxu0 %v4318_v9  ;;  %v1103_v17 = vld [vmem:[%s5974_s14 + $0x9c8] sm:$0xff] }
 0x326   :  { %1489 = vmatmul.f32.vlgmr.msrb.gmra.mxu3 %v4321_v10  ;;  %1573 = vmatpush.msrb.mxu0 %v1107_v12  ;;  %v4340_v18 = vld.sshfl [vmem:[#allocation1 + $0x28] sm:$0xff pattern:$0x73625140] }
 0x327   :  { %v1227_v19 = vld [vmem:[%s5974_s14 + $0xda8] sm:$0xff]  ;;  %1614 = vmatpush.msrb.mxu2 %v1231_v13  ;;  %1633 = vmatpush.msrb.mxu3 %v1299_v15 }
 0x328   :  { %v1171_v20 = vld [vmem:[%s5974_s14 + $0xbe8] sm:$0xff]  ;;  %1528 = vmatpush.msra.mxu1 %v855_v16  ;;  %1574 = vmatpush.msrb.mxu0 %v1103_v17 }
 0x329   :  { %v1295_v21 = vld [vmem:[%s5974_s14 + $0xfc8] sm:$0xff]  ;;  %1449 = vmatmul.f32.vlgmr.msrb.gmra.mxu1 %v4340_v18  ;;  %1615 = vmatpush.msrb.mxu2 %v1227_v19 }
 0x32a   :  { %v1099_v22 = vld [vmem:[%s5974_s14 + $0x9a8] sm:$0xff]  ;;  %1593 = vmatpush.msrb.mxu1 %v1171_v20  ;;  %1634 = vmatpush.msrb.mxu3 %v1295_v21  ;;  %v980_v21 = vld [vmem:[%s5974_s14 + $0x5f0] sm:$0xff] }
 0x32b   :  { %v1223_v23 = vld [vmem:[%s5974_s14 + $0xd88] sm:$0xff]  ;;  %1575 = vmatpush.msrb.mxu0 %v1099_v22  ;;  %1549 = vmatmul.f32.vlgmr.msra.gmra.mxu2 %v4100_v54 }
 0x32c   :  { %v1167_v24 = vld [vmem:[%s5974_s14 + $0xbc8] sm:$0xff]  ;;  %1616 = vmatpush.msrb.mxu2 %v1223_v23 }
 0x32d   :  { %v1291_v25 = vld [vmem:[%s5974_s14 + $0xfa8] sm:$0xff]  ;;  %1594 = vmatpush.msrb.mxu1 %v1167_v24  ;;  %1509 = vmatmul.f32.vlgmr.msra.gmra.mxu0 %v4102_v55  ;;  %v852_v24 = vld [vmem:[%s5974_s14 + $0x1f0] sm:$0xff] }
 0x32e   :  { %v1095_v27 = vld [vmem:[%s5974_s14 + $0x988] sm:$0xff]  ;;  %1635 = vmatpush.msrb.mxu3 %v1291_v25  ;;  %v976_v25 = vld [vmem:[%s5974_s14 + $0x5d0] sm:$0xff] }
 0x32f   :  { %v1219_v28 = vld [vmem:[%s5974_s14 + $0xd68] sm:$0xff]  ;;  %1576 = vmatpush.msrb.mxu0 %v1095_v27  ;;  %1569 = vmatmul.f32.vlgmr.msra.gmra.mxu3 %v4113_v59  ;;  %v1044_v27 = vld [vmem:[%s5974_s14 + $0x7f0] sm:$0xff] }
 0x330   :  { %v1163_v29 = vld [vmem:[%s5974_s14 + $0xba8] sm:$0xff]  ;;  %1617 = vmatpush.msrb.mxu2 %v1219_v28  ;;  %v848_v28 = vld [vmem:[%s5974_s14 + $0x1d0] sm:$0xff] }
 0x331   :  { %v1287_v39 = vld [vmem:[%s5974_s14 + $0xf88] sm:$0xff]  ;;  %1595 = vmatpush.msrb.mxu1 %v1163_v29  ;;  %v972_v29 = vld [vmem:[%s5974_s14 + $0x5b0] sm:$0xff] }
 0x332   :  { %v1091_v40 = vld [vmem:[%s5974_s14 + $0x968] sm:$0xff]  ;;  %1636 = vmatpush.msrb.mxu3 %v1287_v39  ;;  %1529 = vmatmul.f32.vlgmr.msra.gmra.mxu1 %v4136_v2  ;;  %v1040_v39 = vld [vmem:[%s5974_s14 + $0x7d0] sm:$0xff] }
 0x333   :  { %v1215_v41 = vld [vmem:[%s5974_s14 + $0xd48] sm:$0xff]  ;;  %1577 = vmatpush.msrb.mxu0 %v1091_v40  ;;  %v968_v40 = vld [vmem:[%s5974_s14 + $0x590] sm:$0xff] }
 0x334   :  { %v1159_v42 = vld [vmem:[%s5974_s14 + $0xb88] sm:$0xff]  ;;  %1618 = vmatpush.msrb.mxu2 %v1215_v41  ;;  %v912_v41 = vld [vmem:[%s5974_s14 + $0x3d0] sm:$0xff] }
 0x335   :  { %v1283_v44 = vld [vmem:[%s5974_s14 + $0xf68] sm:$0xff]  ;;  %1596 = vmatpush.msrb.mxu1 %v1159_v42  ;;  %v1036_v42 = vld [vmem:[%s5974_s14 + $0x7b0] sm:$0xff] }
 0x336   :  { %v1087_v45 = vld [vmem:[%s5974_s14 + $0x948] sm:$0xff]  ;;  %1637 = vmatpush.msrb.mxu3 %v1283_v44  ;;  %v840_v44 = vld [vmem:[%s5974_s14 + $0x190] sm:$0xff] }
 0x337   :  { %v1211_v48 = vld [vmem:[%s5974_s14 + $0xd28] sm:$0xff]  ;;  %1578 = vmatpush.msrb.mxu0 %v1087_v45  ;;  %v964_v45 = vld [vmem:[%s5974_s14 + $0x570] sm:$0xff] }
 0x338   :  { %v1155_v49 = vld [vmem:[%s5974_s14 + $0xb68] sm:$0xff]  ;;  %1619 = vmatpush.msrb.mxu2 %v1211_v48  ;;  %v1032_v48 = vld [vmem:[%s5974_s14 + $0x790] sm:$0xff] }
 0x339   :  { %v1279_v50 = vld [vmem:[%s5974_s14 + $0xf48] sm:$0xff]  ;;  %1597 = vmatpush.msrb.mxu1 %v1155_v49  ;;  %v836_v49 = vld [vmem:[%s5974_s14 + $0x170] sm:$0xff] }
 0x33a   :  { %v1083_v30 = vld [vmem:[%s5974_s14 + $0x928] sm:$0xff]  ;;  %1638 = vmatpush.msrb.mxu3 %v1279_v50  ;;  %v960_v50 = vld [vmem:[%s5974_s14 + $0x550] sm:$0xff] }
 0x33b   :  { %v1207_v31 = vld [vmem:[%s5974_s14 + $0xd08] sm:$0xff]  ;;  %1579 = vmatpush.msrb.mxu0 %v1083_v30  ;;  %v904_v30 = vld [vmem:[%s5974_s14 + $0x390] sm:$0xff] }
 0x33c   :  { %v1151_v32 = vld [vmem:[%s5974_s14 + $0xb48] sm:$0xff]  ;;  %1620 = vmatpush.msrb.mxu2 %v1207_v31  ;;  %v1028_v31 = vld [vmem:[%s5974_s14 + $0x770] sm:$0xff] }
 0x33d   :  { %v1275_v33 = vld [vmem:[%s5974_s14 + $0xf28] sm:$0xff]  ;;  %1598 = vmatpush.msrb.mxu1 %v1151_v32  ;;  %v832_v32 = vld [vmem:[%s5974_s14 + $0x150] sm:$0xff] }
 0x33e   :  { %v1079_v34 = vld [vmem:[%s5974_s14 + $0x908] sm:$0xff]  ;;  %1639 = vmatpush.msrb.mxu3 %v1275_v33  ;;  %v956_v33 = vld [vmem:[%s5974_s14 + $0x530] sm:$0xff] }
 0x33f   :  { %v1203_v35 = vld [vmem:[%s5974_s14 + $0xce8] sm:$0xff]  ;;  %1580 = vmatpush.msrb.mxu0 %v1079_v34  ;;  %v900_v34 = vld [vmem:[%s5974_s14 + $0x370] sm:$0xff] }
 0x340   :  { %v1147_v37 = vld [vmem:[%s5974_s14 + $0xb28] sm:$0xff]  ;;  %1621 = vmatpush.msrb.mxu2 %v1203_v35  ;;  %v1024_v35 = vld [vmem:[%s5974_s14 + $0x750] sm:$0xff] }
 0x341   :  { %v1271_v38 = vld [vmem:[%s5974_s14 + $0xf08] sm:$0xff]  ;;  %1599 = vmatpush.msrb.mxu1 %v1147_v37  ;;  %v828_v37 = vld [vmem:[%s5974_s14 + $0x130] sm:$0xff] }
 0x342   :  { %v1075_v51 = vld [vmem:[%s5974_s14 + $0x8e8] sm:$0xff]  ;;  %1640 = vmatpush.msrb.mxu3 %v1271_v38  ;;  %v952_v38 = vld [vmem:[%s5974_s14 + $0x510] sm:$0xff] }
 0x343   :  { %v1199_v36 = vld [vmem:[%s5974_s14 + $0xcc8] sm:$0xff]  ;;  %1581 = vmatpush.msrb.mxu0 %v1075_v51  ;;  %v896_v51 = vld [vmem:[%s5974_s14 + $0x350] sm:$0xff] }
 0x344   :  { %v1143_v52 = vld [vmem:[%s5974_s14 + $0xb08] sm:$0xff]  ;;  %1622 = vmatpush.msrb.mxu2 %v1199_v36  ;;  %v1020_v36 = vld [vmem:[%s5974_s14 + $0x730] sm:$0xff] }
 0x345   :  { %v1267_v53 = vld [vmem:[%s5974_s14 + $0xee8] sm:$0xff]  ;;  %1600 = vmatpush.msrb.mxu1 %v1143_v52  ;;  %v824_v52 = vld [vmem:[%s5974_s14 + $0x110] sm:$0xff] }
 0x346   :  { %v1071_v56 = vld [vmem:[%s5974_s14 + $0x8c8] sm:$0xff]  ;;  %1641 = vmatpush.msrb.mxu3 %v1267_v53  ;;  %v948_v53 = vld [vmem:[%s5974_s14 + $0x4f0] sm:$0xff] }
 0x347   :  { %v1195_v57 = vld [vmem:[%s5974_s14 + $0xca8] sm:$0xff]  ;;  %1582 = vmatpush.msrb.mxu0 %v1071_v56  ;;  %v892_v56 = vld [vmem:[%s5974_s14 + $0x330] sm:$0xff] }
 0x348   :  { %v1139_v58 = vld [vmem:[%s5974_s14 + $0xae8] sm:$0xff]  ;;  %1623 = vmatpush.msrb.mxu2 %v1195_v57  ;;  %v1016_v57 = vld [vmem:[%s5974_s14 + $0x710] sm:$0xff] }
 0x349   :  { %v1263_v60 = vld [vmem:[%s5974_s14 + $0xec8] sm:$0xff]  ;;  %1601 = vmatpush.msrb.mxu1 %v1139_v58  ;;  %v820_v58 = vld [vmem:[%s5974_s14 + $0xf0] sm:$0xff] }
 0x34a   :  { %v1067_v61 = vld [vmem:[%s5974_s14 + $0x8a8] sm:$0xff]  ;;  %1642 = vmatpush.msrb.mxu3 %v1263_v60  ;;  %v944_v60 = vld [vmem:[%s5974_s14 + $0x4d0] sm:$0xff] }
 0x34b   :  { %v1191_v62 = vld [vmem:[%s5974_s14 + $0xc88] sm:$0xff]  ;;  %1583 = vmatpush.msrb.mxu0 %v1067_v61  ;;  %v888_v61 = vld [vmem:[%s5974_s14 + $0x310] sm:$0xff] }
 0x34c   :  { %v1135_v63 = vld [vmem:[%s5974_s14 + $0xac8] sm:$0xff]  ;;  %1624 = vmatpush.msrb.mxu2 %v1191_v62  ;;  %v1012_v62 = vld [vmem:[%s5974_s14 + $0x6f0] sm:$0xff] }
 0x34d   :  { %v1259_v0 = vld [vmem:[%s5974_s14 + $0xea8] sm:$0xff]  ;;  %1602 = vmatpush.msrb.mxu1 %v1135_v63  ;;  %v816_v63 = vld [vmem:[%s5974_s14 + $0xd0] sm:$0xff] }
 0x34e   :  { %v1063_v1 = vld [vmem:[%s5974_s14 + $0x888] sm:$0xff]  ;;  %1643 = vmatpush.msrb.mxu3 %v1259_v0  ;;  %v940_v0 = vld [vmem:[%s5974_s14 + $0x4b0] sm:$0xff] }
 0x34f   :  { %v1131_v3 = vld [vmem:[%s5974_s14 + $0xaa8] sm:$0xff]  ;;  %1584 = vmatpush.msrb.mxu0 %v1063_v1  ;;  %v884_v1 = vld [vmem:[%s5974_s14 + $0x2f0] sm:$0xff] }
 0x350   :  { %v1187_v5 = vld [vmem:[%s5974_s14 + $0xc68] sm:$0xff]  ;;  %1603 = vmatpush.msrb.mxu1 %v1131_v3  ;;  %v1008_v3 = vld [vmem:[%s5974_s14 + $0x6d0] sm:$0xff] }
 0x351   :  { %v1255_v6 = vld [vmem:[%s5974_s14 + $0xe88] sm:$0xff]  ;;  %1625 = vmatpush.msrb.mxu2 %v1187_v5  ;;  %v812_v5 = vld [vmem:[%s5974_s14 + $0xb0] sm:$0xff] }
 0x352   :  { %v1059_v7 = vld [vmem:[%s5974_s14 + $0x868] sm:$0xff]  ;;  %1644 = vmatpush.msrb.mxu3 %v1255_v6  ;;  %v936_v6 = vld [vmem:[%s5974_s14 + $0x490] sm:$0xff] }
 0x353   :  { %v1127_v8 = vld [vmem:[%s5974_s14 + $0xa88] sm:$0xff]  ;;  %1585 = vmatpush.msrb.mxu0 %v1059_v7  ;;  %v880_v7 = vld [vmem:[%s5974_s14 + $0x2d0] sm:$0xff] }
 0x354   :  { %v1183_v12 = vld [vmem:[%s5974_s14 + $0xc48] sm:$0xff]  ;;  %1604 = vmatpush.msrb.mxu1 %v1127_v8  ;;  %v1004_v8 = vld [vmem:[%s5974_s14 + $0x6b0] sm:$0xff] }
 0x355   :  { %v1251_v54 = vld [vmem:[%s5974_s14 + $0xe68] sm:$0xff]  ;;  %1626 = vmatpush.msrb.mxu2 %v1183_v12  ;;  %v808_v12 = vld [vmem:[%s5974_s14 + $0x90] sm:$0xff] }
 0x356   :  { %v1055_v13 = vld [vmem:[%s5974_s14 + $0x848] sm:$0xff]  ;;  %1645 = vmatpush.msrb.mxu3 %v1251_v54  ;;  %v932_v54 = vld [vmem:[%s5974_s14 + $0x470] sm:$0xff] }
 0x357   :  { %v1123_v15 = vld [vmem:[%s5974_s14 + $0xa68] sm:$0xff]  ;;  %1586 = vmatpush.msrb.mxu0 %v1055_v13  ;;  %v876_v13 = vld [vmem:[%s5974_s14 + $0x2b0] sm:$0xff] }
 0x358   :  { %v1179_v55 = vld [vmem:[%s5974_s14 + $0xc28] sm:$0xff]  ;;  %1605 = vmatpush.msrb.mxu1 %v1123_v15  ;;  %v1000_v15 = vld [vmem:[%s5974_s14 + $0x690] sm:$0xff] }
 0x359   :  { %v1247_v16 = vld [vmem:[%s5974_s14 + $0xe48] sm:$0xff]  ;;  %1627 = vmatpush.msrb.mxu2 %v1179_v55  ;;  %v804_v55 = vld [vmem:[%s5974_s14 + $0x70] sm:$0xff] }
 0x35a   :  { %v1051_v59 = vld [vmem:[%s5974_s14 + $0x828] sm:$0xff]  ;;  %1646 = vmatpush.msrb.mxu3 %v1247_v16  ;;  %v928_v16 = vld [vmem:[%s5974_s14 + $0x450] sm:$0xff] }
 0x35b   :  { %v1119_v17 = vld [vmem:[%s5974_s14 + $0xa48] sm:$0xff]  ;;  %1587 = vmatpush.msrb.mxu0 %v1051_v59  ;;  %v872_v59 = vld [vmem:[%s5974_s14 + $0x290] sm:$0xff] }
 0x35c   :  { %v1175_v19 = vld [vmem:[%s5974_s14 + $0xc08] sm:$0xff]  ;;  %1606 = vmatpush.msrb.mxu1 %v1119_v17  ;;  %v996_v17 = vld [vmem:[%s5974_s14 + $0x670] sm:$0xff] }
 0x35d   :  { %v1243_v20 = vld [vmem:[%s5974_s14 + $0xe28] sm:$0xff]  ;;  %1628 = vmatpush.msrb.mxu2 %v1175_v19  ;;  %v800_v19 = vld [vmem:[%s5974_s14 + $0x50] sm:$0xff] }
 0x35e   :  { %v1047_v2 = vld [vmem:[%s5974_s14 + $0x808] sm:$0xff]  ;;  %1647 = vmatpush.msrb.mxu3 %v1243_v20  ;;  %1629 = vmatmul.f32.vlgmr.msrb.gmra.mxu2 %v4304_v4  ;;  %v924_v20 = vld [vmem:[%s5974_s14 + $0x430] sm:$0xff] }
 0x35f   :  { %v1115_v22 = vld [vmem:[%s5974_s14 + $0xa28] sm:$0xff]  ;;  %1588 = vmatpush.msrb.mxu0 %v1047_v2  ;;  %1693 = vmatpush.msra.mxu2 %v980_v21  ;;  %v868_v2 = vld [vmem:[%s5974_s14 + $0x270] sm:$0xff] }
 0x360   :  { %v1239_v23 = vld [vmem:[%s5974_s14 + $0xe08] sm:$0xff]  ;;  %1607 = vmatpush.msrb.mxu1 %v1115_v22  ;;  %1589 = vmatmul.f32.vlgmr.msrb.gmra.mxu0 %v4318_v9  ;;  %v916_v9 = vld [vmem:[%s5974_s14 + $0x3f0] sm:$0xff] }
 0x361   :  { %1648 = vmatpush.msrb.mxu3 %v1239_v23  ;;  %v1111_v4 = vld [vmem:[%s5974_s14 + $0xa08] sm:$0xff]  ;;  %1653 = vmatpush.msra.mxu0 %v852_v24  ;;  %v992_v21 = vld [vmem:[%s5974_s14 + $0x650] sm:$0xff] }
 0x362   :  { %1649 = vmatmul.f32.vlgmr.msrb.gmra.mxu3 %v4321_v10  ;;  %1694 = vmatpush.msra.mxu2 %v976_v25  ;;  %v844_v10 = vld [vmem:[%s5974_s14 + $0x1b0] sm:$0xff] }
 0x363   :  { %1713 = vmatpush.msra.mxu3 %v1044_v27  ;;  %1608 = vmatpush.msrb.mxu1 %v1111_v4  ;;  %v796_v22 = vld [vmem:[%s5974_s14 + $0x30] sm:$0xff] }
 0x364   :  { %1654 = vmatpush.msra.mxu0 %v848_v28  ;;  %1609 = vmatmul.f32.vlgmr.msrb.gmra.mxu1 %v4340_v18  ;;  %v908_v18 = vld [vmem:[%s5974_s14 + $0x3b0] sm:$0xff] }
 0x365   :  { %1695 = vmatpush.msra.mxu2 %v972_v29  ;;  %1673 = vmatpush.msra.mxu1 %v916_v9  ;;  %v920_v23 = vld [vmem:[%s5974_s14 + $0x410] sm:$0xff] }
 0x366   :  { %1714 = vmatpush.msra.mxu3 %v1040_v39  ;;  %1655 = vmatpush.msra.mxu0 %v844_v10  ;;  %v864_v24 = vld [vmem:[%s5974_s14 + $0x250] sm:$0xff] }
 0x367   :  { %1696 = vmatpush.msra.mxu2 %v968_v40  ;;  %1674 = vmatpush.msra.mxu1 %v912_v41  ;;  %v988_v25 = vld [vmem:[%s5974_s14 + $0x630] sm:$0xff]  ;;  %v680_v41 = vpop.f32.mrf.mxu2 }
 0x368   :  { %1715 = vmatpush.msra.mxu3 %v1036_v42  ;;  %1656 = vmatpush.msra.mxu0 %v840_v44  ;;  %v1236_v27 = vld [vmem:[%s5974_s14 + $0xdf0] sm:$0xff] }
 0x369   :  { %1697 = vmatpush.msra.mxu2 %v964_v45  ;;  %1675 = vmatpush.msra.mxu1 %v908_v18  ;;  %v792_v4 = vld [vmem:[%s5974_s14 + $0x10] sm:$0xff] }
 0x36a   :  { %1716 = vmatpush.msra.mxu3 %v1032_v48  ;;  %1657 = vmatpush.msra.mxu0 %v836_v49  ;;  %v860_v28 = vld [vmem:[%s5974_s14 + $0x230] sm:$0xff]  ;;  %v640_v48 = vpop.f32.mrf.mxu0 }
 0x36b   :  { %1698 = vmatpush.msra.mxu2 %v960_v50  ;;  %1676 = vmatpush.msra.mxu1 %v904_v30  ;;  %v984_v29 = vld [vmem:[%s5974_s14 + $0x610] sm:$0xff]  ;;  %v700_v30 = vpop.f32.mrf.mxu3 }
 0x36c   :  { %1717 = vmatpush.msra.mxu3 %v1028_v31  ;;  %1658 = vmatpush.msra.mxu0 %v832_v32  ;;  %v1108_v9 = vld [vmem:[%s5974_s14 + $0x9f0] sm:$0xff]  ;;  %v681_v31 = vadd.f32 %v680_v41, %v538_v26 }
 0x36d   :  { %1699 = vmatpush.msra.mxu2 %v956_v33  ;;  %1677 = vmatpush.msra.mxu1 %v900_v34  ;;  %v1232_v39 = vld [vmem:[%s5974_s14 + $0xdd0] sm:$0xff]  ;;  %v660_v34 = vpop.f32.mrf.mxu1 }
 0x36e   :  { %1718 = vmatpush.msra.mxu3 %v1024_v35  ;;  %1659 = vmatpush.msra.mxu0 %v828_v37  ;;  %v1300_v10 = vld [vmem:[%s5974_s14 + $0xff0] sm:$0xff]  ;;  %v641_v37 = vadd.f32 %v640_v48, %v537_v14 }
 0x36f   :  { %1700 = vmatpush.msra.mxu2 %v952_v38  ;;  %1678 = vmatpush.msra.mxu1 %v896_v51  ;;  %v856_v40 = vld [vmem:[%s5974_s14 + $0x210] sm:$0xff] }
 0x370   :  { %1719 = vmatpush.msra.mxu3 %v1020_v36  ;;  %1660 = vmatpush.msra.mxu0 %v824_v52  ;;  %v1104_v42 = vld [vmem:[%s5974_s14 + $0x9d0] sm:$0xff]  ;;  %v701_v36 = vadd.f32 %v700_v30, %v681_v31  ;;  %v661_v14 = vadd.f32 %v660_v34, %v641_v37  ;;  %v853_v31 = vld [vmem:[%s5974_s14 + $0x1f8] sm:$0xff] }
 0x371   :  { %1701 = vmatpush.msra.mxu2 %v948_v53  ;;  %1679 = vmatpush.msra.mxu1 %v892_v56  ;;  %v1172_v44 = vld [vmem:[%s5974_s14 + $0xbf0] sm:$0xff]  ;;  %v849_v37 = vld [vmem:[%s5974_s14 + $0x1d8] sm:$0xff] }
 0x372   :  { %1720 = vmatpush.msra.mxu3 %v1016_v57  ;;  %1661 = vmatpush.msra.mxu0 %v820_v58  ;;  %v1228_v45 = vld [vmem:[%s5974_s14 + $0xdb0] sm:$0xff] }
 0x373   :  { %1702 = vmatpush.msra.mxu2 %v944_v60  ;;  %1680 = vmatpush.msra.mxu1 %v888_v61  ;;  %v1296_v18 = vld [vmem:[%s5974_s14 + $0xfd0] sm:$0xff] }
 0x374   :  { %1721 = vmatpush.msra.mxu3 %v1012_v62  ;;  %1662 = vmatpush.msra.mxu0 %v816_v63  ;;  %v1100_v49 = vld [vmem:[%s5974_s14 + $0x9b0] sm:$0xff]  ;;  %v4797_v62 = vadd.f32 %v701_v36, %v3682_v47  ;;  %v1041_v36 = vld [vmem:[%s5974_s14 + $0x7d8] sm:$0xff] }
 0x375   :  { %1703 = vmatpush.msra.mxu2 %v940_v0  ;;  %1681 = vmatpush.msra.mxu1 %v884_v1  ;;  %v1168_v50 = vld [vmem:[%s5974_s14 + $0xbd0] sm:$0xff] }
 0x376   :  { %1722 = vmatpush.msra.mxu3 %v1008_v3  ;;  %1663 = vmatpush.msra.mxu0 %v812_v5  ;;  %v1224_v32 = vld [vmem:[%s5974_s14 + $0xd90] sm:$0xff]  ;;  %v4812_v3 = vadd.f32 %v661_v14, %v3680_v46  ;;  %v913_v14 = vld [vmem:[%s5974_s14 + $0x3d8] sm:$0xff] }
 0x377   :  { %1704 = vmatpush.msra.mxu2 %v936_v6  ;;  %1682 = vmatpush.msra.mxu1 %v880_v7  ;;  %v1292_v33 = vld [vmem:[%s5974_s14 + $0xfb0] sm:$0xff] }
 0x378   :  { %1723 = vmatpush.msra.mxu3 %v1004_v8  ;;  %1664 = vmatpush.msra.mxu0 %v808_v12  ;;  %v1096_v35 = vld [vmem:[%s5974_s14 + $0x990] sm:$0xff]  ;;  %v707_v8 = vadd.f32 %v4797_v62, %v4812_v3 }
 0x379   :  { %1705 = vmatpush.msra.mxu2 %v932_v54  ;;  %1683 = vmatpush.msra.mxu1 %v876_v13  ;;  %v1164_v26 = vld [vmem:[%s5974_s14 + $0xbb0] sm:$0xff] }
 0x37a   :  { %1724 = vmatpush.msra.mxu3 %v1000_v15  ;;  %1665 = vmatpush.msra.mxu0 %v804_v55  ;;  %v1220_v38 = vld [vmem:[%s5974_s14 + $0xd70] sm:$0xff] }
 0x37b   :  { %1706 = vmatpush.msra.mxu2 %v928_v16  ;;  %1684 = vmatpush.msra.mxu1 %v872_v59  ;;  %v1288_v51 = vld [vmem:[%s5974_s14 + $0xf90] sm:$0xff] }
 0x37c   :  { %1725 = vmatpush.msra.mxu3 %v996_v17  ;;  %1666 = vmatpush.msra.mxu0 %v800_v19  ;;  %v1092_v52 = vld [vmem:[%s5974_s14 + $0x970] sm:$0xff] }
 0x37d   :  { %1707 = vmatpush.msra.mxu2 %v924_v20  ;;  %1685 = vmatpush.msra.mxu1 %v868_v2  ;;  %v1216_v53 = vld [vmem:[%s5974_s14 + $0xd50] sm:$0xff] }
 0x37e   :  { %1726 = vmatpush.msra.mxu3 %v992_v21  ;;  %1667 = vmatpush.msra.mxu0 %v796_v22  ;;  %v1284_v56 = vld [vmem:[%s5974_s14 + $0xf70] sm:$0xff] }
 0x37f   :  { %1708 = vmatpush.msra.mxu2 %v920_v23  ;;  %1686 = vmatpush.msra.mxu1 %v864_v24  ;;  %v1088_v57 = vld [vmem:[%s5974_s14 + $0x950] sm:$0xff] }
 0x380   :  { %1727 = vmatpush.msra.mxu3 %v988_v25  ;;  %1668 = vmatpush.msra.mxu0 %v792_v4  ;;  %v1156_v58 = vld [vmem:[%s5974_s14 + $0xb70] sm:$0xff] }
 0x381   :  { %1773 = vmatpush.msrb.mxu2 %v1236_v27  ;;  %1687 = vmatpush.msra.mxu1 %v860_v28  ;;  %v1212_v60 = vld [vmem:[%s5974_s14 + $0xd30] sm:$0xff] }
 0x382   :  { %1728 = vmatpush.msra.mxu3 %v984_v29  ;;  %1733 = vmatpush.msrb.mxu0 %v1108_v9  ;;  %v1280_v61 = vld [vmem:[%s5974_s14 + $0xf50] sm:$0xff] }
 0x383   :  { %1774 = vmatpush.msrb.mxu2 %v1232_v39  ;;  %1688 = vmatpush.msra.mxu1 %v856_v40  ;;  %v1084_v63 = vld [vmem:[%s5974_s14 + $0x930] sm:$0xff] }
 0x384   :  { %1793 = vmatpush.msrb.mxu3 %v1300_v10  ;;  %1734 = vmatpush.msrb.mxu0 %v1104_v42  ;;  %v1152_v0 = vld [vmem:[%s5974_s14 + $0xb50] sm:$0xff] }
 0x385   :  { %1753 = vmatpush.msrb.mxu1 %v1172_v44  ;;  %1775 = vmatpush.msrb.mxu2 %v1228_v45  ;;  %v1208_v1 = vld [vmem:[%s5974_s14 + $0xd10] sm:$0xff] }
 0x386   :  { %1794 = vmatpush.msrb.mxu3 %v1296_v18  ;;  %1735 = vmatpush.msrb.mxu0 %v1100_v49  ;;  %v1276_v47 = vld [vmem:[%s5974_s14 + $0xf30] sm:$0xff]  ;;  %v981_v18 = vld [vmem:[%s5974_s14 + $0x5f8] sm:$0xff] }
 0x387   :  { %1754 = vmatpush.msrb.mxu1 %v1168_v50  ;;  %1776 = vmatpush.msrb.mxu2 %v1224_v32  ;;  %v1080_v5 = vld [vmem:[%s5974_s14 + $0x910] sm:$0xff]  ;;  %v977_v32 = vld [vmem:[%s5974_s14 + $0x5d8] sm:$0xff] }
 0x388   :  { %1795 = vmatpush.msrb.mxu3 %v1292_v33  ;;  %1736 = vmatpush.msrb.mxu0 %v1096_v35  ;;  %v1148_v6 = vld [vmem:[%s5974_s14 + $0xb30] sm:$0xff]  ;;  %v1045_v33 = vld [vmem:[%s5974_s14 + $0x7f8] sm:$0xff]  ;;  %v4939_v35 = vld.sshfl [vmem:[#allocation1] sm:$0xff pattern:$0x73625140] }
 0x389   :  { %1755 = vmatpush.msrb.mxu1 %v1164_v26  ;;  %1777 = vmatpush.msrb.mxu2 %v1220_v38  ;;  %v1204_v7 = vld [vmem:[%s5974_s14 + $0xcf0] sm:$0xff]  ;;  %v4942_v26 = vld.sshfl [vmem:[#allocation1 + $0x18] sm:$0xff pattern:$0x73625140] }
 0x38a   :  { %1796 = vmatpush.msrb.mxu3 %v1288_v51  ;;  %1737 = vmatpush.msrb.mxu0 %v1092_v52  ;;  %v1272_v46 = vld [vmem:[%s5974_s14 + $0xf10] sm:$0xff]  ;;  %v917_v38 = vld [vmem:[%s5974_s14 + $0x3f8] sm:$0xff] }
 0x38b   :  { %1756 = vmatpush.msrb.mxu1 %v1160_v11  ;;  %1778 = vmatpush.msrb.mxu2 %v1216_v53  ;;  %v1076_v12 = vld [vmem:[%s5974_s14 + $0x8f0] sm:$0xff]  ;;  %v973_v51 = vld [vmem:[%s5974_s14 + $0x5b8] sm:$0xff]  ;;  %v4960_v11 = vld.sshfl [vmem:[#allocation1 + $0x8] sm:$0xff pattern:$0x73625140] }
 0x38c   :  { %1797 = vmatpush.msrb.mxu3 %v1284_v56  ;;  %1738 = vmatpush.msrb.mxu0 %v1088_v57  ;;  %v1144_v54 = vld [vmem:[%s5974_s14 + $0xb10] sm:$0xff]  ;;  %v845_v52 = vld [vmem:[%s5974_s14 + $0x1b8] sm:$0xff] }
 0x38d   :  { %1757 = vmatpush.msrb.mxu1 %v1156_v58  ;;  %1779 = vmatpush.msrb.mxu2 %v1212_v60  ;;  %v1200_v13 = vld [vmem:[%s5974_s14 + $0xcd0] sm:$0xff]  ;;  %v969_v53 = vld [vmem:[%s5974_s14 + $0x598] sm:$0xff] }
 0x38e   :  { %1798 = vmatpush.msrb.mxu3 %v1280_v61  ;;  %1739 = vmatpush.msrb.mxu0 %v1084_v63  ;;  %v1268_v15 = vld [vmem:[%s5974_s14 + $0xef0] sm:$0xff]  ;;  %v1037_v56 = vld [vmem:[%s5974_s14 + $0x7b8] sm:$0xff] }
 0x38f   :  { %1758 = vmatpush.msrb.mxu1 %v1152_v0  ;;  %1780 = vmatpush.msrb.mxu2 %v1208_v1  ;;  %v1072_v55 = vld [vmem:[%s5974_s14 + $0x8d0] sm:$0xff]  ;;  %v841_v57 = vld [vmem:[%s5974_s14 + $0x198] sm:$0xff] }
 0x390   :  { %1799 = vmatpush.msrb.mxu3 %v1276_v47  ;;  %1740 = vmatpush.msrb.mxu0 %v1080_v5  ;;  %v1140_v16 = vld [vmem:[%s5974_s14 + $0xaf0] sm:$0xff]  ;;  %v909_v58 = vld [vmem:[%s5974_s14 + $0x3b8] sm:$0xff] }
 0x391   :  { %1759 = vmatpush.msrb.mxu1 %v1148_v6  ;;  %1781 = vmatpush.msrb.mxu2 %v1204_v7  ;;  %v1196_v59 = vld [vmem:[%s5974_s14 + $0xcb0] sm:$0xff]  ;;  %v965_v60 = vld [vmem:[%s5974_s14 + $0x578] sm:$0xff] }
 0x392   :  { %1800 = vmatpush.msrb.mxu3 %v1272_v46  ;;  %708 = vadd.xlane.f32.xlu1 %v707_v8  ;;  %v1264_v17 = vld [vmem:[%s5974_s14 + $0xed0] sm:$0xff]  ;;  %v1033_v61 = vld [vmem:[%s5974_s14 + $0x798] sm:$0xff] }
 0x393   :  { %1741 = vmatpush.msrb.mxu0 %v1076_v12  ;;  %1760 = vmatpush.msrb.mxu1 %v1144_v54  ;;  %v1068_v19 = vld [vmem:[%s5974_s14 + $0x8b0] sm:$0xff]  ;;  %v837_v63 = vld [vmem:[%s5974_s14 + $0x178] sm:$0xff] }
 0x394   :  { %1782 = vmatpush.msrb.mxu2 %v1200_v13  ;;  %1801 = vmatpush.msrb.mxu3 %v1268_v15  ;;  %v1136_v20 = vld [vmem:[%s5974_s14 + $0xad0] sm:$0xff]  ;;  %v905_v0 = vld [vmem:[%s5974_s14 + $0x398] sm:$0xff] }
 0x395   :  { %1742 = vmatpush.msrb.mxu0 %v1072_v55  ;;  %v1192_v2 = vld [vmem:[%s5974_s14 + $0xc90] sm:$0xff]  ;;  %1761 = vmatpush.msrb.mxu1 %v1140_v16  ;;  %v961_v1 = vld [vmem:[%s5974_s14 + $0x558] sm:$0xff] }
 0x396   :  { %1783 = vmatpush.msrb.mxu2 %v1196_v59  ;;  %v1260_v21 = vld [vmem:[%s5974_s14 + $0xeb0] sm:$0xff]  ;;  %1802 = vmatpush.msrb.mxu3 %v1264_v17  ;;  %v1029_v47 = vld [vmem:[%s5974_s14 + $0x778] sm:$0xff] }
 0x397   :  { %v1064_v22 = vld [vmem:[%s5974_s14 + $0x890] sm:$0xff]  ;;  %1743 = vmatpush.msrb.mxu0 %v1068_v19  ;;  %1762 = vmatpush.msrb.mxu1 %v1136_v20  ;;  %v833_v5 = vld [vmem:[%s5974_s14 + $0x158] sm:$0xff] }
 0x398   :  { %v1132_v23 = vld [vmem:[%s5974_s14 + $0xab0] sm:$0xff]  ;;  %1784 = vmatpush.msrb.mxu2 %v1192_v2  ;;  %1803 = vmatpush.msrb.mxu3 %v1260_v21  ;;  %v901_v6 = vld [vmem:[%s5974_s14 + $0x378] sm:$0xff] }
 0x399   :  { %v1188_v24 = vld [vmem:[%s5974_s14 + $0xc70] sm:$0xff]  ;;  %1744 = vmatpush.msrb.mxu0 %v1064_v22  ;;  %1763 = vmatpush.msrb.mxu1 %v1132_v23  ;;  %v957_v7 = vld [vmem:[%s5974_s14 + $0x538] sm:$0xff] }
 0x39a   :  { %v1256_v25 = vld [vmem:[%s5974_s14 + $0xe90] sm:$0xff]  ;;  %1785 = vmatpush.msrb.mxu2 %v1188_v24  ;;  %1669 = vmatmul.f32.vlgmr.msra.gmra.mxu0 %v4939_v35  ;;  %v1025_v46 = vld [vmem:[%s5974_s14 + $0x758] sm:$0xff] }
 0x39b   :  { %v1060_v27 = vld [vmem:[%s5974_s14 + $0x870] sm:$0xff]  ;;  %1804 = vmatpush.msrb.mxu3 %v1256_v25  ;;  %1689 = vmatmul.f32.vlgmr.msra.gmra.mxu1 %v4960_v11  ;;  %v829_v8 = vld [vmem:[%s5974_s14 + $0x138] sm:$0xff] }
 0x39c   :  { %v1128_v4 = vld [vmem:[%s5974_s14 + $0xa90] sm:$0xff]  ;;  %1745 = vmatpush.msrb.mxu0 %v1060_v27  ;;  %1729 = vmatmul.f32.vlgmr.msra.gmra.mxu3 %v4942_v26  ;;  %v897_v12 = vld [vmem:[%s5974_s14 + $0x358] sm:$0xff] }
 0x39d   :  { %v1184_v28 = vld [vmem:[%s5974_s14 + $0xc50] sm:$0xff]  ;;  %1764 = vmatpush.msrb.mxu1 %v1128_v4  ;;  %v953_v54 = vld [vmem:[%s5974_s14 + $0x518] sm:$0xff] }
 0x39e   :  { %v1252_v29 = vld [vmem:[%s5974_s14 + $0xe70] sm:$0xff]  ;;  %1786 = vmatpush.msrb.mxu2 %v1184_v28  ;;  %v1021_v13 = vld [vmem:[%s5974_s14 + $0x738] sm:$0xff] }
 0x39f   :  { %v1056_v9 = vld [vmem:[%s5974_s14 + $0x850] sm:$0xff]  ;;  %1805 = vmatpush.msrb.mxu3 %v1252_v29  ;;  %v825_v15 = vld [vmem:[%s5974_s14 + $0x118] sm:$0xff] }
 0x3a0   :  { %v1124_v39 = vld [vmem:[%s5974_s14 + $0xa70] sm:$0xff]  ;;  %1746 = vmatpush.msrb.mxu0 %v1056_v9  ;;  %v893_v55 = vld [vmem:[%s5974_s14 + $0x338] sm:$0xff] }
 0x3a1   :  { %v1180_v10 = vld [vmem:[%s5974_s14 + $0xc30] sm:$0xff]  ;;  %1765 = vmatpush.msrb.mxu1 %v1124_v39  ;;  %v949_v16 = vld [vmem:[%s5974_s14 + $0x4f8] sm:$0xff] }
 0x3a2   :  { %v1248_v40 = vld [vmem:[%s5974_s14 + $0xe50] sm:$0xff]  ;;  %1787 = vmatpush.msrb.mxu2 %v1180_v10  ;;  %v1017_v59 = vld [vmem:[%s5974_s14 + $0x718] sm:$0xff] }
 0x3a3   :  { %v1052_v41 = vld [vmem:[%s5974_s14 + $0x830] sm:$0xff]  ;;  %1806 = vmatpush.msrb.mxu3 %v1248_v40  ;;  %v821_v17 = vld [vmem:[%s5974_s14 + $0xf8] sm:$0xff] }
 0x3a4   :  { %v1120_v42 = vld [vmem:[%s5974_s14 + $0xa50] sm:$0xff]  ;;  %1747 = vmatpush.msrb.mxu0 %v1052_v41  ;;  %v889_v19 = vld [vmem:[%s5974_s14 + $0x318] sm:$0xff] }
 0x3a5   :  { %v1176_v44 = vld [vmem:[%s5974_s14 + $0xc10] sm:$0xff]  ;;  %1766 = vmatpush.msrb.mxu1 %v1120_v42  ;;  %v945_v20 = vld [vmem:[%s5974_s14 + $0x4d8] sm:$0xff] }
 0x3a6   :  { %v1244_v45 = vld [vmem:[%s5974_s14 + $0xe30] sm:$0xff]  ;;  %1788 = vmatpush.msrb.mxu2 %v1176_v44  ;;  %v1013_v2 = vld [vmem:[%s5974_s14 + $0x6f8] sm:$0xff] }
 0x3a7   :  { %v1048_v48 = vld [vmem:[%s5974_s14 + $0x810] sm:$0xff]  ;;  %1807 = vmatpush.msrb.mxu3 %v1244_v45  ;;  %v817_v21 = vld [vmem:[%s5974_s14 + $0xd8] sm:$0xff] }
 0x3a8   :  { %v1116_v49 = vld [vmem:[%s5974_s14 + $0xa30] sm:$0xff]  ;;  %1748 = vmatpush.msrb.mxu0 %v1048_v48  ;;  %v885_v22 = vld [vmem:[%s5974_s14 + $0x2f8] sm:$0xff] }
 0x3a9   :  { %v1240_v50 = vld [vmem:[%s5974_s14 + $0xe10] sm:$0xff]  ;;  %1767 = vmatpush.msrb.mxu1 %v1116_v49  ;;  %v941_v23 = vld [vmem:[%s5974_s14 + $0x4b8] sm:$0xff] }
 0x3aa   :  { %v4924_v30 = vld.sshfl [vmem:[#allocation1 + $0x10] sm:$0xff pattern:$0x73625140]  ;;  %1808 = vmatpush.msrb.mxu3 %v1240_v50  ;;  %1813 = vmatpush.msra.mxu0 %v853_v31  ;;  %v1009_v24 = vld [vmem:[%s5974_s14 + $0x6d8] sm:$0xff] }
 0x3ab   :  { %1709 = vmatmul.f32.vlgmr.msra.gmra.mxu2 %v4924_v30  ;;  %v1112_v34 = vld [vmem:[%s5974_s14 + $0xa10] sm:$0xff]  ;;  %v813_v25 = vld [vmem:[%s5974_s14 + $0xb8] sm:$0xff] }
 0x3ac   :  { %1853 = vmatpush.msra.mxu2 %v981_v18  ;;  %1873 = vmatpush.msra.mxu3 %v1045_v33  ;;  %v881_v27 = vld [vmem:[%s5974_s14 + $0x2d8] sm:$0xff] }
 0x3ad   :  { %1768 = vmatpush.msrb.mxu1 %v1112_v34  ;;  %1814 = vmatpush.msra.mxu0 %v849_v37  ;;  %v937_v4 = vld [vmem:[%s5974_s14 + $0x498] sm:$0xff] }
 0x3ae   :  { %1854 = vmatpush.msra.mxu2 %v977_v32  ;;  %1874 = vmatpush.msra.mxu3 %v1041_v36  ;;  %v1005_v28 = vld [vmem:[%s5974_s14 + $0x6b8] sm:$0xff]  ;;  %v5128_v36 = vld.sshfl [vmem:[#allocation1 + $0x30] sm:$0xff pattern:$0x73625140] }
 0x3af   :  { %1833 = vmatpush.msra.mxu1 %v917_v38  ;;  %1815 = vmatpush.msra.mxu0 %v845_v52  ;;  %v809_v29 = vld [vmem:[%s5974_s14 + $0x98] sm:$0xff] }
 0x3b0   :  { %1855 = vmatpush.msra.mxu2 %v973_v51  ;;  %1875 = vmatpush.msra.mxu3 %v1037_v56  ;;  %v877_v9 = vld [vmem:[%s5974_s14 + $0x2b8] sm:$0xff] }
 0x3b1   :  { %1834 = vmatpush.msra.mxu1 %v913_v14  ;;  %1816 = vmatpush.msra.mxu0 %v841_v57  ;;  %v933_v39 = vld [vmem:[%s5974_s14 + $0x478] sm:$0xff]  ;;  %v5143_v57 = vld.sshfl [vmem:[#allocation1 + $0x20] sm:$0xff pattern:$0x73625140] }
 0x3b2   :  { %1856 = vmatpush.msra.mxu2 %v969_v53  ;;  %1876 = vmatpush.msra.mxu3 %v1033_v61  ;;  %v1001_v10 = vld [vmem:[%s5974_s14 + $0x698] sm:$0xff] }
 0x3b3   :  { %1835 = vmatpush.msra.mxu1 %v909_v58  ;;  %1817 = vmatpush.msra.mxu0 %v837_v63  ;;  %v805_v40 = vld [vmem:[%s5974_s14 + $0x78] sm:$0xff] }
 0x3b4   :  { %1857 = vmatpush.msra.mxu2 %v965_v60  ;;  %1877 = vmatpush.msra.mxu3 %v1029_v47  ;;  %v873_v41 = vld [vmem:[%s5974_s14 + $0x298] sm:$0xff]  ;;  %v5164_v47 = vld.sshfl [vmem:[#allocation1 + $0x28] sm:$0xff pattern:$0x73625140] }
 0x3b5   :  { %1836 = vmatpush.msra.mxu1 %v905_v0  ;;  %1818 = vmatpush.msra.mxu0 %v833_v5  ;;  %v929_v42 = vld [vmem:[%s5974_s14 + $0x458] sm:$0xff] }
 0x3b6   :  { %1858 = vmatpush.msra.mxu2 %v961_v1  ;;  %1878 = vmatpush.msra.mxu3 %v1025_v46  ;;  %v997_v44 = vld [vmem:[%s5974_s14 + $0x678] sm:$0xff] }
 0x3b7   :  { %1837 = vmatpush.msra.mxu1 %v901_v6  ;;  %1819 = vmatpush.msra.mxu0 %v829_v8  ;;  %v801_v45 = vld [vmem:[%s5974_s14 + $0x58] sm:$0xff] }
 0x3b8   :  { %1859 = vmatpush.msra.mxu2 %v957_v7  ;;  %1879 = vmatpush.msra.mxu3 %v1021_v13  ;;  %v869_v18 = vld [vmem:[%s5974_s14 + $0x278] sm:$0xff] }
 0x3b9   :  { %1838 = vmatpush.msra.mxu1 %v897_v12  ;;  %1820 = vmatpush.msra.mxu0 %v825_v15  ;;  %v925_v48 = vld [vmem:[%s5974_s14 + $0x438] sm:$0xff] }
 0x3ba   :  { %1860 = vmatpush.msra.mxu2 %v953_v54  ;;  %1880 = vmatpush.msra.mxu3 %v1017_v59  ;;  %v993_v49 = vld [vmem:[%s5974_s14 + $0x658] sm:$0xff] }
 0x3bb   :  { %1839 = vmatpush.msra.mxu1 %v893_v55  ;;  %1821 = vmatpush.msra.mxu0 %v821_v17  ;;  %v797_v50 = vld [vmem:[%s5974_s14 + $0x38] sm:$0xff] }
 0x3bc   :  { %1861 = vmatpush.msra.mxu2 %v949_v16  ;;  %1881 = vmatpush.msra.mxu3 %v1013_v2  ;;  %v865_v31 = vld [vmem:[%s5974_s14 + $0x258] sm:$0xff] }
 0x3bd   :  { %1840 = vmatpush.msra.mxu1 %v889_v19  ;;  %1822 = vmatpush.msra.mxu0 %v817_v21  ;;  %v921_v32 = vld [vmem:[%s5974_s14 + $0x418] sm:$0xff] }
 0x3be   :  { %1862 = vmatpush.msra.mxu2 %v945_v20  ;;  %1882 = vmatpush.msra.mxu3 %v1009_v24  ;;  %v989_v33 = vld [vmem:[%s5974_s14 + $0x638] sm:$0xff] }
 0x3bf   :  { %1841 = vmatpush.msra.mxu1 %v885_v22  ;;  %1823 = vmatpush.msra.mxu0 %v813_v25  ;;  %v1237_v34 = vld [vmem:[%s5974_s14 + $0xdf8] sm:$0xff] }
 0x3c0   :  { %1863 = vmatpush.msra.mxu2 %v941_v23  ;;  %1883 = vmatpush.msra.mxu3 %v1005_v28  ;;  %v793_v37 = vld [vmem:[%s5974_s14 + $0x18] sm:$0xff] }
 0x3c1   :  { %1842 = vmatpush.msra.mxu1 %v881_v27  ;;  %1824 = vmatpush.msra.mxu0 %v809_v29  ;;  %v861_v38 = vld [vmem:[%s5974_s14 + $0x238] sm:$0xff] }
 0x3c2   :  { %1864 = vmatpush.msra.mxu2 %v937_v4  ;;  %1884 = vmatpush.msra.mxu3 %v1001_v10  ;;  %v985_v51 = vld [vmem:[%s5974_s14 + $0x618] sm:$0xff] }
 0x3c3   :  { %1843 = vmatpush.msra.mxu1 %v877_v9  ;;  %1825 = vmatpush.msra.mxu0 %v805_v40  ;;  %v1109_v52 = vld [vmem:[%s5974_s14 + $0x9f8] sm:$0xff] }
 0x3c4   :  { %1865 = vmatpush.msra.mxu2 %v933_v39  ;;  %1885 = vmatpush.msra.mxu3 %v997_v44  ;;  %v1233_v14 = vld [vmem:[%s5974_s14 + $0xdd8] sm:$0xff] }
 0x3c5   :  { %1844 = vmatpush.msra.mxu1 %v873_v41  ;;  %1826 = vmatpush.msra.mxu0 %v801_v45  ;;  %v1301_v53 = vld [vmem:[%s5974_s14 + $0xff8] sm:$0xff] }
 0x3c6   :  { %1866 = vmatpush.msra.mxu2 %v929_v42  ;;  %1886 = vmatpush.msra.mxu3 %v993_v49  ;;  %v857_v56 = vld [vmem:[%s5974_s14 + $0x218] sm:$0xff] }
 0x3c7   :  { %1845 = vmatpush.msra.mxu1 %v869_v18  ;;  %1827 = vmatpush.msra.mxu0 %v797_v50  ;;  %v5146_v58 = vld.sshfl [vmem:[#allocation1 + $0x38] sm:$0xff pattern:$0x73625140] }
 0x3c8   :  { %1867 = vmatpush.msra.mxu2 %v925_v48  ;;  %1887 = vmatpush.msra.mxu3 %v989_v33  ;;  %v1105_v60 = vld [vmem:[%s5974_s14 + $0x9d8] sm:$0xff] }
 0x3c9   :  { %1846 = vmatpush.msra.mxu1 %v865_v31  ;;  %1789 = vmatmul.f32.vlgmr.msrb.gmra.mxu2 %v5128_v36  ;;  %v1173_v61 = vld [vmem:[%s5974_s14 + $0xbf8] sm:$0xff] }
 0x3ca   :  { %1868 = vmatpush.msra.mxu2 %v921_v32  ;;  %1828 = vmatpush.msra.mxu0 %v793_v37  ;;  %v1229_v63 = vld [vmem:[%s5974_s14 + $0xdb8] sm:$0xff] }
 0x3cb   :  { %1847 = vmatpush.msra.mxu1 %v861_v38  ;;  %1888 = vmatpush.msra.mxu3 %v985_v51  ;;  %v1297_v0 = vld [vmem:[%s5974_s14 + $0xfd8] sm:$0xff] }
 0x3cc   :  { %1933 = vmatpush.msrb.mxu2 %v1237_v34  ;;  %1749 = vmatmul.f32.vlgmr.msrb.gmra.mxu0 %v5143_v57  ;;  %v1101_v1 = vld [vmem:[%s5974_s14 + $0x9b8] sm:$0xff] }
 0x3cd   :  { %1809 = vmatmul.f32.vlgmr.msrb.gmra.mxu3 %v5146_v58  ;;  %1893 = vmatpush.msrb.mxu0 %v1109_v52  ;;  %v1169_v5 = vld [vmem:[%s5974_s14 + $0xbd8] sm:$0xff] }
 0x3ce   :  { %1934 = vmatpush.msrb.mxu2 %v1233_v14  ;;  %1953 = vmatpush.msrb.mxu3 %v1301_v53  ;;  %v1225_v6 = vld [vmem:[%s5974_s14 + $0xd98] sm:$0xff] }
 0x3cf   :  { %1848 = vmatpush.msra.mxu1 %v857_v56  ;;  %1894 = vmatpush.msrb.mxu0 %v1105_v60  ;;  %v1293_v7 = vld [vmem:[%s5974_s14 + $0xfb8] sm:$0xff] }
 0x3d0   :  { %1769 = vmatmul.f32.vlgmr.msrb.gmra.mxu1 %v5164_v47  ;;  %1935 = vmatpush.msrb.mxu2 %v1229_v63  ;;  %v1097_v46 = vld [vmem:[%s5974_s14 + $0x998] sm:$0xff] }
 0x3d1   :  { %1913 = vmatpush.msrb.mxu1 %v1173_v61  ;;  %1954 = vmatpush.msrb.mxu3 %v1297_v0  ;;  %v1165_v8 = vld [vmem:[%s5974_s14 + $0xbb8] sm:$0xff] }
 0x3d2   :  { %1895 = vmatpush.msrb.mxu0 %v1101_v1  ;;  %v1221_v12 = vld [vmem:[%s5974_s14 + $0xd78] sm:$0xff]  ;;  %1936 = vmatpush.msrb.mxu2 %v1225_v6 }
 0x3d3   :  { %1914 = vmatpush.msrb.mxu1 %v1169_v5  ;;  %v1289_v54 = vld [vmem:[%s5974_s14 + $0xf98] sm:$0xff]  ;;  %1955 = vmatpush.msrb.mxu3 %v1293_v7 }
 0x3d4   :  { %v1093_v13 = vld [vmem:[%s5974_s14 + $0x978] sm:$0xff]  ;;  %1896 = vmatpush.msrb.mxu0 %v1097_v46  ;;  %1937 = vmatpush.msrb.mxu2 %v1221_v12  ;;  %v1370_v46 = vpop.f32.mrf.mxu1  ;;  %v5353_v12 = vpop.f32.mrf.mxu3 }
 0x3d5   :  { %v1161_v15 = vld [vmem:[%s5974_s14 + $0xb98] sm:$0xff]  ;;  %1915 = vmatpush.msrb.mxu1 %v1165_v8  ;;  %1956 = vmatpush.msrb.mxu3 %v1289_v54 }
 0x3d6   :  { %v1217_v55 = vld [vmem:[%s5974_s14 + $0xd58] sm:$0xff]  ;;  %1897 = vmatpush.msrb.mxu0 %v1093_v13  ;;  %1869 = vmatmul.f32.vlgmr.msra.gmra.mxu2 %v4924_v30 }
 0x3d7   :  { %v1285_v16 = vld [vmem:[%s5974_s14 + $0xf78] sm:$0xff]  ;;  %1916 = vmatpush.msrb.mxu1 %v1161_v15  ;;  %1938 = vmatpush.msrb.mxu2 %v1217_v55 }
 0x3d8   :  { %v1089_v59 = vld [vmem:[%s5974_s14 + $0x958] sm:$0xff]  ;;  %1957 = vmatpush.msrb.mxu3 %v1285_v16  ;;  %1829 = vmatmul.f32.vlgmr.msra.gmra.mxu0 %v4939_v35 }
 0x3d9   :  { %v1157_v17 = vld [vmem:[%s5974_s14 + $0xb78] sm:$0xff]  ;;  %1898 = vmatpush.msrb.mxu0 %v1089_v59  ;;  %1889 = vmatmul.f32.vlgmr.msra.gmra.mxu3 %v4942_v26 }
 0x3da   :  { %v1213_v19 = vld [vmem:[%s5974_s14 + $0xd38] sm:$0xff]  ;;  %1917 = vmatpush.msrb.mxu1 %v1157_v17 }
 0x3db   :  { %v1281_v20 = vld [vmem:[%s5974_s14 + $0xf58] sm:$0xff]  ;;  %1939 = vmatpush.msrb.mxu2 %v1213_v19  ;;  %1849 = vmatmul.f32.vlgmr.msra.gmra.mxu1 %v4960_v11 }
 0x3dc   :  { %v1085_v2 = vld [vmem:[%s5974_s14 + $0x938] sm:$0xff]  ;;  %1958 = vmatpush.msrb.mxu3 %v1281_v20  ;;  %v5359_v13 = vpop.f32.mrf.mxu3 }
 0x3dd   :  { %v1153_v21 = vld [vmem:[%s5974_s14 + $0xb58] sm:$0xff]  ;;  %1899 = vmatpush.msrb.mxu0 %v1085_v2 }
 0x3de   :  { %v1209_v22 = vld [vmem:[%s5974_s14 + $0xd18] sm:$0xff]  ;;  %1918 = vmatpush.msrb.mxu1 %v1153_v21 }
 0x3df   :  { %v1277_v23 = vld [vmem:[%s5974_s14 + $0xf38] sm:$0xff]  ;;  %1940 = vmatpush.msrb.mxu2 %v1209_v22 }
 0x3e0   :  { %v1081_v24 = vld [vmem:[%s5974_s14 + $0x918] sm:$0xff]  ;;  %1959 = vmatpush.msrb.mxu3 %v1277_v23 }
 0x3e1   :  { %v1149_v25 = vld [vmem:[%s5974_s14 + $0xb38] sm:$0xff]  ;;  %1900 = vmatpush.msrb.mxu0 %v1081_v24  ;;  %v1302_v24 = vld [vmem:[%s5975_s15] sm:$0xf] }
 0x3e2   :  { %v1205_v27 = vld [vmem:[%s5974_s14 + $0xcf8] sm:$0xff]  ;;  %1919 = vmatpush.msrb.mxu1 %v1149_v25 }
 0x3e3   :  { %v1273_v4 = vld [vmem:[%s5974_s14 + $0xf18] sm:$0xff]  ;;  %1941 = vmatpush.msrb.mxu2 %v1205_v27  ;;  %v1305_v27 = vperm.slane %v1302_v24, 1 }
 0x3e4   :  { %v1077_v28 = vld [vmem:[%s5974_s14 + $0x8f8] sm:$0xff]  ;;  %1960 = vmatpush.msrb.mxu3 %v1273_v4  ;;  %v1570_v59 = vpop.f32.mrf.mxu3 }
 0x3e5   :  { %v1145_v29 = vld [vmem:[%s5974_s14 + $0xb18] sm:$0xff]  ;;  %1901 = vmatpush.msrb.mxu0 %v1077_v28 }
 0x3e6   :  { %v1201_v9 = vld [vmem:[%s5974_s14 + $0xcd8] sm:$0xff]  ;;  %1920 = vmatpush.msrb.mxu1 %v1145_v29 }
 0x3e7   :  { %v1269_v39 = vld [vmem:[%s5974_s14 + $0xef8] sm:$0xff]  ;;  %1942 = vmatpush.msrb.mxu2 %v1201_v9  ;;  %v1304_v9 = vperm.slane %v1302_v24, 0 }
 0x3e8   :  { %v1073_v10 = vld [vmem:[%s5974_s14 + $0x8d8] sm:$0xff]  ;;  %1961 = vmatpush.msrb.mxu3 %v1269_v39  ;;  %v1307_v39 = vperm.slane %v1302_v24, 3 }
 0x3e9   :  { %v1141_v40 = vld [vmem:[%s5974_s14 + $0xaf8] sm:$0xff]  ;;  %1902 = vmatpush.msrb.mxu0 %v1073_v10 }
 0x3ea   :  { %v1197_v41 = vld [vmem:[%s5974_s14 + $0xcb8] sm:$0xff]  ;;  %1921 = vmatpush.msrb.mxu1 %v1141_v40 }
 0x3eb   :  { %v1265_v42 = vld [vmem:[%s5974_s14 + $0xed8] sm:$0xff]  ;;  %1943 = vmatpush.msrb.mxu2 %v1197_v41 }
 0x3ec   :  { %v1069_v44 = vld [vmem:[%s5974_s14 + $0x8b8] sm:$0xff]  ;;  %1962 = vmatpush.msrb.mxu3 %v1265_v42  ;;  %v5365_v2 = vpop.f32.mrf.mxu3 }
 0x3ed   :  { %v1137_v45 = vld [vmem:[%s5974_s14 + $0xad8] sm:$0xff]  ;;  %1903 = vmatpush.msrb.mxu0 %v1069_v44 }
 0x3ee   :  { %v1193_v18 = vld [vmem:[%s5974_s14 + $0xc98] sm:$0xff]  ;;  %1922 = vmatpush.msrb.mxu1 %v1137_v45 }
 0x3ef   :  { %v1261_v48 = vld [vmem:[%s5974_s14 + $0xeb8] sm:$0xff]  ;;  %1944 = vmatpush.msrb.mxu2 %v1193_v18 }
 0x3f0   :  { %v1065_v49 = vld [vmem:[%s5974_s14 + $0x898] sm:$0xff]  ;;  %1963 = vmatpush.msrb.mxu3 %v1261_v48  ;;  %v1306_v48 = vperm.slane %v1302_v24, 2  ;;  %v2046_v24 = vld [vmem:[%s5976_s16 + $0xa0] sm:$0xff] }
 0x3f1   :  { %v1133_v50 = vld [vmem:[%s5974_s14 + $0xab8] sm:$0xff]  ;;  %1904 = vmatpush.msrb.mxu0 %v1065_v49 }
 0x3f2   :  { %v1189_v31 = vld [vmem:[%s5974_s14 + $0xc78] sm:$0xff]  ;;  %1923 = vmatpush.msrb.mxu1 %v1133_v50 }
 0x3f3   :  { %v1257_v32 = vld [vmem:[%s5974_s14 + $0xe98] sm:$0xff]  ;;  %1945 = vmatpush.msrb.mxu2 %v1189_v31 }
 0x3f4   :  { %v1061_v33 = vld [vmem:[%s5974_s14 + $0x878] sm:$0xff]  ;;  %1964 = vmatpush.msrb.mxu3 %v1257_v32 }
 0x3f5   :  { %v1129_v34 = vld [vmem:[%s5974_s14 + $0xa98] sm:$0xff]  ;;  %1905 = vmatpush.msrb.mxu0 %v1061_v33 }
 0x3f6   :  { %v1185_v37 = vld [vmem:[%s5974_s14 + $0xc58] sm:$0xff]  ;;  %1924 = vmatpush.msrb.mxu1 %v1129_v34  ;;  %v2056_v34 = vld [vmem:[%s5976_s16 + $0xf0] sm:$0xff] }
 0x3f7   :  { %v1253_v30 = vld [vmem:[%s5974_s14 + $0xe78] sm:$0xff]  ;;  %1946 = vmatpush.msrb.mxu2 %v1185_v37  ;;  %v2088_v37 = vld [vmem:[%s5976_s16 + $0x1f0] sm:$0xff] }
 0x3f8   :  { %v1057_v38 = vld [vmem:[%s5974_s14 + $0x858] sm:$0xff]  ;;  %1965 = vmatpush.msrb.mxu3 %v1253_v30 }
 0x3f9   :  { %v1125_v51 = vld [vmem:[%s5974_s14 + $0xa78] sm:$0xff]  ;;  %1906 = vmatpush.msrb.mxu0 %v1057_v38 }
 0x3fa   :  { %v1181_v52 = vld [vmem:[%s5974_s14 + $0xc38] sm:$0xff]  ;;  %1925 = vmatpush.msrb.mxu1 %v1125_v51 }
 0x3fb   :  { %v1249_v35 = vld [vmem:[%s5974_s14 + $0xe58] sm:$0xff]  ;;  %1947 = vmatpush.msrb.mxu2 %v1181_v52 }
 0x3fc   :  { %v1053_v26 = vld [vmem:[%s5974_s14 + $0x838] sm:$0xff]  ;;  %1966 = vmatpush.msrb.mxu3 %v1249_v35  ;;  %v2054_v35 = vld [vmem:[%s5976_s16 + $0xe0] sm:$0xff] }
 0x3fd   :  { %v1121_v14 = vld [vmem:[%s5974_s14 + $0xa58] sm:$0xff]  ;;  %1907 = vmatpush.msrb.mxu0 %v1053_v26  ;;  %v2086_v26 = vld [vmem:[%s5976_s16 + $0x1e0] sm:$0xff] }
 0x3fe   :  { %v1177_v53 = vld [vmem:[%s5974_s14 + $0xc18] sm:$0xff]  ;;  %1926 = vmatpush.msrb.mxu1 %v1121_v14  ;;  %v2055_v14 = vld [vmem:[%s5976_s16 + $0xe8] sm:$0xff] }
 0x3ff   :  { %v1245_v56 = vld [vmem:[%s5974_s14 + $0xe38] sm:$0xff]  ;;  %1948 = vmatpush.msrb.mxu2 %v1177_v53 }
 0x400   :  { %v1049_v11 = vld [vmem:[%s5974_s14 + $0x818] sm:$0xff]  ;;  %1967 = vmatpush.msrb.mxu3 %v1245_v56  ;;  %1949 = vmatmul.f32.vlgmr.msrb.gmra.mxu2 %v5128_v36  ;;  %v2087_v56 = vld [vmem:[%s5976_s16 + $0x1e8] sm:$0xff] }
 0x401   :  { %v1117_v60 = vld [vmem:[%s5974_s14 + $0xa38] sm:$0xff]  ;;  %1908 = vmatpush.msrb.mxu0 %v1049_v11 }
 0x402   :  { %v1241_v61 = vld [vmem:[%s5974_s14 + $0xe18] sm:$0xff]  ;;  %1927 = vmatpush.msrb.mxu1 %v1117_v60  ;;  %1909 = vmatmul.f32.vlgmr.msrb.gmra.mxu0 %v5143_v57 }
 0x403   :  { %v1113_v63 = vld [vmem:[%s5974_s14 + $0xa18] sm:$0xff]  ;;  %1968 = vmatpush.msrb.mxu3 %v1241_v61  ;;  %2105 = vmatpush.msra.mxu0 %v2056_v34  ;;  %v2052_v61 = vld [vmem:[%s5976_s16 + $0xd0] sm:$0xff] }
 0x404   :  { %1969 = vmatmul.f32.vlgmr.msrb.gmra.mxu3 %v5146_v58  ;;  %1928 = vmatpush.msrb.mxu1 %v1113_v63  ;;  %v1350_v58 = vpop.f32.mrf.mxu0  ;;  %v2057_v30 = vld [vmem:[%s5976_s16 + $0xf8] sm:$0xff]  ;;  %v2084_v63 = vld [vmem:[%s5976_s16 + $0x1d0] sm:$0xff] }
 0x405   :  { %1929 = vmatmul.f32.vlgmr.msrb.gmra.mxu1 %v5164_v47  ;;  %v709_v0 = vpop.xlane.xlu1 %708  ;;  %v1390_v47 = vpop.f32.mrf.mxu2  ;;  %v1351_v42 = vadd.f32 %v1350_v58, %v1304_v9  ;;  %v2089_v38 = vld [vmem:[%s5976_s16 + $0x1f8] sm:$0xff]  ;;  %2145 = vmatpush.msra.mxu2 %v2057_v30  ;;  %v2082_v58 = vld [vmem:[%s5976_s16 + $0x1c0] sm:$0xff]  ;;  %v2040_v34 = vld [vmem:[%s5976_s16 + $0x70] sm:$0xff] }
 0x406   :  { %v710_v1 = vmul.f32 %v709_v0, %v3266_v43  ;;  %2125 = vmatpush.msra.mxu1 %v2088_v37  ;;  %2165 = vmatpush.msra.mxu3 %v2089_v38  ;;  %v2053_v0 = vld [vmem:[%s5976_s16 + $0xd8] sm:$0xff]  ;;  %v2072_v37 = vld [vmem:[%s5976_s16 + $0x170] sm:$0xff]  ;;  %v2070_v38 = vld [vmem:[%s5976_s16 + $0x160] sm:$0xff] }
 0x407   :  { %v1371_v49 = vadd.f32 %v1370_v46, %v1351_v42  ;;  %2106 = vmatpush.msra.mxu0 %v2054_v35  ;;  %2146 = vmatpush.msra.mxu2 %v2055_v14  ;;  %v2051_v46 = vld [vmem:[%s5976_s16 + $0xc8] sm:$0xff]  ;;  %v2044_v42 = vld [vmem:[%s5976_s16 + $0x90] sm:$0xff]  ;;  %v2041_v30 = vld [vmem:[%s5976_s16 + $0x78] sm:$0xff] }
 0x408   :  { %v5342_v5 = vsub.f32 %v4812_v3, %v710_v1  ;;  %v5345_v36 = vsub.f32 %v4797_v62, %v710_v1  ;;  %v5355_v3 = vpop.f32.mrf.mxu1  ;;  %2126 = vmatpush.msra.mxu1 %v2086_v26  ;;  %2166 = vmatpush.msra.mxu3 %v2087_v56  ;;  %v2085_v1 = vld [vmem:[%s5976_s16 + $0x1d8] sm:$0xff]  ;;  %v2039_v35 = vld [vmem:[%s5976_s16 + $0x68] sm:$0xff]  ;;  %v2036_v14 = vld [vmem:[%s5976_s16 + $0x50] sm:$0xff] }
 0x409   :  { %v1391_v51 = vadd.f32 %v1390_v47, %v1371_v49  ;;  %2107 = vmatpush.msra.mxu0 %v2052_v61  ;;  %2147 = vmatpush.msra.mxu2 %v2053_v0  ;;  %v2074_v49 = vld [vmem:[%s5976_s16 + $0x180] sm:$0xff]  ;;  %v2071_v26 = vld [vmem:[%s5976_s16 + $0x168] sm:$0xff]  ;;  %v2037_v56 = vld [vmem:[%s5976_s16 + $0x58] sm:$0xff] }
 0x40a   :  { %v713_v6 = vmul.f32 %v5342_v5, %v5342_v5  ;;  %v714_v57 = vmul.f32 %v5345_v36, %v5345_v36  ;;  %2127 = vmatpush.msra.mxu1 %v2084_v63  ;;  %2167 = vmatpush.msra.mxu3 %v2085_v1  ;;  %v2034_v63 = vld [vmem:[%s5976_s16 + $0x40] sm:$0xff] }
 0x40b   :  { %2148 = vmatpush.msra.mxu2 %v2051_v46  ;;  %v2066_v0 = vld [vmem:[%s5976_s16 + $0x140] sm:$0xff]  ;;  %v2032_v46 = vld [vmem:[%s5976_s16 + $0x30] sm:$0xff] }
 0x40c   :  { %v715_v7 = vadd.f32 %v714_v57, %v713_v6  ;;  %v5351_v8 = vpop.f32.mrf.mxu0  ;;  %v1411_v6 = vadd.f32 %v5353_v12, %v1391_v51  ;;  %2128 = vmatpush.msra.mxu1 %v2082_v58  ;;  %v2083_v12 = vld [vmem:[%s5976_s16 + $0x1c8] sm:$0xff] }
 0x40d   :  { %v5357_v54 = vpop.f32.mrf.mxu2  ;;  %2168 = vmatpush.msra.mxu3 %v2083_v12  ;;  %v2065_v12 = vld [vmem:[%s5976_s16 + $0x138] sm:$0xff] }
 0x40e   :  { %716 = vadd.xlane.f32.xlu1 %v715_v7  ;;  %v2050_v7 = vld [vmem:[%s5976_s16 + $0xc0] sm:$0xff] }
 0x40f   :  { %2108 = vmatpush.msra.mxu0 %v2050_v7 }
 0x410   :  { %v1530_v15 = vpop.f32.mrf.mxu1 }
 0x414   :  { %v1510_v62 = vpop.f32.mrf.mxu0 }
 0x415   :  { %v1550_v55 = vpop.f32.mrf.mxu2  ;;  %v1511_v28 = vadd.f32 %v1510_v62, %v1305_v27  ;;  %v2078_v27 = vld [vmem:[%s5976_s16 + $0x1a0] sm:$0xff] }
 0x417   :  { %v1531_v40 = vadd.f32 %v1530_v15, %v1511_v28  ;;  %v2047_v28 = vld [vmem:[%s5976_s16 + $0xa8] sm:$0xff] }
 0x418   :  { %v5361_v17 = vpop.f32.mrf.mxu1 }
 0x419   :  { %v1551_v18 = vadd.f32 %v1550_v55, %v1531_v40  ;;  %v2048_v55 = vld [vmem:[%s5976_s16 + $0xb0] sm:$0xff] }
 0x41a   :  { %2109 = vmatpush.msra.mxu0 %v2048_v55 }
 0x41b   :  { %v1571_v32 = vadd.f32 %v1570_v59, %v1551_v18  ;;  %v2049_v59 = vld [vmem:[%s5976_s16 + $0xb8] sm:$0xff] }
 0x41c   :  { %v1590_v16 = vpop.f32.mrf.mxu0  ;;  %2149 = vmatpush.msra.mxu2 %v2049_v59  ;;  %2110 = vmatpush.msra.mxu0 %v2046_v24  ;;  %v2062_v59 = vld [vmem:[%s5976_s16 + $0x120] sm:$0xff]  ;;  %v2028_v24 = vld [vmem:[%s5976_s16 + $0x10] sm:$0xff] }
 0x41d   :  { %v5363_v19 = vpop.f32.mrf.mxu2  ;;  %v1591_v11 = vadd.f32 %v1590_v16, %v1571_v32  ;;  %v2080_v16 = vld [vmem:[%s5976_s16 + $0x1b0] sm:$0xff] }
 0x41e   :  { %2129 = vmatpush.msra.mxu1 %v2080_v16  ;;  %2150 = vmatpush.msra.mxu2 %v2047_v28  ;;  %v2030_v16 = vld [vmem:[%s5976_s16 + $0x20] sm:$0xff] }
 0x41f   :  { %v5372_v25 = vpop.f32.mrf.mxu3  ;;  %v1611_v62 = vadd.f32 %v5361_v17, %v1591_v11  ;;  %v2081_v17 = vld [vmem:[%s5976_s16 + $0x1b8] sm:$0xff]  ;;  %2111 = vmatpush.msra.mxu0 %v2044_v42 }
 0x420   :  { %v1690_v21 = vpop.f32.mrf.mxu1  ;;  %2169 = vmatpush.msra.mxu3 %v2081_v17  ;;  %2130 = vmatpush.msra.mxu1 %v2078_v27  ;;  %v2069_v11 = vld [vmem:[%s5976_s16 + $0x158] sm:$0xff]  ;;  %v2060_v27 = vld [vmem:[%s5976_s16 + $0x110] sm:$0xff] }
 0x424   :  { %v1670_v20 = vpop.f32.mrf.mxu0 }
 0x425   :  { %v1671_v33 = vadd.f32 %v1670_v20, %v1306_v48  ;;  %v1431_v20 = vadd.f32 %v5351_v8, %v1411_v6  ;;  %v2079_v8 = vld [vmem:[%s5976_s16 + $0x1a8] sm:$0xff]  ;;  %v2042_v48 = vld [vmem:[%s5976_s16 + $0x80] sm:$0xff] }
 0x426   :  { %2170 = vmatpush.msra.mxu3 %v2079_v8  ;;  %2112 = vmatpush.msra.mxu0 %v2042_v48  ;;  %v2035_v6 = vld [vmem:[%s5976_s16 + $0x48] sm:$0xff] }
 0x427   :  { %v1691_v60 = vadd.f32 %v1690_v21, %v1671_v33 }
 0x428   :  { %2113 = vmatpush.msra.mxu0 %v2040_v34 }
 0x42e   :  { %v1710_v22 = vpop.f32.mrf.mxu2 }
 0x42f   :  { %v1711_v15 = vadd.f32 %v1710_v22, %v1691_v60 }
 0x431   :  { %v1731_v40 = vadd.f32 %v5372_v25, %v1711_v15  ;;  %v1451_v25 = vadd.f32 %v5355_v3, %v1431_v20  ;;  %v2075_v3 = vld [vmem:[%s5976_s16 + $0x188] sm:$0xff] }
 0x432   :  { %v2063_v20 = vld [vmem:[%s5976_s16 + $0x128] sm:$0xff] }
 0x433   :  { %v1471_v51 = vadd.f32 %v5357_v54, %v1451_v25  ;;  %v2068_v54 = vld [vmem:[%s5976_s16 + $0x150] sm:$0xff]  ;;  %v2059_v25 = vld [vmem:[%s5976_s16 + $0x108] sm:$0xff] }
 0x449   :  { %v5367_v23 = vpop.f32.mrf.mxu0 }
 0x44a   :  { %v1751_v33 = vadd.f32 %v5367_v23, %v1731_v40  ;;  %v2038_v23 = vld [vmem:[%s5976_s16 + $0x60] sm:$0xff] }
 0x44b   :  { %2114 = vmatpush.msra.mxu0 %v2038_v23  ;;  %v705_v40 = vld [vmem:[%s5972_s12] sm:$0x3] }
 0x44c   :  { %v5376_v29 = vpop.f32.mrf.mxu2  ;;  %v2215_v23 = vld [vmem:[%s5978_s18 + $0xe0] sm:$0xff] }
 0x44d   :  { %v5374_v4 = vpop.f32.mrf.mxu1  ;;  %2115 = vmatpush.msra.mxu0 %v2036_v14  ;;  %v2247_v14 = vld [vmem:[%s5978_s18 + $0x1e0] sm:$0xff] }
 0x44e   :  { %v1771_v61 = vadd.f32 %v5374_v4, %v1751_v33  ;;  %v2067_v4 = vld [vmem:[%s5976_s16 + $0x148] sm:$0xff]  ;;  %v2250_v33 = vld [vmem:[%s5978_s18 + $0x1f8] sm:$0xff] }
 0x44f   :  { %2116 = vmatpush.msra.mxu0 %v2034_v63  ;;  %v2246_v63 = vld [vmem:[%s5978_s18 + $0x1d8] sm:$0xff] }
 0x450   :  { %v5378_v41 = vpop.f32.mrf.mxu3  ;;  %v1791_v15 = vadd.f32 %v5376_v29, %v1771_v61  ;;  %v2031_v29 = vld [vmem:[%s5976_s16 + $0x28] sm:$0xff]  ;;  %v2245_v61 = vld [vmem:[%s5978_s18 + $0x1d0] sm:$0xff] }
 0x451   :  { %2117 = vmatpush.msra.mxu0 %v2032_v46  ;;  %v2244_v46 = vld [vmem:[%s5978_s18 + $0x1c8] sm:$0xff] }
 0x453   :  { %2118 = vmatpush.msra.mxu0 %v2030_v16  ;;  %v2241_v16 = vld [vmem:[%s5978_s18 + $0x1b0] sm:$0xff] }
 0x455   :  { %v1830_v10 = vpop.f32.mrf.mxu0  ;;  %2119 = vmatpush.msra.mxu0 %v2028_v24 }
 0x456   :  { %v1831_v44 = vadd.f32 %v1830_v10, %v1307_v39  ;;  %v1631_v10 = vadd.f32 %v5363_v19, %v1611_v62  ;;  %v2077_v19 = vld [vmem:[%s5976_s16 + $0x198] sm:$0xff] }
 0x457   :  { %2171 = vmatpush.msra.mxu3 %v2077_v19  ;;  %v2027_v19 = vld [vmem:[%s5976_s16 + $0x8] sm:$0xff] }
 0x458   :  { %v1850_v45 = vpop.f32.mrf.mxu1  ;;  %v1651_v32 = vadd.f32 %v5365_v2, %v1631_v10  ;;  %v2073_v2 = vld [vmem:[%s5976_s16 + $0x178] sm:$0xff]  ;;  %v1811_v10 = vadd.f32 %v5378_v41, %v1791_v15  ;;  %v706_v41 = vld [vmem:[%s5973_s13] sm:$0x3] }
 0x459   :  { %v1851_v50 = vadd.f32 %v1850_v45, %v1831_v44  ;;  %v1870_v31 = vpop.f32.mrf.mxu2  ;;  %v2045_v44 = vld [vmem:[%s5976_s16 + $0x98] sm:$0xff]  ;;  %2172 = vmatpush.msra.mxu3 %v2075_v3  ;;  %v733_v3 = vperm.slane %v705_v40, 0 }
 0x45a   :  { %2151 = vmatpush.msra.mxu2 %v2045_v44  ;;  %v1984_v60 = vrot.slane %v1651_v32, 7  ;;  %v2058_v44 = vld [vmem:[%s5976_s16 + $0x100] sm:$0xff]  ;;  %v734_v32 = vperm.slane %v705_v40, 1  ;;  %v2205_v40 = vld [vmem:[%s5978_s18 + $0x90] sm:$0xff] }
 0x45b   :  { %v1871_v52 = vadd.f32 %v1870_v31, %v1851_v50  ;;  %v2043_v50 = vld [vmem:[%s5976_s16 + $0x88] sm:$0xff]  ;;  %2173 = vmatpush.msra.mxu3 %v2073_v2 }
 0x45c   :  { %v1890_v53 = vpop.f32.mrf.mxu3  ;;  %2152 = vmatpush.msra.mxu2 %v2043_v50  ;;  %v2218_v50 = vld [vmem:[%s5978_s18 + $0xf8] sm:$0xff] }
 0x45d   :  { %v1891_v57 = vadd.f32 %v1890_v53, %v1871_v52  ;;  %2174 = vmatpush.msra.mxu3 %v2071_v26 }
 0x45e   :  { %2153 = vmatpush.msra.mxu2 %v2041_v30  ;;  %v740_v30 = vperm.slane %v706_v41, 0 }
 0x45f   :  { %2175 = vmatpush.msra.mxu3 %v2069_v11 }
 0x460   :  { %2154 = vmatpush.msra.mxu2 %v2039_v35 }
 0x461   :  { %2176 = vmatpush.msra.mxu3 %v2067_v4 }
 0x462   :  { %2155 = vmatpush.msra.mxu2 %v2037_v56 }
 0x463   :  { %2177 = vmatpush.msra.mxu3 %v2065_v12  ;;  %v2210_v12 = vld [vmem:[%s5978_s18 + $0xb8] sm:$0xff] }
 0x464   :  { %2156 = vmatpush.msra.mxu2 %v2035_v6  ;;  %v2212_v6 = vld [vmem:[%s5978_s18 + $0xc8] sm:$0xff] }
 0x465   :  { %2178 = vmatpush.msra.mxu3 %v2063_v20  ;;  %v2207_v20 = vld [vmem:[%s5978_s18 + $0xa0] sm:$0xff] }
 0x47f   :  { %v1910_v47 = vpop.f32.mrf.mxu0 }
 0x480   :  { %v1911_v21 = vadd.f32 %v1910_v47, %v1891_v57  ;;  %v1491_v57 = vadd.f32 %v5359_v13, %v1471_v51  ;;  %v2064_v47 = vld [vmem:[%s5976_s16 + $0x130] sm:$0xff]  ;;  %v2033_v13 = vld [vmem:[%s5976_s16 + $0x38] sm:$0xff] }
 0x481   :  { %v717_v22 = vpop.xlane.xlu1 %716  ;;  %2157 = vmatpush.msra.mxu2 %v2033_v13  ;;  %v2209_v13 = vld [vmem:[%s5978_s18 + $0xb0] sm:$0xff] }
 0x482   :  { %v1930_v9 = vpop.f32.mrf.mxu1  ;;  %v718_v39 = vmul.f32 %v717_v22, %v3266_v43  ;;  %v2076_v43 = vld [vmem:[%s5976_s16 + $0x190] sm:$0xff]  ;;  %v1988_v62 = vsel %vm1987_vm12, %v1491_v57, %v1984_v60  ;;  %v1986_v17 = vsel %vm1985_vm13, %v1491_v57, %v1984_v60 }
 0x483   :  { %2131 = vmatpush.msra.mxu1 %v2076_v43  ;;  %v1931_v18 = vadd.f32 %v1930_v9, %v1911_v21  ;;  %v1950_v31 = vpop.f32.mrf.mxu2  ;;  %v1989_v28 = vrot.slane %v1988_v62, 1  ;;  %v2029_v9 = vld [vmem:[%s5976_s16 + $0x18] sm:$0xff]  ;;  %v5586_v8 = vadd.f32 1.0, %v1986_v17  ;;  %2158 = vmatpush.msra.mxu2 %v2031_v29  ;;  %v2026_v43 = vld [vmem:[%s5976_s16] sm:$0xff] }
 0x484   :  { %v5467_v45 = vadd.f32 1e-05, %v718_v39  ;;  %v2061_v39 = vld [vmem:[%s5976_s16 + $0x118] sm:$0xff]  ;;  %2120 = vmatpush.msra.mxu0 %v2026_v43 }
 0x485   :  { %2132 = vmatpush.msra.mxu1 %v2074_v49  ;;  %v1951_v52 = vadd.f32 %v1950_v31, %v1931_v18  ;;  %2159 = vmatpush.msra.mxu2 %v2029_v9  ;;  %v2217_v49 = vld [vmem:[%s5978_s18 + $0xf0] sm:$0xff]  ;;  %v5619_v31 = vadd.f32 1.0, %v1989_v28  ;;  %v1997_v34 = vperm.slane %v5586_v8, 1  ;;  %v2239_v9 = vld [vmem:[%s5978_s18 + $0x1a0] sm:$0xff] }
 0x486   :  { %2561 = vrsqrt.f32 %v5467_v45  ;;  %vm726_vm15 = vweird.f32 %v5467_v45  ;;  %2179 = vmatpush.msra.mxu3 %v2061_v39  ;;  %2257 = vmatpush.msrb.mxu0 %v2217_v49  ;;  %v2240_v39 = vld [vmem:[%s5978_s18 + $0x1a8] sm:$0xff] }
 0x487   :  { %2133 = vmatpush.msra.mxu1 %v2072_v37  ;;  %v1970_v53 = vpop.f32.mrf.mxu3  ;;  %2160 = vmatpush.msra.mxu2 %v2027_v19  ;;  %v1998_v17 = vperm.slane %v5619_v31, 0  ;;  %v2237_v19 = vld [vmem:[%s5978_s18 + $0x190] sm:$0xff] }
 0x488   :  { %v5541_v7 = vadd.f32 %v1970_v53, %v1951_v52  ;;  %2180 = vmatpush.msra.mxu3 %v2059_v25  ;;  %v741_v52 = vperm.slane %v706_v41, 1  ;;  %v2248_v53 = vld [vmem:[%s5978_s18 + $0x1e8] sm:$0xff]  ;;  %2258 = vmatpush.msrb.mxu0 %v2215_v23  ;;  %v2238_v25 = vld [vmem:[%s5978_s18 + $0x198] sm:$0xff] }
 0x489   :  { %2134 = vmatpush.msra.mxu1 %v2070_v38  ;;  %v2216_v38 = vld [vmem:[%s5978_s18 + $0xe8] sm:$0xff]  ;;  %2297 = vmatpush.msrb.mxu2 %v2218_v50  ;;  %v2203_v50 = vld [vmem:[%s5978_s18 + $0x80] sm:$0xff] }
 0x48a   :  { %v2010_v21 = vrot.slane %v5541_v7, 7  ;;  %2317 = vmatpush.msrb.mxu3 %v2250_v33  ;;  %v2201_v33 = vld [vmem:[%s5978_s18 + $0x70] sm:$0xff]  ;;  %v2200_v23 = vld [vmem:[%s5978_s18 + $0x68] sm:$0xff] }
 0x48b   :  { %2135 = vmatpush.msra.mxu1 %v2068_v54  ;;  %v2213_v54 = vld [vmem:[%s5978_s18 + $0xd0] sm:$0xff]  ;;  %2298 = vmatpush.msrb.mxu2 %v2216_v38 }
 0x48c   :  { %v5532_v1 = vpop.eup %2561  ;;  %v5609_v18 = vsel %vm1987_vm12, %v1811_v10, %v2010_v21  ;;  %v5631_v37 = vsel %vm1985_vm13, %v1811_v10, %v2010_v21  ;;  %2318 = vmatpush.msrb.mxu3 %v2248_v53  ;;  %2259 = vmatpush.msrb.mxu0 %v2213_v54  ;;  %v2208_v21 = vld [vmem:[%s5978_s18 + $0xa8] sm:$0xff]  ;;  %v2197_v38 = vld [vmem:[%s5978_s18 + $0x50] sm:$0xff]  ;;  %v2231_v54 = vld [vmem:[%s5978_s18 + $0x160] sm:$0xff] }
 0x48d   :  { %v721_v58 = vmul.f32 %v5532_v1, %v5467_v45  ;;  %2136 = vmatpush.msra.mxu1 %v2066_v0  ;;  %vm727_vm14 = vweird.f32 %v5532_v1  ;;  %v2249_v45 = vld [vmem:[%s5978_s18 + $0x1f0] sm:$0xff]  ;;  %v2013_v51 = vrot.slane %v5609_v18, 1  ;;  %v2015_v56 = vperm.slane %v5631_v37, 1  ;;  %v2204_v18 = vld [vmem:[%s5978_s18 + $0x88] sm:$0xff] }
 0x48e   :  { %vm728_vm0 = vmor %vm726_vm15, %vm727_vm14  ;;  %v2000_v0 = vrot.slane %v1997_v34, 4  ;;  %2319 = vmatpush.msrb.mxu3 %v2246_v63  ;;  %v2202_v34 = vld [vmem:[%s5978_s18 + $0x78] sm:$0xff]  ;;  %v2193_v53 = vld [vmem:[%s5978_s18 + $0x30] sm:$0xff] }
 0x48f   :  { %v722_v55 = vmul.f32 %v5532_v1, %v721_v58  ;;  %2137 = vmatpush.msra.mxu1 %v2064_v47  ;;  %v2017_v4 = vperm.slane %v2013_v51, 1  ;;  %v2243_v58 = vld [vmem:[%s5978_s18 + $0x1c0] sm:$0xff]  ;;  %v1996_v47 = vperm.slane %v5586_v8, 0  ;;  %v2018_v15 = vrot.slane %v2015_v56, 4  ;;  %v2189_v63 = vld [vmem:[%s5978_s18 + $0x10] sm:$0xff] }
 0x490   :  { %2320 = vmatpush.msrb.mxu3 %v2244_v46  ;;  %v2191_v56 = vld [vmem:[%s5978_s18 + $0x20] sm:$0xff] }
 0x491   :  { %v723_v22 = vmul.f32 0.5, %v722_v55  ;;  %2138 = vmatpush.msra.mxu1 %v2062_v59  ;;  %v2242_v59 = vld [vmem:[%s5978_s18 + $0x1b8] sm:$0xff]  ;;  %v2002_v29 = vsel %vm1976_vm1, %v1996_v47, %v2000_v0  ;;  %v2019_v24 = vrot.slane %v2017_v4, 4  ;;  %v2227_v0 = vld [vmem:[%s5978_s18 + $0x140] sm:$0xff]  ;;  %v2224_v47 = vld [vmem:[%s5978_s18 + $0x128] sm:$0xff] }
 0x492   :  { %2321 = vmatpush.msrb.mxu3 %v2242_v59  ;;  %v2187_v4 = vld [vmem:[%s5978_s18] sm:$0xff]  ;;  %v2220_v59 = vld [vmem:[%s5978_s18 + $0x108] sm:$0xff] }
 0x493   :  { %v724_v42 = vsub.f32 1.5, %v723_v22  ;;  %2139 = vmatpush.msra.mxu1 %v2060_v27  ;;  %v2014_v22 = vperm.slane %v5631_v37, 0  ;;  %v2233_v37 = vld [vmem:[%s5978_s18 + $0x170] sm:$0xff]  ;;  %v2223_v46 = vld [vmem:[%s5978_s18 + $0x120] sm:$0xff] }
 0x494   :  { %2322 = vmatpush.msrb.mxu3 %v2240_v39  ;;  %v2366_v39 = vld [vmem:[%s5980_s20 + $0xd8] sm:$0xff] }
 0x495   :  { %v725_v48 = vmul.f32 %v5532_v1, %v724_v42  ;;  %2140 = vmatpush.msra.mxu1 %v2058_v44  ;;  %v2206_v42 = vld [vmem:[%s5978_s18 + $0x98] sm:$0xff]  ;;  %v2016_v44 = vperm.slane %v2013_v51, 0  ;;  %v2020_v41 = vsel %vm1976_vm1, %v2014_v22, %v2018_v15  ;;  %v2219_v15 = vld [vmem:[%s5978_s18 + $0x100] sm:$0xff] }
 0x496   :  { %2323 = vmatpush.msrb.mxu3 %v2238_v25  ;;  %v2198_v51 = vld [vmem:[%s5978_s18 + $0x58] sm:$0xff]  ;;  %v5860_v22 = vld [vmem:[%s6022_s29 + $0x4] sm:$0xf]  ;;  %v2345_v25 = vld [vmem:[%s5980_s20 + $0x30] sm:$0xff] }
 0x497   :  { %v729_v2 = vsel %vm728_vm0, %v5532_v1, %v725_v48  ;;  %2277 = vmatpush.msrb.mxu1 %v2249_v45  ;;  %v2211_v1 = vld [vmem:[%s5978_s18 + $0xc0] sm:$0xff] }
 0x498   :  { %v730_v35 = vmul.f32 %v729_v2, %v5342_v5  ;;  %v731_v26 = vmul.f32 %v729_v2, %v5345_v36  ;;  %v2214_v5 = vld [vmem:[%s5978_s18 + $0xd8] sm:$0xff]  ;;  %v1999_v36 = vperm.slane %v5619_v31, 1  ;;  %2260 = vmatpush.msrb.mxu0 %v2211_v1  ;;  %v2021_v31 = vsel %vm1976_vm1, %v2016_v44, %v2019_v24  ;;  %v2199_v2 = vld [vmem:[%s5978_s18 + $0x60] sm:$0xff]  ;;  %v2368_v24 = vld [vmem:[%s5980_s20 + $0xe8] sm:$0xff] }
 0x499   :  { %2278 = vmatpush.msrb.mxu1 %v2247_v14  ;;  %2299 = vmatpush.msrb.mxu2 %v2214_v5  ;;  %v2194_v5 = vld [vmem:[%s5978_s18 + $0x38] sm:$0xff]  ;;  %v2364_v44 = vld [vmem:[%s5980_s20 + $0xc8] sm:$0xff] }
 0x49a   :  { %v737_v11 = vmul.f32 %v733_v3, %v730_v35  ;;  %v738_v60 = vmul.f32 %v734_v32, %v731_v26  ;;  %v2001_v62 = vrot.slane %v1999_v36, 4  ;;  %2261 = vmatpush.msrb.mxu0 %v2209_v13  ;;  %v2235_v3 = vld [vmem:[%s5978_s18 + $0x180] sm:$0xff]  ;;  %v2236_v32 = vld [vmem:[%s5978_s18 + $0x188] sm:$0xff]  ;;  %v2190_v1 = vld [vmem:[%s5978_s18 + $0x18] sm:$0xff] }
 0x49b   :  { %2279 = vmatpush.msrb.mxu1 %v2245_v61  ;;  %2300 = vmatpush.msrb.mxu2 %v2212_v6  ;;  %v2196_v35 = vld [vmem:[%s5978_s18 + $0x48] sm:$0xff]  ;;  %v2230_v61 = vld [vmem:[%s5978_s18 + $0x158] sm:$0xff]  ;;  %v2221_v13 = vld [vmem:[%s5978_s18 + $0x110] sm:$0xff] }
 0x49c   :  { %v744_v57 = vadd.f32 %v740_v30, %v737_v11  ;;  %v745_v7 = vadd.f32 %v741_v52, %v738_v60  ;;  %v2003_v43 = vsel %vm1976_vm1, %v1998_v17, %v2001_v62  ;;  %2262 = vmatpush.msrb.mxu0 %v2207_v20  ;;  %v2234_v30 = vld [vmem:[%s5978_s18 + $0x178] sm:$0xff]  ;;  %2324 = vmatpush.msrb.mxu3 %v2236_v32  ;;  %v2195_v52 = vld [vmem:[%s5978_s18 + $0x40] sm:$0xff]  ;;  %v2232_v36 = vld [vmem:[%s5978_s18 + $0x168] sm:$0xff] }
 0x49d   :  { %2280 = vmatpush.msrb.mxu1 %v2243_v58  ;;  %2301 = vmatpush.msrb.mxu2 %v2210_v12  ;;  %v2229_v11 = vld [vmem:[%s5978_s18 + $0x150] sm:$0xff]  ;;  %v2192_v60 = vld [vmem:[%s5978_s18 + $0x28] sm:$0xff]  ;;  %v2226_v58 = vld [vmem:[%s5978_s18 + $0x138] sm:$0xff] }
 0x49e   :  { %v1975_v55 = vrot.slane %v745_v7, 4  ;;  %746 = vst [vmem:[#allocation8] sm:$0xff] %v744_v57  ;;  %2263 = vmatpush.msrb.mxu0 %v2205_v40  ;;  %2325 = vmatpush.msrb.mxu3 %v2234_v30  ;;  %v2228_v6 = vld [vmem:[%s5978_s18 + $0x148] sm:$0xff]  ;;  %v2222_v12 = vld [vmem:[%s5978_s18 + $0x118] sm:$0xff]  ;;  %v5829_v62 = vld [vmem:[%s6022_s29] sm:$0xf] }
 0x49f   :  { %747 = vst [vmem:[#allocation8 + $0x8] sm:$0xff] %v745_v7  ;;  %2281 = vmatpush.msrb.mxu1 %v2241_v16  ;;  %2302 = vmatpush.msrb.mxu2 %v2208_v21  ;;  %v2188_v7 = vld [vmem:[%s5978_s18 + $0x8] sm:$0xff]  ;;  %v2353_v16 = vld [vmem:[%s5980_s20 + $0x70] sm:$0xff]  ;;  %v2370_v17 = vld [vmem:[%s5980_s20 + $0xf8] sm:$0xff] }
 0x4a0   :  { %v1977_v27 = vsel %vm1976_vm1, %v744_v57, %v1975_v55  ;;  %v1978_v28 = vsel %vm1976_vm1, %v1975_v55, %v744_v57  ;;  %2264 = vmatpush.msrb.mxu0 %v2203_v50  ;;  %2326 = vmatpush.msrb.mxu3 %v2232_v36  ;;  %v2225_v57 = vld [vmem:[%s5978_s18 + $0x130] sm:$0xff]  ;;  %v2354_v55 = vld [vmem:[%s5980_s20 + $0x78] sm:$0xff]  ;;  %v2351_v21 = vld [vmem:[%s5980_s20 + $0x60] sm:$0xff]  ;;  %s2684_s18 = smov 127  }
 0x4a1   :  { %v1979_v8 = vrot.slane %v1978_v28, 4  ;;  %v2006_v10 = vmul.f32 %v2002_v29, %v1977_v27  ;;  %2282 = vmatpush.msrb.mxu1 %v2239_v9  ;;  %2303 = vmatpush.msrb.mxu2 %v2206_v42  ;;  %v2352_v29 = vld [vmem:[%s5980_s20 + $0x68] sm:$0xff]  ;;  %v2369_v20 = vld [vmem:[%s5980_s20 + $0xf0] sm:$0xff]  ;;  %v2350_v27 = vld [vmem:[%s5980_s20 + $0x58] sm:$0xff]  ;;  %2527 = dma.vmem_to_hbm [thread:$0]  %s2523_s5, 256, %s2525_s9, [#allocation4]  }
 0x4a2   :  { %2265 = vmatpush.msrb.mxu0 %v2201_v33  ;;  %2327 = vmatpush.msrb.mxu3 %v2230_v61  ;;  %v2367_v28 = vld [vmem:[%s5980_s20 + $0xe0] sm:$0xff]  ;;  %v2349_v9 = vld [vmem:[%s5980_s20 + $0x50] sm:$0xff]  ;;  %v2356_v36 = vld [vmem:[%s5980_s20 + $0x88] sm:$0xff] }
 0x4a3   :  { %v2007_v48 = vmul.f32 %v2003_v43, %v1979_v8  ;;  %v2024_v49 = vadd.f32 %v2020_v41, %v2006_v10  ;;  %2283 = vmatpush.msrb.mxu1 %v2237_v19  ;;  %2304 = vmatpush.msrb.mxu2 %v2204_v18  ;;  %v2090_v8 = vld [vmem:[#allocation2] sm:$0x3]  ;;  %v2365_v40 = vld [vmem:[%s5980_s20 + $0xd0] sm:$0xff]  ;;  %v2347_v42 = vld [vmem:[%s5980_s20 + $0x40] sm:$0xff] }
 0x4a4   :  { %2266 = vmatpush.msrb.mxu0 %v2199_v2  ;;  %2328 = vmatpush.msrb.mxu3 %v2228_v6  ;;  %v2348_v10 = vld [vmem:[%s5980_s20 + $0x48] sm:$0xff]  ;;  %v2092_v43 = vperm.slane %v2090_v8, 0  ;;  %v2346_v41 = vld [vmem:[%s5980_s20 + $0x38] sm:$0xff]  ;;  %v2093_v18 = vperm.slane %v2090_v8, 1  ;;  %v2363_v30 = vld [vmem:[%s5980_s20 + $0xc0] sm:$0xff] }
 0x4a5   :  { %v2025_v45 = vadd.f32 %v2021_v31, %v2007_v48  ;;  %2098 = vst [vmem:[#allocation1] ss:$2 sm:$0xff] %v2024_v49  ;;  %2284 = vmatpush.msrb.mxu1 %v2235_v3  ;;  %2305 = vmatpush.msrb.mxu2 %v2202_v34  ;;  %v2343_v2 = vld [vmem:[%s5980_s20 + $0x20] sm:$0xff]  ;;  %v2251_v6 = vld [vmem:[#allocation5] sm:$0x3] }
 0x4a6   :  { %2267 = vmatpush.msrb.mxu0 %v2197_v38  ;;  %2329 = vmatpush.msrb.mxu3 %v2226_v58  ;;  %v2342_v38 = vld [vmem:[%s5980_s20 + $0x18] sm:$0xff] }
 0x4a7   :  { %2100 = vst [vmem:[#allocation1 + $0x1] ss:$2 sm:$0xff] %v2025_v45  ;;  %2285 = vmatpush.msrb.mxu1 %v2233_v37  ;;  %2306 = vmatpush.msrb.mxu2 %v2200_v23  ;;  %v2344_v37 = vld [vmem:[%s5980_s20 + $0x28] sm:$0xff]  ;;  %v2362_v23 = vld [vmem:[%s5980_s20 + $0xb8] sm:$0xff] }
 0x4a8   :  { %2268 = vmatpush.msrb.mxu0 %v2195_v52  ;;  %2330 = vmatpush.msrb.mxu3 %v2224_v47  ;;  %v2341_v52 = vld [vmem:[%s5980_s20 + $0x10] sm:$0xff]  ;;  %v2254_v47 = vperm.slane %v2251_v6, 1 }
 0x4a9   :  { %2307 = vmatpush.msrb.mxu2 %v2198_v51  ;;  %2286 = vmatpush.msrb.mxu1 %v2231_v54  ;;  %v2361_v51 = vld [vmem:[%s5980_s20 + $0xb0] sm:$0xff]  ;;  %v2358_v54 = vld [vmem:[%s5980_s20 + $0x98] sm:$0xff] }
 0x4aa   :  { %2269 = vmatpush.msrb.mxu0 %v2193_v53  ;;  %2417 = vrot.lane.b32.xlu2 %v5829_v62, %s2683_s6  ;;  %v2339_v53 = vld [vmem:[%s5980_s20] sm:$0xff] }
 0x4ab   :  { %2308 = vmatpush.msrb.mxu2 %v2196_v35  ;;  %2287 = vmatpush.msrb.mxu1 %v2229_v11  ;;  %v2360_v35 = vld [vmem:[%s5980_s20 + $0xa8] sm:$0xff] }
 0x4ac   :  { %2270 = vmatpush.msrb.mxu0 %v2191_v56  ;;  %2331 = vmatpush.msrb.mxu3 %v2222_v12  ;;  %v2355_v56 = vld [vmem:[%s5980_s20 + $0x80] sm:$0xff] }
 0x4ad   :  { %2309 = vmatpush.msrb.mxu2 %v2194_v5  ;;  %2288 = vmatpush.msrb.mxu1 %v2227_v0  ;;  %v2357_v5 = vld [vmem:[%s5980_s20 + $0x90] sm:$0xff] }
 0x4ae   :  { %v2101_v26 = vld.sshfl [vmem:[#allocation1] sm:$0xff pattern:$0x75316420]  ;;  %v2102_v14 = vld.sshfl [vmem:[#allocation1 + $0x8] sm:$0xff pattern:$0x75316420]  ;;  %2271 = vmatpush.msrb.mxu0 %v2189_v63  ;;  %2332 = vmatpush.msrb.mxu3 %v2220_v59 }
 0x4af   :  { %2121 = vmatmul.f32.vlgmr.msra.gmra.mxu0 %v2101_v26  ;;  %2141 = vmatmul.f32.vlgmr.msra.gmra.mxu1 %v2102_v14 }
 0x4b0   :  { %2161 = vmatmul.f32.vlgmr.msra.gmra.mxu2 %v2101_v26  ;;  %2181 = vmatmul.f32.vlgmr.msra.gmra.mxu3 %v2102_v14  ;;  %v2340_v26 = vld [vmem:[%s5980_s20 + $0x8] sm:$0xff]  ;;  %v2359_v14 = vld [vmem:[%s5980_s20 + $0xa0] sm:$0xff] }
 0x4b1   :  { %2310 = vmatpush.msrb.mxu2 %v2192_v60  ;;  %2272 = vmatpush.msrb.mxu0 %v2187_v4  ;;  %v2253_v4 = vperm.slane %v2251_v6, 0 }
 0x4b2   :  { %2289 = vmatpush.msrb.mxu1 %v2225_v57  ;;  %2419 = vrot.lane.b32.xlu2 %v5860_v22, %s2683_s6 }
 0x4b3   :  { %2311 = vmatpush.msrb.mxu2 %v2190_v1  ;;  %2375 = vmatpush.msra.mxu0 %v2354_v55 }
 0x4b4   :  { %2290 = vmatpush.msrb.mxu1 %v2223_v46 }
 0x4b5   :  { %2312 = vmatpush.msrb.mxu2 %v2188_v7  ;;  %2376 = vmatpush.msra.mxu0 %v2353_v16 }
 0x4b6   :  { %2291 = vmatpush.msrb.mxu1 %v2221_v13 }
 0x4b7   :  { %2377 = vmatpush.msra.mxu0 %v2352_v29 }
 0x4b8   :  { %2292 = vmatpush.msrb.mxu1 %v2219_v15 }
 0x4b9   :  { %2378 = vmatpush.msra.mxu0 %v2351_v21 }
 0x4ba   :  { %2395 = vmatpush.msra.mxu1 %v2370_v17  ;;  %v2548_v17 = vld [vmem:[#allocation7] ss:$0 sm:$0xff] }
 0x4bb   :  { %2379 = vmatpush.msra.mxu0 %v2350_v27 }
 0x4bc   :  { %2396 = vmatpush.msra.mxu1 %v2369_v20 }
 0x4bd   :  { %2380 = vmatpush.msra.mxu0 %v2349_v9 }
 0x4be   :  { %2397 = vmatpush.msra.mxu1 %v2368_v24 }
 0x4bf   :  { %2381 = vmatpush.msra.mxu0 %v2348_v10 }
 0x4c0   :  { %2398 = vmatpush.msra.mxu1 %v2367_v28 }
 0x4c1   :  { %2382 = vmatpush.msra.mxu0 %v2347_v42 }
 0x4c2   :  { %2399 = vmatpush.msra.mxu1 %v2366_v39 }
 0x4c3   :  { %2383 = vmatpush.msra.mxu0 %v2346_v41 }
 0x4c4   :  { %2400 = vmatpush.msra.mxu1 %v2365_v40 }
 0x4c5   :  { %2384 = vmatpush.msra.mxu0 %v2345_v25 }
 0x4c6   :  { %2401 = vmatpush.msra.mxu1 %v2364_v44 }
 0x4c7   :  { %2385 = vmatpush.msra.mxu0 %v2344_v37 }
 0x4c8   :  { %2402 = vmatpush.msra.mxu1 %v2363_v30 }
 0x4c9   :  { %2386 = vmatpush.msra.mxu0 %v2343_v2 }
 0x4ca   :  { %2403 = vmatpush.msra.mxu1 %v2362_v23 }
 0x4cb   :  { %2387 = vmatpush.msra.mxu0 %v2342_v38 }
 0x4cc   :  { %2404 = vmatpush.msra.mxu1 %v2361_v51 }
 0x4cd   :  { %2388 = vmatpush.msra.mxu0 %v2341_v52 }
 0x4ce   :  { %2405 = vmatpush.msra.mxu1 %v2360_v35 }
 0x4cf   :  { %2389 = vmatpush.msra.mxu0 %v2340_v26 }
 0x4d0   :  { %2406 = vmatpush.msra.mxu1 %v2359_v14 }
 0x4d1   :  { %2390 = vmatpush.msra.mxu0 %v2339_v53 }
 0x4d2   :  { %2407 = vmatpush.msra.mxu1 %v2358_v54 }
 0x4d4   :  { %2408 = vmatpush.msra.mxu1 %v2357_v5 }
 0x4d6   :  { %2409 = vmatpush.msra.mxu1 %v2356_v36 }
 0x4d8   :  { %2410 = vmatpush.msra.mxu1 %v2355_v56 }
 0x504   :  { %v2418_v11 = vpop.permute.xlu2 %2417 }
 0x505   :  { %v2423_v60 = vsub.f32 %v5829_v62, %v2418_v11 }
 0x507   :  { %v2425_v61 = vmul.f32 0.5, %v2423_v60  ;;  %2453 = vst [vmem:[#allocation1] ss:$2 sm:$0xff] %v2423_v60 }
 0x509   :  { %2429 = vrot.lane.b32.xlu0 %v2425_v61, %s2684_s18 }
 0x50c   :  { %v2420_v63 = vpop.permute.xlu2 %2419 }
 0x50d   :  { %v2424_v0 = vsub.f32 %v5860_v22, %v2420_v63 }
 0x50f   :  { %v2426_v1 = vmul.f32 0.5, %v2424_v0  ;;  %2455 = vst [vmem:[#allocation1 + $0x1] ss:$2 sm:$0xff] %v2424_v0 }
 0x511   :  { %2431 = vrot.lane.b32.xlu1 %v2426_v1, %s2684_s18 }
 0x516   :  { %v2456_v28 = vld.sshfl [vmem:[#allocation1] sm:$0xff pattern:$0x75316420] }
 0x52c   :  { %v2122_v19 = vpop.f32.mrf.mxu0  ;;  %v2142_v49 = vpop.f32.mrf.mxu1 }
 0x52d   :  { %v2123_v48 = vadd.f32 %v2122_v19, %v2092_v43 }
 0x52f   :  { %v2143_v50 = vadd.f32 %v2142_v49, %v2123_v48 }
 0x531   :  { %v2185_v31 = vmax.f32 %v2143_v50, 0.0 }
 0x533   :  { %v2162_v3 = vpop.f32.mrf.mxu2  ;;  %2273 = vmatmul.f32.vlgmr.msrb.gmra.mxu0 %v2185_v31  ;;  %2313 = vmatmul.f32.vlgmr.msrb.gmra.mxu2 %v2185_v31  ;;  %v2182_v45 = vpop.f32.mrf.mxu3 }
 0x534   :  { %v2163_v32 = vadd.f32 %v2162_v3, %v2093_v18  ;;  %v2685_v3 = vmov 2.0  }
 0x536   :  { %v2183_v33 = vadd.f32 %v2182_v45, %v2163_v32 }
 0x538   :  { %v2186_v34 = vmax.f32 %v2183_v33, 0.0 }
 0x53a   :  { %2293 = vmatmul.f32.vlgmr.msrb.gmra.mxu1 %v2186_v34  ;;  %2333 = vmatmul.f32.vlgmr.msrb.gmra.mxu3 %v2186_v34 }
 0x57b   :  { %v2430_v2 = vpop.permute.xlu0 %2429 }
 0x57c   :  { %v2435_v38 = vadd.f32 %v2430_v2, %v5829_v62 }
 0x583   :  { %v2432_v52 = vpop.permute.xlu1 %2431 }
 0x584   :  { %v2436_v53 = vadd.f32 %v2432_v52, %v5860_v22 }
 0x5b0   :  { %v2274_v57 = vpop.f32.mrf.mxu0 }
 0x5b1   :  { %v2275_v7 = vadd.f32 %v2274_v57, %v2253_v4 }
 0x5b6   :  { %v2314_v13 = vpop.f32.mrf.mxu2 }
 0x5b7   :  { %v2294_v58 = vpop.f32.mrf.mxu1  ;;  %v2315_v15 = vadd.f32 %v2314_v13, %v2254_v47 }
 0x5b8   :  { %v2295_v46 = vadd.f32 %v2294_v58, %v2275_v7 }
 0x5ba   :  { %v2337_v12 = vmax.f32 %v2295_v46, 0.0 }
 0x5bc   :  { %2391 = vmatmul.f32.vlgmr.msra.gmra.mxu0 %v2337_v12 }
 0x5bd   :  { %v2334_v55 = vpop.f32.mrf.mxu3 }
 0x5be   :  { %v2335_v16 = vadd.f32 %v2334_v55, %v2315_v15 }
 0x5c0   :  { %v2338_v59 = vmax.f32 %v2335_v16, 0.0 }
 0x5c2   :  { %2411 = vmatmul.f32.vlgmr.msra.gmra.mxu1 %v2338_v59 }
 0x639   :  { %v2392_v29 = vpop.f32.mrf.mxu0 }
 0x63a   :  { %v2393_v20 = vadd.f32 %v2548_v17, %v2392_v29 }
 0x63f   :  { %v2412_v21 = vpop.f32.mrf.mxu1 }
 0x640   :  { %v2413_v24 = vadd.f32 %v2412_v21, %v2393_v20 }
 0x642   :  { %v2445_v27 = vmin.f32 %v2413_v24, 5.0 }
 0x644   :  { %v2458_v9 = vadd.f32 %v2456_v28, %v2445_v27 }
 0x646   :  { %v2539_v39 = vmul.f32 -1.442695, %v2458_v9 }
 0x648   :  { %2563 = vpow2.f32 %v2539_v39 }
 0x64e   :  { %v2564_v8 = vpop.eup %2563 }
 0x64f   :  { %v2462_v10 = vadd.f32 1.0, %v2564_v8 }
 0x651   :  { %2565 = vrcp.f32 %v2462_v10  ;;  %v2474_v44 = vand.u32 2147483648, %v2462_v10  ;;  %v2472_v19 = vand.u32 2147483647, %v2462_v10  ;;  %vm2468_vm3 = vweird.f32 %v2462_v10 }
 0x652   :  { %2567 = vrcp.f32 %v2685_v3 }
 0x653   :  { %v2475_v48 = vor.u32 1.1754944e-38, %v2474_v44  ;;  %vm2473_vm5 = vcmp.eq.f32.partialorder %v2472_v19, 8.507059e+37 }
 0x657   :  { %v2566_v40 = vpop.eup %2565 }
 0x658   :  { %v2464_v42 = vmul.f32 %v2566_v40, %v2462_v10  ;;  %vm2469_vm2 = vweird.f32 %v2566_v40  ;;  %v2568_v32 = vpop.eup %2567 }
 0x659   :  { %vm2470_vm4 = vmor %vm2468_vm3, %vm2469_vm2  ;;  %v2438_v45 = vmul.f32 2.0, %v2568_v32  ;;  %vm2442_vm6 = vweird.f32 %v2568_v32 }
 0x65a   :  { %v2465_v43 = vsub.f32 1.0, %v2464_v42 }
 0x65b   :  { %v2439_v33 = vsub.f32 1.0, %v2438_v45 }
 0x65c   :  { %v2466_v41 = vmul.f32 %v2566_v40, %v2465_v43 }
 0x65d   :  { %v2440_v34 = vmul.f32 %v2568_v32, %v2439_v33 }
 0x65e   :  { %v2467_v25 = vadd.f32 %v2566_v40, %v2466_v41 }
 0x65f   :  { %v2441_v37 = vadd.f32 %v2568_v32, %v2440_v34 }
 0x660   :  { %v2471_v49 = vsel %vm2470_vm4, %v2566_v40, %v2467_v25 }
 0x661   :  { %v2476_v50 = vsel %vm2473_vm5, %v2475_v48, %v2471_v49  ;;  %v2443_v30 = vsel %vm2442_vm6, %v2568_v32, %v2441_v37 }
 0x662   :  { %v2478_v18 = vmul.f32 0.5, %v2476_v50  ;;  %v2444_v23 = vmul.f32 %v2443_v30, %v2413_v24 }
 0x664   :  { %2481 = vrot.lane.b32.xlu2 %v2478_v18, %s2684_s18  ;;  %v2480_v31 = vrot.slane %v2478_v18, 4  ;;  %v2449_v51 = vadd.f32 %v2444_v23, %v2435_v38  ;;  %v2447_v14 = vrot.slane %v2444_v23, 4 }
 0x666   :  { %v2450_v54 = vadd.f32 %v2447_v14, %v2436_v53 }
 0x66c   :  { %2483 = vrot.lane.b32.xlu2 %v2480_v31, %s2684_s18 }
 0x6be   :  { %v2482_v35 = vpop.permute.xlu2 %2481 }
 0x6bf   :  { %v2487_v26 = vsub.f32 %v2449_v51, %v2482_v35  ;;  %v2489_v56 = vadd.f32 %v2482_v35, %v2449_v51 }
 0x6c1   :  { %2493 = vst [vmem:[#allocation1] ss:$2 sm:$0xff] %v2487_v26 }
 0x6c6   :  { %v2484_v5 = vpop.permute.xlu2 %2483 }
 0x6c7   :  { %v2488_v36 = vsub.f32 %v2450_v54, %v2484_v5  ;;  %v2490_v11 = vadd.f32 %v2484_v5, %v2450_v54 }
 0x6c9   :  { %2495 = vst [vmem:[#allocation1 + $0x1] ss:$2 sm:$0xff] %v2488_v36 }
 0x6d0   :  { %v2496_v62 = vld.sshfl [vmem:[#allocation1] sm:$0xff pattern:$0x75316420] }
 0x6d1   :  { %2500 = vst [vmem:[#allocation1] ss:$2 sm:$0xff] %v2489_v56 }
 0x6d2   :  { %2502 = vst [vmem:[#allocation1 + $0x1] ss:$2 sm:$0xff] %v2490_v11 }
 0x6d9   :  { %v2503_v60 = vld.sshfl [vmem:[#allocation1] sm:$0xff pattern:$0x75316420] }
 0x6da   :  { %2504 = vrot.lane.b32.xlu2 %v2503_v60, %s2683_s6 }
 0x734   :  { %v2505_v61 = vpop.permute.xlu2 %2504 }
 0x735   :  { %v2508_v63 = vsel %vm2507_vm7, %v2496_v62, %v2505_v61 }
 0x736   :  { %v2510_v0 = vrot.slane %v2508_v63, 4  ;;  %2513 = vst.msk [vmem:[%s5982_s22] sm:$0xf] %vm2512_vm8, %v2508_v63 }
 0x738   :  { %2514 = vst.msk [vmem:[%s5982_s22 + $0x4] sm:$0xf] %vm2512_vm8, %v2510_v0 }
 0x739   :  { %2677 = dma.done.wait [#allocation4], 256  }
 0x73a   :  { %2678 = vsyncadd [#allocation4], 4294967040 }
 0x73b   :  { %2534 = vsyncpa [#allocation3], 1 }
 0x73c   :  { %2535 = vsyncpa [#allocation6], 1 }
 0x73d   :  { %2536 = vsyncpa [#allocation4], 1 }

</bundles_post_ra>
